<compile_context>
chip_gen: v5e
topology: v5e:2x2
jax: 0.10.0
libtpu: 0.0.40
codegen_flags: <defaults>
</compile_context>

<pallas_src>
import jax
import jax.numpy as jnp
from jax import lax
from jax.experimental import pallas as pl
from jax.experimental.pallas import tpu as pltpu

EPS = 1e-5
NEG_SLOPE = 0.2
N_GROUPS = 16
PAD = 5          # wrapper pads the input by 5; layer-1 grid = (H+8, W+8)
OFF = PAD - 1    # image interior starts at (OFF, OFF) on the over-grid


# --------------------------- in-kernel helpers ------------------------------
def _gn_lrelu(acc, stat_row, proj, gamma, beta):
    """GroupNorm(16) + LeakyReLU(0.2) on an (M, SC) f32 tile.

    stat_row : (1, M) f32 0/1 weights for the statistics (interior mask for
               layer 1, all-ones for layer 2).  Moments are computed as MXU
               mat-vecs (idle unit) instead of XLU sublane reductions; the 1/n
               factor is baked into `proj` (SC, SC) group-average projector.
    var = E[x^2] - E[x]^2 in f32 (single pass) -- fine at 5e-2 tolerance.
    """
    sums = jnp.dot(stat_row, acc, preferred_element_type=jnp.float32)        # (1,SC)
    sumsq = jnp.dot(stat_row, acc * acc, preferred_element_type=jnp.float32)  # (1,SC)
    mean = jnp.dot(sums, proj, preferred_element_type=jnp.float32)
    ex2 = jnp.dot(sumsq, proj, preferred_element_type=jnp.float32)
    inv_std = lax.rsqrt(ex2 - mean * mean + EPS)
    y = (acc - mean) * (inv_std * gamma) + beta
    return jnp.maximum(y, NEG_SLOPE * y)          # LeakyReLU(0.2), one VALU op


# ------------------------------- fused kernel -------------------------------
def fused_encoder_kernel(p1_ref, w1_ref, b1_ref, g1_ref, be1_ref,
                         w2_ref, b2_ref, g2_ref, be2_ref, proj_ref, o_ref):
    """One grid step = S batch samples packed along the channel (lane) axis.

    p1_ref   : (1, GH*GW, S*9*Cin) bf16  layer-1 im2col patches (wrapper-built)
    w1_ref   : (S*9*Cin, S*C1)     bf16  block-diag conv-1 weight
    w2_ref   : (9, S*C1, S*C2)     bf16  per-tap block-diag conv-2 weights
    b*/g*/be*: (1, S*C)            f32   conv bias / GN gamma / GN beta
    proj_ref : (S*C, S*C)          f32   group-average projector (1/n baked in)
    o_ref    : (1, H, W, S*C2)     f32
    """
    H, W, SC2 = o_ref.shape[1], o_ref.shape[2], o_ref.shape[3]
    SC1 = w1_ref.shape[1]
    GH, GW = H + 2 * OFF, W + 2 * OFF
    M1, M2 = GH * GW, H * W

    proj = proj_ref[...]

    # ---- layer 1: one MXU contraction over hoisted patches -----------------
    acc1 = jnp.dot(p1_ref[0], w1_ref[...],
                   preferred_element_type=jnp.float32) + b1_ref[...]   # (M1,SC1)

    # interior mask as a lane-dense (1, M1) row, built in-kernel (no DMA).
    # f32 iota + floor avoids vector integer div; exact for these sizes.
    qr = lax.broadcasted_iota(jnp.int32, (1, M1), 1).astype(jnp.float32)
    rr = jnp.floor((qr + 0.5) * (1.0 / GW))
    cr = qr - rr * GW
    mrow = ((rr >= OFF) & (rr < OFF + H) &
            (cr >= OFF) & (cr < OFF + W)).astype(jnp.float32)           # (1, M1)

    y1 = _gn_lrelu(acc1, mrow, proj, g1_ref[...], be1_ref[...])

    # zeroing the halo/garbage rows IS the zero padding layer 2's SAME conv
    # needs (column-mask form of the same predicate, iota on the sublane dim).
    qc = lax.broadcasted_iota(jnp.int32, (M1, 1), 0).astype(jnp.float32)
    rc = jnp.floor((qc + 0.5) * (1.0 / GW))
    cc = qc - rc * GW
    keep = ((rc >= OFF) & (rc < OFF + H) &
            (cc >= OFF) & (cc < OFF + W))                               # (M1, 1)
    h1 = jnp.where(keep, y1, 0.0).reshape(GH, GW, SC1)

    # ---- layer 2: 9 per-tap accumulating MXU matmuls (no patch concat) -----
    acc2 = None
    for dy in range(3):
        for dx in range(3):
            slab = (h1[OFF - 1 + dy:OFF - 1 + dy + H,
                       OFF - 1 + dx:OFF - 1 + dx + W, :]
                    .reshape(M2, SC1).astype(jnp.bfloat16))
            part = jnp.dot(slab, w2_ref[dy * 3 + dx],
                           preferred_element_type=jnp.float32)
            acc2 = part if acc2 is None else acc2 + part
    acc2 = acc2 + b2_ref[...]                                           # (M2,SC2)

    ones_row = jnp.ones((1, M2), jnp.float32)
    y2 = _gn_lrelu(acc2, ones_row, proj, g2_ref[...], be2_ref[...])
    o_ref[0] = y2.reshape(H, W, SC2).astype(o_ref.dtype)


# --------------------------------- wrapper ----------------------------------
def _block_diag(mat, s):
    if s == 1:
        return mat
    k, n = mat.shape
    out = jnp.zeros((s * k, s * n), mat.dtype)
    for i in range(s):
        out = out.at[i * k:(i + 1) * k, i * n:(i + 1) * n].set(mat)
    return out


@jax.jit
def encoder_specific_forward(x_nchw, params):
    """Matches encoder_specific.forward: h2 = c2(c1(x)). NCHW in / NCHW out."""
    B, Cin, H, W = x_nchw.shape
    w1, b1, g1, be1 = params["c1"]
    w2, b2, g2, be2 = params["c2"]
    C1, C2 = w1.shape[-1], w2.shape[-1]
    assert C1 == C2 and C1 % N_GROUPS == 0
    assert H % 8 == 0 and W % 8 == 0     # keeps in-kernel reshapes layout-trivial

    # Pair two samples per grid step (S=2 -> 128-lane density) only when it
    # does not idle v7x's second TensorCore, i.e. B >= 4 and even.
    S = 2 if (B % 2 == 0 and B >= 4) else 1
    GH, GW = H + 2 * OFF, W + 2 * OFF
    M1 = GH * GW

    # ---- layer-1 im2col hoisted to the wrapper (arrives via BlockSpec DMA) --
    x = jnp.transpose(x_nchw, (0, 2, 3, 1)).astype(jnp.float32)      # NHWC
    xp = jnp.pad(x, ((0, 0), (PAD, PAD), (PAD, PAD), (0, 0)))        # (B,H+10,W+10,Cin)
    cols = [xp[:, dy:dy + GH, dx:dx + GW, :]
            for dy in range(3) for dx in range(3)]
    pat = jnp.concatenate(cols, axis=-1).reshape(B, M1, 9 * Cin)
    if S == 2:
        pat = (pat.reshape(B // 2, 2, M1, 9 * Cin)
               .transpose(0, 2, 1, 3).reshape(B // 2, M1, 2 * 9 * Cin))
    pat = pat.astype(jnp.bfloat16)

    # ---- weights / affine params packed for S samples per step -------------
    w1bd = _block_diag(w1.reshape(9 * Cin, C1), S).astype(jnp.bfloat16)
    w2taps = jnp.stack([_block_diag(w2[dy, dx], S)
                        for dy in range(3) for dx in range(3)]
                       ).astype(jnp.bfloat16)                        # (9,S*C1,S*C2)

    def rep(t, c):
        return jnp.tile(t.reshape(1, c), (1, S)).astype(jnp.float32)
    b1p, g1p, be1p = rep(b1, C1), rep(g1, C1), rep(be1, C1)
    b2p, g2p, be2p = rep(b2, C2), rep(g2, C2), rep(be2, C2)

    # block-diagonal group-average projector with 1/n baked in (n identical
    # for both layers: H*W interior positions x (C//16) channels per group)
    cpg = C1 // N_GROUPS
    gid = jnp.arange(S * C1) // cpg
    proj = ((gid[:, None] == gid[None, :]).astype(jnp.float32)
            / float(H * W * cpg))

    out = pl.pallas_call(
        fused_encoder_kernel,
        out_shape=jax.ShapeDtypeStruct((B // S, H, W, S * C2), jnp.float32),
        grid_spec=pltpu.PrefetchScalarGridSpec(
            num_scalar_prefetch=0,
            grid=(B // S,),
            in_specs=[
                pl.BlockSpec((1, M1, S * 9 * Cin), lambda b: (b, 0, 0)),
                pl.BlockSpec((S * 9 * Cin, S * C1), lambda b: (0, 0)),
                pl.BlockSpec((1, S * C1), lambda b: (0, 0)),
                pl.BlockSpec((1, S * C1), lambda b: (0, 0)),
                pl.BlockSpec((1, S * C1), lambda b: (0, 0)),
                pl.BlockSpec((9, S * C1, S * C2), lambda b: (0, 0, 0)),
                pl.BlockSpec((1, S * C2), lambda b: (0, 0)),
                pl.BlockSpec((1, S * C2), lambda b: (0, 0)),
                pl.BlockSpec((1, S * C2), lambda b: (0, 0)),
                pl.BlockSpec((S * C1, S * C1), lambda b: (0, 0)),
            ],
            out_specs=pl.BlockSpec((1, H, W, S * C2), lambda b: (b, 0, 0, 0)),
        ),
        compiler_params=pltpu.CompilerParams(
            dimension_semantics=("parallel",)),
    )(pat, w1bd, b1p, g1p, be1p, w2taps, b2p, g2p, be2p, proj)

    out = (out.reshape(B // S, H, W, S, C2)
           .transpose(0, 3, 4, 1, 2).reshape(B, C2, H, W))
    return out


# ----------------------- pure-JAX reference (for checking) ------------------
def ref_block(x_nhwc, w_hwio, bias, gamma, beta, n_groups=N_GROUPS):
    y = lax.conv_general_dilated(
        x_nhwc, w_hwio, window_strides=(1, 1), padding="SAME",
        dimension_numbers=("NHWC", "HWIO", "NHWC"))
    y = y + bias.reshape(1, 1, 1, -1)
    B, H, W, C = y.shape
    yg = y.reshape(B, H * W, n_groups, C // n_groups)
    mean = yg.mean(axis=(1, 3), keepdims=True)
    var = ((yg - mean) ** 2).mean(axis=(1, 3), keepdims=True)
    yn = ((yg - mean) / jnp.sqrt(var + EPS)).reshape(B, H, W, C)
    yn = yn * gamma.reshape(1, 1, 1, -1) + beta.reshape(1, 1, 1, -1)
    return jnp.where(yn > 0, yn, NEG_SLOPE * yn)


def ref_forward(x_nchw, params):
    x = jnp.transpose(x_nchw, (0, 2, 3, 1))
    h1 = ref_block(x, *params["c1"])
    h2 = ref_block(h1, *params["c2"])
    return jnp.transpose(h2, (0, 3, 1, 2))


# ------------------------------- param init ---------------------------------
def init_params(key, nc, nf):
    def layer(k, cin, cout):
        kw, kb, kg, kbe = jax.random.split(k, 4)
        w = 0.05 * jax.random.normal(kw, (3, 3, cin, cout), jnp.float32)
        b = 0.05 * jax.random.normal(kb, (cout,), jnp.float32)
        gamma = 1.0 + 0.01 * jax.random.normal(kg, (cout,), jnp.float32)
        beta = 0.01 * jax.random.normal(kbe, (cout,), jnp.float32)
        return (w, b, gamma, beta)

    k1, k2 = jax.random.split(key)
    return {"c1": layer(k1, nc, nf), "c2": layer(k2, nf, nf)}


if __name__ == "__main__":
    NC, NF, H, W = 64, 64, 16, 16  # nc=nf=64, as in the module defaults

    key = jax.random.PRNGKey(0)
    kx, kx2, kp = jax.random.split(key, 3)
    params = init_params(kp, NC, NF)

    # B=2: unpaired path (S=1) -- grid=(B,) keeps both v7x TensorCores busy.
    x2 = jax.random.normal(kx, (2, NC, H, W), jnp.float32)
    out2 = jax.block_until_ready(encoder_specific_forward(x2, params))
    assert out2.shape == (2, NF, H, W), out2.shape
    err2 = float(jnp.max(jnp.abs(out2 - ref_forward(x2, params))))
    assert err2 < 5e-2, f"B=2 max abs error too large: {err2}"

    # B=4: paired path (S=2) -- two samples per grid step, 128-lane density.
    x4 = jax.random.normal(kx2, (4, NC, H, W), jnp.float32)
    out4 = jax.block_until_ready(encoder_specific_forward(x4, params))
    assert out4.shape == (4, NF, H, W), out4.shape
    err4 = float(jnp.max(jnp.abs(out4 - ref_forward(x4, params))))
    assert err4 < 5e-2, f"B=4 max abs error too large: {err4}"

    print("KERNEL_OK")
</pallas_src>

<mosaic_0001>
module attributes {stable_mosaic.version = 11 : i64} {
  func.func @fused_encoder_kernel(%arg0: i32, %arg1: memref<1x576x576xbf16, #tpu.memory_space<vmem>>, %arg2: memref<576x64xbf16, #tpu.memory_space<vmem>>, %arg3: memref<1x64xf32, #tpu.memory_space<vmem>>, %arg4: memref<1x64xf32, #tpu.memory_space<vmem>>, %arg5: memref<1x64xf32, #tpu.memory_space<vmem>>, %arg6: memref<9x64x64xbf16, #tpu.memory_space<vmem>>, %arg7: memref<1x64xf32, #tpu.memory_space<vmem>>, %arg8: memref<1x64xf32, #tpu.memory_space<vmem>>, %arg9: memref<1x64xf32, #tpu.memory_space<vmem>>, %arg10: memref<64x64xf32, #tpu.memory_space<vmem>>, %arg11: memref<1x16x16x64xf32, #tpu.memory_space<vmem>>) attributes {dimension_semantics = [#tpu.dimension_semantics<parallel>], iteration_bounds = array<i64: 2>, scalar_prefetch = 0 : i64, scratch_operands = 0 : i64, tpu.core_type = #tpu.core_type<tc>, window_params = [{transform_indices = @transform_0, window_bounds = array<i64: 1, 576, 576>}, {pipeline_mode = #tpu.pipeline_mode<synchronous>, transform_indices = @transform_1, window_bounds = array<i64: 576, 64>}, {pipeline_mode = #tpu.pipeline_mode<synchronous>, transform_indices = @transform_2, window_bounds = array<i64: 1, 64>}, {pipeline_mode = #tpu.pipeline_mode<synchronous>, transform_indices = @transform_3, window_bounds = array<i64: 1, 64>}, {pipeline_mode = #tpu.pipeline_mode<synchronous>, transform_indices = @transform_4, window_bounds = array<i64: 1, 64>}, {pipeline_mode = #tpu.pipeline_mode<synchronous>, transform_indices = @transform_5, window_bounds = array<i64: 9, 64, 64>}, {pipeline_mode = #tpu.pipeline_mode<synchronous>, transform_indices = @transform_6, window_bounds = array<i64: 1, 64>}, {pipeline_mode = #tpu.pipeline_mode<synchronous>, transform_indices = @transform_7, window_bounds = array<i64: 1, 64>}, {pipeline_mode = #tpu.pipeline_mode<synchronous>, transform_indices = @transform_8, window_bounds = array<i64: 1, 64>}, {pipeline_mode = #tpu.pipeline_mode<synchronous>, transform_indices = @transform_9, window_bounds = array<i64: 64, 64>}, {transform_indices = @transform_10, window_bounds = array<i64: 1, 16, 16, 64>}]} {
    %c0 = arith.constant 0 : index
    %c0_0 = arith.constant 0 : index
    %0 = vector.load %arg10[%c0, %c0_0] : memref<64x64xf32, #tpu.memory_space<vmem>>, vector<64x64xf32>
    %c0_1 = arith.constant 0 : index
    %c0_2 = arith.constant 0 : index
    %c0_3 = arith.constant 0 : index
    %1 = vector.load %arg1[%c0_1, %c0_2, %c0_3] : memref<1x576x576xbf16, #tpu.memory_space<vmem>>, vector<1x576x576xbf16>
    %2 = vector.shape_cast %1 : vector<1x576x576xbf16> to vector<576x576xbf16>
    %c0_4 = arith.constant 0 : index
    %c0_5 = arith.constant 0 : index
    %3 = vector.load %arg2[%c0_4, %c0_5] : memref<576x64xbf16, #tpu.memory_space<vmem>>, vector<576x64xbf16>
    %cst = arith.constant dense<0.000000e+00> : vector<576x64xf32>
    %4 = tpu.matmul %2, %3, %cst {dimension_numbers = #tpu.dot_dimension_numbers<[1], [0], [0], [1], [0, 0, 1, 1], [], []>} : vector<576x576xbf16>, vector<576x64xbf16>, vector<576x64xf32> -> vector<576x64xf32>
    %c0_6 = arith.constant 0 : index
    %c0_7 = arith.constant 0 : index
    %5 = vector.load %arg3[%c0_6, %c0_7] : memref<1x64xf32, #tpu.memory_space<vmem>>, vector<1x64xf32>
    %6 = vector.broadcast %5 : vector<1x64xf32> to vector<576x64xf32>
    %7 = arith.addf %4, %6 : vector<576x64xf32>
    %8 = tpu.iota {dimensions = array<i32: 1>} : vector<1x576xi32>
    %9 = arith.sitofp %8 : vector<1x576xi32> to vector<1x576xf32>
    %cst_8 = arith.constant 5.000000e-01 : f32
    %10 = vector.broadcast %cst_8 : f32 to vector<1x576xf32>
    %11 = arith.addf %9, %10 : vector<1x576xf32>
    %cst_9 = arith.constant 0.0416666679 : f32
    %12 = vector.broadcast %cst_9 : f32 to vector<1x576xf32>
    %13 = arith.mulf %11, %12 : vector<1x576xf32>
    %14 = math.floor %13 : vector<1x576xf32>
    %cst_10 = arith.constant 2.400000e+01 : f32
    %15 = vector.broadcast %cst_10 : f32 to vector<1x576xf32>
    %16 = arith.mulf %14, %15 : vector<1x576xf32>
    %17 = arith.subf %9, %16 : vector<1x576xf32>
    %cst_11 = arith.constant 4.000000e+00 : f32
    %18 = vector.broadcast %cst_11 : f32 to vector<1x576xf32>
    %19 = arith.cmpf oge, %14, %18 : vector<1x576xf32>
    %cst_12 = arith.constant 2.000000e+01 : f32
    %20 = vector.broadcast %cst_12 : f32 to vector<1x576xf32>
    %21 = arith.cmpf olt, %14, %20 : vector<1x576xf32>
    %22 = arith.andi %19, %21 : vector<1x576xi1>
    %cst_13 = arith.constant 4.000000e+00 : f32
    %23 = vector.broadcast %cst_13 : f32 to vector<1x576xf32>
    %24 = arith.cmpf oge, %17, %23 : vector<1x576xf32>
    %25 = arith.andi %22, %24 : vector<1x576xi1>
    %cst_14 = arith.constant 2.000000e+01 : f32
    %26 = vector.broadcast %cst_14 : f32 to vector<1x576xf32>
    %27 = arith.cmpf olt, %17, %26 : vector<1x576xf32>
    %28 = arith.andi %25, %27 : vector<1x576xi1>
    %29 = arith.extui %28 : vector<1x576xi1> to vector<1x576xi32>
    %30 = arith.sitofp %29 : vector<1x576xi32> to vector<1x576xf32>
    %c0_15 = arith.constant 0 : index
    %c0_16 = arith.constant 0 : index
    %31 = vector.load %arg4[%c0_15, %c0_16] : memref<1x64xf32, #tpu.memory_space<vmem>>, vector<1x64xf32>
    %c0_17 = arith.constant 0 : index
    %c0_18 = arith.constant 0 : index
    %32 = vector.load %arg5[%c0_17, %c0_18] : memref<1x64xf32, #tpu.memory_space<vmem>>, vector<1x64xf32>
    %cst_19 = arith.constant dense<0.000000e+00> : vector<1x64xf32>
    %33 = tpu.matmul %30, %7, %cst_19 {dimension_numbers = #tpu.dot_dimension_numbers<[1], [0], [0], [1], [0, 0, 1, 1], [], []>} : vector<1x576xf32>, vector<576x64xf32>, vector<1x64xf32> -> vector<1x64xf32>
    %34 = arith.mulf %7, %7 : vector<576x64xf32>
    %cst_20 = arith.constant dense<0.000000e+00> : vector<1x64xf32>
    %35 = tpu.matmul %30, %34, %cst_20 {dimension_numbers = #tpu.dot_dimension_numbers<[1], [0], [0], [1], [0, 0, 1, 1], [], []>} : vector<1x576xf32>, vector<576x64xf32>, vector<1x64xf32> -> vector<1x64xf32>
    %cst_21 = arith.constant dense<0.000000e+00> : vector<1x64xf32>
    %36 = tpu.matmul %33, %0, %cst_21 {dimension_numbers = #tpu.dot_dimension_numbers<[1], [0], [0], [1], [0, 0, 1, 1], [], []>} : vector<1x64xf32>, vector<64x64xf32>, vector<1x64xf32> -> vector<1x64xf32>
    %cst_22 = arith.constant dense<0.000000e+00> : vector<1x64xf32>
    %37 = tpu.matmul %35, %0, %cst_22 {dimension_numbers = #tpu.dot_dimension_numbers<[1], [0], [0], [1], [0, 0, 1, 1], [], []>} : vector<1x64xf32>, vector<64x64xf32>, vector<1x64xf32> -> vector<1x64xf32>
    %38 = arith.mulf %36, %36 : vector<1x64xf32>
    %39 = arith.subf %37, %38 : vector<1x64xf32>
    %cst_23 = arith.constant 9.99999974E-6 : f32
    %40 = vector.broadcast %cst_23 : f32 to vector<1x64xf32>
    %41 = arith.addf %39, %40 : vector<1x64xf32>
    %42 = math.rsqrt %41 : vector<1x64xf32>
    %43 = vector.broadcast %36 : vector<1x64xf32> to vector<576x64xf32>
    %44 = arith.subf %7, %43 : vector<576x64xf32>
    %45 = arith.mulf %42, %31 : vector<1x64xf32>
    %46 = vector.broadcast %45 : vector<1x64xf32> to vector<576x64xf32>
    %47 = arith.mulf %44, %46 : vector<576x64xf32>
    %48 = vector.broadcast %32 : vector<1x64xf32> to vector<576x64xf32>
    %49 = arith.addf %47, %48 : vector<576x64xf32>
    %cst_24 = arith.constant 2.000000e-01 : f32
    %50 = vector.broadcast %cst_24 : f32 to vector<576x64xf32>
    %51 = arith.mulf %50, %49 : vector<576x64xf32>
    %52 = arith.maximumf %49, %51 : vector<576x64xf32>
    %53 = tpu.iota {dimensions = array<i32: 0>} : vector<576x1xi32>
    %54 = arith.sitofp %53 : vector<576x1xi32> to vector<576x1xf32>
    %cst_25 = arith.constant 5.000000e-01 : f32
    %55 = vector.broadcast %cst_25 : f32 to vector<576x1xf32>
    %56 = arith.addf %54, %55 : vector<576x1xf32>
    %cst_26 = arith.constant 0.0416666679 : f32
    %57 = vector.broadcast %cst_26 : f32 to vector<576x1xf32>
    %58 = arith.mulf %56, %57 : vector<576x1xf32>
    %59 = math.floor %58 : vector<576x1xf32>
    %cst_27 = arith.constant 2.400000e+01 : f32
    %60 = vector.broadcast %cst_27 : f32 to vector<576x1xf32>
    %61 = arith.mulf %59, %60 : vector<576x1xf32>
    %62 = arith.subf %54, %61 : vector<576x1xf32>
    %cst_28 = arith.constant 4.000000e+00 : f32
    %63 = vector.broadcast %cst_28 : f32 to vector<576x1xf32>
    %64 = arith.cmpf oge, %59, %63 : vector<576x1xf32>
    %cst_29 = arith.constant 2.000000e+01 : f32
    %65 = vector.broadcast %cst_29 : f32 to vector<576x1xf32>
    %66 = arith.cmpf olt, %59, %65 : vector<576x1xf32>
    %67 = arith.andi %64, %66 : vector<576x1xi1>
    %cst_30 = arith.constant 4.000000e+00 : f32
    %68 = vector.broadcast %cst_30 : f32 to vector<576x1xf32>
    %69 = arith.cmpf oge, %62, %68 : vector<576x1xf32>
    %70 = arith.andi %67, %69 : vector<576x1xi1>
    %cst_31 = arith.constant 2.000000e+01 : f32
    %71 = vector.broadcast %cst_31 : f32 to vector<576x1xf32>
    %72 = arith.cmpf olt, %62, %71 : vector<576x1xf32>
    %73 = arith.andi %70, %72 : vector<576x1xi1>
    %cst_32 = arith.constant 0.000000e+00 : f32
    %74 = vector.shape_cast %73 : vector<576x1xi1> to vector<576x1xi1>
    %75 = vector.broadcast %74 : vector<576x1xi1> to vector<576x64xi1>
    %76 = vector.broadcast %cst_32 : f32 to vector<576x64xf32>
    %77 = arith.select %75, %52, %76 : vector<576x64xi1>, vector<576x64xf32>
    %78 = vector.shape_cast %77 : vector<576x64xf32> to vector<24x24x64xf32>
    %79 = vector.extract_strided_slice %78 {offsets = [3, 3, 0], sizes = [16, 16, 64], strides = [1, 1, 1]} : vector<24x24x64xf32> to vector<16x16x64xf32>
    %80 = vector.shape_cast %79 : vector<16x16x64xf32> to vector<256x64xf32>
    %81 = arith.truncf %80 : vector<256x64xf32> to vector<256x64xbf16>
    %c0_33 = arith.constant 0 : index
    %c0_34 = arith.constant 0 : index
    %c0_35 = arith.constant 0 : index
    %82 = vector.load %arg6[%c0_33, %c0_34, %c0_35] : memref<9x64x64xbf16, #tpu.memory_space<vmem>>, vector<1x64x64xbf16>
    %83 = vector.shape_cast %82 : vector<1x64x64xbf16> to vector<64x64xbf16>
    %cst_36 = arith.constant dense<0.000000e+00> : vector<256x64xf32>
    %84 = tpu.matmul %81, %83, %cst_36 {dimension_numbers = #tpu.dot_dimension_numbers<[1], [0], [0], [1], [0, 0, 1, 1], [], []>} : vector<256x64xbf16>, vector<64x64xbf16>, vector<256x64xf32> -> vector<256x64xf32>
    %85 = vector.extract_strided_slice %78 {offsets = [3, 4, 0], sizes = [16, 16, 64], strides = [1, 1, 1]} : vector<24x24x64xf32> to vector<16x16x64xf32>
    %86 = vector.shape_cast %85 : vector<16x16x64xf32> to vector<256x64xf32>
    %87 = arith.truncf %86 : vector<256x64xf32> to vector<256x64xbf16>
    %c1 = arith.constant 1 : index
    %c0_37 = arith.constant 0 : index
    %c0_38 = arith.constant 0 : index
    %88 = vector.load %arg6[%c1, %c0_37, %c0_38] : memref<9x64x64xbf16, #tpu.memory_space<vmem>>, vector<1x64x64xbf16>
    %89 = vector.shape_cast %88 : vector<1x64x64xbf16> to vector<64x64xbf16>
    %cst_39 = arith.constant dense<0.000000e+00> : vector<256x64xf32>
    %90 = tpu.matmul %87, %89, %cst_39 {dimension_numbers = #tpu.dot_dimension_numbers<[1], [0], [0], [1], [0, 0, 1, 1], [], []>} : vector<256x64xbf16>, vector<64x64xbf16>, vector<256x64xf32> -> vector<256x64xf32>
    %91 = arith.addf %84, %90 : vector<256x64xf32>
    %92 = vector.extract_strided_slice %78 {offsets = [3, 5, 0], sizes = [16, 16, 64], strides = [1, 1, 1]} : vector<24x24x64xf32> to vector<16x16x64xf32>
    %93 = vector.shape_cast %92 : vector<16x16x64xf32> to vector<256x64xf32>
    %94 = arith.truncf %93 : vector<256x64xf32> to vector<256x64xbf16>
    %c2 = arith.constant 2 : index
    %c0_40 = arith.constant 0 : index
    %c0_41 = arith.constant 0 : index
    %95 = vector.load %arg6[%c2, %c0_40, %c0_41] : memref<9x64x64xbf16, #tpu.memory_space<vmem>>, vector<1x64x64xbf16>
    %96 = vector.shape_cast %95 : vector<1x64x64xbf16> to vector<64x64xbf16>
    %cst_42 = arith.constant dense<0.000000e+00> : vector<256x64xf32>
    %97 = tpu.matmul %94, %96, %cst_42 {dimension_numbers = #tpu.dot_dimension_numbers<[1], [0], [0], [1], [0, 0, 1, 1], [], []>} : vector<256x64xbf16>, vector<64x64xbf16>, vector<256x64xf32> -> vector<256x64xf32>
    %98 = arith.addf %91, %97 : vector<256x64xf32>
    %99 = vector.extract_strided_slice %78 {offsets = [4, 3, 0], sizes = [16, 16, 64], strides = [1, 1, 1]} : vector<24x24x64xf32> to vector<16x16x64xf32>
    %100 = vector.shape_cast %99 : vector<16x16x64xf32> to vector<256x64xf32>
    %101 = arith.truncf %100 : vector<256x64xf32> to vector<256x64xbf16>
    %c3 = arith.constant 3 : index
    %c0_43 = arith.constant 0 : index
    %c0_44 = arith.constant 0 : index
    %102 = vector.load %arg6[%c3, %c0_43, %c0_44] : memref<9x64x64xbf16, #tpu.memory_space<vmem>>, vector<1x64x64xbf16>
    %103 = vector.shape_cast %102 : vector<1x64x64xbf16> to vector<64x64xbf16>
    %cst_45 = arith.constant dense<0.000000e+00> : vector<256x64xf32>
    %104 = tpu.matmul %101, %103, %cst_45 {dimension_numbers = #tpu.dot_dimension_numbers<[1], [0], [0], [1], [0, 0, 1, 1], [], []>} : vector<256x64xbf16>, vector<64x64xbf16>, vector<256x64xf32> -> vector<256x64xf32>
    %105 = arith.addf %98, %104 : vector<256x64xf32>
    %106 = vector.extract_strided_slice %78 {offsets = [4, 4, 0], sizes = [16, 16, 64], strides = [1, 1, 1]} : vector<24x24x64xf32> to vector<16x16x64xf32>
    %107 = vector.shape_cast %106 : vector<16x16x64xf32> to vector<256x64xf32>
    %108 = arith.truncf %107 : vector<256x64xf32> to vector<256x64xbf16>
    %c4 = arith.constant 4 : index
    %c0_46 = arith.constant 0 : index
    %c0_47 = arith.constant 0 : index
    %109 = vector.load %arg6[%c4, %c0_46, %c0_47] : memref<9x64x64xbf16, #tpu.memory_space<vmem>>, vector<1x64x64xbf16>
    %110 = vector.shape_cast %109 : vector<1x64x64xbf16> to vector<64x64xbf16>
    %cst_48 = arith.constant dense<0.000000e+00> : vector<256x64xf32>
    %111 = tpu.matmul %108, %110, %cst_48 {dimension_numbers = #tpu.dot_dimension_numbers<[1], [0], [0], [1], [0, 0, 1, 1], [], []>} : vector<256x64xbf16>, vector<64x64xbf16>, vector<256x64xf32> -> vector<256x64xf32>
    %112 = arith.addf %105, %111 : vector<256x64xf32>
    %113 = vector.extract_strided_slice %78 {offsets = [4, 5, 0], sizes = [16, 16, 64], strides = [1, 1, 1]} : vector<24x24x64xf32> to vector<16x16x64xf32>
    %114 = vector.shape_cast %113 : vector<16x16x64xf32> to vector<256x64xf32>
    %115 = arith.truncf %114 : vector<256x64xf32> to vector<256x64xbf16>
    %c5 = arith.constant 5 : index
    %c0_49 = arith.constant 0 : index
    %c0_50 = arith.constant 0 : index
    %116 = vector.load %arg6[%c5, %c0_49, %c0_50] : memref<9x64x64xbf16, #tpu.memory_space<vmem>>, vector<1x64x64xbf16>
    %117 = vector.shape_cast %116 : vector<1x64x64xbf16> to vector<64x64xbf16>
    %cst_51 = arith.constant dense<0.000000e+00> : vector<256x64xf32>
    %118 = tpu.matmul %115, %117, %cst_51 {dimension_numbers = #tpu.dot_dimension_numbers<[1], [0], [0], [1], [0, 0, 1, 1], [], []>} : vector<256x64xbf16>, vector<64x64xbf16>, vector<256x64xf32> -> vector<256x64xf32>
    %119 = arith.addf %112, %118 : vector<256x64xf32>
    %120 = vector.extract_strided_slice %78 {offsets = [5, 3, 0], sizes = [16, 16, 64], strides = [1, 1, 1]} : vector<24x24x64xf32> to vector<16x16x64xf32>
    %121 = vector.shape_cast %120 : vector<16x16x64xf32> to vector<256x64xf32>
    %122 = arith.truncf %121 : vector<256x64xf32> to vector<256x64xbf16>
    %c6 = arith.constant 6 : index
    %c0_52 = arith.constant 0 : index
    %c0_53 = arith.constant 0 : index
    %123 = vector.load %arg6[%c6, %c0_52, %c0_53] : memref<9x64x64xbf16, #tpu.memory_space<vmem>>, vector<1x64x64xbf16>
    %124 = vector.shape_cast %123 : vector<1x64x64xbf16> to vector<64x64xbf16>
    %cst_54 = arith.constant dense<0.000000e+00> : vector<256x64xf32>
    %125 = tpu.matmul %122, %124, %cst_54 {dimension_numbers = #tpu.dot_dimension_numbers<[1], [0], [0], [1], [0, 0, 1, 1], [], []>} : vector<256x64xbf16>, vector<64x64xbf16>, vector<256x64xf32> -> vector<256x64xf32>
    %126 = arith.addf %119, %125 : vector<256x64xf32>
    %127 = vector.extract_strided_slice %78 {offsets = [5, 4, 0], sizes = [16, 16, 64], strides = [1, 1, 1]} : vector<24x24x64xf32> to vector<16x16x64xf32>
    %128 = vector.shape_cast %127 : vector<16x16x64xf32> to vector<256x64xf32>
    %129 = arith.truncf %128 : vector<256x64xf32> to vector<256x64xbf16>
    %c7 = arith.constant 7 : index
    %c0_55 = arith.constant 0 : index
    %c0_56 = arith.constant 0 : index
    %130 = vector.load %arg6[%c7, %c0_55, %c0_56] : memref<9x64x64xbf16, #tpu.memory_space<vmem>>, vector<1x64x64xbf16>
    %131 = vector.shape_cast %130 : vector<1x64x64xbf16> to vector<64x64xbf16>
    %cst_57 = arith.constant dense<0.000000e+00> : vector<256x64xf32>
    %132 = tpu.matmul %129, %131, %cst_57 {dimension_numbers = #tpu.dot_dimension_numbers<[1], [0], [0], [1], [0, 0, 1, 1], [], []>} : vector<256x64xbf16>, vector<64x64xbf16>, vector<256x64xf32> -> vector<256x64xf32>
    %133 = arith.addf %126, %132 : vector<256x64xf32>
    %134 = vector.extract_strided_slice %78 {offsets = [5, 5, 0], sizes = [16, 16, 64], strides = [1, 1, 1]} : vector<24x24x64xf32> to vector<16x16x64xf32>
    %135 = vector.shape_cast %134 : vector<16x16x64xf32> to vector<256x64xf32>
    %136 = arith.truncf %135 : vector<256x64xf32> to vector<256x64xbf16>
    %c8 = arith.constant 8 : index
    %c0_58 = arith.constant 0 : index
    %c0_59 = arith.constant 0 : index
    %137 = vector.load %arg6[%c8, %c0_58, %c0_59] : memref<9x64x64xbf16, #tpu.memory_space<vmem>>, vector<1x64x64xbf16>
    %138 = vector.shape_cast %137 : vector<1x64x64xbf16> to vector<64x64xbf16>
    %cst_60 = arith.constant dense<0.000000e+00> : vector<256x64xf32>
    %139 = tpu.matmul %136, %138, %cst_60 {dimension_numbers = #tpu.dot_dimension_numbers<[1], [0], [0], [1], [0, 0, 1, 1], [], []>} : vector<256x64xbf16>, vector<64x64xbf16>, vector<256x64xf32> -> vector<256x64xf32>
    %140 = arith.addf %133, %139 : vector<256x64xf32>
    %c0_61 = arith.constant 0 : index
    %c0_62 = arith.constant 0 : index
    %141 = vector.load %arg7[%c0_61, %c0_62] : memref<1x64xf32, #tpu.memory_space<vmem>>, vector<1x64xf32>
    %142 = vector.broadcast %141 : vector<1x64xf32> to vector<256x64xf32>
    %143 = arith.addf %140, %142 : vector<256x64xf32>
    %cst_63 = arith.constant 1.000000e+00 : f32
    %144 = vector.broadcast %cst_63 : f32 to vector<1x256xf32>
    %c0_64 = arith.constant 0 : index
    %c0_65 = arith.constant 0 : index
    %145 = vector.load %arg8[%c0_64, %c0_65] : memref<1x64xf32, #tpu.memory_space<vmem>>, vector<1x64xf32>
    %c0_66 = arith.constant 0 : index
    %c0_67 = arith.constant 0 : index
    %146 = vector.load %arg9[%c0_66, %c0_67] : memref<1x64xf32, #tpu.memory_space<vmem>>, vector<1x64xf32>
    %cst_68 = arith.constant dense<0.000000e+00> : vector<1x64xf32>
    %147 = tpu.matmul %144, %143, %cst_68 {dimension_numbers = #tpu.dot_dimension_numbers<[1], [0], [0], [1], [0, 0, 1, 1], [], []>} : vector<1x256xf32>, vector<256x64xf32>, vector<1x64xf32> -> vector<1x64xf32>
    %148 = arith.mulf %143, %143 : vector<256x64xf32>
    %cst_69 = arith.constant dense<0.000000e+00> : vector<1x64xf32>
    %149 = tpu.matmul %144, %148, %cst_69 {dimension_numbers = #tpu.dot_dimension_numbers<[1], [0], [0], [1], [0, 0, 1, 1], [], []>} : vector<1x256xf32>, vector<256x64xf32>, vector<1x64xf32> -> vector<1x64xf32>
    %cst_70 = arith.constant dense<0.000000e+00> : vector<1x64xf32>
    %150 = tpu.matmul %147, %0, %cst_70 {dimension_numbers = #tpu.dot_dimension_numbers<[1], [0], [0], [1], [0, 0, 1, 1], [], []>} : vector<1x64xf32>, vector<64x64xf32>, vector<1x64xf32> -> vector<1x64xf32>
    %cst_71 = arith.constant dense<0.000000e+00> : vector<1x64xf32>
    %151 = tpu.matmul %149, %0, %cst_71 {dimension_numbers = #tpu.dot_dimension_numbers<[1], [0], [0], [1], [0, 0, 1, 1], [], []>} : vector<1x64xf32>, vector<64x64xf32>, vector<1x64xf32> -> vector<1x64xf32>
    %152 = arith.mulf %150, %150 : vector<1x64xf32>
    %153 = arith.subf %151, %152 : vector<1x64xf32>
    %cst_72 = arith.constant 9.99999974E-6 : f32
    %154 = vector.broadcast %cst_72 : f32 to vector<1x64xf32>
    %155 = arith.addf %153, %154 : vector<1x64xf32>
    %156 = math.rsqrt %155 : vector<1x64xf32>
    %157 = vector.broadcast %150 : vector<1x64xf32> to vector<256x64xf32>
    %158 = arith.subf %143, %157 : vector<256x64xf32>
    %159 = arith.mulf %156, %145 : vector<1x64xf32>
    %160 = vector.broadcast %159 : vector<1x64xf32> to vector<256x64xf32>
    %161 = arith.mulf %158, %160 : vector<256x64xf32>
    %162 = vector.broadcast %146 : vector<1x64xf32> to vector<256x64xf32>
    %163 = arith.addf %161, %162 : vector<256x64xf32>
    %cst_73 = arith.constant 2.000000e-01 : f32
    %164 = vector.broadcast %cst_73 : f32 to vector<256x64xf32>
    %165 = arith.mulf %164, %163 : vector<256x64xf32>
    %166 = arith.maximumf %163, %165 : vector<256x64xf32>
    %167 = vector.shape_cast %166 : vector<256x64xf32> to vector<16x16x64xf32>
    %c0_74 = arith.constant 0 : index
    %c0_75 = arith.constant 0 : index
    %c0_76 = arith.constant 0 : index
    %c0_77 = arith.constant 0 : index
    %168 = vector.load %arg11[%c0_74, %c0_75, %c0_76, %c0_77] : memref<1x16x16x64xf32, #tpu.memory_space<vmem>>, vector<1x16x16x64xf32>
    %169 = vector.shape_cast %168 : vector<1x16x16x64xf32> to vector<16x16x64xf32>
    %170 = vector.shape_cast %167 : vector<16x16x64xf32> to vector<1x16x16x64xf32>
    tpu.vector_store %arg11[%c0_74, %c0_75, %c0_76, %c0_77], %170 {strides = array<i32>} : memref<1x16x16x64xf32, #tpu.memory_space<vmem>>, vector<1x16x16x64xf32>,
    return
  }
  func.func @transform_0(%arg0: i32) -> (i32, i32, i32) {
    %c0_i32 = arith.constant 0 : i32
    %c0_i32_0 = arith.constant 0 : i32
    %c0_i32_1 = arith.constant 0 : i32
    return %arg0, %c0_i32, %c0_i32_0 : i32, i32, i32
  }
  func.func @transform_1(%arg0: i32) -> (i32, i32) {
    %c0_i32 = arith.constant 0 : i32
    %c0_i32_0 = arith.constant 0 : i32
    %c0_i32_1 = arith.constant 0 : i32
    return %c0_i32, %c0_i32_0 : i32, i32
  }
  func.func @transform_2(%arg0: i32) -> (i32, i32) {
    %c0_i32 = arith.constant 0 : i32
    %c0_i32_0 = arith.constant 0 : i32
    %c0_i32_1 = arith.constant 0 : i32
    return %c0_i32, %c0_i32_0 : i32, i32
  }
  func.func @transform_3(%arg0: i32) -> (i32, i32) {
    %c0_i32 = arith.constant 0 : i32
    %c0_i32_0 = arith.constant 0 : i32
    %c0_i32_1 = arith.constant 0 : i32
    return %c0_i32, %c0_i32_0 : i32, i32
  }
  func.func @transform_4(%arg0: i32) -> (i32, i32) {
    %c0_i32 = arith.constant 0 : i32
    %c0_i32_0 = arith.constant 0 : i32
    %c0_i32_1 = arith.constant 0 : i32
    return %c0_i32, %c0_i32_0 : i32, i32
  }
  func.func @transform_5(%arg0: i32) -> (i32, i32, i32) {
    %c0_i32 = arith.constant 0 : i32
    %c0_i32_0 = arith.constant 0 : i32
    %c0_i32_1 = arith.constant 0 : i32
    %c0_i32_2 = arith.constant 0 : i32
    return %c0_i32, %c0_i32_0, %c0_i32_1 : i32, i32, i32
  }
  func.func @transform_6(%arg0: i32) -> (i32, i32) {
    %c0_i32 = arith.constant 0 : i32
    %c0_i32_0 = arith.constant 0 : i32
    %c0_i32_1 = arith.constant 0 : i32
    return %c0_i32, %c0_i32_0 : i32, i32
  }
  func.func @transform_7(%arg0: i32) -> (i32, i32) {
    %c0_i32 = arith.constant 0 : i32
    %c0_i32_0 = arith.constant 0 : i32
    %c0_i32_1 = arith.constant 0 : i32
    return %c0_i32, %c0_i32_0 : i32, i32
  }
  func.func @transform_8(%arg0: i32) -> (i32, i32) {
    %c0_i32 = arith.constant 0 : i32
    %c0_i32_0 = arith.constant 0 : i32
    %c0_i32_1 = arith.constant 0 : i32
    return %c0_i32, %c0_i32_0 : i32, i32
  }
  func.func @transform_9(%arg0: i32) -> (i32, i32) {
    %c0_i32 = arith.constant 0 : i32
    %c0_i32_0 = arith.constant 0 : i32
    %c0_i32_1 = arith.constant 0 : i32
    return %c0_i32, %c0_i32_0 : i32, i32
  }
  func.func @transform_10(%arg0: i32) -> (i32, i32, i32, i32) {
    %c0_i32 = arith.constant 0 : i32
    %c0_i32_0 = arith.constant 0 : i32
    %c0_i32_1 = arith.constant 0 : i32
    %c0_i32_2 = arith.constant 0 : i32
    return %arg0, %c0_i32, %c0_i32_0, %c0_i32_1 : i32, i32, i32, i32
  }
}

</mosaic_0001>

<bundles_post_ra>
// kernel: encoder_specific_forward.1
= control target key start
LH: loop header
LB: loop body
LE: loop exit
PB: predicated region body
PF: predicated region fallthrough
CT: control target
= control target key end

     0   :  { %15 = vsyncpa [#allocation3], 0  ;;  %s15274_s0 = inlined_call_operand.vmem [shape: bf16[2,576,576], index: 0, kind: input, shape index: {}]   ;;  %s15275_s1 = inlined_call_operand.vmem [shape: bf16[576,64], index: 1, kind: input, shape index: {}]   ;;  %s15276_s2 = inlined_call_operand.vmem [shape: f32[1,64], index: 2, kind: input, shape index: {}]   ;;  %s15277_s3 = inlined_call_operand.vmem [shape: f32[1,64], index: 3, kind: input, shape index: {}]   ;;  %s15278_s4 = inlined_call_operand.vmem [shape: f32[1,64], index: 4, kind: input, shape index: {}]   ;;  %s15279_s5 = inlined_call_operand.vmem [shape: bf16[9,64,64], index: 5, kind: input, shape index: {}]   ;;  %s15280_s6 = inlined_call_operand.vmem [shape: f32[1,64], index: 6, kind: input, shape index: {}]   ;;  %s15281_s7 = inlined_call_operand.vmem [shape: f32[1,64], index: 7, kind: input, shape index: {}]   ;;  %s15282_s8 = inlined_call_operand.vmem [shape: f32[1,64], index: 8, kind: input, shape index: {}]   ;;  %s15283_s9 = inlined_call_operand.vmem [shape: f32[64,64], index: 9, kind: input, shape index: {}]   ;;  %s15284_s10 = inlined_call_operand.hbm [shape: f32[2,16,16,64], index: 10, kind: output, shape index: {}]  }
   0x1   :  { %17 = vsyncpa [#allocation3 + $0x1], 0  ;;  %s8627_s13 = smov 0   ;;  %s8629_s14 = smov 0  }
   0x2   :  { %s8631_s15 = smov 0   ;;  %s8633_s16 = smov 0  }
   0x3 LB: > { %s8648_s17 = sadd.s32 4294967295, %s8566_s16   ;;  %s6899_s18 = sadd.s32 4294967294, %s8566_s16   ;;  %s8566_s16 = sphi %s8633_s16, %s17974_s16   ;;  %s8562_s15 = sphi %s8631_s15, %s17973_s15   ;;  %s8558_s14 = sphi %s8629_s14, %s17972_s14   ;;  %s8554_s13 = sphi %s8627_s13, %s17971_s13  }
   0x4   : > { %s8652_s19 = sadd.s32 1, %s8566_s16   ;;  %s245_s20 = sadd.s32 1, %s8562_s15 }
   0x5   : > { %s242_s21 = ssub.s32 %s8566_s16, %s8652_s19  ;;  %p255_p0 = scmp.ne.s32.totalorder %s8562_s15, %s8558_s14 }
   0x6   : > { %p243_p1 = scmp.eq.s32.totalorder %s242_s21, 0  ;;  %p256_p2 = scmp.eq.s32.totalorder %s8648_s17, 1 }
   0x7   : > { %p261_p3 = scmp.ne.s32.totalorder %s8558_s14, %s8554_s13  ;;  %p262_p4 = scmp.eq.s32.totalorder %s6899_s18, 1 }
   0x8   : > { %s8663_s22 = scalar_select %p243_p1, %s8562_s15, %s245_s20  }
   0x9   : > { %p8665_p5 = por %p256_p2, %p255_p0  ;;  %p8669_p6 = por %p262_p4, %p261_p3 }
   0xa   : > { %p6902_p7 = scmp.ge.s32.totalorder %s8566_s16, 1  ;;  %p315_p8 = scmp.lt.s32.totalorder %s8566_s16, 3 }
   0xc   : > { %p316_p9 = pnand %p6902_p7, %p315_p8 }
   0xe   : > { %319 = sbr.rel (%p316_p9) target bundleno = 3288 (0xcd8), region = 60 }
  0x13   : > { %v8368_v0 = vld [vmem:[%s15275_s1 + $0x38] sm:$0xff]  ;;  %v8367_v2 = vld [vmem:[%s15275_s1 + $0x30] sm:$0xff]  ;;  %v8366_v5 = vld [vmem:[%s15275_s1 + $0x28] sm:$0xff]  ;;  %p353_p10 = scmp.lt.s32.totalorder %s8648_s17, 1  ;;  %vm15526_vm0 = vcmask 523264   ;;  %s350_s28 = sand.u32 1, %s8558_s14  }
  0x14   : > { %v8376_v1 = vld [vmem:[%s15275_s1 + $0x78] sm:$0xff]  ;;  %1884 = vmatpush.bf16.msra.mxu0 %v8368_v0  ;;  %v8375_v3 = vld [vmem:[%s15275_s1 + $0x70] sm:$0xff]  ;;  %v8374_v6 = vld [vmem:[%s15275_s1 + $0x68] sm:$0xff]  ;;  %s6903_s30 = sshll.u32 %s350_s28, 8  ;;  %s6822_s21 = scalar_lea.sflag [#allocation3], %s350_s28 }
  0x15   : > { %8434 = vmatpush.bf16.msra.mxu2 %v8376_v1  ;;  %2073 = vmatpush.bf16.msra.mxu1 %v8376_v1  ;;  %v8392_v4 = vld [vmem:[%s15275_s1 + $0xf8] sm:$0xff]  ;;  %v8391_v7 = vld [vmem:[%s15275_s1 + $0xf0] sm:$0xff]  ;;  %v8365_v8 = vld [vmem:[%s15275_s1 + $0x20] sm:$0xff]  ;;  %s354_s29 = scalar_select %p353_p10, %s8648_s17, 1 }
  0x16   : > { %2451 = vmatpush.bf16.msra.mxu3 %v8392_v4  ;;  %v8373_v9 = vld [vmem:[%s15275_s1 + $0x60] sm:$0xff]  ;;  %v8390_v10 = vld [vmem:[%s15275_s1 + $0xe8] sm:$0xff]  ;;  %v8364_v11 = vld [vmem:[%s15275_s1 + $0x18] sm:$0xff]  ;;  %s15076_s11 = scalar_lea.vmem [#allocation2], %s6903_s30  ;;  %s8524_s12 = scalar_lea.hbm %s15284_s10, 512 }
  0x17   : > { %v8372_v12 = vld [vmem:[%s15275_s1 + $0x58] sm:$0xff]  ;;  %v8389_v13 = vld [vmem:[%s15275_s1 + $0xe0] sm:$0xff]  ;;  %v8363_v14 = vld [vmem:[%s15275_s1 + $0x10] sm:$0xff]  ;;  %s8442_s25 = smul.u32 1440, %s354_s29  ;;  %s6834_s18 = sshll.u32 %s15076_s11, 4  ;;  %s6835_s18 = int_to_ptr.vmem [resolvable:$true] %s6834_s18 }
  0x18   : > { %1885 = vmatpush.bf16.msra.mxu0 %v8367_v2  ;;  %v8371_v15 = vld [vmem:[%s15275_s1 + $0x50] sm:$0xff]  ;;  %v8388_v16 = vld [vmem:[%s15275_s1 + $0xd8] sm:$0xff]  ;;  %v8362_v17 = vld [vmem:[%s15275_s1 + $0x8] sm:$0xff] }
  0x19   : > { %8435 = vmatpush.bf16.msra.mxu2 %v8375_v3  ;;  %2074 = vmatpush.bf16.msra.mxu1 %v8375_v3  ;;  %v8370_v18 = vld [vmem:[%s15275_s1 + $0x48] sm:$0xff]  ;;  %s8737_s29 = scalar_lea.vmem %s15274_s0, %s8442_s25  ;;  %v8387_v19 = vld [vmem:[%s15275_s1 + $0xd0] sm:$0xff]  ;;  %v8361_v20 = vld [vmem:[%s15275_s1] sm:$0xff]  ;;  %s8433_s25 = sshll.u32 %s8648_s17, 8 }
  0x1a   : > { %2452 = vmatpush.bf16.msra.mxu3 %v8391_v7  ;;  %v8369_v21 = vld [vmem:[%s15275_s1 + $0x40] sm:$0xff]  ;;  %v8183_v23 = vld [vmem:[%s8737_s29 + $0x10] sm:$0xf0]  ;;  %v7589_v25 = vld [vmem:[%s8737_s29 + $0x564] sm:$0xf0]  ;;  %s6833_s17 = scalar_lea.hbm %s15284_s10, %s8433_s25 }
  0x1b   : > { %v6907_v22 = vld [vmem:[%s8737_s29] sm:$0xf]  ;;  %v8351_v24 = vld [vmem:[%s8737_s29 + $0x554] sm:$0xf]  ;;  %v8384_v26 = vld [vmem:[%s15275_s1 + $0xb8] sm:$0xff]  ;;  %s6836_s20 = sshll.u32 %s6833_s17, 4  ;;  %s6837_s20 = int_to_ptr.hbm [resolvable:$true] %s6836_s20 }
  0x1c   : > { %1886 = vmatpush.bf16.msra.mxu0 %v8366_v5  ;;  %v8181_v27 = vld [vmem:[%s8737_s29 + $0x4] sm:$0xf]  ;;  %v6909_v28 = vld [vmem:[%s8737_s29 + $0x14] sm:$0xf0]  ;;  %v8386_v29 = vld [vmem:[%s15275_s1 + $0xc8] sm:$0xff]  ;;  %v6908_v30 = vor.u32 %v8183_v23, %v6907_v22  ;;  %v7592_v31 = vor.u32 %v8351_v24, %v7589_v25  ;;  %s8518_s26 = sshra.s32 %s6837_s20, 4  ;;  %s8519_s26 = int_to_ptr.hbm [resolvable:$true] %s8518_s26 }
  0x1d   : > { %8436 = vmatpush.bf16.msra.mxu2 %v8374_v6  ;;  %2075 = vmatpush.bf16.msra.mxu1 %v8374_v6  ;;  %v6912_v32 = vor.u32 %v8181_v27, %v6909_v28  ;;  %v8383_v33 = vld [vmem:[%s15275_s1 + $0xb0] sm:$0xff]  ;;  %v8385_v34 = vld [vmem:[%s15275_s1 + $0xc0] sm:$0xff]  ;;  %v8182_v35 = vld [vmem:[%s8737_s29 + $0xc] sm:$0xf]  ;;  %s8520_s27 = scalar_lea.hbm %s8519_s26, 256  ;;  %p8525_p0 = scmp.lt.s32.totalorder %s8519_s26, %s15284_s10 }
  0x1e   : > { %2453 = vmatpush.bf16.msra.mxu3 %v8390_v10  ;;  %v6917_v36 = vld [vmem:[%s8737_s29 + $0x1c] sm:$0xf0]  ;;  %v8382_v37 = vld [vmem:[%s15275_s1 + $0xa8] sm:$0xff]  ;;  %v8188_v41 = vld [vmem:[%s8737_s29 + $0x38] sm:$0xf0]  ;;  %p8521_p11 = scmp.ne.s32.totalorder %s8519_s26, %s8520_s27  ;;  %p8526_p1 = scmp.lt.s32.totalorder %s8524_s12, %s8520_s27 }
  0x1f   : > { %v6920_v38 = vor.u32 %v8182_v35, %v6917_v36  ;;  %v8381_v39 = vld [vmem:[%s15275_s1 + $0xa0] sm:$0xff]  ;;  %v6927_v40 = vld [vmem:[%s8737_s29 + $0x28] sm:$0xf]  ;;  %v8356_v42 = vld [vmem:[%s8737_s29 + $0x57c] sm:$0xf] }
  0x20   : > { %1887 = vmatpush.bf16.msra.mxu0 %v8365_v8  ;;  %v7609_v43 = vld [vmem:[%s8737_s29 + $0x58c] sm:$0xf0]  ;;  %v8380_v44 = vld [vmem:[%s15275_s1 + $0x98] sm:$0xff]  ;;  %v8186_v45 = vld [vmem:[%s8737_s29 + $0x2c] sm:$0xf]  ;;  %v6928_v47 = vor.u32 %v8188_v41, %v6927_v40  ;;  %p8522_p12 = pnand %p8521_p11, %p8665_p5  ;;  %p8527_p2 = por %p8526_p1, %p8525_p0 }
  0x21   : > { %8437 = vmatpush.bf16.msra.mxu2 %v8373_v9  ;;  %2076 = vmatpush.bf16.msra.mxu1 %v8373_v9  ;;  %v6929_v46 = vld [vmem:[%s8737_s29 + $0x3c] sm:$0xf0]  ;;  %v7612_v48 = vor.u32 %v8356_v42, %v7609_v43  ;;  %v8379_v50 = vld [vmem:[%s15275_s1 + $0x90] sm:$0xff]  ;;  %v6937_v52 = vld [vmem:[%s8737_s29 + $0x44] sm:$0xf0] }
  0x22   : > { %2454 = vmatpush.bf16.msra.mxu3 %v8389_v13  ;;  %v6932_v49 = vor.u32 %v8186_v45, %v6929_v46  ;;  %v8187_v51 = vld [vmem:[%s8737_s29 + $0x34] sm:$0xf]  ;;  %v8378_v53 = vld [vmem:[%s15275_s1 + $0x88] sm:$0xff]  ;;  %v8377_v55 = vld [vmem:[%s15275_s1 + $0x80] sm:$0xff]  ;;  %p8523_p13 = pneg %p8522_p12 }
  0x23   : > { %v6940_v54 = vor.u32 %v8187_v51, %v6937_v52  ;;  %v6947_v56 = vld [vmem:[%s8737_s29 + $0x50] sm:$0xf]  ;;  %v8193_v57 = vld [vmem:[%s8737_s29 + $0x60] sm:$0xf0]  ;;  %v6915_v58 = vld [vmem:[%s8737_s29 + $0x8] sm:$0xf] }
  0x24   : > { %1888 = vmatpush.bf16.msra.mxu0 %v8364_v11  ;;  %v8184_v59 = vld [vmem:[%s8737_s29 + $0x18] sm:$0xf0]  ;;  %v8191_v60 = vld [vmem:[%s8737_s29 + $0x54] sm:$0xf]  ;;  %v6949_v61 = vld [vmem:[%s8737_s29 + $0x64] sm:$0xf0]  ;;  %v6948_v62 = vor.u32 %v8193_v57, %v6947_v56  ;;  %p8528_p3 = pnand %p8527_p2, %p8523_p13 }
  0x25   : > { %8438 = vmatpush.bf16.msra.mxu2 %v8372_v12  ;;  %2077 = vmatpush.bf16.msra.mxu1 %v8372_v12  ;;  %v6916_v63 = vor.u32 %v8184_v59, %v6915_v58  ;;  %v6952_v0 = vor.u32 %v8191_v60, %v6949_v61  ;;  %v8192_v1 = vld [vmem:[%s8737_s29 + $0x5c] sm:$0xf]  ;;  %v6957_v2 = vld [vmem:[%s8737_s29 + $0x6c] sm:$0xf0]  ;;  %v6967_v4 = vld [vmem:[%s8737_s29 + $0x78] sm:$0xf] }
  0x26   : > { %2455 = vmatpush.bf16.msra.mxu3 %v8388_v16  ;;  %v6960_v3 = vor.u32 %v8192_v1, %v6957_v2  ;;  %v8198_v5 = vld [vmem:[%s8737_s29 + $0x88] sm:$0xf0]  ;;  %v6935_v6 = vld [vmem:[%s8737_s29 + $0x30] sm:$0xf]  ;;  %v8189_v7 = vld [vmem:[%s8737_s29 + $0x40] sm:$0xf0] }
  0x27   : > { %v8196_v8 = vld [vmem:[%s8737_s29 + $0x7c] sm:$0xf]  ;;  %v6969_v9 = vld [vmem:[%s8737_s29 + $0x8c] sm:$0xf0]  ;;  %v6968_v10 = vor.u32 %v8198_v5, %v6967_v4  ;;  %v6936_v11 = vor.u32 %v8189_v7, %v6935_v6  ;;  %v8197_v13 = vld [vmem:[%s8737_s29 + $0x84] sm:$0xf] }
  0x28   : > { %1889 = vmatpush.bf16.msra.mxu0 %v8363_v14  ;;  %v6972_v12 = vor.u32 %v8196_v8, %v6969_v9  ;;  %v6977_v14 = vld [vmem:[%s8737_s29 + $0x94] sm:$0xf0]  ;;  %v6987_v16 = vld [vmem:[%s8737_s29 + $0xa0] sm:$0xf]  ;;  %v8202_v25 = vld [vmem:[%s8737_s29 + $0xac] sm:$0xf] }
  0x29   : > { %8439 = vmatpush.bf16.msra.mxu2 %v8371_v15  ;;  %2078 = vmatpush.bf16.msra.mxu1 %v8371_v15  ;;  %v6980_v15 = vor.u32 %v8197_v13, %v6977_v14  ;;  %v7007_v28 = vld [vmem:[%s8737_s29 + $0xc8] sm:$0xf]  ;;  %v7027_v40 = vld [vmem:[%s8737_s29 + $0xf0] sm:$0xf]  ;;  %v8213_v41 = vld [vmem:[%s8737_s29 + $0x100] sm:$0xf0] }
  0x2a   : > { %2456 = vmatpush.bf16.msra.mxu3 %v8387_v19  ;;  %v8194_v19 = vld [vmem:[%s8737_s29 + $0x68] sm:$0xf0]  ;;  %v6995_v42 = vld [vmem:[%s8737_s29 + $0xa8] sm:$0xf]  ;;  %v8204_v43 = vld [vmem:[%s8737_s29 + $0xb8] sm:$0xf0]  ;;  %v7028_v46 = vor.u32 %v8213_v41, %v7027_v40 }
  0x2b   : > { %v7029_v45 = vld [vmem:[%s8737_s29 + $0x104] sm:$0xf0]  ;;  %v7047_v52 = vld [vmem:[%s8737_s29 + $0x118] sm:$0xf]  ;;  %v8216_v56 = vld [vmem:[%s8737_s29 + $0x11c] sm:$0xf] }
  0x2c   : > { %1890 = vmatpush.bf16.msra.mxu0 %v8362_v17  ;;  %v8203_v17 = vld [vmem:[%s8737_s29 + $0xb0] sm:$0xf0]  ;;  %v7049_v57 = vld [vmem:[%s8737_s29 + $0x12c] sm:$0xf0]  ;;  %v8217_v61 = vld [vmem:[%s8737_s29 + $0x124] sm:$0xf] }
  0x2d   : > { %8440 = vmatpush.bf16.msra.mxu2 %v8370_v18  ;;  %2079 = vmatpush.bf16.msra.mxu1 %v8370_v18  ;;  %v6955_v18 = vld [vmem:[%s8737_s29 + $0x58] sm:$0xf]  ;;  %v6988_v22 = vor.u32 %v8203_v17, %v6987_v16  ;;  %v7052_v60 = vor.u32 %v8216_v56, %v7049_v57  ;;  %v8223_v1 = vld [vmem:[%s8737_s29 + $0x150] sm:$0xf0]  ;;  %v8849_v4 = vld [vmem:[%s15276_s2] ss:$0 sm:$0xff] }
  0x2e   : > { %2457 = vmatpush.bf16.msra.mxu3 %v8386_v29  ;;  %v6956_v23 = vor.u32 %v8194_v19, %v6955_v18  ;;  %v8208_v29 = vld [vmem:[%s8737_s29 + $0xd8] sm:$0xf0]  ;;  %v7035_v2 = vld [vmem:[%s8737_s29 + $0xf8] sm:$0xf]  ;;  %v8221_v5 = vld [vmem:[%s8737_s29 + $0x144] sm:$0xf] }
  0x2f   : > { %v7069_v6 = vld [vmem:[%s8737_s29 + $0x154] sm:$0xf0]  ;;  %v8222_v13 = vld [vmem:[%s8737_s29 + $0x14c] sm:$0xf] }
  0x30   : > { %1891 = vmatpush.bf16.msra.mxu0 %v8361_v20  ;;  %v8201_v20 = vld [vmem:[%s8737_s29 + $0xa4] sm:$0xf] }
  0x31   : > { %8441 = vmatpush.bf16.msra.mxu2 %v8369_v21  ;;  %2080 = vmatpush.bf16.msra.mxu1 %v8369_v21  ;;  %v6989_v21 = vld [vmem:[%s8737_s29 + $0xb4] sm:$0xf0] }
  0x32   : > { %2458 = vmatpush.bf16.msra.mxu3 %v8385_v34  ;;  %v6992_v24 = vor.u32 %v8201_v20, %v6989_v21  ;;  %v7008_v34 = vor.u32 %v8208_v29, %v7007_v28  ;;  %v7089_v28 = vld [vmem:[%s8737_s29 + $0x17c] sm:$0xf0] }
  0x33   : > { %1892 = vmatmul.bf16.vlgmr.msra.gmra.mxu0 %v6908_v30  ;;  %v6975_v30 = vld [vmem:[%s8737_s29 + $0x80] sm:$0xf] }
  0x34   : > { %2251 = vmatmul.bf16.vlgmr.msra.gmra.mxu2 %v7592_v31  ;;  %2081 = vmatmul.bf16.vlgmr.msra.gmra.mxu1 %v6912_v32  ;;  %v8199_v31 = vld [vmem:[%s8737_s29 + $0x90] sm:$0xf0]  ;;  %v8206_v32 = vld [vmem:[%s8737_s29 + $0xcc] sm:$0xf] }
  0x35   : > { %2262 = vmatpush.bf16.msrb.mxu2 %v8384_v26  ;;  %2459 = vmatmul.bf16.vlgmr.msra.gmra.mxu3 %v6920_v38  ;;  %v6997_v26 = vld [vmem:[%s8737_s29 + $0xbc] sm:$0xf0]  ;;  %v6976_v35 = vor.u32 %v8199_v31, %v6975_v30  ;;  %v7017_v38 = vld [vmem:[%s8737_s29 + $0xe4] sm:$0xf0] }
  0x36   : > { %v7000_v27 = vor.u32 %v8202_v25, %v6997_v26  ;;  %v8219_v25 = vld [vmem:[%s8737_s29 + $0x130] sm:$0xf0] }
  0x39   : > { %2263 = vmatpush.bf16.msrb.mxu2 %v8383_v33  ;;  %v7009_v33 = vld [vmem:[%s8737_s29 + $0xdc] sm:$0xf0] }
  0x3a   : > { %v7012_v36 = vor.u32 %v8206_v32, %v7009_v33 }
  0x3d   : > { %2264 = vmatpush.bf16.msrb.mxu2 %v8382_v37  ;;  %v8207_v37 = vld [vmem:[%s8737_s29 + $0xd4] sm:$0xf] }
  0x41   : > { %2265 = vmatpush.bf16.msrb.mxu2 %v8381_v39  ;;  %v7020_v39 = vor.u32 %v8207_v37, %v7017_v38  ;;  %v7097_v38 = vld [vmem:[%s8737_s29 + $0x184] sm:$0xf0] }
  0x43   : > { %1897 = vmatmul.bf16.gmra.mxu0 %v6928_v47  ;;  %v6996_v47 = vor.u32 %v8204_v43, %v6995_v42 }
  0x44   : > { %2256 = vmatmul.bf16.gmra.mxu2 %v7612_v48  ;;  %2086 = vmatmul.bf16.gmra.mxu1 %v6932_v49  ;;  %v8212_v49 = vld [vmem:[%s8737_s29 + $0xfc] sm:$0xf] }
  0x45   : > { %2266 = vmatpush.bf16.msrb.mxu2 %v8380_v44  ;;  %2464 = vmatmul.bf16.gmra.mxu3 %v6940_v54  ;;  %v8211_v44 = vld [vmem:[%s8737_s29 + $0xf4] sm:$0xf]  ;;  %v7015_v54 = vld [vmem:[%s8737_s29 + $0xd0] sm:$0xf] }
  0x46   : > { %v7032_v48 = vor.u32 %v8211_v44, %v7029_v45 }
  0x49   : > { %2267 = vmatpush.bf16.msrb.mxu2 %v8379_v50  ;;  %v7037_v50 = vld [vmem:[%s8737_s29 + $0x10c] sm:$0xf0] }
  0x4a   : > { %v7040_v51 = vor.u32 %v8212_v49, %v7037_v50  ;;  %v8224_v49 = vld [vmem:[%s8737_s29 + $0x158] sm:$0xf0] }
  0x4d   : > { %2268 = vmatpush.bf16.msrb.mxu2 %v8378_v53  ;;  %v8218_v53 = vld [vmem:[%s8737_s29 + $0x128] sm:$0xf0] }
  0x4e   : > { %v7048_v58 = vor.u32 %v8218_v53, %v7047_v52  ;;  %v7109_v52 = vld [vmem:[%s8737_s29 + $0x1a4] sm:$0xf0] }
  0x51   : > { %2269 = vmatpush.bf16.msrb.mxu2 %v8377_v55  ;;  %v8209_v55 = vld [vmem:[%s8737_s29 + $0xe0] sm:$0xf0] }
  0x52   : > { %v7016_v59 = vor.u32 %v8209_v55, %v7015_v54 }
  0x53   : > { %1902 = vmatmul.bf16.gmra.mxu0 %v6948_v62  ;;  %v7057_v62 = vld [vmem:[%s8737_s29 + $0x134] sm:$0xf0] }
  0x54   : > { %2270 = vmatmul.bf16.vlgmr.msrb.gmra.mxu2 %v6916_v63  ;;  %2091 = vmatmul.bf16.gmra.mxu1 %v6952_v0  ;;  %v7060_v63 = vor.u32 %v8217_v61, %v7057_v62  ;;  %v7067_v0 = vld [vmem:[%s8737_s29 + $0x140] sm:$0xf]  ;;  %v7117_v62 = vld [vmem:[%s8737_s29 + $0x1ac] sm:$0xf0] }
  0x55   : > { %2469 = vmatmul.bf16.gmra.mxu3 %v6960_v3  ;;  %v8214_v3 = vld [vmem:[%s8737_s29 + $0x108] sm:$0xf0]  ;;  %v7068_v7 = vor.u32 %v8223_v1, %v7067_v0 }
  0x56   : > { %v7036_v8 = vor.u32 %v8214_v3, %v7035_v2 }
  0x63   : > { %1907 = vmatmul.bf16.gmra.mxu0 %v6968_v10  ;;  %v7072_v10 = vor.u32 %v8221_v5, %v7069_v6 }
  0x64   : > { %2275 = vmatmul.bf16.gmra.mxu2 %v6936_v11  ;;  %2096 = vmatmul.bf16.gmra.mxu1 %v6972_v12 }
  0x65   : > { %2474 = vmatmul.bf16.gmra.mxu3 %v6980_v15  ;;  %v7077_v15 = vld [vmem:[%s8737_s29 + $0x15c] sm:$0xf0] }
  0x66   : > { %v7080_v16 = vor.u32 %v8222_v13, %v7077_v15  ;;  %v8236_v15 = vld [vmem:[%s8737_s29 + $0x1bc] sm:$0xf] }
  0x73   : > { %1912 = vmatmul.bf16.gmra.mxu0 %v6988_v22  ;;  %v7087_v22 = vld [vmem:[%s8737_s29 + $0x168] sm:$0xf] }
  0x74   : > { %2280 = vmatmul.bf16.gmra.mxu2 %v6956_v23  ;;  %2101 = vmatmul.bf16.gmra.mxu1 %v6992_v24  ;;  %v8228_v23 = vld [vmem:[%s8737_s29 + $0x178] sm:$0xf0]  ;;  %v7055_v24 = vld [vmem:[%s8737_s29 + $0x120] sm:$0xf] }
  0x75   : > { %2479 = vmatmul.bf16.gmra.mxu3 %v7000_v27  ;;  %v8226_v27 = vld [vmem:[%s8737_s29 + $0x16c] sm:$0xf]  ;;  %v7088_v30 = vor.u32 %v8228_v23, %v7087_v22  ;;  %v7056_v31 = vor.u32 %v8219_v25, %v7055_v24 }
  0x76   : > { %v7092_v33 = vor.u32 %v8226_v27, %v7089_v28  ;;  %v8237_v27 = vld [vmem:[%s8737_s29 + $0x1c4] sm:$0xf] }
  0x83   : > { %1917 = vmatmul.bf16.gmra.mxu0 %v7008_v34 }
  0x84   : > { %2285 = vmatmul.bf16.gmra.mxu2 %v6976_v35  ;;  %2106 = vmatmul.bf16.gmra.mxu1 %v7012_v36  ;;  %v8227_v36 = vld [vmem:[%s8737_s29 + $0x174] sm:$0xf] }
  0x85   : > { %2484 = vmatmul.bf16.gmra.mxu3 %v7020_v39  ;;  %v7100_v40 = vor.u32 %v8227_v36, %v7097_v38 }
  0x93   : > { %1922 = vmatmul.bf16.gmra.mxu0 %v7028_v46  ;;  %v7107_v46 = vld [vmem:[%s8737_s29 + $0x190] sm:$0xf] }
  0x94   : > { %2290 = vmatmul.bf16.gmra.mxu2 %v6996_v47  ;;  %2111 = vmatmul.bf16.gmra.mxu1 %v7032_v48  ;;  %v8233_v47 = vld [vmem:[%s8737_s29 + $0x1a0] sm:$0xf0]  ;;  %v7075_v48 = vld [vmem:[%s8737_s29 + $0x148] sm:$0xf] }
  0x95   : > { %2489 = vmatmul.bf16.gmra.mxu3 %v7040_v51  ;;  %v8231_v51 = vld [vmem:[%s8737_s29 + $0x194] sm:$0xf]  ;;  %v7108_v54 = vor.u32 %v8233_v47, %v7107_v46  ;;  %v7076_v55 = vor.u32 %v8224_v49, %v7075_v48  ;;  %v8241_v47 = vld [vmem:[%s8737_s29 + $0x1e4] sm:$0xf]  ;;  %v7149_v48 = vld [vmem:[%s8737_s29 + $0x1f4] sm:$0xf0] }
  0x96   : > { %v7112_v57 = vor.u32 %v8231_v51, %v7109_v52 }
  0xa3   : > { %1927 = vmatmul.bf16.gmra.mxu0 %v7048_v58 }
  0xa4   : > { %2295 = vmatmul.bf16.gmra.mxu2 %v7016_v59  ;;  %2116 = vmatmul.bf16.gmra.mxu1 %v7052_v60  ;;  %v8232_v60 = vld [vmem:[%s8737_s29 + $0x19c] sm:$0xf] }
  0xa5   : > { %2494 = vmatmul.bf16.gmra.mxu3 %v7060_v63  ;;  %v7120_v0 = vor.u32 %v8232_v60, %v7117_v62  ;;  %v7157_v60 = vld [vmem:[%s8737_s29 + $0x1fc] sm:$0xf0] }
  0xb0   : > { %v1893_v9 = vpop.f32.mrf.mxu0 }
  0xb1   : > { %v1894_v11 = vadd.f32 %v8849_v4, %v1893_v9  ;;  %v2082_v12 = vpop.f32.mrf.mxu1  ;;  %v7127_v9 = vld [vmem:[%s8737_s29 + $0x1b8] sm:$0xf] }
  0xb3   : > { %v8855_v14 = vadd.f32 %v2082_v12, %v1894_v11  ;;  %1932 = vmatmul.bf16.gmra.mxu0 %v7068_v7  ;;  %v7095_v11 = vld [vmem:[%s8737_s29 + $0x170] sm:$0xf]  ;;  %v8229_v12 = vld [vmem:[%s8737_s29 + $0x180] sm:$0xf0] }
  0xb4   : > { %2300 = vmatmul.bf16.gmra.mxu2 %v7036_v8  ;;  %2121 = vmatmul.bf16.gmra.mxu1 %v7072_v10  ;;  %v8238_v10 = vld [vmem:[%s8737_s29 + $0x1c8] sm:$0xf0] }
  0xb5   : > { %2499 = vmatmul.bf16.gmra.mxu3 %v7080_v16  ;;  %v7129_v16 = vld [vmem:[%s8737_s29 + $0x1cc] sm:$0xf0] }
  0xb6   : > { %v7132_v23 = vor.u32 %v8236_v15, %v7129_v16  ;;  %v8246_v16 = vld [vmem:[%s8737_s29 + $0x20c] sm:$0xf] }
  0xb7   : > { %v8858_v17 = vpop.f32.mrf.mxu2 }
  0xb8   : > { %15821 = vst [vmem:[#allocation5_spill] sm:$0xff] %v8858_v17  ;;  %v1895_v18 = vpop.f32.mrf.mxu0  ;;  %v2460_v26 = vpop.f32.mrf.mxu3  ;;  %v7457_v17 = vld [vmem:[%s8737_s29 + $0x454] sm:$0xf0] }
  0xb9   : > { %v1896_v19 = vadd.f32 %v8849_v4, %v1895_v18  ;;  %v2084_v20 = vpop.f32.mrf.mxu1 }
  0xbb   : > { %v8861_v21 = vadd.f32 %v2084_v20, %v1896_v19  ;;  %v7128_v19 = vor.u32 %v8238_v10, %v7127_v9  ;;  %v7096_v20 = vor.u32 %v8229_v12, %v7095_v11  ;;  %v7167_v9 = vld [vmem:[%s8737_s29 + $0x208] sm:$0xf]  ;;  %v8248_v10 = vld [vmem:[%s8737_s29 + $0x218] sm:$0xf0]  ;;  %v7135_v11 = vld [vmem:[%s8737_s29 + $0x1c0] sm:$0xf] }
  0xbc   : > { %v8239_v12 = vld [vmem:[%s8737_s29 + $0x1d0] sm:$0xf0] }
  0xbf   : > { %v8869_v29 = vpop.f32.mrf.mxu2 }
  0xc0   : > { %15822 = vst [vmem:[#allocation6_spill] sm:$0xff] %v8869_v29  ;;  %v1898_v32 = vpop.f32.mrf.mxu0  ;;  %v2462_v39 = vpop.f32.mrf.mxu3 }
  0xc1   : > { %v1899_v34 = vadd.f32 %v8849_v4, %v1898_v32  ;;  %v2087_v35 = vpop.f32.mrf.mxu1 }
  0xc3   : > { %v8873_v37 = vadd.f32 %v2087_v35, %v1899_v34  ;;  %1937 = vmatmul.bf16.gmra.mxu0 %v7088_v30  ;;  %v7137_v30 = vld [vmem:[%s8737_s29 + $0x1d4] sm:$0xf0] }
  0xc4   : > { %2305 = vmatmul.bf16.gmra.mxu2 %v7056_v31  ;;  %2126 = vmatmul.bf16.gmra.mxu1 %v7092_v33  ;;  %v7140_v31 = vor.u32 %v8237_v27, %v7137_v30  ;;  %v8247_v27 = vld [vmem:[%s8737_s29 + $0x214] sm:$0xf] }
  0xc5   : > { %2504 = vmatmul.bf16.gmra.mxu3 %v7100_v40  ;;  %v7147_v40 = vld [vmem:[%s8737_s29 + $0x1e0] sm:$0xf] }
  0xc7   : > { %v8876_v41 = vpop.f32.mrf.mxu2 }
  0xc8   : > { %15823 = vst [vmem:[#allocation7_spill] sm:$0xff] %v8876_v41  ;;  %v1900_v42 = vpop.f32.mrf.mxu0  ;;  %v2465_v50 = vpop.f32.mrf.mxu3  ;;  %v7477_v41 = vld [vmem:[%s8737_s29 + $0x47c] sm:$0xf0] }
  0xc9   : > { %v1901_v43 = vadd.f32 %v8849_v4, %v1900_v42  ;;  %v2089_v44 = vpop.f32.mrf.mxu1  ;;  %v8243_v42 = vld [vmem:[%s8737_s29 + $0x1f0] sm:$0xf0] }
  0xca   : > { %v7148_v51 = vor.u32 %v8243_v42, %v7147_v40 }
  0xcb   : > { %v8879_v45 = vadd.f32 %v2089_v44, %v1901_v43  ;;  %v7115_v43 = vld [vmem:[%s8737_s29 + $0x198] sm:$0xf]  ;;  %v8234_v44 = vld [vmem:[%s8737_s29 + $0x1a8] sm:$0xf0] }
  0xcc   : > { %v7116_v52 = vor.u32 %v8234_v44, %v7115_v43  ;;  %v7187_v43 = vld [vmem:[%s8737_s29 + $0x230] sm:$0xf]  ;;  %v8253_v44 = vld [vmem:[%s8737_s29 + $0x240] sm:$0xf0] }
  0xcf   : > { %v8887_v53 = vpop.f32.mrf.mxu2 }
  0xd0   : > { %15824 = vst [vmem:[#allocation8_spill] sm:$0xff] %v8887_v53  ;;  %v1903_v56 = vpop.f32.mrf.mxu0  ;;  %v2467_v63 = vpop.f32.mrf.mxu3 }
  0xd1   : > { %v1904_v58 = vadd.f32 %v8849_v4, %v1903_v56  ;;  %v2092_v59 = vpop.f32.mrf.mxu1 }
  0xd3   : > { %v8891_v61 = vadd.f32 %v2092_v59, %v1904_v58  ;;  %1942 = vmatmul.bf16.gmra.mxu0 %v7108_v54  ;;  %v7152_v54 = vor.u32 %v8241_v47, %v7149_v48  ;;  %v8242_v58 = vld [vmem:[%s8737_s29 + $0x1ec] sm:$0xf]  ;;  %v7155_v47 = vld [vmem:[%s8737_s29 + $0x1e8] sm:$0xf]  ;;  %v8244_v48 = vld [vmem:[%s8737_s29 + $0x1f8] sm:$0xf0] }
  0xd4   : > { %2310 = vmatmul.bf16.gmra.mxu2 %v7076_v55  ;;  %2131 = vmatmul.bf16.gmra.mxu1 %v7112_v57  ;;  %v7160_v62 = vor.u32 %v8242_v58, %v7157_v60 }
  0xd5   : > { %2509 = vmatmul.bf16.gmra.mxu3 %v7120_v0 }
  0xd7   : > { %v2271_v1 = vpop.f32.mrf.mxu2 }
  0xd8   : > { %v2272_v2 = vadd.f32 %v2271_v1, %v8855_v14  ;;  %v1905_v3 = vpop.f32.mrf.mxu0  ;;  %v2470_v13 = vpop.f32.mrf.mxu3 }
  0xd9   : > { %v1906_v5 = vadd.f32 %v8849_v4, %v1905_v3  ;;  %v2094_v7 = vpop.f32.mrf.mxu1 }
  0xda   : > { %v8896_v6 = vadd.f32 %v2460_v26, %v2272_v2 }
  0xdb   : > { %v8898_v8 = vadd.f32 %v2094_v7, %v1906_v5 }
  0xdf   : > { %v2273_v18 = vpop.f32.mrf.mxu2 }
  0xe0   : > { %v2274_v14 = vadd.f32 %v2273_v18, %v8861_v21  ;;  %v1908_v22 = vpop.f32.mrf.mxu0  ;;  %v2472_v21 = vpop.f32.mrf.mxu3  ;;  %v7169_v18 = vld [vmem:[%s8737_s29 + $0x21c] sm:$0xf0] }
  0xe1   : > { %v1909_v24 = vadd.f32 %v8849_v4, %v1908_v22  ;;  %v2097_v26 = vpop.f32.mrf.mxu1  ;;  %v7172_v22 = vor.u32 %v8246_v16, %v7169_v18  ;;  %v7207_v16 = vld [vmem:[%s8737_s29 + $0x258] sm:$0xf]  ;;  %v8258_v18 = vld [vmem:[%s8737_s29 + $0x268] sm:$0xf0] }
  0xe2   : > { %v8908_v25 = vadd.f32 %v2462_v39, %v2274_v14 }
  0xe3   : > { %v8911_v28 = vadd.f32 %v2097_v26, %v1909_v24  ;;  %1947 = vmatmul.bf16.gmra.mxu0 %v7128_v19  ;;  %v7168_v19 = vor.u32 %v8248_v10, %v7167_v9 }
  0xe4   : > { %2315 = vmatmul.bf16.gmra.mxu2 %v7096_v20  ;;  %2136 = vmatmul.bf16.gmra.mxu1 %v7132_v23  ;;  %v7136_v20 = vor.u32 %v8239_v12, %v7135_v11 }
  0xe5   : > { %2514 = vmatmul.bf16.gmra.mxu3 %v7140_v31  ;;  %v7177_v31 = vld [vmem:[%s8737_s29 + $0x224] sm:$0xf0] }
  0xe7   : > { %v2276_v32 = vpop.f32.mrf.mxu2 }
  0xe8   : > { %v2277_v33 = vadd.f32 %v2276_v32, %v8873_v37  ;;  %v1910_v34 = vpop.f32.mrf.mxu0  ;;  %v2475_v46 = vpop.f32.mrf.mxu3  ;;  %v7180_v32 = vor.u32 %v8247_v27, %v7177_v31 }
  0xe9   : > { %v1911_v35 = vadd.f32 %v8849_v4, %v1910_v34  ;;  %v2099_v38 = vpop.f32.mrf.mxu1 }
  0xea   : > { %v8916_v36 = vadd.f32 %v2465_v50, %v2277_v33 }
  0xeb   : > { %v8918_v39 = vadd.f32 %v2099_v38, %v1911_v35 }
  0xef   : > { %v2278_v49 = vpop.f32.mrf.mxu2 }
  0xf0   : > { %v2279_v37 = vadd.f32 %v2278_v49, %v8879_v45  ;;  %v1913_v50 = vpop.f32.mrf.mxu0  ;;  %v2477_v45 = vpop.f32.mrf.mxu3 }
  0xf1   : > { %v1914_v55 = vadd.f32 %v8849_v4, %v1913_v50  ;;  %v2102_v57 = vpop.f32.mrf.mxu1  ;;  %v7188_v50 = vor.u32 %v8253_v44, %v7187_v43 }
  0xf2   : > { %v8928_v56 = vadd.f32 %v2467_v63, %v2279_v37  ;;  %v8251_v37 = vld [vmem:[%s8737_s29 + $0x234] sm:$0xf] }
  0xf3   : > { %v8931_v59 = vadd.f32 %v2102_v57, %v1914_v55  ;;  %1952 = vmatmul.bf16.gmra.mxu0 %v7148_v51  ;;  %v7189_v51 = vld [vmem:[%s8737_s29 + $0x244] sm:$0xf0] }
  0xf4   : > { %2320 = vmatmul.bf16.gmra.mxu2 %v7116_v52  ;;  %2141 = vmatmul.bf16.gmra.mxu1 %v7152_v54  ;;  %v7156_v54 = vor.u32 %v8244_v48, %v7155_v47  ;;  %v7192_v55 = vor.u32 %v8251_v37, %v7189_v51 }
  0xf5   : > { %2519 = vmatmul.bf16.gmra.mxu3 %v7160_v62  ;;  %v8252_v62 = vld [vmem:[%s8737_s29 + $0x23c] sm:$0xf] }
  0xf7   : > { %v2281_v0 = vpop.f32.mrf.mxu2 }
  0xf8   : > { %v2282_v63 = vadd.f32 %v2281_v0, %v8891_v61  ;;  %v1915_v1 = vpop.f32.mrf.mxu0  ;;  %v2480_v15 = vpop.f32.mrf.mxu3 }
  0xf9   : > { %v1916_v2 = vadd.f32 %v8849_v4, %v1915_v1  ;;  %v2104_v5 = vpop.f32.mrf.mxu1 }
  0xfa   : > { %v8936_v3 = vadd.f32 %v2470_v13, %v2282_v63  ;;  %v7197_v63 = vld [vmem:[%s8737_s29 + $0x24c] sm:$0xf0] }
  0xfb   : > { %v8938_v7 = vadd.f32 %v2104_v5, %v1916_v2  ;;  %v7200_v1 = vor.u32 %v8252_v62, %v7197_v63 }
  0xff   : > { %v2283_v14 = vpop.f32.mrf.mxu2 }
 0x100   : > { %v2284_v61 = vadd.f32 %v2283_v14, %v8898_v8  ;;  %v1918_v13 = vpop.f32.mrf.mxu0  ;;  %v2482_v8 = vpop.f32.mrf.mxu3  ;;  %v7175_v14 = vld [vmem:[%s8737_s29 + $0x210] sm:$0xf] }
 0x101   : > { %v1919_v23 = vadd.f32 %v8849_v4, %v1918_v13  ;;  %v2107_v26 = vpop.f32.mrf.mxu1  ;;  %v7209_v13 = vld [vmem:[%s8737_s29 + $0x26c] sm:$0xf0] }
 0x102   : > { %v8948_v24 = vadd.f32 %v2472_v21, %v2284_v61  ;;  %v8249_v61 = vld [vmem:[%s8737_s29 + $0x220] sm:$0xf0] }
 0x103   : > { %v8951_v30 = vadd.f32 %v2107_v26, %v1919_v23  ;;  %1957 = vmatmul.bf16.gmra.mxu0 %v7168_v19  ;;  %v7208_v23 = vor.u32 %v8258_v18, %v7207_v16  ;;  %v7176_v26 = vor.u32 %v8249_v61, %v7175_v14  ;;  %v7237_v18 = vld [vmem:[%s8737_s29 + $0x29c] sm:$0xf0] }
 0x104   : > { %2325 = vmatmul.bf16.gmra.mxu2 %v7136_v20  ;;  %2146 = vmatmul.bf16.gmra.mxu1 %v7172_v22  ;;  %v8256_v20 = vld [vmem:[%s8737_s29 + $0x25c] sm:$0xf] }
 0x105   : > { %2524 = vmatmul.bf16.gmra.mxu3 %v7180_v32  ;;  %v7212_v27 = vor.u32 %v8256_v20, %v7209_v13 }
 0x107   : > { %v2286_v33 = vpop.f32.mrf.mxu2 }
 0x108   : > { %v2287_v21 = vadd.f32 %v2286_v33, %v8911_v28  ;;  %v1920_v34 = vpop.f32.mrf.mxu0  ;;  %v2485_v49 = vpop.f32.mrf.mxu3 }
 0x109   : > { %v1921_v35 = vadd.f32 %v8849_v4, %v1920_v34  ;;  %v2109_v40 = vpop.f32.mrf.mxu1 }
 0x10a   : > { %v8956_v38 = vadd.f32 %v2475_v46, %v2287_v21  ;;  %v8257_v21 = vld [vmem:[%s8737_s29 + $0x264] sm:$0xf] }
 0x10b   : > { %v8958_v42 = vadd.f32 %v2109_v40, %v1921_v35  ;;  %v7217_v35 = vld [vmem:[%s8737_s29 + $0x274] sm:$0xf0] }
 0x10f   : > { %v2288_v52 = vpop.f32.mrf.mxu2 }
 0x110   : > { %v2289_v28 = vadd.f32 %v2288_v52, %v8918_v39  ;;  %v1923_v46 = vpop.f32.mrf.mxu0  ;;  %v2487_v39 = vpop.f32.mrf.mxu3 }
 0x111   : > { %v1924_v57 = vadd.f32 %v8849_v4, %v1923_v46  ;;  %v2112_v60 = vpop.f32.mrf.mxu1  ;;  %v8254_v46 = vld [vmem:[%s8737_s29 + $0x248] sm:$0xf0] }
 0x112   : > { %v8968_v58 = vadd.f32 %v2477_v45, %v2289_v28  ;;  %v7227_v28 = vld [vmem:[%s8737_s29 + $0x280] sm:$0xf] }
 0x113   : > { %v8971_v0 = vadd.f32 %v2112_v60, %v1924_v57  ;;  %1962 = vmatmul.bf16.gmra.mxu0 %v7188_v50  ;;  %v8263_v50 = vld [vmem:[%s8737_s29 + $0x290] sm:$0xf0]  ;;  %v8261_v57 = vld [vmem:[%s8737_s29 + $0x284] sm:$0xf]  ;;  %v7229_v60 = vld [vmem:[%s8737_s29 + $0x294] sm:$0xf0] }
 0x114   : > { %2330 = vmatmul.bf16.gmra.mxu2 %v7156_v54  ;;  %2151 = vmatmul.bf16.gmra.mxu1 %v7192_v55  ;;  %v7195_v54 = vld [vmem:[%s8737_s29 + $0x238] sm:$0xf]  ;;  %v7228_v63 = vor.u32 %v8263_v50, %v7227_v28  ;;  %v8267_v28 = vld [vmem:[%s8737_s29 + $0x2b4] sm:$0xf] }
 0x115   : > { %2529 = vmatmul.bf16.gmra.mxu3 %v7200_v1  ;;  %v7196_v1 = vor.u32 %v8254_v46, %v7195_v54  ;;  %v7257_v54 = vld [vmem:[%s8737_s29 + $0x2c4] sm:$0xf0] }
 0x116   : > { %v7260_v46 = vor.u32 %v8267_v28, %v7257_v54  ;;  %v7255_v28 = vld [vmem:[%s8737_s29 + $0x2b0] sm:$0xf]  ;;  %v8269_v54 = vld [vmem:[%s8737_s29 + $0x2c0] sm:$0xf0] }
 0x117   : > { %v2291_v2 = vpop.f32.mrf.mxu2 }
 0x118   : > { %v2292_v45 = vadd.f32 %v2291_v2, %v8931_v59  ;;  %v1925_v5 = vpop.f32.mrf.mxu0  ;;  %v2490_v19 = vpop.f32.mrf.mxu3  ;;  %v7232_v2 = vor.u32 %v8261_v57, %v7229_v60 }
 0x119   : > { %v1926_v9 = vadd.f32 %v8849_v4, %v1925_v5  ;;  %v2114_v11 = vpop.f32.mrf.mxu1 }
 0x11a   : > { %v8976_v10 = vadd.f32 %v2480_v15, %v2292_v45 }
 0x11b   : > { %v8978_v12 = vadd.f32 %v2114_v11, %v1926_v9  ;;  %v8262_v11 = vld [vmem:[%s8737_s29 + $0x28c] sm:$0xf] }
 0x11c   : > { %v7240_v14 = vor.u32 %v8262_v11, %v7237_v18  ;;  %v8271_v18 = vld [vmem:[%s8737_s29 + $0x2d4] sm:$0xf] }
 0x11f   : > { %v2293_v22 = vpop.f32.mrf.mxu2 }
 0x120   : > { %v2294_v59 = vadd.f32 %v2293_v22, %v8938_v7  ;;  %v1928_v15 = vpop.f32.mrf.mxu0  ;;  %v8396_v7 = vld [vmem:[%s15275_s1 + $0x118] sm:$0xff]  ;;  %v2492_v40 = vpop.f32.mrf.mxu3 }
 0x121   : > { %v1929_v31 = vadd.f32 %v8849_v4, %v1928_v15  ;;  %v2117_v33 = vpop.f32.mrf.mxu1  ;;  %2644 = vmatpush.bf16.msrb.mxu0 %v8396_v7  ;;  %v8268_v15 = vld [vmem:[%s8737_s29 + $0x2b8] sm:$0xf0]  ;;  %v7249_v7 = vld [vmem:[%s8737_s29 + $0x2bc] sm:$0xf0] }
 0x122   : > { %v8988_v32 = vadd.f32 %v2482_v8, %v2294_v59  ;;  %v7220_v8 = vor.u32 %v8257_v21, %v7217_v35  ;;  %v8266_v21 = vld [vmem:[%s8737_s29 + $0x2ac] sm:$0xf] }
 0x123   : > { %v8991_v34 = vadd.f32 %v2117_v33, %v1929_v31  ;;  %1967 = vmatmul.bf16.gmra.mxu0 %v7208_v23  ;;  %v8259_v31 = vld [vmem:[%s8737_s29 + $0x270] sm:$0xf0] }
 0x124   : > { %2335 = vmatmul.bf16.gmra.mxu2 %v7176_v26  ;;  %2156 = vmatmul.bf16.gmra.mxu1 %v7212_v27  ;;  %v7247_v26 = vld [vmem:[%s8737_s29 + $0x2a8] sm:$0xf]  ;;  %v7215_v27 = vld [vmem:[%s8737_s29 + $0x260] sm:$0xf] }
 0x125   : > { %2534 = vmatmul.bf16.gmra.mxu3 %v7220_v8  ;;  %v7248_v8 = vor.u32 %v8268_v15, %v7247_v26 }
 0x127   : > { %v2296_v43 = vpop.f32.mrf.mxu2 }
 0x128   : > { %v2297_v44 = vadd.f32 %v2296_v43, %v8951_v30  ;;  %v1930_v47 = vpop.f32.mrf.mxu0  ;;  %v2495_v55 = vpop.f32.mrf.mxu3  ;;  %v7216_v43 = vor.u32 %v8259_v31, %v7215_v27  ;;  %v8272_v27 = vld [vmem:[%s8737_s29 + $0x2dc] sm:$0xf] }
 0x129   : > { %v1931_v48 = vadd.f32 %v8849_v4, %v1930_v47  ;;  %v2119_v51 = vpop.f32.mrf.mxu1 }
 0x12a   : > { %v8999_v37 = vadd.f32 %v2485_v49, %v2297_v44  ;;  %v7252_v44 = vor.u32 %v8266_v21, %v7249_v7  ;;  %v7277_v21 = vld [vmem:[%s8737_s29 + $0x2ec] sm:$0xf0] }
 0x12b   : > { %v9001_v52 = vadd.f32 %v2119_v51, %v1931_v48  ;;  %v7280_v7 = vor.u32 %v8272_v27, %v7277_v21  ;;  %v7307_v27 = vld [vmem:[%s8737_s29 + $0x320] sm:$0xf]  ;;  %v8283_v21 = vld [vmem:[%s8737_s29 + $0x330] sm:$0xf0] }
 0x12f   : > { %v2298_v62 = vpop.f32.mrf.mxu2 }
 0x130   : > { %v2299_v30 = vadd.f32 %v2298_v62, %v8958_v42  ;;  %v1933_v49 = vpop.f32.mrf.mxu0  ;;  %v2497_v42 = vpop.f32.mrf.mxu3 }
 0x131   : > { %v1934_v45 = vadd.f32 %v8849_v4, %v1933_v49  ;;  %v2122_v9 = vpop.f32.mrf.mxu1  ;;  %v7267_v49 = vld [vmem:[%s8737_s29 + $0x2d0] sm:$0xf] }
 0x132   : > { %v9011_v5 = vadd.f32 %v2487_v39, %v2299_v30 }
 0x133   : > { %v9014_v16 = vadd.f32 %v2122_v9, %v1934_v45  ;;  %1972 = vmatmul.bf16.gmra.mxu0 %v7228_v63  ;;  %v7235_v45 = vld [vmem:[%s8737_s29 + $0x288] sm:$0xf]  ;;  %v8264_v9 = vld [vmem:[%s8737_s29 + $0x298] sm:$0xf0] }
 0x134   : > { %2340 = vmatmul.bf16.gmra.mxu2 %v7196_v1  ;;  %2161 = vmatmul.bf16.gmra.mxu1 %v7232_v2  ;;  %v8273_v2 = vld [vmem:[%s8737_s29 + $0x2e0] sm:$0xf0] }
 0x135   : > { %2539 = vmatmul.bf16.gmra.mxu3 %v7240_v14  ;;  %v7269_v14 = vld [vmem:[%s8737_s29 + $0x2e4] sm:$0xf0] }
 0x137   : > { %v2301_v61 = vpop.f32.mrf.mxu2 }
 0x138   : > { %v2302_v39 = vadd.f32 %v2301_v61, %v8971_v0  ;;  %v1935_v20 = vpop.f32.mrf.mxu0  ;;  %v2500_v33 = vpop.f32.mrf.mxu3 }
 0x139   : > { %v1936_v13 = vadd.f32 %v8849_v4, %v1935_v20  ;;  %v2124_v59 = vpop.f32.mrf.mxu1  ;;  %v7236_v20 = vor.u32 %v8264_v9, %v7235_v45 }
 0x13a   : > { %v9019_v22 = vadd.f32 %v2490_v19, %v2302_v39  ;;  %v7268_v39 = vor.u32 %v8273_v2, %v7267_v49 }
 0x13b   : > { %v9021_v23 = vadd.f32 %v2124_v59, %v1936_v13  ;;  %v7272_v13 = vor.u32 %v8271_v18, %v7269_v14  ;;  %v8277_v18 = vld [vmem:[%s8737_s29 + $0x304] sm:$0xf] }
 0x13f   : > { %v2303_v35 = vpop.f32.mrf.mxu2 }
 0x140   : > { %v2304_v0 = vadd.f32 %v2303_v35, %v8978_v12  ;;  %v1938_v19 = vpop.f32.mrf.mxu0  ;;  %v2502_v12 = vpop.f32.mrf.mxu3 }
 0x141   : > { %v1939_v47 = vadd.f32 %v8849_v4, %v1938_v19  ;;  %v2127_v51 = vpop.f32.mrf.mxu1 }
 0x142   : > { %v9031_v48 = vadd.f32 %v2492_v40, %v2304_v0 }
 0x143   : > { %v9034_v50 = vadd.f32 %v2127_v51, %v1939_v47  ;;  %1977 = vmatmul.bf16.gmra.mxu0 %v7248_v8  ;;  %v7287_v47 = vld [vmem:[%s8737_s29 + $0x2f8] sm:$0xf]  ;;  %v8278_v51 = vld [vmem:[%s8737_s29 + $0x308] sm:$0xf0] }
 0x144   : > { %2345 = vmatmul.bf16.gmra.mxu2 %v7216_v43  ;;  %2166 = vmatmul.bf16.gmra.mxu1 %v7252_v44 }
 0x145   : > { %2544 = vmatmul.bf16.gmra.mxu3 %v7260_v46 }
 0x147   : > { %v2306_v57 = vpop.f32.mrf.mxu2 }
 0x148   : > { %v2307_v40 = vadd.f32 %v2306_v57, %v8991_v34  ;;  %v1940_v60 = vpop.f32.mrf.mxu0  ;;  %v2505_v11 = vpop.f32.mrf.mxu3  ;;  %v8276_v57 = vld [vmem:[%s8737_s29 + $0x2fc] sm:$0xf] }
 0x149   : > { %v1941_v62 = vadd.f32 %v8849_v4, %v1940_v60  ;;  %v2129_v63 = vpop.f32.mrf.mxu1 }
 0x14a   : > { %v9039_v30 = vadd.f32 %v2495_v55, %v2307_v40  ;;  %v7289_v40 = vld [vmem:[%s8737_s29 + $0x30c] sm:$0xf0] }
 0x14b   : > { %v9041_v1 = vadd.f32 %v2129_v63, %v1941_v62  ;;  %v7288_v62 = vor.u32 %v8278_v51, %v7287_v47  ;;  %v7256_v63 = vor.u32 %v8269_v54, %v7255_v28  ;;  %v7292_v49 = vor.u32 %v8276_v57, %v7289_v40 }
 0x14c   : > { %v7308_v47 = vor.u32 %v8283_v21, %v7307_v27  ;;  %v7329_v27 = vld [vmem:[%s8737_s29 + $0x35c] sm:$0xf0] }
 0x14f   : > { %v2308_v61 = vpop.f32.mrf.mxu2 }
 0x150   : > { %v2309_v34 = vadd.f32 %v2308_v61, %v9001_v52  ;;  %v1943_v55 = vpop.f32.mrf.mxu0  ;;  %v2507_v52 = vpop.f32.mrf.mxu3  ;;  %v7297_v61 = vld [vmem:[%s8737_s29 + $0x314] sm:$0xf0] }
 0x151   : > { %v1944_v59 = vadd.f32 %v8849_v4, %v1943_v55  ;;  %v2132_v15 = vpop.f32.mrf.mxu1 }
 0x152   : > { %v9051_v26 = vadd.f32 %v2497_v42, %v2309_v34  ;;  %v7300_v34 = vor.u32 %v8277_v18, %v7297_v61 }
 0x153   : > { %v9054_v31 = vadd.f32 %v2132_v15, %v1944_v59  ;;  %1982 = vmatmul.bf16.gmra.mxu0 %v7268_v39 }
 0x154   : > { %2350 = vmatmul.bf16.gmra.mxu2 %v7236_v20  ;;  %2171 = vmatmul.bf16.gmra.mxu1 %v7272_v13 }
 0x155   : > { %2549 = vmatmul.bf16.gmra.mxu3 %v7280_v7  ;;  %v7275_v7 = vld [vmem:[%s8737_s29 + $0x2d8] sm:$0xf] }
 0x157   : > { %v2311_v35 = vpop.f32.mrf.mxu2 }
 0x158   : > { %v2312_v42 = vadd.f32 %v2311_v35, %v9014_v16  ;;  %v1945_v0 = vpop.f32.mrf.mxu0  ;;  %v2510_v46 = vpop.f32.mrf.mxu3  ;;  %v8274_v35 = vld [vmem:[%s8737_s29 + $0x2e8] sm:$0xf0] }
 0x159   : > { %v1946_v8 = vadd.f32 %v8849_v4, %v1945_v0  ;;  %v2134_v19 = vpop.f32.mrf.mxu1  ;;  %v8281_v0 = vld [vmem:[%s8737_s29 + $0x324] sm:$0xf]  ;;  %v7276_v51 = vor.u32 %v8274_v35, %v7275_v7 }
 0x15a   : > { %v9059_v43 = vadd.f32 %v2500_v33, %v2312_v42 }
 0x15b   : > { %v9061_v44 = vadd.f32 %v2134_v19, %v1946_v8  ;;  %v7309_v8 = vld [vmem:[%s8737_s29 + $0x334] sm:$0xf0] }
 0x15c   : > { %v7312_v28 = vor.u32 %v8281_v0, %v7309_v8 }
 0x15f   : > { %v2313_v60 = vpop.f32.mrf.mxu2 }
 0x160   : > { %v2314_v16 = vadd.f32 %v2313_v60, %v9021_v23  ;;  %v1948_v33 = vpop.f32.mrf.mxu0  ;;  %v2512_v23 = vpop.f32.mrf.mxu3  ;;  %v8282_v60 = vld [vmem:[%s8737_s29 + $0x32c] sm:$0xf] }
 0x161   : > { %v1949_v2 = vadd.f32 %v8849_v4, %v1948_v33  ;;  %v2137_v9 = vpop.f32.mrf.mxu1 }
 0x162   : > { %v9071_v45 = vadd.f32 %v2502_v12, %v2314_v16 }
 0x163   : > { %v9074_v14 = vadd.f32 %v2137_v9, %v1949_v2  ;;  %1987 = vmatmul.bf16.gmra.mxu0 %v7288_v62  ;;  %v7317_v62 = vld [vmem:[%s8737_s29 + $0x33c] sm:$0xf0] }
 0x164   : > { %2355 = vmatmul.bf16.gmra.mxu2 %v7256_v63  ;;  %2176 = vmatmul.bf16.gmra.mxu1 %v7292_v49  ;;  %v7320_v63 = vor.u32 %v8282_v60, %v7317_v62 }
 0x165   : > { %2554 = vmatmul.bf16.gmra.mxu3 %v7300_v34  ;;  %v7327_v34 = vld [vmem:[%s8737_s29 + $0x348] sm:$0xf] }
 0x167   : > { %v2316_v39 = vpop.f32.mrf.mxu2 }
 0x168   : > { %v2317_v12 = vadd.f32 %v2316_v39, %v9034_v50  ;;  %v1950_v20 = vpop.f32.mrf.mxu0  ;;  %v2515_v42 = vpop.f32.mrf.mxu3  ;;  %v8288_v39 = vld [vmem:[%s8737_s29 + $0x358] sm:$0xf0] }
 0x169   : > { %v1951_v55 = vadd.f32 %v8849_v4, %v1950_v20  ;;  %v2139_v59 = vpop.f32.mrf.mxu1  ;;  %v8279_v20 = vld [vmem:[%s8737_s29 + $0x310] sm:$0xf0]  ;;  %v7328_v7 = vor.u32 %v8288_v39, %v7327_v34 }
 0x16a   : > { %v9079_v13 = vadd.f32 %v2505_v11, %v2317_v12  ;;  %v7295_v12 = vld [vmem:[%s8737_s29 + $0x300] sm:$0xf]  ;;  %v8291_v39 = vld [vmem:[%s8737_s29 + $0x374] sm:$0xf] }
 0x16b   : > { %v9081_v15 = vadd.f32 %v2139_v59, %v1951_v55  ;;  %v8286_v59 = vld [vmem:[%s8737_s29 + $0x34c] sm:$0xf]  ;;  %v7296_v35 = vor.u32 %v8279_v20, %v7295_v12  ;;  %v7349_v12 = vld [vmem:[%s8737_s29 + $0x384] sm:$0xf0] }
 0x16c   : > { %v7332_v0 = vor.u32 %v8286_v59, %v7329_v27 }
 0x16f   : > { %v2318_v19 = vpop.f32.mrf.mxu2 }
 0x170   : > { %v2319_v50 = vadd.f32 %v2318_v19, %v9041_v1  ;;  %v1953_v11 = vpop.f32.mrf.mxu0  ;;  %v2517_v1 = vpop.f32.mrf.mxu3 }
 0x171   : > { %v1954_v54 = vadd.f32 %v8849_v4, %v1953_v11  ;;  %v2142_v40 = vpop.f32.mrf.mxu1  ;;  %v7337_v11 = vld [vmem:[%s8737_s29 + $0x364] sm:$0xf0] }
 0x172   : > { %v9091_v57 = vadd.f32 %v2507_v52, %v2319_v50 }
 0x173   : > { %v9094_v16 = vadd.f32 %v2142_v40, %v1954_v54  ;;  %1992 = vmatmul.bf16.gmra.mxu0 %v7308_v47  ;;  %v8287_v47 = vld [vmem:[%s8737_s29 + $0x354] sm:$0xf] }
 0x174   : > { %2360 = vmatmul.bf16.gmra.mxu2 %v7276_v51  ;;  %2181 = vmatmul.bf16.gmra.mxu1 %v7312_v28  ;;  %v7340_v28 = vor.u32 %v8287_v47, %v7337_v11 }
 0x175   : > { %2559 = vmatmul.bf16.gmra.mxu3 %v7320_v63 }
 0x177   : > { %v2321_v33 = vpop.f32.mrf.mxu2 }
 0x178   : > { %v2322_v52 = vadd.f32 %v2321_v33, %v9054_v31  ;;  %v1955_v49 = vpop.f32.mrf.mxu0  ;;  %v2520_v55 = vpop.f32.mrf.mxu3 }
 0x179   : > { %v1956_v2 = vadd.f32 %v8849_v4, %v1955_v49  ;;  %v2144_v18 = vpop.f32.mrf.mxu1  ;;  %v8293_v49 = vld [vmem:[%s8737_s29 + $0x380] sm:$0xf0] }
 0x17a   : > { %v9099_v9 = vadd.f32 %v2510_v46, %v2322_v52  ;;  %v7347_v52 = vld [vmem:[%s8737_s29 + $0x370] sm:$0xf] }
 0x17b   : > { %v9101_v61 = vadd.f32 %v2144_v18, %v1956_v2  ;;  %v7315_v2 = vld [vmem:[%s8737_s29 + $0x328] sm:$0xf]  ;;  %v8284_v18 = vld [vmem:[%s8737_s29 + $0x338] sm:$0xf0]  ;;  %v7348_v59 = vor.u32 %v8293_v49, %v7347_v52  ;;  %v7335_v52 = vld [vmem:[%s8737_s29 + $0x350] sm:$0xf] }
 0x17c   : > { %v7316_v27 = vor.u32 %v8284_v18, %v7315_v2  ;;  %v8289_v49 = vld [vmem:[%s8737_s29 + $0x360] sm:$0xf0]  ;;  %v8296_v18 = vld [vmem:[%s8737_s29 + $0x39c] sm:$0xf] }
 0x17f   : > { %v2323_v21 = vpop.f32.mrf.mxu2 }
 0x180   : > { %v2324_v31 = vadd.f32 %v2323_v21, %v9061_v44  ;;  %v1958_v46 = vpop.f32.mrf.mxu0  ;;  %v2522_v44 = vpop.f32.mrf.mxu3  ;;  %v7352_v21 = vor.u32 %v8291_v39, %v7349_v12  ;;  %v7369_v39 = vld [vmem:[%s8737_s29 + $0x3ac] sm:$0xf0] }
 0x181   : > { %v1959_v8 = vadd.f32 %v8849_v4, %v1958_v46  ;;  %v2147_v50 = vpop.f32.mrf.mxu1  ;;  %v8292_v46 = vld [vmem:[%s8737_s29 + $0x37c] sm:$0xf] }
 0x182   : > { %v9111_v19 = vadd.f32 %v2512_v23, %v2324_v31 }
 0x183   : > { %v9114_v51 = vadd.f32 %v2147_v50, %v1959_v8  ;;  %1997 = vmatmul.bf16.gmra.mxu0 %v7328_v7  ;;  %v7357_v8 = vld [vmem:[%s8737_s29 + $0x38c] sm:$0xf0] }
 0x184   : > { %2365 = vmatmul.bf16.gmra.mxu2 %v7296_v35  ;;  %2186 = vmatmul.bf16.gmra.mxu1 %v7332_v0  ;;  %v7360_v50 = vor.u32 %v8292_v46, %v7357_v8  ;;  %v7377_v46 = vld [vmem:[%s8737_s29 + $0x3b4] sm:$0xf0] }
 0x185   : > { %2564 = vmatmul.bf16.gmra.mxu3 %v7340_v28 }
 0x187   : > { %v2326_v54 = vpop.f32.mrf.mxu2 }
 0x188   : > { %v2327_v23 = vadd.f32 %v2326_v54, %v9074_v14  ;;  %v1960_v40 = vpop.f32.mrf.mxu0  ;;  %v2525_v34 = vpop.f32.mrf.mxu3 }
 0x189   : > { %v1961_v60 = vadd.f32 %v8849_v4, %v1960_v40  ;;  %v2149_v63 = vpop.f32.mrf.mxu1 }
 0x18a   : > { %v9119_v62 = vadd.f32 %v2515_v42, %v2327_v23 }
 0x18b   : > { %v9121_v33 = vadd.f32 %v2149_v63, %v1961_v60  ;;  %v7367_v60 = vld [vmem:[%s8737_s29 + $0x398] sm:$0xf]  ;;  %v8298_v63 = vld [vmem:[%s8737_s29 + $0x3a8] sm:$0xf0] }
 0x18f   : > { %v2328_v20 = vpop.f32.mrf.mxu2 }
 0x190   : > { %v2329_v14 = vadd.f32 %v2328_v20, %v9081_v15  ;;  %v1963_v42 = vpop.f32.mrf.mxu0  ;;  %v2527_v15 = vpop.f32.mrf.mxu3  ;;  %v7368_v20 = vor.u32 %v8298_v63, %v7367_v60  ;;  %v7387_v60 = vld [vmem:[%s8737_s29 + $0x3c0] sm:$0xf]  ;;  %v8303_v63 = vld [vmem:[%s8737_s29 + $0x3d0] sm:$0xf0] }
 0x191   : > { %v1964_v31 = vadd.f32 %v8849_v4, %v1963_v42  ;;  %v2152_v35 = vpop.f32.mrf.mxu1 }
 0x192   : > { %v9131_v7 = vadd.f32 %v2517_v1, %v2329_v14  ;;  %v7336_v14 = vor.u32 %v8289_v49, %v7335_v52  ;;  %v7355_v52 = vld [vmem:[%s8737_s29 + $0x378] sm:$0xf]  ;;  %v8294_v49 = vld [vmem:[%s8737_s29 + $0x388] sm:$0xf0] }
 0x193   : > { %v9134_v0 = vadd.f32 %v2152_v35, %v1964_v31  ;;  %2002 = vmatmul.bf16.gmra.mxu0 %v7348_v59  ;;  %v7372_v59 = vor.u32 %v8296_v18, %v7369_v39  ;;  %v8297_v31 = vld [vmem:[%s8737_s29 + $0x3a4] sm:$0xf] }
 0x194   : > { %2370 = vmatmul.bf16.gmra.mxu2 %v7316_v27  ;;  %2191 = vmatmul.bf16.gmra.mxu1 %v7352_v21  ;;  %v7380_v8 = vor.u32 %v8297_v31, %v7377_v46  ;;  %v8301_v39 = vld [vmem:[%s8737_s29 + $0x3c4] sm:$0xf]  ;;  %v8302_v31 = vld [vmem:[%s8737_s29 + $0x3cc] sm:$0xf] }
 0x195   : > { %2569 = vmatmul.bf16.gmra.mxu3 %v7360_v50 }
 0x197   : > { %v2331_v47 = vpop.f32.mrf.mxu2 }
 0x198   : > { %v2332_v1 = vadd.f32 %v2331_v47, %v9094_v16  ;;  %v1965_v11 = vpop.f32.mrf.mxu0  ;;  %v2530_v2 = vpop.f32.mrf.mxu3 }
 0x199   : > { %v1966_v28 = vadd.f32 %v8849_v4, %v1965_v11  ;;  %v2154_v23 = vpop.f32.mrf.mxu1 }
 0x19a   : > { %v9139_v54 = vadd.f32 %v2520_v55, %v2332_v1 }
 0x19b   : > { %v9141_v40 = vadd.f32 %v2154_v23, %v1966_v28 }
 0x19f   : > { %v2333_v12 = vpop.f32.mrf.mxu2 }
 0x1a0   : > { %v2334_v16 = vadd.f32 %v2333_v12, %v9101_v61  ;;  %v1968_v55 = vpop.f32.mrf.mxu0  ;;  %v2532_v61 = vpop.f32.mrf.mxu3  ;;  %v7389_v12 = vld [vmem:[%s8737_s29 + $0x3d4] sm:$0xf0] }
 0x1a1   : > { %v1969_v27 = vadd.f32 %v8849_v4, %v1968_v55  ;;  %v2157_v21 = vpop.f32.mrf.mxu1  ;;  %v7392_v55 = vor.u32 %v8301_v39, %v7389_v12  ;;  %v8308_v39 = vld [vmem:[%s8737_s29 + $0x3f8] sm:$0xf0]  ;;  %v7375_v12 = vld [vmem:[%s8737_s29 + $0x3a0] sm:$0xf] }
 0x1a2   : > { %v9151_v42 = vadd.f32 %v2522_v44, %v2334_v16 }
 0x1a3   : > { %v9154_v35 = vadd.f32 %v2157_v21, %v1969_v27  ;;  %2007 = vmatmul.bf16.gmra.mxu0 %v7368_v20  ;;  %v7388_v20 = vor.u32 %v8303_v63, %v7387_v60 }
 0x1a4   : > { %15825 = vst [vmem:[#allocation9_spill] sm:$0xff] %v9151_v42  ;;  %2375 = vmatmul.bf16.gmra.mxu2 %v7336_v14  ;;  %2196 = vmatmul.bf16.gmra.mxu1 %v7372_v59  ;;  %v7356_v14 = vor.u32 %v8294_v49, %v7355_v52  ;;  %v7407_v49 = vld [vmem:[%s8737_s29 + $0x3e8] sm:$0xf]  ;;  %v7557_v42 = vld [vmem:[%s8737_s29 + $0x51c] sm:$0xf0] }
 0x1a5   : > { %2574 = vmatmul.bf16.gmra.mxu3 %v7380_v8  ;;  %v8395_v8 = vld [vmem:[%s15275_s1 + $0x110] sm:$0xff] }
 0x1a6   : > { %2645 = vmatpush.bf16.msrb.mxu0 %v8395_v8 }
 0x1a7   : > { %v2336_v50 = vpop.f32.mrf.mxu2 }
 0x1a8   : > { %v2337_v44 = vadd.f32 %v2336_v50, %v9114_v51  ;;  %v1970_v47 = vpop.f32.mrf.mxu0  ;;  %v2535_v18 = vpop.f32.mrf.mxu3 }
 0x1a9   : > { %v1971_v1 = vadd.f32 %v8849_v4, %v1970_v47  ;;  %v2159_v28 = vpop.f32.mrf.mxu1 }
 0x1aa   : > { %v9159_v11 = vadd.f32 %v2525_v34, %v2337_v44 }
 0x1ab   : > { %v9161_v23 = vadd.f32 %v2159_v28, %v1971_v1  ;;  %v9184_v1 = vld [vmem:[%s15276_s2] ss:$0 sm:$0xff] }
 0x1ac   : > { %15826 = vst [vmem:[#allocation10_spill] sm:$0xff] %v9159_v11 }
 0x1af   : > { %v2338_v16 = vpop.f32.mrf.mxu2 }
 0x1b0   : > { %v2339_v51 = vadd.f32 %v2338_v16, %v9121_v33  ;;  %v1973_v34 = vpop.f32.mrf.mxu0  ;;  %v7397_v33 = vld [vmem:[%s8737_s29 + $0x3dc] sm:$0xf0]  ;;  %v2537_v50 = vpop.f32.mrf.mxu3  ;;  %v8299_v16 = vld [vmem:[%s8737_s29 + $0x3b0] sm:$0xf0] }
 0x1b1   : > { %v1974_v59 = vadd.f32 %v8849_v4, %v1973_v34  ;;  %v2162_v21 = vpop.f32.mrf.mxu1  ;;  %v7400_v4 = vor.u32 %v8302_v31, %v7397_v33 }
 0x1b2   : > { %v9171_v27 = vadd.f32 %v2527_v15, %v2339_v51  ;;  %v8306_v51 = vld [vmem:[%s8737_s29 + $0x3ec] sm:$0xf] }
 0x1b3   : > { %v9174_v46 = vadd.f32 %v2162_v21, %v1974_v59  ;;  %2012 = vmatmul.bf16.gmra.mxu0 %v7388_v20  ;;  %v7409_v20 = vld [vmem:[%s8737_s29 + $0x3fc] sm:$0xf0]  ;;  %v7376_v59 = vor.u32 %v8299_v16, %v7375_v12 }
 0x1b4   : > { %2380 = vmatmul.bf16.gmra.mxu2 %v7356_v14  ;;  %2201 = vmatmul.bf16.gmra.mxu1 %v7392_v55  ;;  %v7408_v55 = vor.u32 %v8308_v39, %v7407_v49  ;;  %v7412_v21 = vor.u32 %v8306_v51, %v7409_v20  ;;  %v7427_v51 = vld [vmem:[%s8737_s29 + $0x410] sm:$0xf]  ;;  %v8313_v20 = vld [vmem:[%s8737_s29 + $0x420] sm:$0xf0] }
 0x1b5   : > { %2579 = vmatmul.bf16.gmra.mxu3 %v7400_v4  ;;  %v8307_v4 = vld [vmem:[%s8737_s29 + $0x3f4] sm:$0xf] }
 0x1b7   : > { %v2341_v15 = vpop.f32.mrf.mxu2 }
 0x1b8   : > { %v2342_v44 = vadd.f32 %v2341_v15, %v9134_v0  ;;  %v1975_v47 = vpop.f32.mrf.mxu0  ;;  %v2540_v0 = vpop.f32.mrf.mxu3 }
 0x1b9   : > { %v1976_v28 = vadd.f32 %v9184_v1, %v1975_v47  ;;  %v2164_v63 = vpop.f32.mrf.mxu1 }
 0x1ba   : > { %v9187_v60 = vadd.f32 %v2530_v2, %v2342_v44  ;;  %v7417_v44 = vld [vmem:[%s8737_s29 + $0x404] sm:$0xf0] }
 0x1bb   : > { %v9189_v52 = vadd.f32 %v2164_v63, %v1976_v28  ;;  %v7420_v47 = vor.u32 %v8307_v4, %v7417_v44 }
 0x1bf   : > { %v2343_v14 = vpop.f32.mrf.mxu2 }
 0x1c0   : > { %v2344_v34 = vadd.f32 %v2343_v14, %v9141_v40  ;;  %v1978_v2 = vpop.f32.mrf.mxu0  ;;  %v2542_v40 = vpop.f32.mrf.mxu3  ;;  %v7395_v14 = vld [vmem:[%s8737_s29 + $0x3c8] sm:$0xf] }
 0x1c1   : > { %v1979_v31 = vadd.f32 %v9184_v1, %v1978_v2  ;;  %v2167_v33 = vpop.f32.mrf.mxu1  ;;  %v7429_v2 = vld [vmem:[%s8737_s29 + $0x424] sm:$0xf0] }
 0x1c2   : > { %v9199_v8 = vadd.f32 %v2532_v61, %v2344_v34  ;;  %v8304_v34 = vld [vmem:[%s8737_s29 + $0x3d8] sm:$0xf0] }
 0x1c3   : > { %v9202_v15 = vadd.f32 %v2167_v33, %v1979_v31  ;;  %2017 = vmatmul.bf16.gmra.mxu0 %v7408_v55  ;;  %v7428_v31 = vor.u32 %v8313_v20, %v7427_v51  ;;  %v7396_v33 = vor.u32 %v8304_v34, %v7395_v14 }
 0x1c4   : > { %2385 = vmatmul.bf16.gmra.mxu2 %v7376_v59  ;;  %2206 = vmatmul.bf16.gmra.mxu1 %v7412_v21  ;;  %v8311_v59 = vld [vmem:[%s8737_s29 + $0x414] sm:$0xf] }
 0x1c5   : > { %2584 = vmatmul.bf16.gmra.mxu3 %v7420_v47  ;;  %v7432_v4 = vor.u32 %v8311_v59, %v7429_v2 }
 0x1c7   : > { %v2346_v28 = vpop.f32.mrf.mxu2 }
 0x1c8   : > { %v2347_v61 = vadd.f32 %v2346_v28, %v9154_v35  ;;  %v1980_v63 = vpop.f32.mrf.mxu0  ;;  %v2545_v55 = vpop.f32.mrf.mxu3 }
 0x1c9   : > { %v1981_v49 = vadd.f32 %v9184_v1, %v1980_v63  ;;  %v2169_v12 = vpop.f32.mrf.mxu1 }
 0x1ca   : > { %v9207_v39 = vadd.f32 %v2535_v18, %v2347_v61  ;;  %v8312_v61 = vld [vmem:[%s8737_s29 + $0x41c] sm:$0xf] }
 0x1cb   : > { %v9209_v16 = vadd.f32 %v2169_v12, %v1981_v49  ;;  %v7437_v49 = vld [vmem:[%s8737_s29 + $0x42c] sm:$0xf0] }
 0x1cc   : > { %v7440_v12 = vor.u32 %v8312_v61, %v7437_v49 }
 0x1cf   : > { %v2348_v21 = vpop.f32.mrf.mxu2 }
 0x1d0   : > { %v2349_v35 = vadd.f32 %v2348_v21, %v9161_v23  ;;  %v1983_v18 = vpop.f32.mrf.mxu0  ;;  %v2547_v23 = vpop.f32.mrf.mxu3  ;;  %v7447_v21 = vld [vmem:[%s8737_s29 + $0x438] sm:$0xf] }
 0x1d1   : > { %v1984_v44 = vadd.f32 %v9184_v1, %v1983_v18  ;;  %v2172_v28 = vpop.f32.mrf.mxu1 }
 0x1d2   : > { %v9219_v47 = vadd.f32 %v2537_v50, %v2349_v35  ;;  %v8318_v35 = vld [vmem:[%s8737_s29 + $0x448] sm:$0xf0] }
 0x1d3   : > { %v9222_v63 = vadd.f32 %v2172_v28, %v1984_v44  ;;  %2022 = vmatmul.bf16.gmra.mxu0 %v7428_v31  ;;  %v7415_v31 = vld [vmem:[%s8737_s29 + $0x3f0] sm:$0xf]  ;;  %v7448_v61 = vor.u32 %v8318_v35, %v7447_v21 }
 0x1d4   : > { %2390 = vmatmul.bf16.gmra.mxu2 %v7396_v33  ;;  %2211 = vmatmul.bf16.gmra.mxu1 %v7432_v4  ;;  %v8309_v33 = vld [vmem:[%s8737_s29 + $0x400] sm:$0xf0]  ;;  %v8316_v4 = vld [vmem:[%s8737_s29 + $0x43c] sm:$0xf]  ;;  %v7449_v44 = vld [vmem:[%s8737_s29 + $0x44c] sm:$0xf0] }
 0x1d5   : > { %2589 = vmatmul.bf16.gmra.mxu3 %v7440_v12  ;;  %v7416_v49 = vor.u32 %v8309_v33, %v7415_v31 }
 0x1d7   : > { %v2351_v51 = vpop.f32.mrf.mxu2 }
 0x1d8   : > { %v2352_v50 = vadd.f32 %v2351_v51, %v9174_v46  ;;  %v1985_v20 = vpop.f32.mrf.mxu0  ;;  %v2550_v18 = vpop.f32.mrf.mxu3  ;;  %v7452_v51 = vor.u32 %v8316_v4, %v7449_v44 }
 0x1d9   : > { %v1986_v14 = vadd.f32 %v9184_v1, %v1985_v20  ;;  %v2174_v59 = vpop.f32.mrf.mxu1 }
 0x1da   : > { %v9227_v34 = vadd.f32 %v2540_v0, %v2352_v50 }
 0x1db   : > { %v9229_v2 = vadd.f32 %v2174_v59, %v1986_v14  ;;  %v8317_v14 = vld [vmem:[%s8737_s29 + $0x444] sm:$0xf] }
 0x1dc   : > { %v7460_v21 = vor.u32 %v8317_v14, %v7457_v17  ;;  %v8321_v17 = vld [vmem:[%s8737_s29 + $0x464] sm:$0xf] }
 0x1df   : > { %v2353_v28 = vpop.f32.mrf.mxu2 }
 0x1e0   : > { %v2354_v46 = vadd.f32 %v2353_v28, %v9189_v52  ;;  %v1988_v0 = vpop.f32.mrf.mxu0  ;;  %v2552_v52 = vpop.f32.mrf.mxu3 }
 0x1e1   : > { %v1989_v12 = vadd.f32 %v9184_v1, %v1988_v0  ;;  %v2177_v20 = vpop.f32.mrf.mxu1  ;;  %v8314_v0 = vld [vmem:[%s8737_s29 + $0x428] sm:$0xf0] }
 0x1e2   : > { %v9239_v50 = vadd.f32 %v2542_v40, %v2354_v46  ;;  %v7467_v46 = vld [vmem:[%s8737_s29 + $0x460] sm:$0xf] }
 0x1e3   : > { %v9242_v59 = vadd.f32 %v2177_v20, %v1989_v12  ;;  %2027 = vmatmul.bf16.gmra.mxu0 %v7448_v61  ;;  %v8323_v61 = vld [vmem:[%s8737_s29 + $0x470] sm:$0xf0]  ;;  %v7469_v12 = vld [vmem:[%s8737_s29 + $0x474] sm:$0xf0] }
 0x1e4   : > { %15827 = vst [vmem:[#allocation11_spill] sm:$0xff] %v9239_v50  ;;  %2395 = vmatmul.bf16.gmra.mxu2 %v7416_v49  ;;  %2216 = vmatmul.bf16.gmra.mxu1 %v7452_v51  ;;  %v7435_v49 = vld [vmem:[%s8737_s29 + $0x418] sm:$0xf]  ;;  %v7468_v14 = vor.u32 %v8323_v61, %v7467_v46  ;;  %v8342_v50 = vld [vmem:[%s8737_s29 + $0x50c] sm:$0xf] }
 0x1e5   : > { %2594 = vmatmul.bf16.gmra.mxu3 %v7460_v21 }
 0x1e7   : > { %v2356_v35 = vpop.f32.mrf.mxu2 }
 0x1e8   : > { %v2357_v40 = vadd.f32 %v2356_v35, %v9202_v15  ;;  %v1990_v31 = vpop.f32.mrf.mxu0  ;;  %v2555_v51 = vpop.f32.mrf.mxu3  ;;  %v7436_v35 = vor.u32 %v8314_v0, %v7435_v49 }
 0x1e9   : > { %v1991_v33 = vadd.f32 %v9184_v1, %v1990_v31  ;;  %v2179_v44 = vpop.f32.mrf.mxu1 }
 0x1ea   : > { %v9247_v4 = vadd.f32 %v2545_v55, %v2357_v40  ;;  %v7472_v40 = vor.u32 %v8321_v17, %v7469_v12 }
 0x1eb   : > { %v9249_v28 = vadd.f32 %v2179_v44, %v1991_v33  ;;  %v8322_v44 = vld [vmem:[%s8737_s29 + $0x46c] sm:$0xf] }
 0x1ec   : > { %15828 = vst [vmem:[#allocation12_spill] sm:$0xff] %v9247_v4  ;;  %v7480_v46 = vor.u32 %v8322_v44, %v7477_v41  ;;  %v8326_v41 = vld [vmem:[%s8737_s29 + $0x48c] sm:$0xf] }
 0x1ef   : > { %v2358_v20 = vpop.f32.mrf.mxu2 }
 0x1f0   : > { %v2359_v15 = vadd.f32 %v2358_v20, %v9209_v16  ;;  %v1993_v55 = vpop.f32.mrf.mxu0  ;;  %v2557_v16 = vpop.f32.mrf.mxu3 }
 0x1f1   : > { %v1994_v21 = vadd.f32 %v9184_v1, %v1993_v55  ;;  %v2182_v33 = vpop.f32.mrf.mxu1  ;;  %v8319_v55 = vld [vmem:[%s8737_s29 + $0x450] sm:$0xf0] }
 0x1f2   : > { %v9259_v31 = vadd.f32 %v2547_v23, %v2359_v15  ;;  %v7487_v15 = vld [vmem:[%s8737_s29 + $0x488] sm:$0xf] }
 0x1f3   : > { %v9262_v29 = vadd.f32 %v2182_v33, %v1994_v21  ;;  %2032 = vmatmul.bf16.gmra.mxu0 %v7468_v14  ;;  %v8328_v14 = vld [vmem:[%s8737_s29 + $0x498] sm:$0xf0]  ;;  %v7489_v21 = vld [vmem:[%s8737_s29 + $0x49c] sm:$0xf0] }
 0x1f4   : > { %15829 = vst [vmem:[#allocation13_spill] sm:$0xff] %v9259_v31  ;;  %2400 = vmatmul.bf16.gmra.mxu2 %v7436_v35  ;;  %2221 = vmatmul.bf16.gmra.mxu1 %v7472_v40  ;;  %v7455_v35 = vld [vmem:[%s8737_s29 + $0x440] sm:$0xf]  ;;  %v7488_v44 = vor.u32 %v8328_v14, %v7487_v15 }
 0x1f5   : > { %2599 = vmatmul.bf16.gmra.mxu3 %v7480_v46 }
 0x1f7   : > { %v2361_v61 = vpop.f32.mrf.mxu2 }
 0x1f8   : > { %v2362_v23 = vadd.f32 %v2361_v61, %v9222_v63  ;;  %v1995_v49 = vpop.f32.mrf.mxu0  ;;  %v2560_v40 = vpop.f32.mrf.mxu3  ;;  %v7456_v61 = vor.u32 %v8319_v55, %v7455_v35 }
 0x1f9   : > { %v1996_v0 = vadd.f32 %v9184_v1, %v1995_v49  ;;  %v2184_v12 = vpop.f32.mrf.mxu1 }
 0x1fa   : > { %v9267_v17 = vadd.f32 %v2550_v18, %v2362_v23  ;;  %v7492_v23 = vor.u32 %v8326_v41, %v7489_v21 }
 0x1fb   : > { %v9269_v20 = vadd.f32 %v2184_v12, %v1996_v0  ;;  %v8327_v12 = vld [vmem:[%s8737_s29 + $0x494] sm:$0xf] }
 0x1fc   : > { %15830 = vst [vmem:[#allocation14_spill] sm:$0xff] %v9267_v17  ;;  %v7497_v17 = vld [vmem:[%s8737_s29 + $0x4a4] sm:$0xf0] }
 0x1fd   : > { %v7500_v15 = vor.u32 %v8327_v12, %v7497_v17  ;;  %v8331_v17 = vld [vmem:[%s8737_s29 + $0x4b4] sm:$0xf] }
 0x1ff   : > { %v2363_v33 = vpop.f32.mrf.mxu2 }
 0x200   : > { %v2364_v63 = vadd.f32 %v2363_v33, %v9229_v2  ;;  %v1998_v18 = vpop.f32.mrf.mxu0  ;;  %v2562_v2 = vpop.f32.mrf.mxu3 }
 0x201   : > { %v1999_v46 = vadd.f32 %v9184_v1, %v1998_v18  ;;  %v2187_v0 = vpop.f32.mrf.mxu1  ;;  %v8324_v18 = vld [vmem:[%s8737_s29 + $0x478] sm:$0xf0] }
 0x202   : > { %v9279_v49 = vadd.f32 %v2552_v52, %v2364_v63  ;;  %v7507_v63 = vld [vmem:[%s8737_s29 + $0x4b0] sm:$0xf] }
 0x203   : > { %v9282_v53 = vadd.f32 %v2187_v0, %v1999_v46  ;;  %2037 = vmatmul.bf16.gmra.mxu0 %v7488_v44  ;;  %v8333_v44 = vld [vmem:[%s8737_s29 + $0x4c0] sm:$0xf0]  ;;  %v7509_v46 = vld [vmem:[%s8737_s29 + $0x4c4] sm:$0xf0] }
 0x204   : > { %15831 = vst [vmem:[#allocation15_spill] sm:$0xff] %v9279_v49  ;;  %2405 = vmatmul.bf16.gmra.mxu2 %v7456_v61  ;;  %2226 = vmatmul.bf16.gmra.mxu1 %v7492_v23  ;;  %v7475_v61 = vld [vmem:[%s8737_s29 + $0x468] sm:$0xf]  ;;  %v7508_v12 = vor.u32 %v8333_v44, %v7507_v63  ;;  %v7537_v49 = vld [vmem:[%s8737_s29 + $0x4f4] sm:$0xf0] }
 0x205   : > { %2604 = vmatmul.bf16.gmra.mxu3 %v7500_v15 }
 0x207   : > { %v2366_v14 = vpop.f32.mrf.mxu2 }
 0x208   : > { %v2367_v52 = vadd.f32 %v2366_v14, %v9242_v59  ;;  %v2000_v35 = vpop.f32.mrf.mxu0  ;;  %v2565_v23 = vpop.f32.mrf.mxu3  ;;  %v7476_v14 = vor.u32 %v8324_v18, %v7475_v61 }
 0x209   : > { %v2001_v55 = vadd.f32 %v9184_v1, %v2000_v35  ;;  %v2189_v21 = vpop.f32.mrf.mxu1 }
 0x20a   : > { %v9287_v41 = vadd.f32 %v2555_v51, %v2367_v52  ;;  %v7512_v52 = vor.u32 %v8331_v17, %v7509_v46  ;;  %v7527_v46 = vld [vmem:[%s8737_s29 + $0x4d8] sm:$0xf] }
 0x20b   : > { %v9289_v33 = vadd.f32 %v2189_v21, %v2001_v55  ;;  %v8332_v55 = vld [vmem:[%s8737_s29 + $0x4bc] sm:$0xf]  ;;  %v7517_v21 = vld [vmem:[%s8737_s29 + $0x4cc] sm:$0xf0] }
 0x20c   : > { %15832 = vst [vmem:[#allocation16_spill] sm:$0xff] %v9287_v41  ;;  %v7520_v63 = vor.u32 %v8332_v55, %v7517_v21 }
 0x20f   : > { %v2368_v0 = vpop.f32.mrf.mxu2 }
 0x210   : > { %v2369_v59 = vadd.f32 %v2368_v0, %v9249_v28  ;;  %v2003_v51 = vpop.f32.mrf.mxu0  ;;  %v2567_v28 = vpop.f32.mrf.mxu3  ;;  %v8338_v0 = vld [vmem:[%s8737_s29 + $0x4e8] sm:$0xf0] }
 0x211   : > { %v9300_v35 = vpop.f32.mrf.mxu1  ;;  %v7528_v21 = vor.u32 %v8338_v0, %v7527_v46 }
 0x212   : > { %v9298_v15 = vadd.f32 %v2557_v16, %v2369_v59  ;;  %v7495_v59 = vld [vmem:[%s8737_s29 + $0x490] sm:$0xf] }
 0x213   : > { %2042 = vmatmul.bf16.gmra.mxu0 %v7508_v12  ;;  %v8329_v12 = vld [vmem:[%s8737_s29 + $0x4a0] sm:$0xf0] }
 0x214   : > { %15833 = vst [vmem:[#allocation17_spill] sm:$0xff] %v9298_v15  ;;  %2410 = vmatmul.bf16.gmra.mxu2 %v7476_v14  ;;  %2231 = vmatmul.bf16.gmra.mxu1 %v7512_v52  ;;  %v8336_v15 = vld [vmem:[%s8737_s29 + $0x4dc] sm:$0xf]  ;;  %v7529_v52 = vld [vmem:[%s8737_s29 + $0x4ec] sm:$0xf0] }
 0x215   : > { %2609 = vmatmul.bf16.gmra.mxu3 %v7520_v63 }
 0x217   : > { %v2371_v44 = vpop.f32.mrf.mxu2 }
 0x218   : > { %v2372_v61 = vadd.f32 %v2371_v44, %v9262_v29  ;;  %v2005_v18 = vpop.f32.mrf.mxu0  ;;  %v2570_v14 = vpop.f32.mrf.mxu3  ;;  %v7496_v29 = vor.u32 %v8329_v12, %v7495_v59  ;;  %v7547_v12 = vld [vmem:[%s8737_s29 + $0x500] sm:$0xf] }
 0x219   : > { %v9307_v17 = vpop.f32.mrf.mxu1 }
 0x21a   : > { %v9305_v16 = vadd.f32 %v2560_v40, %v2372_v61  ;;  %v7532_v40 = vor.u32 %v8336_v15, %v7529_v52  ;;  %v8343_v52 = vld [vmem:[%s8737_s29 + $0x510] sm:$0xf0] }
 0x21c   : > { %15834 = vst [vmem:[#allocation18_spill] sm:$0xff] %v9305_v16  ;;  %v8337_v16 = vld [vmem:[%s8737_s29 + $0x4e4] sm:$0xf] }
 0x21f   : > { %v2373_v41 = vpop.f32.mrf.mxu2 }
 0x220   : > { %v2374_v55 = vadd.f32 %v2373_v41, %v9269_v20  ;;  %v9316_v44 = vpop.f32.mrf.mxu0  ;;  %v2572_v20 = vpop.f32.mrf.mxu3  ;;  %v7540_v41 = vor.u32 %v8337_v16, %v7537_v49 }
 0x221   : > { %v9320_v63 = vpop.f32.mrf.mxu1 }
 0x222   : > { %v9318_v61 = vadd.f32 %v2562_v2, %v2374_v55  ;;  %v7515_v55 = vld [vmem:[%s8737_s29 + $0x4b8] sm:$0xf] }
 0x223   : > { %2047 = vmatmul.bf16.gmra.mxu0 %v7528_v21  ;;  %v8334_v21 = vld [vmem:[%s8737_s29 + $0x4c8] sm:$0xf0] }
 0x224   : > { %15835 = vst [vmem:[#allocation19_spill] sm:$0xff] %v9318_v61  ;;  %2415 = vmatmul.bf16.gmra.mxu2 %v7496_v29  ;;  %2236 = vmatmul.bf16.gmra.mxu1 %v7532_v40  ;;  %v8341_v40 = vld [vmem:[%s8737_s29 + $0x504] sm:$0xf]  ;;  %v7549_v61 = vld [vmem:[%s8737_s29 + $0x514] sm:$0xf0] }
 0x225   : > { %2614 = vmatmul.bf16.gmra.mxu3 %v7540_v41 }
 0x227   : > { %v2376_v46 = vpop.f32.mrf.mxu2 }
 0x228   : > { %v2377_v15 = vadd.f32 %v2376_v46, %v9282_v53  ;;  %v9325_v0 = vpop.f32.mrf.mxu0  ;;  %v2575_v29 = vpop.f32.mrf.mxu3  ;;  %v7548_v53 = vor.u32 %v8343_v52, %v7547_v12  ;;  %v7516_v46 = vor.u32 %v8334_v21, %v7515_v55  ;;  %v2006_v52 = vadd.f32 %v9184_v1, %v2005_v18  ;;  %v7567_v21 = vld [vmem:[%s8737_s29 + $0x528] sm:$0xf] }
 0x229   : > { %v9329_v59 = vpop.f32.mrf.mxu1 }
 0x22a   : > { %v9327_v2 = vadd.f32 %v2565_v23, %v2377_v15  ;;  %v7552_v23 = vor.u32 %v8341_v40, %v7549_v61  ;;  %v2004_v15 = vadd.f32 %v9184_v1, %v2003_v51  ;;  %v8348_v40 = vld [vmem:[%s8737_s29 + $0x538] sm:$0xf0] }
 0x22b   : > { %v7568_v18 = vor.u32 %v8348_v40, %v7567_v21 }
 0x22c   : > { %15836 = vst [vmem:[#allocation20_spill] sm:$0xff] %v9327_v2  ;;  %v2193_v51 = vadd.f32 %v9300_v35, %v2004_v15 }
 0x22f   : > { %v2378_v49 = vpop.f32.mrf.mxu2 }
 0x230   : > { %v2379_v16 = vadd.f32 %v2378_v49, %v9289_v33  ;;  %v2013_v31 = vpop.f32.mrf.mxu0  ;;  %v2577_v33 = vpop.f32.mrf.mxu3  ;;  %v7535_v49 = vld [vmem:[%s8737_s29 + $0x4e0] sm:$0xf] }
 0x231   : > { %v2014_v41 = vadd.f32 %v9184_v1, %v2013_v31  ;;  %v2202_v4 = vpop.f32.mrf.mxu1  ;;  %v7560_v31 = vor.u32 %v8342_v50, %v7557_v42  ;;  %v2195_v42 = vadd.f32 %v9307_v17, %v2006_v52  ;;  %v8346_v50 = vld [vmem:[%s8737_s29 + $0x52c] sm:$0xf] }
 0x232   : > { %v9340_v2 = vadd.f32 %v2567_v28, %v2379_v16  ;;  %v8339_v16 = vld [vmem:[%s8737_s29 + $0x4f0] sm:$0xf0]  ;;  %v8394_v17 = vld [vmem:[%s15275_s1 + $0x108] sm:$0xff] }
 0x233   : > { %v9344_v11 = vadd.f32 %v2202_v4, %v2014_v41  ;;  %2052 = vmatmul.bf16.gmra.mxu0 %v7548_v53  ;;  %v7569_v53 = vld [vmem:[%s8737_s29 + $0x53c] sm:$0xf0] }
 0x234   : > { %15837 = vst [vmem:[#allocation21_spill] sm:$0xff] %v9340_v2  ;;  %2420 = vmatmul.bf16.gmra.mxu2 %v7516_v46  ;;  %2241 = vmatmul.bf16.gmra.mxu1 %v7552_v23  ;;  %v7572_v41 = vor.u32 %v8346_v50, %v7569_v53  ;;  %v7587_v53 = vld [vmem:[%s8737_s29 + $0x550] sm:$0xf] }
 0x235   : > { %2619 = vmatmul.bf16.gmra.mxu3 %v7560_v31  ;;  %2646 = vmatpush.bf16.msrb.mxu0 %v8394_v17  ;;  %v7597_v17 = vld [vmem:[%s8737_s29 + $0x56c] sm:$0xf0] }
 0x237   : > { %v2381_v28 = vpop.f32.mrf.mxu2 }
 0x238   : > { %v2382_v61 = vadd.f32 %v2381_v28, %v2193_v51  ;;  %v9347_v12 = vpop.f32.mrf.mxu0  ;;  %v9358_v35 = vpop.f32.mrf.mxu3  ;;  %v2009_v51 = vadd.f32 %v9184_v1, %v9316_v44 }
 0x239   : > { %15838 = vst [vmem:[#allocation22_spill] sm:$0xff] %v9347_v12  ;;  %v9352_v4 = vpop.f32.mrf.mxu1  ;;  %v7577_v12 = vld [vmem:[%s8737_s29 + $0x544] sm:$0xf0] }
 0x23a   : > { %v9350_v55 = vadd.f32 %v2570_v14, %v2382_v61  ;;  %15839 = vst [vmem:[#allocation23_spill] sm:$0xff] %v9352_v4  ;;  %v7536_v14 = vor.u32 %v8339_v16, %v7535_v49  ;;  %v8347_v4 = vld [vmem:[%s8737_s29 + $0x534] sm:$0xf]  ;;  %v2011_v16 = vadd.f32 %v9184_v1, %v9325_v0 }
 0x23b   : > { %v7580_v52 = vor.u32 %v8347_v4, %v7577_v12 }
 0x23c   : > { %v2200_v12 = vadd.f32 %v9329_v59, %v2011_v16  ;;  %v8352_v59 = vld [vmem:[%s8737_s29 + $0x55c] sm:$0xf] }
 0x23f   : > { %v2383_v46 = vpop.f32.mrf.mxu2 }
 0x240   : > { %v2384_v23 = vadd.f32 %v2383_v46, %v2195_v42  ;;  %v2018_v15 = vpop.f32.mrf.mxu0  ;;  %v9373_v44 = vpop.f32.mrf.mxu3  ;;  %v8353_v46 = vld [vmem:[%s8737_s29 + $0x560] sm:$0xf0] }
 0x241   : > { %v2019_v31 = vadd.f32 %v9184_v1, %v2018_v15  ;;  %v2207_v61 = vpop.f32.mrf.mxu1  ;;  %15840 = vst [vmem:[#allocation24_spill] sm:$0xff] %v9373_v44 }
 0x242   : > { %v9366_v28 = vadd.f32 %v2572_v20, %v2384_v23  ;;  %v2198_v20 = vadd.f32 %v9320_v63, %v2009_v51  ;;  %v7555_v23 = vld [vmem:[%s8737_s29 + $0x508] sm:$0xf]  ;;  %v8344_v63 = vld [vmem:[%s8737_s29 + $0x518] sm:$0xf0] }
 0x243   : > { %v2208_v2 = vadd.f32 %v2207_v61, %v2019_v31  ;;  %2057 = vmatmul.bf16.gmra.mxu0 %v7568_v18  ;;  %v7556_v15 = vor.u32 %v8344_v63, %v7555_v23  ;;  %v7575_v23 = vld [vmem:[%s8737_s29 + $0x530] sm:$0xf]  ;;  %v8349_v63 = vld [vmem:[%s8737_s29 + $0x540] sm:$0xf0] }
 0x244   : > { %2425 = vmatmul.bf16.gmra.mxu2 %v7536_v14  ;;  %2246 = vmatmul.bf16.gmra.mxu1 %v7572_v41  ;;  %v8393_v14 = vld [vmem:[%s15275_s1 + $0x100] sm:$0xff] }
 0x245   : > { %2624 = vmatmul.bf16.gmra.mxu3 %v7580_v52  ;;  %2647 = vmatpush.bf16.msrb.mxu0 %v8393_v14 }
 0x247   : > { %v2386_v21 = vpop.f32.mrf.mxu2 }
 0x248   : > { %v2387_v40 = vadd.f32 %v2386_v21, %v2198_v20  ;;  %v9376_v49 = vpop.f32.mrf.mxu0  ;;  %v2585_v18 = vpop.f32.mrf.mxu3  ;;  %v7600_v21 = vor.u32 %v8352_v59, %v7597_v17 }
 0x249   : > { %15841 = vst [vmem:[#allocation25_spill] sm:$0xff] %v9376_v49  ;;  %v9382_v50 = vpop.f32.mrf.mxu1  ;;  %v6983_v49 = vld [vmem:[%s8737_s29 + $0x88] sm:$0xf] }
 0x24a   : > { %v9380_v42 = vadd.f32 %v2575_v29, %v2387_v40  ;;  %15842 = vst [vmem:[#allocation26_spill] sm:$0xff] %v9382_v50  ;;  %v7588_v29 = vor.u32 %v8353_v46, %v7587_v53  ;;  %v8358_v46 = vld [vmem:[%s8737_s29 + $0x588] sm:$0xf0]  ;;  %v8185_v50 = vld [vmem:[%s8737_s29 + $0x20] sm:$0xf0] }
 0x24f   : > { %v2388_v4 = vpop.f32.mrf.mxu2 }
 0x250   : > { %v2389_v0 = vadd.f32 %v2388_v4, %v2200_v12  ;;  %v2023_v41 = vpop.f32.mrf.mxu0  ;;  %v9397_v52 = vpop.f32.mrf.mxu3 }
 0x251   : > { %v2024_v51 = vadd.f32 %v9184_v1, %v2023_v41  ;;  %v2212_v61 = vpop.f32.mrf.mxu1  ;;  %15843 = vst [vmem:[#allocation27_spill] sm:$0xff] %v9397_v52 }
 0x252   : > { %v9393_v31 = vadd.f32 %v2577_v33, %v2389_v0  ;;  %v7607_v33 = vld [vmem:[%s8737_s29 + $0x578] sm:$0xf]  ;;  %v7576_v0 = vor.u32 %v8349_v63, %v7575_v23 }
 0x253   : > { %v2213_v20 = vadd.f32 %v2212_v61, %v2024_v51  ;;  %2062 = vmatmul.bf16.gmra.mxu0 %v7588_v29  ;;  %v7608_v14 = vor.u32 %v8358_v46, %v7607_v33  ;;  %v8357_v51 = vld [vmem:[%s8737_s29 + $0x584] sm:$0xf]  ;;  %v7617_v61 = vld [vmem:[%s8737_s29 + $0x594] sm:$0xf0] }
 0x254   : > { %2430 = vmatmul.bf16.gmra.mxu2 %v7556_v15  ;;  %v7620_v17 = vor.u32 %v8357_v51, %v7617_v61  ;;  %v7595_v63 = vld [vmem:[%s8737_s29 + $0x558] sm:$0xf] }
 0x255   : > { %2629 = vmatmul.bf16.gmra.mxu3 %v7600_v21 }
 0x257   : > { %v9399_v40 = vpop.f32.mrf.mxu2 }
 0x258   : > { %v9401_v16 = vpop.f32.mrf.mxu0  ;;  %v2590_v4 = vpop.f32.mrf.mxu3 }
 0x259   : > { %15844 = vst [vmem:[#allocation28_spill] sm:$0xff] %v9401_v16  ;;  %v9403_v53 = vpop.f32.mrf.mxu1 }
 0x25a   : > { %15845 = vst [vmem:[#allocation29_spill] sm:$0xff] %v9403_v53 }
 0x25f   : > { %v9409_v12 = vpop.f32.mrf.mxu2 }
 0x260   : > { %15846 = vst [vmem:[#allocation30_spill] sm:$0xff] %v9409_v12  ;;  %v2028_v29 = vpop.f32.mrf.mxu0  ;;  %v9416_v33 = vpop.f32.mrf.mxu3  ;;  %v6923_v12 = vld [vmem:[%s8737_s29 + $0x10] sm:$0xf] }
 0x261   : > { %v2029_v15 = vadd.f32 %v9184_v1, %v2028_v29  ;;  %v2217_v41 = vpop.f32.mrf.mxu1  ;;  %15848 = vst [vmem:[#allocation32_spill] sm:$0xff] %v9416_v33  ;;  %v8354_v29 = vld [vmem:[%s8737_s29 + $0x568] sm:$0xf0] }
 0x263   : > { %v2218_v59 = vadd.f32 %v2217_v41, %v2029_v15  ;;  %2067 = vmatmul.bf16.gmra.mxu0 %v7608_v14  ;;  %v7596_v14 = vor.u32 %v8354_v29, %v7595_v63  ;;  %v7615_v63 = vld [vmem:[%s8737_s29 + $0x580] sm:$0xf]  ;;  %v8359_v29 = vld [vmem:[%s8737_s29 + $0x590] sm:$0xf0] }
 0x264   : > { %2435 = vmatmul.bf16.gmra.mxu2 %v7576_v0 }
 0x265   : > { %2634 = vmatmul.bf16.gmra.mxu3 %v7620_v17 }
 0x267   : > { %v2396_v21 = vpop.f32.mrf.mxu2 }
 0x268   : > { %v2397_v44 = vadd.f32 %v2396_v21, %v2208_v2  ;;  %v9414_v52 = vpop.f32.mrf.mxu0  ;;  %v6924_v2 = vor.u32 %v8185_v50, %v6923_v12  ;;  %v2595_v41 = vpop.f32.mrf.mxu3  ;;  %v6943_v50 = vld [vmem:[%s8737_s29 + $0x38] sm:$0xf]  ;;  %v8190_v12 = vld [vmem:[%s8737_s29 + $0x48] sm:$0xf0] }
 0x269   : > { %15847 = vst [vmem:[#allocation31_spill] sm:$0xff] %v9414_v52  ;;  %v9420_v23 = vpop.f32.mrf.mxu1  ;;  %v7023_v52 = vld [vmem:[%s8737_s29 + $0xd8] sm:$0xf] }
 0x26a   : > { %v9418_v46 = vadd.f32 %v2585_v18, %v2397_v44  ;;  %15849 = vst [vmem:[#allocation33_spill] sm:$0xff] %v9420_v23  ;;  %v8205_v23 = vld [vmem:[%s8737_s29 + $0xc0] sm:$0xf0] }
 0x26f   : > { %v9426_v15 = vpop.f32.mrf.mxu2 }
 0x270   : > { %15850 = vst [vmem:[#allocation34_spill] sm:$0xff] %v9426_v15  ;;  %v2033_v0 = vpop.f32.mrf.mxu0  ;;  %v9438_v15 = vpop.f32.mrf.mxu3 }
 0x271   : > { %v2034_v44 = vadd.f32 %v9184_v1, %v2033_v0  ;;  %v2222_v18 = vpop.f32.mrf.mxu1  ;;  %15852 = vst [vmem:[#allocation36_spill] sm:$0xff] %v9438_v15  ;;  %v6963_v15 = vld [vmem:[%s8737_s29 + $0x60] sm:$0xf] }
 0x273   : > { %v2223_v51 = vadd.f32 %v2222_v18, %v2034_v44  ;;  %7769 = vmatmul.msk.bf16.vlgmr.msrb.gmra.mxu0 %vm15526_vm0, %v6924_v2  ;;  %v7616_v44 = vor.u32 %v8359_v29, %v7615_v63 }
 0x274   : > { %2440 = vmatmul.bf16.gmra.mxu2 %v7596_v14  ;;  %v6944_v14 = vor.u32 %v8190_v12, %v6943_v50 }
 0x277   : > { %v2401_v61 = vpop.f32.mrf.mxu2 }
 0x278   : > { %v2402_v17 = vadd.f32 %v2401_v61, %v2213_v20  ;;  %v9430_v21 = vpop.f32.mrf.mxu0 }
 0x279   : > { %15851 = vst [vmem:[#allocation35_spill] sm:$0xff] %v9430_v21  ;;  %v9449_v53 = vpop.f32.mrf.mxu1  ;;  %v7043_v21 = vld [vmem:[%s8737_s29 + $0x100] sm:$0xf] }
 0x27a   : > { %v9432_v33 = vadd.f32 %v2590_v4, %v2402_v17  ;;  %v2600_v4 = vpop.f32.mrf.mxu3  ;;  %15855 = vst [vmem:[#allocation39_spill] sm:$0xff] %v9449_v53 }
 0x27f   : > { %v9440_v0 = vpop.f32.mrf.mxu2 }
 0x280   : > { %15853 = vst [vmem:[#allocation37_spill] sm:$0xff] %v9440_v0  ;;  %v9442_v18 = vpop.f32.mrf.mxu0  ;;  %v8195_v0 = vld [vmem:[%s8737_s29 + $0x70] sm:$0xf0] }
 0x281   : > { %15854 = vst [vmem:[#allocation38_spill] sm:$0xff] %v9442_v18  ;;  %v6964_v29 = vor.u32 %v8195_v0, %v6963_v15  ;;  %v8200_v15 = vld [vmem:[%s8737_s29 + $0x98] sm:$0xf0] }
 0x282   : > { %v9457_v12 = vpop.f32.mrf.mxu3 }
 0x283   : > { %7770 = vmatmul.msk.bf16.gmra.mxu0 %vm15526_vm0, %v6944_v14  ;;  %15857 = vst [vmem:[#allocation41_spill] sm:$0xff] %v9457_v12 }
 0x284   : > { %2445 = vmatmul.bf16.gmra.mxu2 %v7616_v44 }
 0x287   : > { %v2406_v20 = vpop.f32.mrf.mxu2 }
 0x288   : > { %v2407_v2 = vadd.f32 %v2406_v20, %v2218_v59  ;;  %v9445_v61 = vpop.f32.mrf.mxu0  ;;  %v9460_v59 = vpop.f32.mrf.mxu1 }
 0x289   : > { %15858 = vst [vmem:[#allocation42_spill] sm:$0xff] %v9460_v59  ;;  %v8210_v59 = vld [vmem:[%s8737_s29 + $0xe8] sm:$0xf0] }
 0x28a   : > { %v9447_v17 = vadd.f32 %v2595_v41, %v2407_v2  ;;  %v9466_v2 = vpop.f32.mrf.mxu3 }
 0x28b   : > { %15859 = vst [vmem:[#allocation43_spill] sm:$0xff] %v9466_v2  ;;  %v7003_v2 = vld [vmem:[%s8737_s29 + $0xb0] sm:$0xf] }
 0x28f   : > { %v9453_v63 = vpop.f32.mrf.mxu2 }
 0x290   : > { %15856 = vst [vmem:[#allocation40_spill] sm:$0xff] %v9453_v63  ;;  %v9455_v50 = vpop.f32.mrf.mxu0  ;;  %v6984_v63 = vor.u32 %v8200_v15, %v6983_v49  ;;  %v9472_v12 = vpop.f32.mrf.mxu1  ;;  %v7004_v15 = vor.u32 %v8205_v23, %v7003_v2  ;;  %v7024_v23 = vor.u32 %v8210_v59, %v7023_v52 }
 0x291   : > { %15861 = vst [vmem:[#allocation45_spill] sm:$0xff] %v9472_v12 }
 0x293   : > { %7771 = vmatmul.msk.bf16.gmra.mxu0 %vm15526_vm0, %v6964_v29 }
 0x297   : > { %v2411_v44 = vpop.f32.mrf.mxu2 }
 0x298   : > { %v2412_v41 = vadd.f32 %v2411_v44, %v2223_v51  ;;  %v9462_v14 = vpop.f32.mrf.mxu0  ;;  %v9477_v51 = vpop.f32.mrf.mxu3 }
 0x299   : > { %15862 = vst [vmem:[#allocation46_spill] sm:$0xff] %v9477_v51 }
 0x29a   : > { %v9464_v20 = vadd.f32 %v2600_v4, %v2412_v41  ;;  %v9483_v41 = vpop.f32.mrf.mxu1 }
 0x29b   : > { %15864 = vst [vmem:[#allocation48_spill] sm:$0xff] %v9483_v41  ;;  %v8215_v41 = vld [vmem:[%s8737_s29 + $0x110] sm:$0xf0] }
 0x29c   : > { %v7044_v52 = vor.u32 %v8215_v41, %v7043_v21  ;;  %v7063_v21 = vld [vmem:[%s8737_s29 + $0x128] sm:$0xf]  ;;  %v8220_v41 = vld [vmem:[%s8737_s29 + $0x138] sm:$0xf0] }
 0x29f   : > { %v9470_v0 = vpop.f32.mrf.mxu2 }
 0x2a0   : > { %15860 = vst [vmem:[#allocation44_spill] sm:$0xff] %v9470_v0  ;;  %v9474_v29 = vpop.f32.mrf.mxu0  ;;  %v9489_v49 = vpop.f32.mrf.mxu3 }
 0x2a1   : > { %15866 = vst [vmem:[#allocation50_spill] sm:$0xff] %v9489_v49 }
 0x2a3   : > { %7772 = vmatmul.msk.bf16.gmra.mxu0 %vm15526_vm0, %v6984_v63  ;;  %v9492_v63 = vpop.f32.mrf.mxu1 }
 0x2a4   : > { %15867 = vst [vmem:[#allocation51_spill] sm:$0xff] %v9492_v63 }
 0x2a7   : > { %v9479_v44 = vpop.f32.mrf.mxu2 }
 0x2a8   : > { %15863 = vst [vmem:[#allocation47_spill] sm:$0xff] %v9479_v44  ;;  %v9481_v4 = vpop.f32.mrf.mxu0  ;;  %v9498_v53 = vpop.f32.mrf.mxu3 }
 0x2a9   : > { %15870 = vst [vmem:[#allocation54_spill] sm:$0xff] %v9498_v53 }
 0x2ab   : > { %v9502_v12 = vpop.f32.mrf.mxu1 }
 0x2af   : > { %v9487_v16 = vpop.f32.mrf.mxu2 }
 0x2b0   : > { %15865 = vst [vmem:[#allocation49_spill] sm:$0xff] %v9487_v16  ;;  %v2053_v0 = vpop.f32.mrf.mxu0 }
 0x2b3   : > { %7773 = vmatmul.msk.bf16.gmra.mxu0 %vm15526_vm0, %v7004_v15  ;;  %v9508_v15 = vpop.f32.mrf.mxu3 }
 0x2b4   : > { %15873 = vst [vmem:[#allocation57_spill] sm:$0xff] %v9508_v15 }
 0x2b7   : > { %v9494_v51 = vpop.f32.mrf.mxu2 }
 0x2b8   : > { %15868 = vst [vmem:[#allocation52_spill] sm:$0xff] %v9494_v51  ;;  %v9496_v44 = vpop.f32.mrf.mxu0  ;;  %v9513_v51 = vpop.f32.mrf.mxu1 }
 0x2b9   : > { %15869 = vst [vmem:[#allocation53_spill] sm:$0xff] %v9496_v44 }
 0x2bb   : > { %v9517_v53 = vpop.f32.mrf.mxu3 }
 0x2bc   : > { %15876 = vst [vmem:[#allocation60_spill] sm:$0xff] %v9517_v53 }
 0x2bf   : > { %v9504_v16 = vpop.f32.mrf.mxu2 }
 0x2c0   : > { %15871 = vst [vmem:[#allocation55_spill] sm:$0xff] %v9504_v16  ;;  %v9506_v2 = vpop.f32.mrf.mxu0 }
 0x2c1   : > { %15872 = vst [vmem:[#allocation56_spill] sm:$0xff] %v9506_v2  ;;  %v2242_v2 = vpop.f32.mrf.mxu1 }
 0x2c3   : > { %7774 = vmatmul.msk.bf16.gmra.mxu0 %vm15526_vm0, %v7024_v23  ;;  %v2054_v23 = vadd.f32 %v9184_v1, %v2053_v0  ;;  %v2620_v18 = vpop.f32.mrf.mxu3  ;;  %v7083_v0 = vld [vmem:[%s8737_s29 + $0x150] sm:$0xf] }
 0x2c5   : > { %v2243_v15 = vadd.f32 %v2242_v2, %v2054_v23  ;;  %v8225_v2 = vld [vmem:[%s8737_s29 + $0x160] sm:$0xf0]  ;;  %v7103_v23 = vld [vmem:[%s8737_s29 + $0x178] sm:$0xf] }
 0x2c7   : > { %v9511_v49 = vpop.f32.mrf.mxu2 }
 0x2c8   : > { %15874 = vst [vmem:[#allocation58_spill] sm:$0xff] %v9511_v49  ;;  %v9515_v44 = vpop.f32.mrf.mxu0 }
 0x2c9   : > { %15875 = vst [vmem:[#allocation59_spill] sm:$0xff] %v9515_v44 }
 0x2cf   : > { %v9521_v16 = vpop.f32.mrf.mxu2 }
 0x2d0   : > { %15877 = vst [vmem:[#allocation61_spill] sm:$0xff] %v9521_v16  ;;  %v9523_v59 = vpop.f32.mrf.mxu0 }
 0x2d1   : > { %15878 = vst [vmem:[#allocation62_spill] sm:$0xff] %v9523_v59  ;;  %v7064_v59 = vor.u32 %v8220_v41, %v7063_v21 }
 0x2d3   : > { %7775 = vmatmul.msk.bf16.gmra.mxu0 %vm15526_vm0, %v7044_v52 }
 0x2d7   : > { %v2431_v44 = vpop.f32.mrf.mxu2 }
 0x2d8   : > { %v2432_v49 = vadd.f32 %v2431_v44, %v2243_v15  ;;  %v9527_v53 = vpop.f32.mrf.mxu0  ;;  %v7084_v44 = vor.u32 %v8225_v2, %v7083_v0  ;;  %v7123_v2 = vld [vmem:[%s8737_s29 + $0x1a0] sm:$0xf] }
 0x2d9   : > { %15879 = vst [vmem:[#allocation63_spill] sm:$0xff] %v9527_v53 }
 0x2da   : > { %v9529_v63 = vadd.f32 %v2620_v18, %v2432_v49 }
 0x2dc   : > { %15880 = vst [vmem:[#allocation64_spill] sm:$0xff] %v9529_v63 }
 0x2e0   : > { %v9533_v16 = vpop.f32.mrf.mxu0 }
 0x2e1   : > { %15881 = vst [vmem:[#allocation65_spill] sm:$0xff] %v9533_v16 }
 0x2e3   : > { %7776 = vmatmul.msk.bf16.gmra.mxu0 %vm15526_vm0, %v7064_v59  ;;  %v8230_v59 = vld [vmem:[%s8737_s29 + $0x188] sm:$0xf0] }
 0x2e4   : > { %v7104_v21 = vor.u32 %v8230_v59, %v7103_v23  ;;  %v7143_v59 = vld [vmem:[%s8737_s29 + $0x1c8] sm:$0xf] }
 0x2e8   : > { %v9536_v1 = vpop.f32.mrf.mxu0 }
 0x2e9   : > { %15882 = vst [vmem:[#allocation66_spill] sm:$0xff] %v9536_v1 }
 0x2f0   : > { %v2649_v15 = vpop.f32.mrf.mxu0 }
 0x2f1   : > { %v9541_v52 = vadd.f32 %v2649_v15, %v8896_v6 }
 0x2f3   : > { %7777 = vmatmul.msk.bf16.gmra.mxu0 %vm15526_vm0, %v7084_v44  ;;  %v8235_v44 = vld [vmem:[%s8737_s29 + $0x1b0] sm:$0xf0] }
 0x2f8   : > { %v2651_v18 = vpop.f32.mrf.mxu0 }
 0x2f9   : > { %v9545_v49 = vadd.f32 %v2651_v18, %v8908_v25  ;;  %v7124_v25 = vor.u32 %v8235_v44, %v7123_v2  ;;  %v7163_v44 = vld [vmem:[%s8737_s29 + $0x1f0] sm:$0xf] }
 0x300   : > { %v2654_v41 = vpop.f32.mrf.mxu0 }
 0x301   : > { %v9550_v53 = vadd.f32 %v2654_v41, %v8916_v36 }
 0x303   : > { %7778 = vmatmul.msk.bf16.gmra.mxu0 %vm15526_vm0, %v7104_v21 }
 0x308   : > { %v2656_v0 = vpop.f32.mrf.mxu0 }
 0x309   : > { %v9554_v6 = vadd.f32 %v2656_v0, %v8928_v56  ;;  %v8240_v56 = vld [vmem:[%s8737_s29 + $0x1d8] sm:$0xf0] }
 0x30a   : > { %v7144_v21 = vor.u32 %v8240_v56, %v7143_v59  ;;  %v7183_v59 = vld [vmem:[%s8737_s29 + $0x218] sm:$0xf]  ;;  %v8250_v56 = vld [vmem:[%s8737_s29 + $0x228] sm:$0xf0] }
 0x310   : > { %v2659_v15 = vpop.f32.mrf.mxu0 }
 0x311   : > { %v9559_v18 = vadd.f32 %v2659_v15, %v8936_v3 }
 0x313   : > { %7779 = vmatmul.msk.bf16.gmra.mxu0 %vm15526_vm0, %v7124_v25 }
 0x318   : > { %v2661_v23 = vpop.f32.mrf.mxu0 }
 0x319   : > { %v9563_v36 = vadd.f32 %v2661_v23, %v8948_v24  ;;  %v8245_v24 = vld [vmem:[%s8737_s29 + $0x200] sm:$0xf0] }
 0x31a   : > { %v7164_v25 = vor.u32 %v8245_v24, %v7163_v44  ;;  %v7223_v24 = vld [vmem:[%s8737_s29 + $0x268] sm:$0xf] }
 0x320   : > { %v2664_v41 = vpop.f32.mrf.mxu0 }
 0x321   : > { %v9568_v0 = vadd.f32 %v2664_v41, %v8956_v38 }
 0x323   : > { %7780 = vmatmul.msk.bf16.gmra.mxu0 %vm15526_vm0, %v7144_v21  ;;  %v7184_v21 = vor.u32 %v8250_v56, %v7183_v59 }
 0x328   : > { %v2666_v3 = vpop.f32.mrf.mxu0 }
 0x329   : > { %v9572_v2 = vadd.f32 %v2666_v3, %v8968_v58  ;;  %v7203_v58 = vld [vmem:[%s8737_s29 + $0x240] sm:$0xf]  ;;  %v8255_v3 = vld [vmem:[%s8737_s29 + $0x250] sm:$0xf0] }
 0x32a   : > { %v7204_v1 = vor.u32 %v8255_v3, %v7203_v58  ;;  %v7243_v3 = vld [vmem:[%s8737_s29 + $0x290] sm:$0xf] }
 0x330   : > { %v2669_v15 = vpop.f32.mrf.mxu0 }
 0x331   : > { %v2670_v23 = vadd.f32 %v2669_v15, %v8976_v10  ;;  %v8260_v15 = vld [vmem:[%s8737_s29 + $0x278] sm:$0xf0] }
 0x333   : > { %7781 = vmatmul.msk.bf16.gmra.mxu0 %vm15526_vm0, %v7164_v25  ;;  %v7224_v25 = vor.u32 %v8260_v15, %v7223_v24  ;;  %v8265_v24 = vld [vmem:[%s8737_s29 + $0x2a0] sm:$0xf0] }
 0x338   : > { %v2671_v38 = vpop.f32.mrf.mxu0 }
 0x340   : > { %v2674_v41 = vpop.f32.mrf.mxu0 }
 0x343   : > { %7782 = vmatmul.msk.bf16.gmra.mxu0 %vm15526_vm0, %v7184_v21 }
 0x348   : > { %v2676_v16 = vpop.f32.mrf.mxu0 }
 0x350   : > { %v2679_v44 = vpop.f32.mrf.mxu0 }
 0x353   : > { %7783 = vmatmul.msk.bf16.gmra.mxu0 %vm15526_vm0, %v7204_v1 }
 0x358   : > { %v2681_v10 = vpop.f32.mrf.mxu0 }
 0x359   : > { %v9594_v58 = vadd.f32 %v2681_v10, %v9031_v48  ;;  %v9611_v10 = vadd.f32 %v2676_v16, %v9011_v5  ;;  %v9625_v5 = vadd.f32 %v2671_v38, %v8988_v32 }
 0x35b   : > { %15885 = vst [vmem:[#allocation69_spill] sm:$0xff] %v9594_v58  ;;  %v3028_v48 = vmul.f32 %v9594_v58, %v9594_v58  ;;  %v3024_v32 = vmul.f32 %v9625_v5, %v9625_v5 }
 0x35c   : > { %15887 = vst [vmem:[#allocation71_spill] sm:$0xff] %v9611_v10 }
 0x35d   : > { %15890 = vst [vmem:[#allocation74_spill] sm:$0xff] %v9625_v5 }
 0x360   : > { %v2684_v63 = vpop.f32.mrf.mxu0 }
 0x361   : > { %v9588_v56 = vadd.f32 %v2684_v63, %v9039_v30  ;;  %v9605_v63 = vadd.f32 %v2679_v44, %v9019_v22  ;;  %v9618_v22 = vadd.f32 %v2674_v41, %v8999_v37  ;;  %v3023_v41 = vmul.f32 %v2670_v23, %v2670_v23 }
 0x363   : > { %7784 = vmatmul.msk.bf16.gmra.mxu0 %vm15526_vm0, %v7224_v25  ;;  %15883 = vst [vmem:[#allocation67_spill] sm:$0xff] %v9588_v56  ;;  %v3029_v30 = vmul.f32 %v9588_v56, %v9588_v56  ;;  %v3027_v44 = vmul.f32 %v9605_v63, %v9605_v63  ;;  %v3025_v37 = vmul.f32 %v9618_v22, %v9618_v22 }
 0x364   : > { %15886 = vst [vmem:[#allocation70_spill] sm:$0xff] %v9605_v63 }
 0x365   : > { %15889 = vst [vmem:[#allocation73_spill] sm:$0xff] %v9618_v22 }
 0x368   : > { %v2686_v59 = vpop.f32.mrf.mxu0 }
 0x369   : > { %v9591_v21 = vadd.f32 %v2686_v59, %v9051_v26  ;;  %v7244_v26 = vor.u32 %v8265_v24, %v7243_v3  ;;  %v3022_v59 = vmul.f32 %v9572_v2, %v9572_v2  ;;  %v8270_v3 = vld [vmem:[%s8737_s29 + $0x2c8] sm:$0xf0]  ;;  %v3021_v24 = vmul.f32 %v9568_v0, %v9568_v0 }
 0x36b   : > { %15884 = vst [vmem:[#allocation68_spill] sm:$0xff] %v9591_v21  ;;  %2915 = vmatpush.msrb.mxu1 %v9591_v21  ;;  %v3030_v1 = vmul.f32 %v9591_v21, %v9591_v21 }
 0x36d   : > { %2916 = vmatpush.msrb.mxu1 %v9588_v56  ;;  %3087 = vmatpush.msrb.mxu3 %v3030_v1  ;;  %v7263_v1 = vld [vmem:[%s8737_s29 + $0x2b8] sm:$0xf] }
 0x36f   : > { %2917 = vmatpush.msrb.mxu1 %v9594_v58  ;;  %3088 = vmatpush.msrb.mxu3 %v3029_v30 }
 0x370   : > { %v2689_v15 = vpop.f32.mrf.mxu0 }
 0x371   : > { %v9614_v25 = vadd.f32 %v2689_v15, %v9059_v43  ;;  %2918 = vmatpush.msrb.mxu1 %v9605_v63  ;;  %3089 = vmatpush.msrb.mxu3 %v3028_v48  ;;  %v3026_v43 = vmul.f32 %v9611_v10, %v9611_v10  ;;  %v8275_v15 = vld [vmem:[%s8737_s29 + $0x2f0] sm:$0xf0] }
 0x373   : > { %15888 = vst [vmem:[#allocation72_spill] sm:$0xff] %v9614_v25  ;;  %7785 = vmatmul.msk.bf16.gmra.mxu0 %vm15526_vm0, %v7244_v26  ;;  %2919 = vmatpush.msrb.mxu1 %v9611_v10 }
 0x374   : > { %3090 = vmatpush.msrb.mxu3 %v3027_v44 }
 0x375   : > { %2920 = vmatpush.msrb.mxu1 %v9618_v22 }
 0x376   : > { %3091 = vmatpush.msrb.mxu3 %v3026_v43 }
 0x377   : > { %2921 = vmatpush.msrb.mxu1 %v9625_v5 }
 0x378   : > { %3092 = vmatpush.msrb.mxu3 %v3025_v37  ;;  %v2691_v16 = vpop.f32.mrf.mxu0 }
 0x379   : > { %v9636_v38 = vadd.f32 %v2691_v16, %v9071_v45  ;;  %2922 = vmatpush.msrb.mxu1 %v2670_v23  ;;  %v7264_v45 = vor.u32 %v8270_v3, %v7263_v1  ;;  %v3020_v23 = vmul.f32 %v9563_v36, %v9563_v36  ;;  %v7303_v16 = vld [vmem:[%s8737_s29 + $0x308] sm:$0xf]  ;;  %v7323_v3 = vld [vmem:[%s8737_s29 + $0x330] sm:$0xf] }
 0x37a   : > { %3093 = vmatpush.msrb.mxu3 %v3024_v32 }
 0x37b   : > { %15891 = vst [vmem:[#allocation75_spill] sm:$0xff] %v9636_v38  ;;  %2923 = vmatpush.msrb.mxu1 %v9572_v2  ;;  %v3019_v2 = vmul.f32 %v9559_v18, %v9559_v18 }
 0x37c   : > { %3094 = vmatpush.msrb.mxu3 %v3023_v41 }
 0x37d   : > { %2924 = vmatpush.msrb.mxu1 %v9568_v0  ;;  %v3018_v0 = vmul.f32 %v9554_v6, %v9554_v6 }
 0x37e   : > { %3095 = vmatpush.msrb.mxu3 %v3022_v59 }
 0x37f   : > { %2925 = vmatpush.msrb.mxu1 %v9563_v36  ;;  %v3016_v36 = vmul.f32 %v9545_v49, %v9545_v49 }
 0x380   : > { %3096 = vmatpush.msrb.mxu3 %v3021_v24  ;;  %v2694_v30 = vpop.f32.mrf.mxu0 }
 0x381   : > { %v9650_v48 = vadd.f32 %v2694_v30, %v9079_v13  ;;  %2926 = vmatpush.msrb.mxu1 %v9559_v18  ;;  %v3017_v13 = vmul.f32 %v9550_v53, %v9550_v53 }
 0x382   : > { %3097 = vmatpush.msrb.mxu3 %v3020_v23  ;;  %v7343_v23 = vld [vmem:[%s8737_s29 + $0x358] sm:$0xf] }
 0x383   : > { %15892 = vst [vmem:[#allocation76_spill] sm:$0xff] %v9650_v48  ;;  %7786 = vmatmul.msk.bf16.gmra.mxu0 %vm15526_vm0, %v7264_v45  ;;  %2927 = vmatpush.msrb.mxu1 %v9554_v6  ;;  %v3015_v6 = vmul.f32 %v9541_v52, %v9541_v52 }
 0x384   : > { %3098 = vmatpush.msrb.mxu3 %v3019_v2  ;;  %v8290_v2 = vld [vmem:[%s8737_s29 + $0x368] sm:$0xf0] }
 0x385   : > { %2928 = vmatpush.msrb.mxu1 %v9550_v53  ;;  %v7283_v53 = vld [vmem:[%s8737_s29 + $0x2e0] sm:$0xf] }
 0x386   : > { %3099 = vmatpush.msrb.mxu3 %v3018_v0  ;;  %v7284_v44 = vor.u32 %v8275_v15, %v7283_v53  ;;  %v7344_v0 = vor.u32 %v8290_v2, %v7343_v23  ;;  %v7383_v15 = vld [vmem:[%s8737_s29 + $0x3a8] sm:$0xf] }
 0x387   : > { %2929 = vmatpush.msrb.mxu1 %v9545_v49 }
 0x388   : > { %3100 = vmatpush.msrb.mxu3 %v3017_v13  ;;  %v2696_v18 = vpop.f32.mrf.mxu0 }
 0x389   : > { %v9666_v26 = vadd.f32 %v2696_v18, %v9091_v57  ;;  %2930 = vmatpush.msrb.mxu1 %v9541_v52  ;;  %v8280_v52 = vld [vmem:[%s8737_s29 + $0x318] sm:$0xf0]  ;;  %v7363_v18 = vld [vmem:[%s8737_s29 + $0x380] sm:$0xf] }
 0x38a   : > { %3101 = vmatpush.msrb.mxu3 %v3016_v36  ;;  %v7304_v32 = vor.u32 %v8280_v52, %v7303_v16  ;;  %v8295_v36 = vld [vmem:[%s8737_s29 + $0x390] sm:$0xf0] }
 0x38b   : > { %15893 = vst [vmem:[#allocation77_spill] sm:$0xff] %v9666_v26 }
 0x38c   : > { %3102 = vmatpush.msrb.mxu3 %v3015_v6  ;;  %v7364_v6 = vor.u32 %v8295_v36, %v7363_v18  ;;  %v15906_v36 = vld [vmem:[#allocation12_spill] sm:$0xff] }
 0x390   : > { %v2699_v43 = vpop.f32.mrf.mxu0 }
 0x391   : > { %v9674_v37 = vadd.f32 %v2699_v43, %v9099_v9 }
 0x393   : > { %15894 = vst [vmem:[#allocation78_spill] sm:$0xff] %v9674_v37  ;;  %7787 = vmatmul.msk.bf16.gmra.mxu0 %vm15526_vm0, %v7284_v44  ;;  %v8300_v44 = vld [vmem:[%s8737_s29 + $0x3b8] sm:$0xf0] }
 0x394   : > { %v7384_v43 = vor.u32 %v8300_v44, %v7383_v15  ;;  %v7443_v44 = vld [vmem:[%s8737_s29 + $0x420] sm:$0xf] }
 0x398   : > { %v2701_v57 = vpop.f32.mrf.mxu0 }
 0x399   : > { %v9678_v49 = vadd.f32 %v2701_v57, %v9111_v19  ;;  %v8285_v19 = vld [vmem:[%s8737_s29 + $0x340] sm:$0xf0] }
 0x39a   : > { %v7324_v24 = vor.u32 %v8285_v19, %v7323_v3 }
 0x39b   : > { %15895 = vst [vmem:[#allocation79_spill] sm:$0xff] %v9678_v49 }
 0x3a0   : > { %v2704_v41 = vpop.f32.mrf.mxu0 }
 0x3a1   : > { %v9683_v59 = vadd.f32 %v2704_v41, %v9119_v62  ;;  %v7403_v41 = vld [vmem:[%s8737_s29 + $0x3d0] sm:$0xf] }
 0x3a3   : > { %15896 = vst [vmem:[#allocation80_spill] sm:$0xff] %v9683_v59  ;;  %7788 = vmatmul.msk.bf16.gmra.mxu0 %vm15526_vm0, %v7304_v32 }
 0x3a8   : > { %v2706_v9 = vpop.f32.mrf.mxu0 }
 0x3a9   : > { %v9687_v1 = vadd.f32 %v2706_v9, %v9131_v7  ;;  %v8305_v9 = vld [vmem:[%s8737_s29 + $0x3e0] sm:$0xf0] }
 0x3ab   : > { %15897 = vst [vmem:[#allocation81_spill] sm:$0xff] %v9687_v1 }
 0x3b0   : > { %v2709_v45 = vpop.f32.mrf.mxu0 }
 0x3b1   : > { %v9692_v30 = vadd.f32 %v2709_v45, %v9139_v54 }
 0x3b3   : > { %15898 = vst [vmem:[#allocation82_spill] sm:$0xff] %v9692_v30  ;;  %7789 = vmatmul.msk.bf16.gmra.mxu0 %vm15526_vm0, %v7324_v24 }
 0x3b8   : > { %v2711_v62 = vpop.f32.mrf.mxu0 }
 0x3c0   : > { %v2714_v13 = vpop.f32.mrf.mxu0 }
 0x3c3   : > { %7790 = vmatmul.msk.bf16.gmra.mxu0 %vm15526_vm0, %v7344_v0  ;;  %v15905_v0 = vld [vmem:[#allocation11_spill] sm:$0xff] }
 0x3c8   : > { %v2716_v7 = vpop.f32.mrf.mxu0 }
 0x3d0   : > { %v2719_v53 = vpop.f32.mrf.mxu0 }
 0x3d1   : > { %v9718_v19 = vadd.f32 %v2719_v53, %v9187_v60  ;;  %v15903_v60 = vld [vmem:[#allocation9_spill] sm:$0xff] }
 0x3d2   : > { %v9734_v2 = vadd.f32 %v2711_v62, %v15903_v60  ;;  %v7463_v60 = vld [vmem:[%s8737_s29 + $0x448] sm:$0xf] }
 0x3d3   : > { %7791 = vmatmul.msk.bf16.gmra.mxu0 %vm15526_vm0, %v7364_v6  ;;  %15899 = vst [vmem:[#allocation83_spill] sm:$0xff] %v9718_v19 }
 0x3d4   : > { %15904 = vst [vmem:[#allocation9_spill] sm:$0xff] %v9734_v2 }
 0x3d8   : > { %v2721_v54 = vpop.f32.mrf.mxu0 }
 0x3d9   : > { %v9714_v3 = vadd.f32 %v2721_v54, %v9199_v8  ;;  %v15901_v8 = vld [vmem:[#allocation10_spill] sm:$0xff]  ;;  %v15908_v54 = vld [vmem:[#allocation13_spill] sm:$0xff] }
 0x3da   : > { %v9729_v23 = vadd.f32 %v2714_v13, %v15901_v8  ;;  %v7423_v13 = vld [vmem:[%s8737_s29 + $0x3f8] sm:$0xf] }
 0x3dc   : > { %15902 = vst [vmem:[#allocation10_spill] sm:$0xff] %v9729_v23 }
 0x3e0   : > { %v2724_v57 = vpop.f32.mrf.mxu0 }
 0x3e1   : > { %v9708_v32 = vadd.f32 %v2724_v57, %v9207_v39  ;;  %v9722_v39 = vadd.f32 %v2716_v7, %v9171_v27  ;;  %v8310_v7 = vld [vmem:[%s8737_s29 + $0x408] sm:$0xf0] }
 0x3e2   : > { %v7424_v62 = vor.u32 %v8310_v7, %v7423_v13  ;;  %v15914_v7 = vld [vmem:[#allocation16_spill] sm:$0xff] }
 0x3e3   : > { %7792 = vmatmul.msk.bf16.gmra.mxu0 %vm15526_vm0, %v7384_v43  ;;  %15900 = vst [vmem:[#allocation84_spill] sm:$0xff] %v9722_v39  ;;  %v8315_v43 = vld [vmem:[%s8737_s29 + $0x430] sm:$0xf0] }
 0x3e4   : > { %v7444_v57 = vor.u32 %v8315_v43, %v7443_v44  ;;  %v8325_v44 = vld [vmem:[%s8737_s29 + $0x480] sm:$0xf0] }
 0x3e8   : > { %v2726_v16 = vpop.f32.mrf.mxu0 }
 0x3e9   : > { %v9705_v52 = vadd.f32 %v2726_v16, %v9219_v47  ;;  %v7404_v47 = vor.u32 %v8305_v9, %v7403_v41  ;;  %v15910_v41 = vld [vmem:[#allocation14_spill] sm:$0xff] }
 0x3eb   : > { %2935 = vmatpush.msra.mxu2 %v9705_v52 }
 0x3ed   : > { %2936 = vmatpush.msra.mxu2 %v9708_v32 }
 0x3ef   : > { %2937 = vmatpush.msra.mxu2 %v9714_v3 }
 0x3f0   : > { %v2729_v24 = vpop.f32.mrf.mxu0 }
 0x3f1   : > { %v9725_v45 = vadd.f32 %v2729_v24, %v9227_v34  ;;  %2938 = vmatpush.msra.mxu2 %v9718_v19  ;;  %v15912_v24 = vld [vmem:[#allocation15_spill] sm:$0xff]  ;;  %v9910_v19 = vpop.f32.mrf.mxu3 }
 0x3f3   : > { %7793 = vmatmul.msk.bf16.gmra.mxu0 %vm15526_vm0, %v7404_v47  ;;  %2939 = vmatpush.msra.mxu2 %v9722_v39 }
 0x3f5   : > { %2940 = vmatpush.msra.mxu2 %v9729_v23 }
 0x3f7   : > { %2941 = vmatpush.msra.mxu2 %v9734_v2 }
 0x3f8   : > { %v2731_v27 = vpop.f32.mrf.mxu0 }
 0x3f9   : > { %v9739_v34 = vadd.f32 %v2731_v27, %v15905_v0  ;;  %2942 = vmatpush.msra.mxu2 %v9692_v30  ;;  %v8320_v27 = vld [vmem:[%s8737_s29 + $0x458] sm:$0xf0] }
 0x3fa   : > { %v7464_v0 = vor.u32 %v8320_v27, %v7463_v60  ;;  %v8330_v60 = vld [vmem:[%s8737_s29 + $0x4a8] sm:$0xf0] }
 0x3fb   : > { %2943 = vmatpush.msra.mxu2 %v9687_v1 }
 0x3fd   : > { %2944 = vmatpush.msra.mxu2 %v9683_v59 }
 0x3ff   : > { %2945 = vmatpush.msra.mxu2 %v9678_v49  ;;  %v15937_v49 = vld [vmem:[#allocation61_spill] sm:$0xff] }
 0x400   : > { %v2734_v18 = vpop.f32.mrf.mxu0 }
 0x401   : > { %v9748_v6 = vadd.f32 %v2734_v18, %v15906_v36  ;;  %2946 = vmatpush.msra.mxu2 %v9674_v37  ;;  %v15916_v36 = vld [vmem:[#allocation17_spill] sm:$0xff] }
 0x403   : > { %15907 = vst [vmem:[#allocation11_spill] sm:$0xff] %v9748_v6  ;;  %7794 = vmatmul.msk.bf16.gmra.mxu0 %vm15526_vm0, %v7424_v62  ;;  %2947 = vmatpush.msra.mxu2 %v9666_v26 }
 0x405   : > { %2948 = vmatpush.msra.mxu2 %v9650_v48  ;;  %v15935_v48 = vld [vmem:[#allocation51_spill] sm:$0xff] }
 0x407   : > { %2949 = vmatpush.msra.mxu2 %v9636_v38 }
 0x408   : > { %v2736_v53 = vpop.f32.mrf.mxu0 }
 0x409   : > { %v9756_v15 = vadd.f32 %v2736_v53, %v15908_v54  ;;  %2950 = vmatpush.msra.mxu2 %v9614_v25  ;;  %v7483_v54 = vld [vmem:[%s8737_s29 + $0x470] sm:$0xf] }
 0x40a   : > { %v7484_v43 = vor.u32 %v8325_v44, %v7483_v54 }
 0x40b   : > { %15909 = vst [vmem:[#allocation12_spill] sm:$0xff] %v9756_v15 }
 0x410   : > { %v2739_v16 = vpop.f32.mrf.mxu0 }
 0x411   : > { %v9762_v9 = vadd.f32 %v2739_v16, %v15910_v41  ;;  %v15918_v16 = vld [vmem:[#allocation18_spill] sm:$0xff] }
 0x413   : > { %15911 = vst [vmem:[#allocation13_spill] sm:$0xff] %v9762_v9  ;;  %7795 = vmatmul.msk.bf16.gmra.mxu0 %vm15526_vm0, %v7444_v57 }
 0x418   : > { %v2741_v47 = vpop.f32.mrf.mxu0 }
 0x419   : > { %v9766_v8 = vadd.f32 %v2741_v47, %v15912_v24  ;;  %v7503_v24 = vld [vmem:[%s8737_s29 + $0x498] sm:$0xf] }
 0x41a   : > { %v7504_v27 = vor.u32 %v8330_v60, %v7503_v24 }
 0x41b   : > { %15913 = vst [vmem:[#allocation14_spill] sm:$0xff] %v9766_v8 }
 0x420   : > { %v2744_v13 = vpop.f32.mrf.mxu0 }
 0x421   : > { %v9771_v62 = vadd.f32 %v2744_v13, %v15914_v7  ;;  %v7523_v7 = vld [vmem:[%s8737_s29 + $0x4c0] sm:$0xf] }
 0x423   : > { %15915 = vst [vmem:[#allocation15_spill] sm:$0xff] %v9771_v62  ;;  %7796 = vmatmul.msk.bf16.gmra.mxu0 %vm15526_vm0, %v7464_v0 }
 0x428   : > { %v2746_v18 = vpop.f32.mrf.mxu0 }
 0x429   : > { %v9775_v53 = vadd.f32 %v2746_v18, %v15916_v36  ;;  %v8335_v18 = vld [vmem:[%s8737_s29 + $0x4d0] sm:$0xf0] }
 0x42a   : > { %v7524_v36 = vor.u32 %v8335_v18, %v7523_v7  ;;  %v7563_v7 = vld [vmem:[%s8737_s29 + $0x510] sm:$0xf]  ;;  %v8345_v18 = vld [vmem:[%s8737_s29 + $0x520] sm:$0xf0] }
 0x42b   : > { %15917 = vst [vmem:[#allocation16_spill] sm:$0xff] %v9775_v53 }
 0x430   : > { %v2749_v57 = vpop.f32.mrf.mxu0 }
 0x431   : > { %v9780_v41 = vadd.f32 %v2749_v57, %v15918_v16  ;;  %v7543_v57 = vld [vmem:[%s8737_s29 + $0x4e8] sm:$0xf]  ;;  %v8340_v16 = vld [vmem:[%s8737_s29 + $0x4f8] sm:$0xf0] }
 0x433   : > { %15919 = vst [vmem:[#allocation17_spill] sm:$0xff] %v9780_v41  ;;  %7797 = vmatmul.msk.bf16.gmra.mxu0 %vm15526_vm0, %v7484_v43  ;;  %v7544_v43 = vor.u32 %v8340_v16, %v7543_v57 }
 0x438   : > { %v2751_v47 = vpop.f32.mrf.mxu0 }
 0x440   : > { %v2754_v0 = vpop.f32.mrf.mxu0 }
 0x443   : > { %7798 = vmatmul.msk.bf16.gmra.mxu0 %vm15526_vm0, %v7504_v27  ;;  %v2392_v27 = vadd.f32 %v9399_v40, %v9344_v11  ;;  %v7564_v11 = vor.u32 %v8345_v18, %v7563_v7  ;;  %v15924_v40 = vld [vmem:[#allocation21_spill] sm:$0xff]  ;;  %v8355_v18 = vld [vmem:[%s8737_s29 + $0x570] sm:$0xf0] }
 0x444   : > { %v7603_v7 = vld [vmem:[%s8737_s29 + $0x560] sm:$0xf] }
 0x445   : > { %v2581_v57 = vadd.f32 %v9358_v35, %v2392_v27 }
 0x448   : > { %v2756_v13 = vpop.f32.mrf.mxu0 }
 0x450   : > { %v2759_v54 = vpop.f32.mrf.mxu0 }
 0x453   : > { %7799 = vmatmul.msk.bf16.gmra.mxu0 %vm15526_vm0, %v7524_v36 }
 0x458   : > { %v2761_v44 = vpop.f32.mrf.mxu0 }
 0x459   : > { %v9804_v36 = vadd.f32 %v2761_v44, %v9366_v28  ;;  %v15927_v28 = vld [vmem:[#allocation20_spill] sm:$0xff] }
 0x45a   : > { %v9819_v44 = vadd.f32 %v2754_v0, %v15927_v28  ;;  %v7583_v0 = vld [vmem:[%s8737_s29 + $0x538] sm:$0xf]  ;;  %v8360_v28 = vld [vmem:[%s8737_s29 + $0x598] sm:$0xf0] }
 0x45b   : > { %15922 = vst [vmem:[#allocation86_spill] sm:$0xff] %v9804_v36 }
 0x45c   : > { %15928 = vst [vmem:[#allocation20_spill] sm:$0xff] %v9819_v44 }
 0x460   : > { %v2764_v21 = vpop.f32.mrf.mxu0 }
 0x461   : > { %v9798_v56 = vadd.f32 %v2764_v21, %v9380_v42  ;;  %v9813_v21 = vadd.f32 %v2756_v13, %v15924_v40  ;;  %v7623_v40 = vld [vmem:[%s8737_s29 + $0x588] sm:$0xf] }
 0x463   : > { %7800 = vmatmul.msk.bf16.gmra.mxu0 %vm15526_vm0, %v7544_v43  ;;  %15921 = vst [vmem:[#allocation85_spill] sm:$0xff] %v9798_v56 }
 0x464   : > { %15925 = vst [vmem:[#allocation21_spill] sm:$0xff] %v9813_v21 }
 0x468   : > { %v2766_v24 = vpop.f32.mrf.mxu0 }
 0x469   : > { %v9793_v60 = vadd.f32 %v2766_v24, %v9393_v31  ;;  %v9809_v31 = vadd.f32 %v2759_v54, %v9350_v55  ;;  %v15929_v55 = vld [vmem:[#allocation19_spill] sm:$0xff]  ;;  %v8350_v54 = vld [vmem:[%s8737_s29 + $0x548] sm:$0xf0] }
 0x46a   : > { %v9824_v35 = vadd.f32 %v2751_v47, %v15929_v55  ;;  %v7584_v47 = vor.u32 %v8350_v54, %v7583_v0  ;;  %v7624_v55 = vor.u32 %v8360_v28, %v7623_v40  ;;  %v15293_v40 = vlaneseq }
 0x46b   : > { %15920 = vst [vmem:[#allocation18_spill] sm:$0xff] %v9793_v60  ;;  %2955 = vmatpush.msrb.mxu2 %v9793_v60 }
 0x46c   : > { %15923 = vst [vmem:[#allocation87_spill] sm:$0xff] %v9809_v31 }
 0x46d   : > { %2956 = vmatpush.msrb.mxu2 %v9798_v56  ;;  %15930 = vst [vmem:[#allocation19_spill] sm:$0xff] %v9824_v35 }
 0x46f   : > { %2957 = vmatpush.msrb.mxu2 %v9804_v36 }
 0x470   : > { %v2769_v42 = vpop.f32.mrf.mxu0 }
 0x471   : > { %v9815_v16 = vadd.f32 %v2769_v42, %v2581_v57  ;;  %2958 = vmatpush.msrb.mxu2 %v9809_v31  ;;  %v7604_v57 = vor.u32 %v8355_v18, %v7603_v7 }
 0x473   : > { %15926 = vst [vmem:[#allocation88_spill] sm:$0xff] %v9815_v16  ;;  %7801 = vmatmul.msk.bf16.gmra.mxu0 %vm15526_vm0, %v7564_v11  ;;  %2959 = vmatpush.msrb.mxu2 %v9813_v21 }
 0x475   : > { %2960 = vmatpush.msrb.mxu2 %v9819_v44 }
 0x477   : > { %2961 = vmatpush.msrb.mxu2 %v9824_v35 }
 0x478   : > { %v9828_v13 = vpop.f32.mrf.mxu0 }
 0x479   : > { %2962 = vmatpush.msrb.mxu2 %v9780_v41 }
 0x47b   : > { %2963 = vmatpush.msrb.mxu2 %v9775_v53 }
 0x47d   : > { %2964 = vmatpush.msrb.mxu2 %v9771_v62 }
 0x47f   : > { %2965 = vmatpush.msrb.mxu2 %v9766_v8 }
 0x480   : > { %v2774_v43 = vpop.f32.mrf.mxu0 }
 0x481   : > { %v9837_v24 = vadd.f32 %v2774_v43, %v9418_v46  ;;  %2966 = vmatpush.msrb.mxu2 %v9762_v9 }
 0x483   : > { %15931 = vst [vmem:[#allocation89_spill] sm:$0xff] %v9837_v24  ;;  %7802 = vmatmul.msk.bf16.gmra.mxu0 %vm15526_vm0, %v7584_v47  ;;  %2967 = vmatpush.msrb.mxu2 %v9756_v15 }
 0x485   : > { %2968 = vmatpush.msrb.mxu2 %v9748_v6 }
 0x487   : > { %2969 = vmatpush.msrb.mxu2 %v9739_v34 }
 0x488   : > { %v9844_v27 = vpop.f32.mrf.mxu0 }
 0x489   : > { %2970 = vmatpush.msrb.mxu2 %v9725_v45 }
 0x490   : > { %v2779_v46 = vpop.f32.mrf.mxu0 }
 0x491   : > { %v9850_v11 = vadd.f32 %v2779_v46, %v9432_v33 }
 0x493   : > { %15932 = vst [vmem:[#allocation90_spill] sm:$0xff] %v9850_v11  ;;  %7803 = vmatmul.msk.bf16.gmra.mxu0 %vm15526_vm0, %v7604_v57 }
 0x498   : > { %v9853_v42 = vpop.f32.mrf.mxu0 }
 0x4a0   : > { %v2784_v0 = vpop.f32.mrf.mxu0 }
 0x4a1   : > { %v9858_v54 = vadd.f32 %v2784_v0, %v9447_v17  ;;  %v9873_v17 = vand.u32 127, %v15293_v40  ;;  %v9879_v0 = vld [vmem:[%s15276_s2] ss:$0 sm:$0xff] }
 0x4a2   : > { %v2046_v63 = vadd.f32 %v9879_v0, %v9462_v14  ;;  %v2044_v40 = vadd.f32 %v9879_v0, %v9455_v50  ;;  %v2041_v38 = vadd.f32 %v9879_v0, %v9445_v61  ;;  %v15938_v14 = vld [vmem:[#allocation38_spill] sm:$0xff]  ;;  %v15939_v50 = vld [vmem:[#allocation48_spill] sm:$0xff] }
 0x4a3   : > { %15933 = vst [vmem:[#allocation91_spill] sm:$0xff] %v9858_v54  ;;  %7804 = vmatmul.msk.bf16.gmra.mxu0 %vm15526_vm0, %v7624_v55  ;;  %v2835_v55 = vcvt.s32.f32 %v9873_v17  ;;  %v2039_v1 = vadd.f32 %v9879_v0, %v15938_v14 }
 0x4a4   : > { %v2235_v26 = vadd.f32 %v15935_v48, %v2046_v63  ;;  %v2233_v30 = vadd.f32 %v15939_v50, %v2044_v40  ;;  %v15943_v63 = vld [vmem:[#allocation52_spill] sm:$0xff]  ;;  %v15946_v40 = vld [vmem:[#allocation42_spill] sm:$0xff]  ;;  %v15947_v50 = vld [vmem:[#allocation49_spill] sm:$0xff] }
 0x4a5   : > { %v2840_v58 = vadd.f32 0.5, %v2835_v55  ;;  %v2228_v14 = vadd.f32 %v15946_v40, %v2039_v1  ;;  %v15952_v1 = vld [vmem:[#allocation47_spill] sm:$0xff]  ;;  %v15959_v40 = vld [vmem:[#allocation33_spill] sm:$0xff] }
 0x4a6   : > { %v2422_v48 = vadd.f32 %v15943_v63, %v2233_v30 }
 0x4a7   : > { %v2845_v22 = vmul.f32 0.041666668, %v2840_v58  ;;  %v9899_v58 = vpop.f32.mrf.mxu2 }
 0x4a8   : > { %v9861_v47 = vpop.f32.mrf.mxu0 }
 0x4b0   : > { %v2789_v43 = vpop.f32.mrf.mxu0 }
 0x4b1   : > { %v9864_v7 = vadd.f32 %v2789_v43, %v9464_v20  ;;  %v2049_v20 = vadd.f32 %v9879_v0, %v9474_v29  ;;  %v2051_v43 = vadd.f32 %v9879_v0, %v9481_v4  ;;  %v2850_v29 = vfloor.f32 %v2845_v22  ;;  %v15936_v4 = vld [vmem:[#allocation58_spill] sm:$0xff]  ;;  %v15942_v22 = vld [vmem:[#allocation45_spill] sm:$0xff] }
 0x4b2   : > { %v2230_v2 = vadd.f32 %v15942_v22, %v2041_v38 }
 0x4b3   : > { %15934 = vst [vmem:[#allocation92_spill] sm:$0xff] %v9864_v7  ;;  %v2238_v5 = vadd.f32 %v9502_v12, %v2049_v20  ;;  %v2240_v25 = vadd.f32 %v9513_v51, %v2051_v43  ;;  %v2855_v12 = vmul.f32 24.0, %v2850_v29  ;;  %v15940_v20 = vld [vmem:[#allocation55_spill] sm:$0xff]  ;;  %vm2865_vm1 = vcmp.ge.f32.partialorder %v2850_v29, 4.0 }
 0x4b4   : > { %v2424_v51 = vadd.f32 %v15940_v20, %v2235_v26  ;;  %v15941_v43 = vld [vmem:[#allocation35_spill] sm:$0xff]  ;;  %vm2870_vm2 = vcmp.lt.f32.partialorder %v2850_v29, 20.0  ;;  %v2419_v39 = vadd.f32 %v15947_v50, %v2230_v2  ;;  %v15948_v20 = vld [vmem:[#allocation54_spill] sm:$0xff]  ;;  %v9934_v50 = vpop.f32.mrf.mxu2 }
 0x4b5   : > { %v2427_v37 = vadd.f32 %v15936_v4, %v2238_v5  ;;  %v2429_v59 = vadd.f32 %v15937_v49, %v2240_v25  ;;  %v2036_v61 = vadd.f32 %v9879_v0, %v15941_v43  ;;  %v2860_v5 = vsub.f32 %v2835_v55, %v2855_v12  ;;  %v15944_v4 = vld [vmem:[#allocation57_spill] sm:$0xff]  ;;  %v15945_v49 = vld [vmem:[#allocation60_spill] sm:$0xff]  ;;  %vm2875_vm3 = vmand %vm2865_vm1, %vm2870_vm2 }
 0x4b6   : > { %v2613_v38 = vadd.f32 %v15948_v20, %v2424_v51  ;;  %v15951_v55 = vld [vmem:[#allocation39_spill] sm:$0xff]  ;;  %v2417_v12 = vadd.f32 %v15952_v1, %v2228_v14  ;;  %v15953_v2 = vld [vmem:[#allocation50_spill] sm:$0xff]  ;;  %v15330_v51 = vmov 1.0   ;;  %v15965_v1 = vld [vmem:[#allocation64_spill] sm:$0xff] }
 0x4b7   : > { %v2616_v25 = vadd.f32 %v15944_v4, %v2427_v37  ;;  %v2618_v23 = vadd.f32 %v15945_v49, %v2429_v59  ;;  %vm2880_vm4 = vcmp.ge.f32.partialorder %v2860_v5, 4.0  ;;  %vm2890_vm6 = vcmp.lt.f32.partialorder %v2860_v5, 20.0  ;;  %v15950_v37 = vld [vmem:[#allocation31_spill] sm:$0xff]  ;;  %v15956_v5 = vld [vmem:[#allocation46_spill] sm:$0xff] }
 0x4b8   : > { %v9866_v33 = vpop.f32.mrf.mxu0  ;;  %vm2885_vm5 = vmand %vm2875_vm3, %vm2880_vm4  ;;  %v2031_v59 = vadd.f32 %v9879_v0, %v15950_v37  ;;  %v2225_v29 = vadd.f32 %v15951_v55, %v2036_v61  ;;  %v2611_v22 = vadd.f32 %v15953_v2, %v2422_v48  ;;  %v15958_v61 = vld [vmem:[#allocation28_spill] sm:$0xff]  ;;  %v15963_v37 = vld [vmem:[#allocation41_spill] sm:$0xff] }
 0x4b9   : > { %vm2895_vm7 = vmand %vm2885_vm5, %vm2890_vm6  ;;  %v2026_v48 = vadd.f32 %v9879_v0, %v15958_v61  ;;  %v15970_v61 = vld [vmem:[#allocation36_spill] sm:$0xff] }
 0x4ba   : > { %7815 = vmatmul.msk.f32.vlgmr.msrb.gmra.mxu3 %vm2895_vm7, %v15330_v51  ;;  %7810 = vmatmul.msk.f32.vlgmr.msrb.gmra.mxu1 %vm2895_vm7, %v15330_v51  ;;  %v2220_v14 = vadd.f32 %v15959_v40, %v2031_v59 }
 0x4c0   : > { %v9868_v18 = vpop.f32.mrf.mxu0 }
 0x4c8   : > { %v9870_v57 = vpop.f32.mrf.mxu0 }
 0x4d0   : > { %v2799_v46 = vpop.f32.mrf.mxu0 }
 0x4d1   : > { %v9926_v49 = vadd.f32 %v2799_v46, %v2611_v22  ;;  %v15962_v46 = vld [vmem:[#allocation40_spill] sm:$0xff] }
 0x4d3   : > { %15957 = vst [vmem:[#allocation61_spill] sm:$0xff] %v9926_v49 }
 0x4d8   : > { %v2801_v28 = vpop.f32.mrf.mxu0 }
 0x4d9   : > { %v9920_v63 = vadd.f32 %v2801_v28, %v2613_v38 }
 0x4db   : > { %15954 = vst [vmem:[#allocation58_spill] sm:$0xff] %v9920_v63 }
 0x4e0   : > { %v2804_v10 = vpop.f32.mrf.mxu0 }
 0x4e1   : > { %v9913_v43 = vadd.f32 %v2804_v10, %v2616_v25  ;;  %v15955_v10 = vld [vmem:[#allocation44_spill] sm:$0xff]  ;;  %v2608_v25 = vadd.f32 %v15956_v5, %v2419_v39  ;;  %v3076_v39 = vmul.f32 %v9920_v63, %v9920_v63 }
 0x4e3   : > { %15949 = vst [vmem:[#allocation51_spill] sm:$0xff] %v9913_v43  ;;  %v3077_v28 = vmul.f32 %v9913_v43, %v9913_v43  ;;  %v9938_v38 = vadd.f32 %v9870_v57, %v2608_v25  ;;  %v3075_v57 = vmul.f32 %v9926_v49, %v9926_v49  ;;  %v15969_v25 = vld [vmem:[#allocation37_spill] sm:$0xff] }
 0x4e5   : > { %15961 = vst [vmem:[#allocation38_spill] sm:$0xff] %v9938_v38 }
 0x4e8   : > { %v2806_v26 = vpop.f32.mrf.mxu0 }
 0x4e9   : > { %v2807_v30 = vadd.f32 %v2806_v26, %v2618_v23  ;;  %v2414_v23 = vadd.f32 %v15955_v10, %v2225_v29  ;;  %v15960_v26 = vld [vmem:[#allocation43_spill] sm:$0xff]  ;;  %v15967_v10 = vld [vmem:[#allocation29_spill] sm:$0xff] }
 0x4ea   : > { %v2606_v20 = vadd.f32 %v15960_v26, %v2417_v12  ;;  %v15966_v12 = vld [vmem:[#allocation25_spill] sm:$0xff] }
 0x4eb   : > { %v3078_v4 = vmul.f32 %v2807_v30, %v2807_v30  ;;  %2975 = vmatpush.msra.mxu1 %v2807_v30  ;;  %v2409_v30 = vadd.f32 %v15962_v46, %v2220_v14  ;;  %v2603_v55 = vadd.f32 %v15963_v37, %v2414_v23  ;;  %v2021_v22 = vadd.f32 %v9879_v0, %v15966_v12  ;;  %v15975_v12 = vld [vmem:[#allocation32_spill] sm:$0xff] }
 0x4ec   : > { %v9946_v59 = vadd.f32 %v9868_v18, %v2606_v20  ;;  %v2215_v23 = vadd.f32 %v15967_v10, %v2026_v48  ;;  %v3074_v18 = vmul.f32 %v9938_v38, %v9938_v38  ;;  %v2831_v48 = vadd.s32 128, %v9873_v17  ;;  %v15972_v20 = vld [vmem:[#allocation26_spill] sm:$0xff] }
 0x4ed   : > { %2976 = vmatpush.msra.mxu1 %v9913_v43  ;;  %3147 = vmatpush.msra.mxu3 %v3078_v4  ;;  %v9956_v4 = vpop.f32.mrf.mxu3  ;;  %v9960_v5 = vadd.f32 %v9866_v33, %v2603_v55  ;;  %v2598_v40 = vadd.f32 %v15970_v61, %v2409_v30  ;;  %v15971_v33 = vld [vmem:[#allocation22_spill] sm:$0xff]  ;;  %v9980_v55 = vpop.f32.mrf.mxu2 }
 0x4ee   : > { %15964 = vst [vmem:[#allocation48_spill] sm:$0xff] %v9946_v59  ;;  %v3073_v14 = vmul.f32 %v9946_v59, %v9946_v59  ;;  %v2016_v26 = vadd.f32 %v9879_v0, %v15971_v33  ;;  %v2836_v37 = vcvt.s32.f32 %v2831_v48  ;;  %v15979_v33 = vld [vmem:[#allocation27_spill] sm:$0xff]  ;;  %v15987_v43 = vld [vmem:[#allocation66_spill] sm:$0xff] }
 0x4ef   : > { %2977 = vmatpush.msra.mxu1 %v9920_v63  ;;  %3148 = vmatpush.msra.mxu3 %v3077_v28  ;;  %15968 = vst [vmem:[#allocation55_spill] sm:$0xff] %v9960_v5  ;;  %v2404_v28 = vadd.f32 %v15969_v25, %v2215_v23  ;;  %v9975_v46 = vadd.f32 %v9861_v47, %v2598_v40  ;;  %v15976_v23 = vld [vmem:[#allocation23_spill] sm:$0xff] }
 0x4f0   : > { %v2809_v29 = vpop.f32.mrf.mxu0  ;;  %v3072_v30 = vmul.f32 %v9960_v5, %v9960_v5  ;;  %v3071_v47 = vmul.f32 %v9864_v7, %v9864_v7  ;;  %v2071_v63 = vadd.f32 %v9879_v0, %v15987_v43  ;;  %v3049_v43 = vmul.f32 %v9748_v6, %v9748_v6 }
 0x4f1   : > { %v9949_v2 = vadd.f32 %v2809_v29, %v15965_v1  ;;  %2978 = vmatpush.msra.mxu1 %v9926_v49  ;;  %3149 = vmatpush.msra.mxu3 %v3076_v39  ;;  %v2210_v39 = vadd.f32 %v15972_v20, %v2021_v22  ;;  %15973 = vst [vmem:[#allocation35_spill] sm:$0xff] %v9975_v46  ;;  %v15974_v1 = vld [vmem:[#allocation34_spill] sm:$0xff]  ;;  %v2841_v22 = vadd.f32 0.5, %v2836_v37  ;;  %v15988_v49 = vld [vmem:[#allocation65_spill] sm:$0xff] }
 0x4f2   : > { %v2593_v10 = vadd.f32 %v15975_v12, %v2404_v28  ;;  %v3070_v61 = vmul.f32 %v9975_v46, %v9975_v46  ;;  %v15978_v28 = vld [vmem:[#allocation30_spill] sm:$0xff] }
 0x4f3   : > { %2979 = vmatpush.msra.mxu1 %v9938_v38  ;;  %3150 = vmatpush.msra.mxu3 %v3075_v57  ;;  %v2399_v57 = vadd.f32 %v15974_v1, %v2210_v39  ;;  %v2846_v40 = vmul.f32 0.041666668, %v2841_v22  ;;  %v2832_v39 = vadd.s32 256, %v9873_v17 }
 0x4f4   : > { %v9991_v25 = vadd.f32 %v9853_v42, %v2593_v10  ;;  %v3069_v42 = vmul.f32 %v9858_v54, %v9858_v54 }
 0x4f5   : > { %2980 = vmatpush.msra.mxu1 %v9946_v59  ;;  %3151 = vmatpush.msra.mxu3 %v3074_v18  ;;  %v2205_v18 = vadd.f32 %v15976_v23, %v2016_v26  ;;  %v9997_v48 = vpop.f32.mrf.mxu3  ;;  %v2588_v20 = vadd.f32 %v15979_v33, %v2399_v57  ;;  %v2851_v26 = vfloor.f32 %v2846_v40  ;;  %v2837_v57 = vcvt.s32.f32 %v2832_v39 }
 0x4f6   : > { %15977 = vst [vmem:[#allocation45_spill] sm:$0xff] %v9991_v25  ;;  %v3068_v1 = vmul.f32 %v9991_v25, %v9991_v25  ;;  %v3067_v23 = vmul.f32 %v9850_v11, %v9850_v11 }
 0x4f7   : > { %2981 = vmatpush.msra.mxu1 %v9960_v5  ;;  %3152 = vmatpush.msra.mxu3 %v3073_v14  ;;  %v2394_v14 = vadd.f32 %v15978_v28, %v2205_v18  ;;  %v2856_v12 = vmul.f32 24.0, %v2851_v26  ;;  %v2842_v18 = vadd.f32 0.5, %v2837_v57  ;;  %vm2866_vm8 = vcmp.ge.f32.partialorder %v2851_v26, 4.0  ;;  %v15989_v5 = vld [vmem:[#allocation63_spill] sm:$0xff] }
 0x4f8   : > { %v9982_v29 = vpop.f32.mrf.mxu0  ;;  %vm2871_vm9 = vcmp.lt.f32.partialorder %v2851_v26, 20.0 }
 0x4f9   : > { %2982 = vmatpush.msra.mxu1 %v9864_v7  ;;  %3153 = vmatpush.msra.mxu3 %v3072_v30  ;;  %v10005_v30 = vadd.f32 %v9844_v27, %v2588_v20  ;;  %v2861_v27 = vsub.f32 %v2836_v37, %v2856_v12  ;;  %vm2876_vm10 = vmand %vm2866_vm8, %vm2871_vm9  ;;  %v3065_v37 = vmul.f32 %v9837_v24, %v9837_v24  ;;  %v2833_v20 = vadd.s32 384, %v9873_v17 }
 0x4fa   : > { %v3062_v12 = vmul.f32 %v9793_v60, %v9793_v60  ;;  %v2066_v7 = vadd.f32 %v9879_v0, %v15989_v5  ;;  %v3048_v5 = vmul.f32 %v9739_v34, %v9739_v34  ;;  %v15995_v60 = vld [vmem:[#allocation56_spill] sm:$0xff] }
 0x4fb   : > { %2983 = vmatpush.msra.mxu1 %v9975_v46  ;;  %3154 = vmatpush.msra.mxu3 %v3071_v47  ;;  %15980 = vst [vmem:[#allocation52_spill] sm:$0xff] %v10005_v30  ;;  %v15981_v47 = vld [vmem:[#allocation24_spill] sm:$0xff]  ;;  %v3066_v28 = vmul.f32 %v10005_v30, %v10005_v30  ;;  %vm2881_vm11 = vcmp.ge.f32.partialorder %v2861_v27, 4.0  ;;  %vm2891_vm13 = vcmp.lt.f32.partialorder %v2861_v27, 20.0 }
 0x4fc   : > { %v2583_v22 = vadd.f32 %v15981_v47, %v2394_v14  ;;  %v2847_v14 = vmul.f32 0.041666668, %v2842_v18  ;;  %vm2886_vm12 = vmand %vm2876_vm10, %vm2881_vm11  ;;  %v3061_v18 = vmul.f32 %v9798_v56, %v9798_v56  ;;  %v15990_v46 = vld [vmem:[#allocation8_spill] sm:$0xff] }
 0x4fd   : > { %2984 = vmatpush.msra.mxu1 %v9858_v54  ;;  %3155 = vmatpush.msra.mxu3 %v3070_v61  ;;  %v10016_v61 = vpop.f32.mrf.mxu2  ;;  %vm10027_vm14 = vmand %vm2886_vm12, %vm2891_vm13  ;;  %v2260_v54 = vadd.f32 %v15990_v46, %v2071_v63  ;;  %v15994_v46 = vld [vmem:[#allocation6_spill] sm:$0xff] }
 0x4fe   : > { %v10019_v40 = vadd.f32 %v9828_v13, %v2583_v22  ;;  %v2852_v33 = vfloor.f32 %v2847_v14  ;;  %7811 = vmatmul.msk.f32.vlgmr.msra.gmra.mxu2 %vm10027_vm14, %v15330_v51  ;;  %v3063_v22 = vmul.f32 %v9815_v16, %v9815_v16  ;;  %v366_v13 = vld [vmem:[%s15283_s9 + $0x38] sm:$0xff] }
 0x4ff   : > { %2985 = vmatpush.msra.mxu1 %v9991_v25  ;;  %3156 = vmatpush.msra.mxu3 %v3069_v42  ;;  %v10032_v42 = vpop.f32.mrf.mxu3 }
 0x500   : > { %v10010_v10 = vpop.f32.mrf.mxu0  ;;  %15982 = vst [vmem:[#allocation57_spill] sm:$0xff] %v10019_v40  ;;  %v3064_v26 = vmul.f32 %v10019_v40, %v10019_v40  ;;  %v2857_v39 = vmul.f32 24.0, %v2852_v33  ;;  %vm2867_vm15 = vcmp.ge.f32.partialorder %v2852_v33, 4.0  ;;  %vm2872_vm1 = vcmp.lt.f32.partialorder %v2852_v33, 20.0 }
 0x501   : > { %2986 = vmatpush.msra.mxu1 %v9850_v11  ;;  %3157 = vmatpush.msra.mxu3 %v3068_v1  ;;  %v2838_v1 = vcvt.s32.f32 %v2833_v20  ;;  %vm2877_vm2 = vmand %vm2867_vm15, %vm2872_vm1  ;;  %v3059_v33 = vmul.f32 %v9809_v31, %v9809_v31 }
 0x503   : > { %2987 = vmatpush.msra.mxu1 %v10005_v30  ;;  %3158 = vmatpush.msra.mxu3 %v3067_v23  ;;  %v2862_v23 = vsub.f32 %v2837_v57, %v2857_v39  ;;  %v2843_v27 = vadd.f32 0.5, %v2838_v1 }
 0x505   : > { %2988 = vmatpush.msra.mxu1 %v9837_v24  ;;  %3159 = vmatpush.msra.mxu3 %v3066_v28  ;;  %vm2882_vm3 = vcmp.ge.f32.partialorder %v2862_v23, 4.0  ;;  %v2848_v28 = vmul.f32 0.041666668, %v2843_v27  ;;  %v10049_v14 = vpop.f32.mrf.mxu2  ;;  %vm2892_vm5 = vcmp.lt.f32.partialorder %v2862_v23, 20.0  ;;  %v10068_v23 = vpop.f32.mrf.mxu1 }
 0x506   : > { %vm2887_vm4 = vmand %vm2877_vm2, %vm2882_vm3 }
 0x507   : > { %2989 = vmatpush.msra.mxu1 %v10019_v40  ;;  %3160 = vmatpush.msra.mxu3 %v3065_v37  ;;  %v3060_v37 = vmul.f32 %v9804_v36, %v9804_v36  ;;  %vm10053_vm6 = vmand %vm2887_vm4, %vm2892_vm5  ;;  %v2853_v20 = vfloor.f32 %v2848_v28  ;;  %v10062_v39 = vpop.f32.mrf.mxu3  ;;  %v10073_v28 = vadd.s32 512, %v9873_v17  ;;  %v15997_v36 = vld [vmem:[#allocation53_spill] sm:$0xff] }
 0x508   : > { %v10042_v47 = vpop.f32.mrf.mxu0  ;;  %7812 = vmatmul.msk.f32.vlgmr.msrb.gmra.mxu2 %vm10053_vm6, %v15330_v51 }
 0x509   : > { %2990 = vmatpush.msra.mxu1 %v9815_v16  ;;  %3161 = vmatpush.msra.mxu3 %v3064_v26  ;;  %v2858_v26 = vmul.f32 24.0, %v2853_v20  ;;  %vm2868_vm7 = vcmp.ge.f32.partialorder %v2853_v20, 4.0  ;;  %vm2873_vm8 = vcmp.lt.f32.partialorder %v2853_v20, 20.0  ;;  %v3054_v20 = vmul.f32 %v9775_v53, %v9775_v53 }
 0x50a   : > { %vm2878_vm9 = vmand %vm2868_vm7, %vm2873_vm8 }
 0x50b   : > { %3127 = vmatpush.msrb.mxu1 %v3062_v12  ;;  %3162 = vmatpush.msra.mxu3 %v3063_v22  ;;  %v3058_v22 = vmul.f32 %v9813_v21, %v9813_v21  ;;  %v2863_v27 = vsub.f32 %v2838_v1, %v2858_v26  ;;  %v3055_v1 = vmul.f32 %v9780_v41, %v9780_v41  ;;  %v2839_v26 = vcvt.s32.f32 %v10073_v28 }
 0x50c   : > { %v3052_v28 = vmul.f32 %v9766_v8, %v9766_v8 }
 0x50d   : > { %3128 = vmatpush.msrb.mxu1 %v3061_v18  ;;  %v3057_v18 = vmul.f32 %v9819_v44, %v9819_v44  ;;  %vm2883_vm10 = vcmp.ge.f32.partialorder %v2863_v27, 4.0  ;;  %vm2893_vm12 = vcmp.lt.f32.partialorder %v2863_v27, 20.0  ;;  %v3053_v27 = vmul.f32 %v9771_v62, %v9771_v62 }
 0x50e   : > { %vm2888_vm11 = vmand %vm2878_vm9, %vm2883_vm10 }
 0x50f   : > { %3129 = vmatpush.msrb.mxu1 %v3060_v37  ;;  %v3056_v37 = vmul.f32 %v9824_v35, %v9824_v35  ;;  %vm2898_vm13 = vmand %vm2888_vm11, %vm2893_vm12 }
 0x510   : > { %v10064_v12 = vpop.f32.mrf.mxu0  ;;  %7818 = vmatmul.msk.f32.vlgmr.msra.gmra.mxu3 %vm2898_vm13, %v15330_v51  ;;  %7813 = vmatmul.msk.f32.vlgmr.msra.gmra.mxu1 %vm2898_vm13, %v15330_v51 }
 0x511   : > { %3130 = vmatpush.msrb.mxu1 %v3059_v33  ;;  %v2446_v33 = vpop.f32.mrf.mxu2 }
 0x513   : > { %3131 = vmatpush.msrb.mxu1 %v3058_v22  ;;  %v2635_v22 = vpop.f32.mrf.mxu3 }
 0x515   : > { %3132 = vmatpush.msrb.mxu1 %v3057_v18  ;;  %v2844_v18 = vadd.f32 0.5, %v2839_v26 }
 0x517   : > { %3133 = vmatpush.msrb.mxu1 %v3056_v37  ;;  %v2247_v37 = vpop.f32.mrf.mxu1  ;;  %v2849_v51 = vmul.f32 0.041666668, %v2844_v18  ;;  %v15991_v18 = vld [vmem:[#allocation62_spill] sm:$0xff] }
 0x518   : > { %v2821_v17 = vpop.f32.mrf.mxu0  ;;  %v2064_v25 = vadd.f32 %v9879_v0, %v15991_v18 }
 0x519   : > { %3134 = vmatpush.msrb.mxu1 %v3055_v1  ;;  %v3051_v1 = vmul.f32 %v9762_v9, %v9762_v9  ;;  %v2448_v38 = vpop.f32.mrf.mxu2 }
 0x51a   : > { %v2449_v30 = vadd.f32 %v2448_v38, %v2260_v54  ;;  %v15996_v38 = vld [vmem:[#allocation5_spill] sm:$0xff] }
 0x51b   : > { %3135 = vmatpush.msrb.mxu1 %v3054_v20  ;;  %v2069_v20 = vadd.f32 %v9879_v0, %v15988_v49  ;;  %v15992_v49 = vld [vmem:[#allocation7_spill] sm:$0xff]  ;;  %v2637_v40 = vpop.f32.mrf.mxu3  ;;  %v2253_v18 = vadd.f32 %v15996_v38, %v2064_v25 }
 0x51c   : > { %v16006_v38 = vld [vmem:[#allocation79_spill] sm:$0xff] }
 0x51d   : > { %3136 = vmatpush.msrb.mxu1 %v3053_v27  ;;  %v3050_v27 = vmul.f32 %v9756_v15, %v9756_v15  ;;  %v2258_v11 = vadd.f32 %v15992_v49, %v2069_v20  ;;  %v3047_v20 = vmul.f32 %v9725_v45, %v9725_v45 }
 0x51f   : > { %3137 = vmatpush.msrb.mxu1 %v3052_v28  ;;  %v2854_v28 = vfloor.f32 %v2849_v51  ;;  %v2249_v63 = vpop.f32.mrf.mxu1  ;;  %v2447_v16 = vadd.f32 %v2446_v33, %v2258_v11  ;;  %v2059_v51 = vadd.f32 %v9879_v0, %v15995_v60  ;;  %v2442_v11 = vadd.f32 %v10016_v61, %v2253_v18 }
 0x520   : > { %v2824_v59 = vpop.f32.mrf.mxu0  ;;  %v3036_v18 = vmul.f32 %v16006_v38, %v16006_v38 }
 0x521   : > { %3138 = vmatpush.msrb.mxu1 %v3051_v1  ;;  %v15993_v1 = vld [vmem:[#allocation59_spill] sm:$0xff]  ;;  %v2859_v54 = vmul.f32 24.0, %v2854_v28  ;;  %v2636_v33 = vadd.f32 %v2635_v22, %v2447_v16  ;;  %vm2869_vm15 = vcmp.ge.f32.partialorder %v2854_v28, 4.0  ;;  %vm2874_vm1 = vcmp.lt.f32.partialorder %v2854_v28, 20.0  ;;  %v16002_v22 = vld [vmem:[#allocation9_spill] sm:$0xff]  ;;  %v16003_v28 = vld [vmem:[#allocation82_spill] sm:$0xff] }
 0x522   : > { %v2061_v24 = vadd.f32 %v9879_v0, %v15993_v1  ;;  %v2631_v16 = vadd.f32 %v10032_v42, %v2442_v11  ;;  %vm2879_vm2 = vmand %vm2869_vm15, %vm2874_vm1  ;;  %v16009_v11 = vld [vmem:[#allocation76_spill] sm:$0xff] }
 0x523   : > { %3139 = vmatpush.msrb.mxu1 %v3050_v27  ;;  %v2255_v27 = vadd.f32 %v15994_v46, %v2066_v7  ;;  %v2056_v7 = vadd.f32 %v9879_v0, %v15997_v36  ;;  %v2248_v46 = vadd.f32 %v2247_v37, %v2059_v51  ;;  %v3040_v37 = vmul.f32 %v16002_v22, %v16002_v22 }
 0x524   : > { %v2250_v1 = vadd.f32 %v2249_v63, %v2061_v24  ;;  %v2820_v61 = vadd.f32 %v10064_v12, %v2631_v16  ;;  %v16000_v12 = vld [vmem:[#allocation84_spill] sm:$0xff]  ;;  %v3039_v63 = vmul.f32 %v16003_v28, %v16003_v28 }
 0x525   : > { %3140 = vmatpush.msrb.mxu1 %v3049_v43  ;;  %v2444_v49 = vadd.f32 %v10049_v14, %v2255_v27  ;;  %v2638_v43 = vadd.f32 %v2637_v40, %v2449_v30  ;;  %v2864_v14 = vsub.f32 %v2839_v26, %v2859_v54  ;;  %v10125_v30 = vadd.f32 %v2824_v59, %v2636_v33  ;;  %v16001_v26 = vld [vmem:[#allocation10_spill] sm:$0xff]  ;;  %v16004_v27 = vld [vmem:[#allocation81_spill] sm:$0xff] }
 0x526   : > { %v2439_v25 = vadd.f32 %v9980_v55, %v2250_v1  ;;  %v2245_v36 = vadd.f32 %v10068_v23, %v2056_v7  ;;  %v3042_v23 = vmul.f32 %v16000_v12, %v16000_v12  ;;  %v3038_v51 = vmul.f32 %v16004_v27, %v16004_v27  ;;  %v16008_v1 = vld [vmem:[#allocation77_spill] sm:$0xff] }
 0x527   : > { %3141 = vmatpush.msrb.mxu1 %v3048_v5  ;;  %v15998_v5 = vmov 1.0   ;;  %v2633_v24 = vadd.f32 %v10062_v39, %v2444_v49  ;;  %vm2884_vm3 = vcmp.ge.f32.partialorder %v2864_v14, 4.0  ;;  %vm2894_vm5 = vcmp.lt.f32.partialorder %v2864_v14, 20.0  ;;  %v16007_v49 = vld [vmem:[#allocation78_spill] sm:$0xff]  ;;  %v16011_v14 = vld [vmem:[#allocation72_spill] sm:$0xff] }
 0x528   : > { %v2826_v56 = vpop.f32.mrf.mxu0  ;;  %v2434_v55 = vadd.f32 %v9899_v58, %v2245_v36  ;;  %v2628_v59 = vadd.f32 %v9997_v48, %v2439_v25  ;;  %vm2889_vm4 = vmand %vm2879_vm2, %vm2884_vm3  ;;  %v8569_v48 = vmov 0.0   ;;  %v3034_v7 = vmul.f32 %v16008_v1, %v16008_v1 }
 0x529   : > { %3142 = vmatpush.msrb.mxu1 %v3047_v20  ;;  %v10118_v60 = vadd.f32 %v2826_v56, %v2638_v43  ;;  %v2437_v56 = vadd.f32 %v9934_v50, %v2248_v46  ;;  %v2822_v0 = vadd.f32 %v2821_v17, %v2633_v24  ;;  %v3041_v17 = vmul.f32 %v16001_v26, %v16001_v26  ;;  %v16005_v20 = vld [vmem:[#allocation80_spill] sm:$0xff]  ;;  %v16010_v46 = vld [vmem:[#allocation75_spill] sm:$0xff] }
 0x52a   : > { %7817 = vmatmul.msk.f32.vlgmr.msrb.gmra.mxu1 %vm10053_vm6, %v15998_v5  ;;  %v2817_v57 = vadd.f32 %v10042_v47, %v2628_v59  ;;  %v2623_v50 = vadd.f32 %v9910_v19, %v2434_v55  ;;  %vm2899_vm6 = vmand %vm2889_vm4, %vm2894_vm5  ;;  %v3045_v19 = vmul.f32 %v9708_v32, %v9708_v32  ;;  %v3037_v54 = vmul.f32 %v16005_v20, %v16005_v20 }
 0x52b   : > { %3003 = vmatpush.msra.mxu2 %v10118_v60  ;;  %v2626_v40 = vadd.f32 %v9956_v4, %v2437_v56  ;;  %v7809_v39 = vsel %vm2899_vm6, 1.0, %v8569_v48  ;;  %v3046_v4 = vmul.f32 %v9705_v52, %v9705_v52  ;;  %v3035_v43 = vmul.f32 %v16007_v49, %v16007_v49  ;;  %3198 = vmatpush.msra.mxu1 %v366_v13 }
 0x52c   : > { %v2812_v58 = vadd.f32 %v9982_v29, %v2623_v50  ;;  %v15999_v29 = vld [vmem:[#allocation83_spill] sm:$0xff]  ;;  %v3033_v33 = vmul.f32 %v16009_v11, %v16009_v11  ;;  %v3032_v25 = vmul.f32 %v16010_v46, %v16010_v46  ;;  %v3031_v24 = vmul.f32 %v16011_v14, %v16011_v14 }
 0x52d   : > { %3004 = vmatpush.msra.mxu2 %v10125_v30  ;;  %v2815_v42 = vadd.f32 %v10010_v10, %v2626_v40  ;;  %v3044_v10 = vmul.f32 %v9714_v3, %v9714_v3  ;;  %v3043_v47 = vmul.f32 %v15999_v29, %v15999_v29  ;;  %v3086_v36 = vmul.f32 %v10118_v60, %v10118_v60 }
 0x52e   : > { %v3085_v56 = vmul.f32 %v10125_v30, %v10125_v30  ;;  %v3084_v16 = vmul.f32 %v2822_v0, %v2822_v0  ;;  %v3083_v55 = vmul.f32 %v2820_v61, %v2820_v61  ;;  %v3082_v59 = vmul.f32 %v2817_v57, %v2817_v57  ;;  %v365_v30 = vld [vmem:[%s15283_s9 + $0x30] sm:$0xff] }
 0x52f   : > { %3005 = vmatpush.msra.mxu2 %v2822_v0  ;;  %v3081_v40 = vmul.f32 %v2815_v42, %v2815_v42  ;;  %v3080_v50 = vmul.f32 %v2812_v58, %v2812_v58  ;;  %v3079_v60 = vmul.f32 %v9949_v2, %v9949_v2  ;;  %3199 = vmatpush.msra.mxu1 %v365_v30  ;;  %v363_v0 = vld [vmem:[%s15283_s9 + $0x20] sm:$0xff] }
 0x531   : > { %3006 = vmatpush.msra.mxu2 %v2820_v61  ;;  %v362_v61 = vld [vmem:[%s15283_s9 + $0x18] sm:$0xff] }
 0x533   : > { %3007 = vmatpush.msra.mxu2 %v2817_v57  ;;  %v361_v57 = vld [vmem:[%s15283_s9 + $0x10] sm:$0xff] }
 0x535   : > { %3008 = vmatpush.msra.mxu2 %v2815_v42  ;;  %v360_v42 = vld [vmem:[%s15283_s9 + $0x8] sm:$0xff] }
 0x537   : > { %3009 = vmatpush.msra.mxu2 %v2812_v58  ;;  %v359_v58 = vld [vmem:[%s15283_s9] sm:$0xff] }
 0x539   : > { %3010 = vmatpush.msra.mxu2 %v9949_v2  ;;  %v364_v2 = vld [vmem:[%s15283_s9 + $0x28] sm:$0xff] }
 0x53a   : > { %7814 = vmatmul.msk.f32.vlgmr.msra.gmra.mxu2 %vm15526_vm0, %v7809_v39  ;;  %3200 = vmatpush.msra.mxu1 %v364_v2 }
 0x53b   : > { %3107 = vmatpush.msrb.mxu2 %v3046_v4 }
 0x53c   : > { %3201 = vmatpush.msra.mxu1 %v363_v0 }
 0x53d   : > { %3108 = vmatpush.msrb.mxu2 %v3045_v19 }
 0x53e   : > { %3202 = vmatpush.msra.mxu1 %v362_v61 }
 0x53f   : > { %3109 = vmatpush.msrb.mxu2 %v3044_v10 }
 0x540   : > { %3203 = vmatpush.msra.mxu1 %v361_v57 }
 0x541   : > { %3110 = vmatpush.msrb.mxu2 %v3043_v47 }
 0x542   : > { %3204 = vmatpush.msra.mxu1 %v360_v42 }
 0x543   : > { %3111 = vmatpush.msrb.mxu2 %v3042_v23 }
 0x544   : > { %3205 = vmatpush.msra.mxu1 %v359_v58 }
 0x545   : > { %3112 = vmatpush.msrb.mxu2 %v3041_v17 }
 0x547   : > { %3113 = vmatpush.msrb.mxu2 %v3040_v37 }
 0x549   : > { %3114 = vmatpush.msrb.mxu2 %v3039_v63  ;;  %v3104_v63 = vpop.f32.mrf.mxu3 }
 0x54b   : > { %3115 = vmatpush.msrb.mxu2 %v3038_v51 }
 0x54d   : > { %3116 = vmatpush.msrb.mxu2 %v3037_v54 }
 0x54f   : > { %3117 = vmatpush.msrb.mxu2 %v3036_v18 }
 0x551   : > { %3118 = vmatpush.msrb.mxu2 %v3035_v43 }
 0x553   : > { %3119 = vmatpush.msrb.mxu2 %v3034_v7 }
 0x555   : > { %3120 = vmatpush.msrb.mxu2 %v3033_v33 }
 0x557   : > { %3121 = vmatpush.msrb.mxu2 %v3032_v25 }
 0x559   : > { %3122 = vmatpush.msrb.mxu2 %v3031_v24 }
 0x55a   : > { %7816 = vmatmul.msk.f32.vlgmr.msrb.gmra.mxu2 %vm10027_vm14, %v15998_v5 }
 0x55b   : > { %3175 = vmatpush.msra.mxu2 %v3086_v36  ;;  %v16012_v36 = vlaneseq }
 0x55d   : > { %3176 = vmatpush.msra.mxu2 %v3085_v56  ;;  %v10211_v56 = vshrl.u32 %v16012_v36, 7 }
 0x55f   : > { %3177 = vmatpush.msra.mxu2 %v3084_v16  ;;  %v3524_v16 = vadd.s32 72, %v10211_v56 }
 0x561   : > { %3178 = vmatpush.msra.mxu2 %v3083_v55  ;;  %v3525_v55 = vadd.s32 80, %v10211_v56 }
 0x563   : > { %3179 = vmatpush.msra.mxu2 %v3082_v59  ;;  %v3526_v59 = vadd.s32 88, %v10211_v56 }
 0x565   : > { %3180 = vmatpush.msra.mxu2 %v3081_v40  ;;  %v3578_v40 = vcvt.s32.f32 %v3524_v16 }
 0x567   : > { %3181 = vmatpush.msra.mxu2 %v3080_v50  ;;  %v3579_v50 = vcvt.s32.f32 %v3525_v55 }
 0x569   : > { %3182 = vmatpush.msra.mxu2 %v3079_v60  ;;  %v3580_v60 = vcvt.s32.f32 %v3526_v59 }
 0x56a   : > { %7819 = vmatmul.msk.f32.vlgmr.msra.gmra.mxu2 %vm15526_vm0, %v7809_v39  ;;  %v2932_v39 = vpop.f32.mrf.mxu1 }
 0x56b   : > { %3221 = vmatpush.msrb.mxu2 %v366_v13  ;;  %v3527_v13 = vadd.s32 96, %v10211_v56 }
 0x56d   : > { %3222 = vmatpush.msrb.mxu2 %v365_v30  ;;  %v3528_v30 = vadd.s32 104, %v10211_v56 }
 0x56f   : > { %3223 = vmatpush.msrb.mxu2 %v364_v2  ;;  %v3529_v2 = vadd.s32 112, %v10211_v56 }
 0x571   : > { %3224 = vmatpush.msrb.mxu2 %v363_v0  ;;  %v3632_v0 = vadd.f32 0.5, %v3578_v40 }
 0x573   : > { %3225 = vmatpush.msrb.mxu2 %v362_v61  ;;  %v3633_v61 = vadd.f32 0.5, %v3579_v50 }
 0x575   : > { %3226 = vmatpush.msrb.mxu2 %v361_v57  ;;  %v3634_v57 = vadd.f32 0.5, %v3580_v60 }
 0x577   : > { %3227 = vmatpush.msrb.mxu2 %v360_v42  ;;  %v3581_v42 = vcvt.s32.f32 %v3527_v13 }
 0x579   : > { %3228 = vmatpush.msrb.mxu2 %v359_v58  ;;  %v3582_v58 = vcvt.s32.f32 %v3528_v30 }
 0x581   : > { %v2952_v48 = vpop.f32.mrf.mxu2 }
 0x582   : > { %v2953_v4 = vadd.f32 %v2952_v48, %v2932_v39  ;;  %v3583_v48 = vcvt.s32.f32 %v3529_v2  ;;  %v3686_v39 = vmul.f32 0.041666668, %v3632_v0  ;;  %v10245_v2 = vadd.s32 128, %v10211_v56 }
 0x58b   : > { %v2972_v19 = vpop.f32.mrf.mxu2 }
 0x58c   : > { %v2973_v10 = vadd.f32 %v2972_v19, %v2953_v4  ;;  %v3687_v4 = vmul.f32 0.041666668, %v3633_v61  ;;  %v3688_v19 = vmul.f32 0.041666668, %v3634_v57 }
 0x58d   : > { %v2992_v47 = vpop.f32.mrf.mxu1 }
 0x58e   : > { %v2993_v23 = vadd.f32 %v2992_v47, %v2973_v10  ;;  %v3635_v10 = vadd.f32 0.5, %v3581_v42  ;;  %v3636_v47 = vadd.f32 0.5, %v3582_v58 }
 0x593   : > { %v3164_v7 = vpop.f32.mrf.mxu3 }
 0x5a7   : > { %v3144_v18 = vpop.f32.mrf.mxu1 }
 0x5bd   : > { %v3012_v17 = vpop.f32.mrf.mxu2 }
 0x5be   : > { %v3013_v37 = vadd.f32 %v3012_v17, %v2993_v23  ;;  %v3637_v23 = vadd.f32 0.5, %v3583_v48  ;;  %v10220_v17 = vadd.s32 120, %v10211_v56 }
 0x5c0   : > { %7820 = vmatmul.msk.f32.vlgmr.msra.gmra.mxu1 %vm15526_vm0, %v3013_v37  ;;  %v10222_v37 = vfloor.f32 %v3686_v39  ;;  %v10252_v39 = vadd.s32 136, %v10211_v56 }
 0x5c2   : > { %16013 = vst [vmem:[#allocation60_spill] sm:$0xff] %v10222_v37 }
 0x5dd   : > { %v3124_v51 = vpop.f32.mrf.mxu2 }
 0x5de   : > { %v3125_v54 = vadd.f32 %v3124_v51, %v3104_v63  ;;  %v10224_v63 = vfloor.f32 %v3687_v4  ;;  %v10226_v51 = vfloor.f32 %v3688_v19  ;;  %v10256_v19 = vadd.s32 144, %v10211_v56 }
 0x5e0   : > { %v3145_v43 = vadd.f32 %v3144_v18, %v3125_v54  ;;  %16014 = vst [vmem:[#allocation42_spill] sm:$0xff] %v10224_v63  ;;  %v3689_v54 = vmul.f32 0.041666668, %v3635_v10  ;;  %v3690_v18 = vmul.f32 0.041666668, %v3636_v47  ;;  %v10265_v10 = vadd.s32 168, %v10211_v56 }
 0x5e1   : > { %16015 = vst [vmem:[#allocation49_spill] sm:$0xff] %v10226_v51  ;;  %v10268_v47 = vadd.s32 176, %v10211_v56 }
 0x5e2   : > { %v3165_v33 = vadd.f32 %v3164_v7, %v3145_v43  ;;  %v3691_v43 = vmul.f32 0.041666668, %v3637_v23  ;;  %v15348_v7 = vcvt.s32.f32 %v10220_v17  ;;  %v10232_v36 = vfloor.f32 %v3689_v54 }
 0x5e3   : > { %v10234_v16 = vfloor.f32 %v3690_v18  ;;  %v10271_v23 = vadd.s32 184, %v10211_v56  ;;  %v10275_v18 = vadd.s32 192, %v10211_v56 }
 0x5e4   : > { %16016 = vst [vmem:[#allocation54_spill] sm:$0xff] %v10232_v36  ;;  %v10236_v55 = vfloor.f32 %v3691_v43  ;;  %v3638_v59 = vadd.f32 0.5, %v15348_v7  ;;  %v3797_v61 = vmul.f32 24.0, %v10232_v36  ;;  %v10278_v43 = vadd.s32 200, %v10211_v56 }
 0x5e5   : > { %16017 = vst [vmem:[#allocation31_spill] sm:$0xff] %v10234_v16  ;;  %v3798_v57 = vmul.f32 24.0, %v10234_v16  ;;  %v10289_v7 = vadd.s32 216, %v10211_v56  ;;  %v16033_v36 = vcvt.s32.f32 %v10271_v23 }
 0x5e6   : > { %16018 = vst [vmem:[#allocation39_spill] sm:$0xff] %v10236_v55  ;;  %v3799_v4 = vmul.f32 24.0, %v10236_v55  ;;  %v16032_v55 = vcvt.s32.f32 %v10268_v47 }
 0x5e7   : > { %v16037_v44 = vcvt.s32.f32 %v10289_v7 }
 0x5e8   : > { %v10291_v5 = vsub.f32 %v3583_v48, %v3799_v4  ;;  %v3645_v16 = vadd.f32 0.5, %v16032_v55 }
 0x5ea   : > { %16024 = vst [vmem:[#allocation33_spill] sm:$0xff] %v10291_v5  ;;  %v3699_v8 = vmul.f32 0.041666668, %v3645_v16 }
 0x5ed   : > { %v3184_v25 = vpop.f32.mrf.mxu2 }
 0x5ee   : > { %v3185_v24 = vadd.f32 %v3184_v25, %v3165_v33  ;;  %v3794_v33 = vmul.f32 24.0, %v10222_v37  ;;  %v3795_v25 = vmul.f32 24.0, %v10224_v63 }
 0x5f0   : > { %7821 = vmatmul.msk.f32.vlgmr.msrb.gmra.mxu2 %vm15526_vm0, %v3185_v24  ;;  %v3796_v24 = vmul.f32 24.0, %v10226_v51  ;;  %v10240_v13 = vsub.f32 %v3578_v40, %v3794_v33  ;;  %v10242_v30 = vsub.f32 %v3579_v50, %v3795_v25  ;;  %v10259_v40 = vadd.s32 152, %v10211_v56 }
 0x5f1   : > { %v10262_v50 = vadd.s32 160, %v10211_v56  ;;  %v10281_v33 = vadd.s32 208, %v10211_v56  ;;  %v10283_v25 = vsub.f32 %v3581_v42, %v3797_v61  ;;  %v10310_v42 = vadd.s32 224, %v10211_v56 }
 0x5f2   : > { %16019 = vst [vmem:[#allocation47_spill] sm:$0xff] %v10240_v13  ;;  %v10247_v0 = vsub.f32 %v3580_v60, %v3796_v24  ;;  %v3692_v60 = vmul.f32 0.041666668, %v3638_v59  ;;  %v10285_v24 = vsub.f32 %v3582_v58, %v3798_v57  ;;  %v16026_v57 = vcvt.s32.f32 %v10245_v2 }
 0x5f3   : > { %16020 = vst [vmem:[#allocation50_spill] sm:$0xff] %v10242_v30  ;;  %v10313_v58 = vadd.s32 232, %v10211_v56  ;;  %v16028_v61 = vcvt.s32.f32 %v10256_v19  ;;  %v16029_v48 = vcvt.s32.f32 %v10259_v40  ;;  %v16030_v4 = vcvt.s32.f32 %v10262_v50 }
 0x5f4   : > { %16021 = vst [vmem:[#allocation44_spill] sm:$0xff] %v10247_v0  ;;  %v10296_v13 = vfloor.f32 %v3692_v60  ;;  %v3639_v59 = vadd.f32 0.5, %v16026_v57  ;;  %v16027_v0 = vcvt.s32.f32 %v10252_v39  ;;  %v16031_v60 = vcvt.s32.f32 %v10265_v10 }
 0x5f5   : > { %16022 = vst [vmem:[#allocation46_spill] sm:$0xff] %v10283_v25  ;;  %v3641_v57 = vadd.f32 0.5, %v16028_v61  ;;  %v3642_v5 = vadd.f32 0.5, %v16029_v48  ;;  %v3643_v54 = vadd.f32 0.5, %v16030_v4  ;;  %v3646_v61 = vadd.f32 0.5, %v16033_v36 }
 0x5f6   : > { %16023 = vst [vmem:[#allocation28_spill] sm:$0xff] %v10285_v24  ;;  %v3640_v30 = vadd.f32 0.5, %v16027_v0  ;;  %v10322_v24 = vadd.s32 240, %v10211_v56  ;;  %v3800_v0 = vmul.f32 24.0, %v10296_v13  ;;  %v3644_v25 = vadd.f32 0.5, %v16031_v60 }
 0x5f7   : > { %16025 = vst [vmem:[#allocation43_spill] sm:$0xff] %v10296_v13  ;;  %v3693_v51 = vmul.f32 0.041666668, %v3639_v59  ;;  %v16034_v48 = vcvt.s32.f32 %v10275_v18  ;;  %v16035_v4 = vcvt.s32.f32 %v10278_v43  ;;  %v16036_v31 = vcvt.s32.f32 %v10281_v33 }
 0x5f8   : > { %v3694_v13 = vmul.f32 0.041666668, %v3640_v30  ;;  %v3650_v60 = vadd.f32 0.5, %v16037_v44  ;;  %v3695_v41 = vmul.f32 0.041666668, %v3641_v57  ;;  %v16043_v57 = vcvt.s32.f32 %v10313_v58 }
 0x5f9   : > { %v3647_v63 = vadd.f32 0.5, %v16034_v48  ;;  %v3648_v37 = vadd.f32 0.5, %v16035_v4  ;;  %v3649_v21 = vadd.f32 0.5, %v16036_v31  ;;  %v3696_v36 = vmul.f32 0.041666668, %v3642_v5 }
 0x5fa   : > { %v3697_v59 = vmul.f32 0.041666668, %v3643_v54  ;;  %v16038_v48 = vcvt.s32.f32 %v10220_v17  ;;  %v3698_v4 = vmul.f32 0.041666668, %v3644_v25  ;;  %v3700_v31 = vmul.f32 0.041666668, %v3646_v61 }
 0x5fb   : > { %v10346_v30 = vfloor.f32 %v3693_v51  ;;  %v3701_v9 = vmul.f32 0.041666668, %v3647_v63  ;;  %v3702_v44 = vmul.f32 0.041666668, %v3648_v37  ;;  %v3703_v15 = vmul.f32 0.041666668, %v3649_v21 }
 0x5fc   : > { %v10344_v62 = vsub.f32 %v16038_v48, %v3800_v0  ;;  %v10348_v35 = vfloor.f32 %v3694_v13  ;;  %v3704_v55 = vmul.f32 0.041666668, %v3650_v60  ;;  %v16042_v5 = vcvt.s32.f32 %v10310_v42 }
 0x5fd   : > { %16040 = vst [vmem:[#allocation41_spill] sm:$0xff] %v10346_v30  ;;  %v3652_v53 = vadd.f32 0.5, %v16043_v57  ;;  %v10354_v17 = vfloor.f32 %v3695_v41  ;;  %v10356_v0 = vfloor.f32 %v3696_v36  ;;  %v10358_v16 = vfloor.f32 %v3697_v59 }
 0x5fe   : > { %16039 = vst [vmem:[#allocation40_spill] sm:$0xff] %v10344_v62  ;;  %v3651_v54 = vadd.f32 0.5, %v16042_v5  ;;  %v16047_v51 = vcvt.s32.f32 %v10322_v24  ;;  %v10362_v37 = vfloor.f32 %v3698_v4  ;;  %v10364_v21 = vfloor.f32 %v3699_v8 }
 0x5ff   : > { %16041 = vst [vmem:[#allocation64_spill] sm:$0xff] %v10348_v35  ;;  %v10366_v13 = vfloor.f32 %v3700_v31  ;;  %v10369_v25 = vadd.s32 248, %v10211_v56  ;;  %v3801_v61 = vmul.f32 24.0, %v10346_v30  ;;  %v10372_v41 = vfloor.f32 %v3701_v9 }
 0x600   : > { %16044 = vst [vmem:[#allocation25_spill] sm:$0xff] %v10354_v17  ;;  %v3653_v63 = vadd.f32 0.5, %v16047_v51  ;;  %v10374_v60 = vfloor.f32 %v3702_v44  ;;  %v10376_v36 = vfloor.f32 %v3703_v15  ;;  %v3802_v59 = vmul.f32 24.0, %v10348_v35 }
 0x601   : > { %16045 = vst [vmem:[#allocation29_spill] sm:$0xff] %v10356_v0  ;;  %v10379_v48 = vfloor.f32 %v3704_v55  ;;  %v3705_v4 = vmul.f32 0.041666668, %v3651_v54  ;;  %v3706_v8 = vmul.f32 0.041666668, %v3652_v53  ;;  %v3803_v31 = vmul.f32 24.0, %v10354_v17 }
 0x602   : > { %16046 = vst [vmem:[#allocation37_spill] sm:$0xff] %v10358_v16  ;;  %v3804_v5 = vmul.f32 24.0, %v10356_v0  ;;  %v3805_v57 = vmul.f32 24.0, %v10358_v16  ;;  %v3707_v51 = vmul.f32 0.041666668, %v3653_v63  ;;  %v3806_v9 = vmul.f32 24.0, %v10362_v37 }
 0x603   : > { %16048 = vst [vmem:[#allocation36_spill] sm:$0xff] %v10362_v37  ;;  %v3807_v44 = vmul.f32 24.0, %v10364_v21  ;;  %v3808_v15 = vmul.f32 24.0, %v10366_v13  ;;  %v16055_v55 = vcvt.s32.f32 %v10245_v2  ;;  %v3809_v53 = vmul.f32 24.0, %v10372_v41 }
 0x604   : > { %16049 = vst [vmem:[#allocation22_spill] sm:$0xff] %v10364_v21  ;;  %v3810_v54 = vmul.f32 24.0, %v10374_v60  ;;  %v3811_v0 = vmul.f32 24.0, %v10376_v36  ;;  %v16057_v63 = vcvt.s32.f32 %v10252_v39  ;;  %v3812_v21 = vmul.f32 24.0, %v10379_v48 }
 0x605   : > { %16050 = vst [vmem:[#allocation26_spill] sm:$0xff] %v10366_v13  ;;  %v10390_v35 = vsub.f32 %v16055_v55, %v3801_v61  ;;  %v10400_v37 = vfloor.f32 %v3705_v4  ;;  %v10402_v13 = vfloor.f32 %v3706_v8  ;;  %v16061_v2 = vcvt.s32.f32 %v10256_v19 }
 0x606   : > { %16051 = vst [vmem:[#allocation34_spill] sm:$0xff] %v10372_v41  ;;  %v10397_v16 = vsub.f32 %v16057_v63, %v3802_v59  ;;  %v16063_v55 = vcvt.s32.f32 %v10259_v40  ;;  %v10416_v39 = vfloor.f32 %v3707_v51  ;;  %v16068_v59 = vcvt.s32.f32 %v10265_v10 }
 0x607   : > { %16052 = vst [vmem:[#allocation32_spill] sm:$0xff] %v10374_v60  ;;  %v10406_v61 = vsub.f32 %v16061_v2, %v3803_v31  ;;  %v16070_v8 = vcvt.s32.f32 %v10268_v47  ;;  %v16072_v19 = vcvt.s32.f32 %v10271_v23  ;;  %v16074_v40 = vcvt.s32.f32 %v10369_v25 }
 0x608   : > { %16053 = vst [vmem:[#allocation23_spill] sm:$0xff] %v10376_v36  ;;  %v10410_v62 = vsub.f32 %v16063_v55, %v3804_v5  ;;  %v10420_v4 = vsub.f32 %v16068_v59, %v3806_v9  ;;  %v16079_v51 = vcvt.s32.f32 %v10281_v33  ;;  %v10445_v9 = vadd.s32 256, %v10211_v56 }
 0x609   : > { %16054 = vst [vmem:[#allocation30_spill] sm:$0xff] %v10379_v48  ;;  %v10424_v63 = vsub.f32 %v16070_v8, %v3807_v44  ;;  %v10428_v31 = vsub.f32 %v16072_v19, %v3808_v15  ;;  %v3654_v5 = vadd.f32 0.5, %v16074_v40  ;;  %v16081_v23 = vcvt.s32.f32 %v10289_v7 }
 0x60a   : > { %16056 = vst [vmem:[#allocation27_spill] sm:$0xff] %v10390_v35  ;;  %v16065_v35 = vcvt.s32.f32 %v10262_v50  ;;  %v10442_v47 = vsub.f32 %v16079_v51, %v3811_v0  ;;  %v3813_v15 = vmul.f32 24.0, %v10400_v37  ;;  %v10458_v33 = vadd.s32 272, %v10211_v56 }
 0x60b   : > { %16058 = vst [vmem:[#allocation24_spill] sm:$0xff] %v10397_v16  ;;  %v10449_v44 = vsub.f32 %v16081_v23, %v3812_v21  ;;  %v10461_v0 = vadd.s32 280, %v10211_v56  ;;  %v3708_v7 = vmul.f32 0.041666668, %v3654_v5  ;;  %v10467_v21 = vadd.s32 296, %v10211_v56 }
 0x60c   : > { %16059 = vst [vmem:[#allocation66_spill] sm:$0xff] %v10400_v37  ;;  %v10414_v36 = vsub.f32 %v16065_v35, %v3805_v57  ;;  %v16075_v35 = vcvt.s32.f32 %v10275_v18  ;;  %v16077_v57 = vcvt.s32.f32 %v10278_v43  ;;  %v3814_v18 = vmul.f32 24.0, %v10402_v13 }
 0x60d   : > { %16060 = vst [vmem:[#allocation65_spill] sm:$0xff] %v10402_v13  ;;  %v3815_v43 = vmul.f32 24.0, %v10416_v39  ;;  %v10470_v2 = vadd.s32 304, %v10211_v56  ;;  %v10473_v55 = vadd.s32 312, %v10211_v56  ;;  %v10477_v8 = vadd.s32 320, %v10211_v56 }
 0x60e   : > { %16062 = vst [vmem:[#allocation63_spill] sm:$0xff] %v10406_v61  ;;  %v10434_v50 = vsub.f32 %v16075_v35, %v3809_v53  ;;  %v10438_v10 = vsub.f32 %v16077_v57, %v3810_v54  ;;  %v10454_v53 = vadd.s32 264, %v10211_v56  ;;  %v10464_v54 = vadd.s32 288, %v10211_v56 }
 0x60f   : > { %16064 = vst [vmem:[#allocation8_spill] sm:$0xff] %v10410_v62  ;;  %v10480_v19 = vadd.s32 328, %v10211_v56  ;;  %v10483_v40 = vadd.s32 336, %v10211_v56  ;;  %v16083_v5 = vcvt.s32.f32 %v10310_v42  ;;  %v16085_v57 = vcvt.s32.f32 %v10313_v58 }
 0x610   : > { %16066 = vst [vmem:[#allocation62_spill] sm:$0xff] %v10414_v36  ;;  %v10495_v59 = vadd.s32 344, %v10211_v56  ;;  %v10518_v58 = vadd.s32 352, %v10211_v56 }
 0x611   : > { %16067 = vst [vmem:[#allocation7_spill] sm:$0xff] %v10416_v39  ;;  %v10487_v35 = vsub.f32 %v16083_v5, %v3813_v15  ;;  %v10491_v51 = vsub.f32 %v16085_v57, %v3814_v18  ;;  %v10504_v15 = vfloor.f32 %v3708_v7  ;;  %v16090_v57 = vcvt.s32.f32 %v10445_v9 }
 0x612   : > { %16069 = vst [vmem:[#allocation59_spill] sm:$0xff] %v10420_v4  ;;  %v10521_v18 = vadd.s32 360, %v10211_v56  ;;  %v16094_v7 = vcvt.s32.f32 %v10467_v21  ;;  %v16099_v61 = vcvt.s32.f32 %v10483_v40  ;;  %v16100_v39 = vcvt.s32.f32 %v10495_v59 }
 0x613   : > { %16071 = vst [vmem:[#allocation6_spill] sm:$0xff] %v10424_v63  ;;  %v3655_v23 = vadd.f32 0.5, %v16090_v57  ;;  %v16096_v63 = vcvt.s32.f32 %v10473_v55 }
 0x614   : > { %16073 = vst [vmem:[#allocation56_spill] sm:$0xff] %v10428_v31  ;;  %v3665_v16 = vadd.f32 0.5, %v16099_v61 }
 0x615   : > { %16076 = vst [vmem:[#allocation5_spill] sm:$0xff] %v10434_v50  ;;  %v16091_v50 = vcvt.s32.f32 %v10454_v53  ;;  %v3709_v4 = vmul.f32 0.041666668, %v3655_v23 }
 0x616   : > { %16078 = vst [vmem:[#allocation53_spill] sm:$0xff] %v10438_v10  ;;  %v15405_v10 = vcvt.s32.f32 %v10458_v33  ;;  %v3719_v30 = vmul.f32 0.041666668, %v3665_v16 }
 0x617   : > { %16080 = vst [vmem:[#allocation83_spill] sm:$0xff] %v10442_v47  ;;  %v3656_v42 = vadd.f32 0.5, %v16091_v50  ;;  %v3816_v50 = vmul.f32 24.0, %v10504_v15 }
 0x618   : > { %16082 = vst [vmem:[#allocation84_spill] sm:$0xff] %v10449_v44  ;;  %v16087_v44 = vcvt.s32.f32 %v10322_v24  ;;  %v3657_v57 = vadd.f32 0.5, %v15405_v10  ;;  %v16092_v24 = vcvt.s32.f32 %v10461_v0  ;;  %v3662_v10 = vadd.f32 0.5, %v16096_v63 }
 0x619   : > { %16084 = vst [vmem:[#allocation10_spill] sm:$0xff] %v10487_v35  ;;  %v16095_v35 = vcvt.s32.f32 %v10470_v2 }
 0x61a   : > { %16086 = vst [vmem:[#allocation9_spill] sm:$0xff] %v10491_v51  ;;  %v10499_v47 = vsub.f32 %v16087_v44, %v3815_v43  ;;  %v3658_v5 = vadd.f32 0.5, %v16092_v24  ;;  %v16093_v44 = vcvt.s32.f32 %v10464_v54  ;;  %v3660_v51 = vadd.f32 0.5, %v16094_v7 }
 0x61b   : > { %16089 = vst [vmem:[#allocation81_spill] sm:$0xff] %v10504_v15  ;;  %v3661_v31 = vadd.f32 0.5, %v16095_v35  ;;  %v16097_v24 = vcvt.s32.f32 %v10477_v8  ;;  %v3710_v15 = vmul.f32 0.041666668, %v3656_v42  ;;  %v3666_v7 = vadd.f32 0.5, %v16100_v39 }
 0x61c   : > { %16088 = vst [vmem:[#allocation82_spill] sm:$0xff] %v10499_v47  ;;  %v3659_v43 = vadd.f32 0.5, %v16093_v44  ;;  %v10530_v47 = vadd.s32 368, %v10211_v56  ;;  %v16098_v44 = vcvt.s32.f32 %v10480_v19  ;;  %v3711_v37 = vmul.f32 0.041666668, %v3657_v57 }
 0x61d   : > { %v3663_v36 = vadd.f32 0.5, %v16097_v24  ;;  %v3712_v63 = vmul.f32 0.041666668, %v3658_v5  ;;  %v16101_v24 = vcvt.s32.f32 %v10369_v25  ;;  %v3715_v41 = vmul.f32 0.041666668, %v3661_v31 }
 0x61e   : > { %v3664_v62 = vadd.f32 0.5, %v16098_v44  ;;  %v3713_v23 = vmul.f32 0.041666668, %v3659_v43  ;;  %v3714_v44 = vmul.f32 0.041666668, %v3660_v51  ;;  %v10554_v42 = vfloor.f32 %v3709_v4 }
 0x61f   : > { %v10552_v60 = vsub.f32 %v16101_v24, %v3816_v50  ;;  %v3716_v61 = vmul.f32 0.041666668, %v3662_v10  ;;  %v3717_v17 = vmul.f32 0.041666668, %v3663_v36  ;;  %v10556_v13 = vfloor.f32 %v3710_v15 }
 0x620   : > { %16103 = vst [vmem:[#allocation79_spill] sm:$0xff] %v10554_v42  ;;  %v3718_v39 = vmul.f32 0.041666668, %v3664_v62  ;;  %v3720_v35 = vmul.f32 0.041666668, %v3666_v7  ;;  %v16105_v5 = vcvt.s32.f32 %v10518_v58  ;;  %v16106_v57 = vcvt.s32.f32 %v10521_v18 }
 0x621   : > { %16102 = vst [vmem:[#allocation80_spill] sm:$0xff] %v10552_v60  ;;  %v10562_v25 = vfloor.f32 %v3711_v37  ;;  %v10564_v50 = vfloor.f32 %v3712_v63  ;;  %v10566_v31 = vfloor.f32 %v3713_v23  ;;  %v16110_v4 = vcvt.s32.f32 %v10530_v47 }
 0x622   : > { %16104 = vst [vmem:[#allocation78_spill] sm:$0xff] %v10556_v13  ;;  %v3667_v43 = vadd.f32 0.5, %v16105_v5  ;;  %v3668_v48 = vadd.f32 0.5, %v16106_v57  ;;  %v10570_v62 = vfloor.f32 %v3714_v44  ;;  %v10572_v16 = vfloor.f32 %v3715_v41 }
 0x623   : > { %16107 = vst [vmem:[#allocation77_spill] sm:$0xff] %v10562_v25  ;;  %v3669_v36 = vadd.f32 0.5, %v16110_v4  ;;  %v10574_v10 = vfloor.f32 %v3716_v61  ;;  %v10577_v51 = vadd.s32 376, %v10211_v56  ;;  %v3817_v15 = vmul.f32 24.0, %v10554_v42 }
 0x624   : > { %16108 = vst [vmem:[#allocation76_spill] sm:$0xff] %v10564_v50  ;;  %v10580_v37 = vfloor.f32 %v3717_v17  ;;  %v10582_v7 = vfloor.f32 %v3718_v39  ;;  %v10584_v63 = vfloor.f32 %v3719_v30  ;;  %v3818_v23 = vmul.f32 24.0, %v10556_v13 }
 0x625   : > { %16109 = vst [vmem:[#allocation75_spill] sm:$0xff] %v10566_v31  ;;  %v10587_v24 = vfloor.f32 %v3720_v35  ;;  %v3721_v44 = vmul.f32 0.041666668, %v3667_v43  ;;  %v3722_v41 = vmul.f32 0.041666668, %v3668_v48  ;;  %v3819_v61 = vmul.f32 24.0, %v10562_v25 }
 0x626   : > { %16111 = vst [vmem:[#allocation72_spill] sm:$0xff] %v10570_v62  ;;  %v3820_v5 = vmul.f32 24.0, %v10564_v50  ;;  %v3821_v57 = vmul.f32 24.0, %v10566_v31  ;;  %v3723_v4 = vmul.f32 0.041666668, %v3669_v36  ;;  %v3822_v17 = vmul.f32 24.0, %v10570_v62 }
 0x627   : > { %16112 = vst [vmem:[#allocation93_spill] sm:$0xff] %v10572_v16  ;;  %v3823_v39 = vmul.f32 24.0, %v10572_v16  ;;  %v3824_v30 = vmul.f32 24.0, %v10574_v10  ;;  %v16118_v35 = vcvt.s32.f32 %v10445_v9  ;;  %v3825_v48 = vmul.f32 24.0, %v10580_v37 }
 0x628   : > { %16113 = vst [vmem:[#allocation94_spill] sm:$0xff] %v10574_v10  ;;  %v3826_v43 = vmul.f32 24.0, %v10582_v7  ;;  %v3827_v50 = vmul.f32 24.0, %v10584_v63  ;;  %v16120_v36 = vcvt.s32.f32 %v10454_v53  ;;  %v3828_v16 = vmul.f32 24.0, %v10587_v24 }
 0x629   : > { %16114 = vst [vmem:[#allocation95_spill] sm:$0xff] %v10580_v37  ;;  %v10598_v13 = vsub.f32 %v16118_v35, %v3817_v15  ;;  %v10608_v62 = vfloor.f32 %v3721_v44  ;;  %v10610_v10 = vfloor.f32 %v3722_v41  ;;  %v16124_v9 = vcvt.s32.f32 %v10458_v33 }
 0x62a   : > { %16115 = vst [vmem:[#allocation96_spill] sm:$0xff] %v10582_v7  ;;  %v10605_v31 = vsub.f32 %v16120_v36, %v3818_v23  ;;  %v16126_v35 = vcvt.s32.f32 %v10461_v0  ;;  %v10624_v53 = vfloor.f32 %v3723_v4  ;;  %v16131_v23 = vcvt.s32.f32 %v10467_v21 }
 0x62b   : > { %16116 = vst [vmem:[#allocation97_spill] sm:$0xff] %v10584_v63  ;;  %v10614_v15 = vsub.f32 %v16124_v9, %v3819_v61  ;;  %v16133_v41 = vcvt.s32.f32 %v10470_v2  ;;  %v16135_v33 = vcvt.s32.f32 %v10473_v55  ;;  %v16137_v0 = vcvt.s32.f32 %v10577_v51 }
 0x62c   : > { %16117 = vst [vmem:[#allocation98_spill] sm:$0xff] %v10587_v24  ;;  %v10618_v60 = vsub.f32 %v16126_v35, %v3820_v5  ;;  %v10628_v44 = vsub.f32 %v16131_v23, %v3822_v17  ;;  %v16142_v4 = vcvt.s32.f32 %v10483_v40  ;;  %v10653_v17 = vadd.s32 384, %v10211_v56 }
 0x62d   : > { %16119 = vst [vmem:[#allocation99_spill] sm:$0xff] %v10598_v13  ;;  %v16128_v13 = vcvt.s32.f32 %v10464_v54  ;;  %v10632_v36 = vsub.f32 %v16133_v41, %v3823_v39  ;;  %v10636_v61 = vsub.f32 %v16135_v33, %v3824_v30  ;;  %v3670_v5 = vadd.f32 0.5, %v16137_v0 }
 0x62e   : > { %16121 = vst [vmem:[#allocation100_spill] sm:$0xff] %v10605_v31  ;;  %v10650_v2 = vsub.f32 %v16142_v4, %v3827_v50  ;;  %v16144_v55 = vcvt.s32.f32 %v10495_v59  ;;  %v3829_v30 = vmul.f32 24.0, %v10608_v62  ;;  %v10666_v40 = vadd.s32 400, %v10211_v56 }
 0x62f   : > { %16122 = vst [vmem:[#allocation101_spill] sm:$0xff] %v10608_v62  ;;  %v10622_v63 = vsub.f32 %v16128_v13, %v3821_v57  ;;  %v16138_v13 = vcvt.s32.f32 %v10477_v8  ;;  %v16140_v57 = vcvt.s32.f32 %v10480_v19  ;;  %v3830_v8 = vmul.f32 24.0, %v10610_v10 }
 0x630   : > { %16123 = vst [vmem:[#allocation102_spill] sm:$0xff] %v10610_v10  ;;  %v10657_v39 = vsub.f32 %v16144_v55, %v3828_v16  ;;  %v3831_v19 = vmul.f32 24.0, %v10624_v53  ;;  %v10669_v50 = vadd.s32 408, %v10211_v56  ;;  %v3724_v59 = vmul.f32 0.041666668, %v3670_v5 }
 0x631   : > { %16125 = vst [vmem:[#allocation103_spill] sm:$0xff] %v10614_v15  ;;  %v10642_v54 = vsub.f32 %v16138_v13, %v3825_v48  ;;  %v10646_v21 = vsub.f32 %v16140_v57, %v3826_v43  ;;  %v10662_v48 = vadd.s32 392, %v10211_v56  ;;  %v10672_v43 = vadd.s32 416, %v10211_v56 }
 0x632   : > { %16127 = vst [vmem:[#allocation104_spill] sm:$0xff] %v10618_v60  ;;  %v10675_v16 = vadd.s32 424, %v10211_v56  ;;  %v10678_v9 = vadd.s32 432, %v10211_v56  ;;  %v10681_v35 = vadd.s32 440, %v10211_v56  ;;  %v10685_v41 = vadd.s32 448, %v10211_v56 }
 0x633   : > { %16129 = vst [vmem:[#allocation105_spill] sm:$0xff] %v10622_v63  ;;  %v10688_v33 = vadd.s32 456, %v10211_v56  ;;  %v10691_v0 = vadd.s32 464, %v10211_v56  ;;  %v16146_v5 = vcvt.s32.f32 %v10518_v58  ;;  %v16148_v57 = vcvt.s32.f32 %v10521_v18 }
 0x634   : > { %16130 = vst [vmem:[#allocation106_spill] sm:$0xff] %v10624_v53  ;;  %v10703_v23 = vadd.s32 472, %v10211_v56  ;;  %v10726_v18 = vadd.s32 480, %v10211_v56  ;;  %v16167_v24 = vcvt.s32.f32 %v10577_v51 }
 0x635   : > { %16132 = vst [vmem:[#allocation107_spill] sm:$0xff] %v10628_v44  ;;  %v10695_v13 = vsub.f32 %v16146_v5, %v3829_v30  ;;  %v10699_v4 = vsub.f32 %v16148_v57, %v3830_v8  ;;  %v10712_v30 = vfloor.f32 %v3724_v59  ;;  %v16153_v57 = vcvt.s32.f32 %v10653_v17 }
 0x636   : > { %16134 = vst [vmem:[#allocation108_spill] sm:$0xff] %v10632_v36  ;;  %v10729_v8 = vadd.s32 488, %v10211_v56  ;;  %v16160_v59 = vcvt.s32.f32 %v10675_v16  ;;  %v16162_v36 = vcvt.s32.f32 %v10681_v35 }
 0x637   : > { %16136 = vst [vmem:[#allocation109_spill] sm:$0xff] %v10636_v61  ;;  %v3671_v55 = vadd.f32 0.5, %v16153_v57 }
 0x638   : > { %16139 = vst [vmem:[#allocation110_spill] sm:$0xff] %v10642_v54  ;;  %v16154_v54 = vcvt.s32.f32 %v10662_v48 }
 0x639   : > { %16141 = vst [vmem:[#allocation111_spill] sm:$0xff] %v10646_v21  ;;  %v15454_v21 = vcvt.s32.f32 %v10666_v40  ;;  %v3725_v44 = vmul.f32 0.041666668, %v3671_v55 }
 0x63a   : > { %16143 = vst [vmem:[#allocation112_spill] sm:$0xff] %v10650_v2  ;;  %v3672_v58 = vadd.f32 0.5, %v16154_v54  ;;  %v3832_v54 = vmul.f32 24.0, %v10712_v30 }
 0x63b   : > { %16145 = vst [vmem:[#allocation113_spill] sm:$0xff] %v10657_v39  ;;  %v16150_v39 = vcvt.s32.f32 %v10530_v47  ;;  %v3673_v57 = vadd.f32 0.5, %v15454_v21  ;;  %v16157_v47 = vcvt.s32.f32 %v10669_v50  ;;  %v3678_v21 = vadd.f32 0.5, %v16162_v36 }
 0x63c   : > { %16147 = vst [vmem:[#allocation114_spill] sm:$0xff] %v10695_v13  ;;  %v16161_v13 = vcvt.s32.f32 %v10678_v9  ;;  %v3726_v31 = vmul.f32 0.041666668, %v3672_v58  ;;  %v10762_v37 = vfloor.f32 %v3725_v44 }
 0x63d   : > { %16149 = vst [vmem:[#allocation115_spill] sm:$0xff] %v10699_v4  ;;  %v10707_v2 = vsub.f32 %v16150_v39, %v3831_v19  ;;  %v3674_v5 = vadd.f32 0.5, %v16157_v47  ;;  %v16158_v39 = vcvt.s32.f32 %v10672_v43  ;;  %v3676_v4 = vadd.f32 0.5, %v16160_v59 }
 0x63e   : > { %16152 = vst [vmem:[#allocation117_spill] sm:$0xff] %v10712_v30  ;;  %v3677_v61 = vadd.f32 0.5, %v16161_v13  ;;  %v16163_v47 = vcvt.s32.f32 %v10685_v41  ;;  %v16166_v30 = vcvt.s32.f32 %v10703_v23  ;;  %v15479_v13 = vcvt.s32.f32 %v10729_v8 }
 0x63f   : > { %16151 = vst [vmem:[#allocation116_spill] sm:$0xff] %v10707_v2  ;;  %v3675_v19 = vadd.f32 0.5, %v16158_v39  ;;  %v10738_v2 = vadd.s32 496, %v10211_v56  ;;  %v16164_v39 = vcvt.s32.f32 %v10688_v33  ;;  %v16165_v56 = vcvt.s32.f32 %v10691_v0 }
 0x640   : > { %16155 = vst [vmem:[#allocation118_spill] sm:$0xff] %v10726_v18  ;;  %v3679_v63 = vadd.f32 0.5, %v16163_v47  ;;  %v3682_v59 = vadd.f32 0.5, %v16166_v30  ;;  %v3727_v10 = vmul.f32 0.041666668, %v3673_v57  ;;  %v3207_v47 = vpop.f32.mrf.mxu1  ;;  %v16170_v57 = vcvt.s32.f32 %v10726_v18  ;;  %v16245_v18 = vld [vmem:[#allocation38_spill] sm:$0xff] }
 0x641   : > { %16156 = vst [vmem:[#allocation119_spill] sm:$0xff] %v10729_v8  ;;  %v3680_v60 = vadd.f32 0.5, %v16164_v39  ;;  %v3681_v15 = vadd.f32 0.5, %v16165_v56  ;;  %v3728_v36 = vmul.f32 0.041666668, %v3674_v5  ;;  %v10760_v39 = vsub.f32 %v16167_v24, %v3832_v54  ;;  %v16243_v8 = vld [vmem:[#allocation55_spill] sm:$0xff] }
 0x642   : > { %16159 = vst [vmem:[#allocation120_spill] sm:$0xff] %v10738_v2  ;;  %v3729_v55 = vmul.f32 0.041666668, %v3675_v19  ;;  %v3730_v7 = vmul.f32 0.041666668, %v3676_v4  ;;  %v3683_v5 = vadd.f32 0.5, %v16170_v57  ;;  %v3233_v62 = vmul.f32 %v3207_v47, %v3207_v47 }
 0x643   : > { %16168 = vst [vmem:[#allocation121_spill] sm:$0xff] %v10760_v39  ;;  %v3731_v56 = vmul.f32 0.041666668, %v3677_v61  ;;  %v3732_v58 = vmul.f32 0.041666668, %v3678_v21  ;;  %v3684_v19 = vadd.f32 0.5, %v15479_v13  ;;  %v10768_v6 = vfloor.f32 %v3726_v31 }
 0x644   : > { %16169 = vst [vmem:[#allocation122_spill] sm:$0xff] %v10762_v37  ;;  %v3733_v30 = vmul.f32 0.041666668, %v3679_v63  ;;  %v3734_v25 = vmul.f32 0.041666668, %v3680_v60  ;;  %v10770_v51 = vfloor.f32 %v3727_v10  ;;  %v10772_v24 = vfloor.f32 %v3728_v36  ;;  %v16242_v39 = vld [vmem:[#allocation92_spill] sm:$0xff] }
 0x645   : > { %v3735_v53 = vmul.f32 0.041666668, %v3681_v15  ;;  %v3736_v42 = vmul.f32 0.041666668, %v3682_v59  ;;  %16171 = vst [vmem:[#allocation123_spill] sm:$0xff] %v10768_v6  ;;  %v16174_v44 = vcvt.s32.f32 %v10738_v2  ;;  %v10776_v60 = vfloor.f32 %v3729_v55 }
 0x646   : > { %16172 = vst [vmem:[#allocation124_spill] sm:$0xff] %v10770_v51  ;;  %v10778_v15 = vfloor.f32 %v3730_v7  ;;  %v10780_v21 = vfloor.f32 %v3731_v56  ;;  %v10782_v54 = vfloor.f32 %v3732_v58  ;;  %v10784_v59 = vfloor.f32 %v3733_v30 }
 0x647   : > { %16173 = vst [vmem:[#allocation125_spill] sm:$0xff] %v10772_v24  ;;  %v3685_v61 = vadd.f32 0.5, %v16174_v44  ;;  %v10786_v31 = vfloor.f32 %v3734_v25  ;;  %v10788_v10 = vfloor.f32 %v3735_v53  ;;  %v10790_v36 = vfloor.f32 %v3736_v42 }
 0x648   : > { %16175 = vst [vmem:[#allocation126_spill] sm:$0xff] %v10776_v60  ;;  %v3737_v57 = vmul.f32 0.041666668, %v3683_v5  ;;  %v3738_v44 = vmul.f32 0.041666668, %v3684_v19  ;;  %v3833_v7 = vmul.f32 24.0, %v10762_v37 }
 0x649   : > { %16176 = vst [vmem:[#allocation127_spill] sm:$0xff] %v10778_v15  ;;  %v3834_v55 = vmul.f32 24.0, %v10768_v6  ;;  %v3739_v56 = vmul.f32 0.041666668, %v3685_v61  ;;  %v3836_v58 = vmul.f32 24.0, %v10772_v24  ;;  %v3837_v25 = vmul.f32 24.0, %v10776_v60 }
 0x64a   : > { %16177 = vst [vmem:[#allocation128_spill] sm:$0xff] %v10780_v21  ;;  %v3838_v53 = vmul.f32 24.0, %v10778_v15  ;;  %v3839_v42 = vmul.f32 24.0, %v10780_v21  ;;  %v3840_v30 = vmul.f32 24.0, %v10782_v54  ;;  %v3841_v5 = vmul.f32 24.0, %v10784_v59 }
 0x64b   : > { %16178 = vst [vmem:[#allocation129_spill] sm:$0xff] %v10782_v54  ;;  %v3842_v19 = vmul.f32 24.0, %v10786_v31  ;;  %v3844_v61 = vmul.f32 24.0, %v10790_v36  ;;  %v10809_v24 = vfloor.f32 %v3738_v44  ;;  %v16185_v15 = vcvt.s32.f32 %v10653_v17 }
 0x64c   : > { %16179 = vst [vmem:[#allocation130_spill] sm:$0xff] %v10784_v59  ;;  %v16187_v21 = vcvt.s32.f32 %v10662_v48  ;;  %v10819_v54 = vfloor.f32 %v3739_v56  ;;  %v10821_v59 = vperm.slane %v3207_v47, 0  ;;  %v16194_v17 = vcvt.s32.f32 %v10672_v43 }
 0x64d   : > { %16180 = vst [vmem:[#allocation131_spill] sm:$0xff] %v10786_v31  ;;  %v10813_v60 = vsub.f32 %v16185_v15, %v3833_v7  ;;  %v16196_v48 = vcvt.s32.f32 %v10675_v16  ;;  %v16198_v7 = vcvt.s32.f32 %v10678_v9  ;;  %v16204_v43 = vcvt.s32.f32 %v10688_v33  ;;  %v16213_v33 = vld [vmem:[#allocation74_spill] sm:$0xff] }
 0x64e   : > { %16181 = vst [vmem:[#allocation132_spill] sm:$0xff] %v10788_v10  ;;  %v10817_v2 = vsub.f32 %v16187_v21, %v3834_v55  ;;  %v10833_v15 = vsub.f32 %v16194_v17, %v3837_v25  ;;  %v16206_v16 = vcvt.s32.f32 %v10691_v0  ;;  %v16208_v9 = vcvt.s32.f32 %v10703_v23  ;;  %v16214_v0 = vld [vmem:[#allocation73_spill] sm:$0xff]  ;;  %v16215_v23 = vld [vmem:[#allocation71_spill] sm:$0xff] }
 0x64f   : > { %16182 = vst [vmem:[#allocation133_spill] sm:$0xff] %v10790_v36  ;;  %v10837_v21 = vsub.f32 %v16196_v48, %v3838_v53  ;;  %v10841_v47 = vsub.f32 %v16198_v7, %v3839_v42  ;;  %v10870_v53 = vmul.f32 24.0, %v10819_v54  ;;  %v16218_v48 = vld [vmem:[#allocation67_spill] sm:$0xff]  ;;  %v3265_v17 = vsub.f32 %v16000_v12, %v10821_v59  ;;  %v16222_v42 = vld [vmem:[#allocation13_spill] sm:$0xff] }
 0x650   : > { %16184 = vst [vmem:[#allocation135_spill] sm:$0xff] %v10809_v24  ;;  %v10861_v25 = vsub.f32 %v16208_v9, %v3844_v61  ;;  %v3266_v7 = vsub.f32 %v15999_v29, %v10821_v59  ;;  %v3270_v61 = vsub.f32 %v9725_v45, %v10821_v59  ;;  %v3271_v12 = vsub.f32 %v9739_v34, %v10821_v59  ;;  %v16223_v45 = vld [vmem:[#allocation14_spill] sm:$0xff]  ;;  %v16224_v34 = vld [vmem:[#allocation15_spill] sm:$0xff] }
 0x651   : > { %16186 = vst [vmem:[#allocation136_spill] sm:$0xff] %v10813_v60  ;;  %v16241_v60 = vld [vmem:[#allocation35_spill] sm:$0xff] }
 0x652   : > { %16188 = vst [vmem:[#allocation137_spill] sm:$0xff] %v10817_v2 }
 0x653   : > { %16189 = vst [vmem:[#allocation138_spill] sm:$0xff] %v10819_v54  ;;  %v3275_v54 = vsub.f32 %v16223_v45, %v10821_v59 }
 0x654   : > { %16195 = vst [vmem:[#allocation141_spill] sm:$0xff] %v10833_v15  ;;  %v16233_v15 = vld [vmem:[#allocation18_spill] sm:$0xff] }
 0x655   : > { %16197 = vst [vmem:[#allocation142_spill] sm:$0xff] %v10837_v21 }
 0x656   : > { %16199 = vst [vmem:[#allocation143_spill] sm:$0xff] %v10841_v47  ;;  %v16232_v47 = vld [vmem:[#allocation85_spill] sm:$0xff] }
 0x657   : > { %16209 = vst [vmem:[#allocation148_spill] sm:$0xff] %v10861_v25 }
 0x658   : > { %16212 = vst [vmem:[#allocation151_spill] sm:$0xff] %v10870_v53 }
 0x673   : > { %v3230_v63 = vpop.f32.mrf.mxu2 }
 0x674   : > { %v3234_v4 = vsub.f32 %v3230_v63, %v3233_v62  ;;  %v3835_v62 = vmul.f32 24.0, %v10770_v51  ;;  %v3843_v63 = vmul.f32 24.0, %v10788_v10  ;;  %v16190_v10 = vcvt.s32.f32 %v10666_v40 }
 0x675   : > { %v16200_v40 = vcvt.s32.f32 %v10681_v35 }
 0x676   : > { %v10792_v13 = vadd.f32 1e-05, %v3234_v4  ;;  %v10807_v4 = vfloor.f32 %v3737_v57  ;;  %v10825_v31 = vsub.f32 %v16190_v10, %v3835_v62  ;;  %v16192_v57 = vcvt.s32.f32 %v10669_v50 }
 0x677   : > { %v10845_v10 = vsub.f32 %v16200_v40, %v3840_v30  ;;  %v16202_v50 = vcvt.s32.f32 %v10685_v41  ;;  %v10853_v62 = vsub.f32 %v16204_v43, %v3842_v19  ;;  %v10867_v41 = vmul.f32 24.0, %v10809_v24  ;;  %v16219_v40 = vld [vmem:[#allocation68_spill] sm:$0xff]  ;;  %v16220_v19 = vld [vmem:[#allocation11_spill] sm:$0xff] }
 0x678   : > { %8490 = vrsqrt.f32 %v10792_v13  ;;  %16183 = vst [vmem:[#allocation134_spill] sm:$0xff] %v10807_v4  ;;  %v10829_v44 = vsub.f32 %v16192_v57, %v3836_v58  ;;  %v10857_v58 = vsub.f32 %v16206_v16, %v3843_v63  ;;  %v10864_v35 = vmul.f32 24.0, %v10807_v4  ;;  %v16216_v63 = vld [vmem:[#allocation70_spill] sm:$0xff]  ;;  %v16217_v57 = vld [vmem:[#allocation69_spill] sm:$0xff]  ;;  %v16221_v30 = vld [vmem:[#allocation12_spill] sm:$0xff] }
 0x679   : > { %16191 = vst [vmem:[#allocation139_spill] sm:$0xff] %v10825_v31  ;;  %v10849_v55 = vsub.f32 %v16202_v50, %v3841_v5  ;;  %v3267_v50 = vsub.f32 %v9714_v3, %v10821_v59  ;;  %v3268_v43 = vsub.f32 %v9708_v32, %v10821_v59  ;;  %v3272_v29 = vsub.f32 %v16220_v19, %v10821_v59  ;;  %v16225_v19 = vld [vmem:[#allocation16_spill] sm:$0xff]  ;;  %v16235_v31 = vld [vmem:[#allocation57_spill] sm:$0xff] }
 0x67a   : > { %16193 = vst [vmem:[#allocation140_spill] sm:$0xff] %v10829_v44  ;;  %v3273_v3 = vsub.f32 %v16221_v30, %v10821_v59  ;;  %v3274_v32 = vsub.f32 %v16222_v42, %v10821_v59  ;;  %vm3242_vm7 = vweird.f32 %v10792_v13  ;;  %v3276_v24 = vsub.f32 %v16224_v34, %v10821_v59  ;;  %v16226_v30 = vld [vmem:[#allocation17_spill] sm:$0xff]  ;;  %v16227_v42 = vld [vmem:[#allocation19_spill] sm:$0xff]  ;;  %v16234_v44 = vld [vmem:[#allocation88_spill] sm:$0xff] }
 0x67b   : > { %16201 = vst [vmem:[#allocation144_spill] sm:$0xff] %v10845_v10  ;;  %v3277_v4 = vsub.f32 %v16225_v19, %v10821_v59  ;;  %v3278_v25 = vsub.f32 %v16226_v30, %v10821_v59  ;;  %v16231_v10 = vld [vmem:[#allocation86_spill] sm:$0xff]  ;;  %v3284_v30 = vsub.f32 %v16232_v47, %v10821_v59  ;;  %v16239_v47 = vld [vmem:[#allocation45_spill] sm:$0xff]  ;;  %v16252_v6 = vsub.f32 %v16216_v63, %v10821_v59 }
 0x67c   : > { %16203 = vst [vmem:[#allocation145_spill] sm:$0xff] %v10849_v55  ;;  %v16230_v55 = vld [vmem:[#allocation87_spill] sm:$0xff]  ;;  %v3283_v19 = vsub.f32 %v16231_v10, %v10821_v59  ;;  %v16238_v10 = vld [vmem:[#allocation90_spill] sm:$0xff] }
 0x67d   : > { %16205 = vst [vmem:[#allocation146_spill] sm:$0xff] %v10853_v62  ;;  %v3282_v34 = vsub.f32 %v16230_v55, %v10821_v59  ;;  %v16237_v55 = vld [vmem:[#allocation52_spill] sm:$0xff]  ;;  %v3290_v53 = vsub.f32 %v16238_v10, %v10821_v59 }
 0x67e   : > { %v8491_v56 = vpop.eup %8490  ;;  %16207 = vst [vmem:[#allocation147_spill] sm:$0xff] %v10857_v58  ;;  %v3279_v58 = vsub.f32 %v16227_v42, %v10821_v59  ;;  %v3285_v42 = vsub.f32 %v16233_v15, %v10821_v59  ;;  %v3289_v2 = vsub.f32 %v16237_v55, %v10821_v59  ;;  %v16240_v15 = vld [vmem:[#allocation91_spill] sm:$0xff]  ;;  %v3295_v55 = vsub.f32 %v16243_v8, %v10821_v59 }
 0x67f   : > { %16210 = vst [vmem:[#allocation149_spill] sm:$0xff] %v10864_v35  ;;  %v3237_v5 = vmul.f32 %v8491_v56, %v10792_v13  ;;  %vm3243_vm14 = vweird.f32 %v8491_v56  ;;  %v16229_v13 = vld [vmem:[#allocation21_spill] sm:$0xff] }
 0x680   : > { %16211 = vst [vmem:[#allocation150_spill] sm:$0xff] %v10867_v41  ;;  %vm3244_vm8 = vmor %vm3242_vm7, %vm3243_vm14  ;;  %v3281_v36 = vsub.f32 %v16229_v13, %v10821_v59  ;;  %v3287_v13 = vsub.f32 %v16235_v31, %v10821_v59  ;;  %v3293_v31 = vsub.f32 %v16241_v60, %v10821_v59  ;;  %v16244_v41 = vld [vmem:[#allocation48_spill] sm:$0xff]  ;;  %v16248_v60 = vld [vmem:[#allocation51_spill] sm:$0xff] }
 0x681   : > { %v3238_v9 = vmul.f32 %v8491_v56, %v3237_v5  ;;  %v3296_v10 = vsub.f32 %v16244_v41, %v10821_v59  ;;  %v16250_v41 = vsub.f32 %v16214_v0, %v10821_v59 }
 0x683   : > { %v3239_v16 = vmul.f32 0.5, %v3238_v9  ;;  %v3269_v9 = vsub.f32 %v9705_v52, %v10821_v59 }
 0x685   : > { %v3240_v5 = vsub.f32 1.5, %v3239_v16  ;;  %v2910_v16 = vld [vmem:[%s15277_s3] sm:$0x1] }
 0x687   : > { %v3241_v52 = vmul.f32 %v8491_v56, %v3240_v5  ;;  %v16228_v5 = vld [vmem:[#allocation20_spill] sm:$0xff] }
 0x688   : > { %v3280_v62 = vsub.f32 %v16228_v5, %v10821_v59  ;;  %v3286_v5 = vsub.f32 %v16234_v44, %v10821_v59  ;;  %v3292_v44 = vsub.f32 %v16240_v15, %v10821_v59  ;;  %v16247_v15 = vld [vmem:[#allocation58_spill] sm:$0xff] }
 0x689   : > { %v3245_v45 = vsel %vm3244_vm8, %v8491_v56, %v3241_v52  ;;  %v16236_v56 = vld [vmem:[#allocation89_spill] sm:$0xff] }
 0x68a   : > { %v3301_v21 = vmul.f32 %v3245_v45, %v2910_v16  ;;  %v3288_v52 = vsub.f32 %v16236_v56, %v10821_v59  ;;  %v3291_v16 = vsub.f32 %v16239_v47, %v10821_v59  ;;  %v3294_v56 = vsub.f32 %v16242_v39, %v10821_v59 }
 0x68b   : > { %v3297_v47 = vsub.f32 %v16245_v18, %v10821_v59  ;;  %v16249_v39 = vsub.f32 %v16213_v33, %v10821_v59 }
 0x68c   : > { %v10967_v45 = vperm.slane %v3301_v21, 0  ;;  %v16246_v21 = vld [vmem:[#allocation61_spill] sm:$0xff] }
 0x68d   : > { %v3298_v35 = vsub.f32 %v16246_v21, %v10821_v59  ;;  %v16251_v21 = vsub.f32 %v16215_v23, %v10821_v59 }
 0x68e   : > { %v10991_v8 = vmul.f32 %v10967_v45, %v16249_v39  ;;  %v10997_v18 = vmul.f32 %v10967_v45, %v16250_v41  ;;  %v11009_v33 = vmul.f32 %v10967_v45, %v16252_v6  ;;  %v16253_v39 = vsub.f32 %v16217_v57, %v10821_v59 }
 0x68f   : > { %v11003_v51 = vmul.f32 %v10967_v45, %v16251_v21  ;;  %v16254_v41 = vsub.f32 %v16218_v48, %v10821_v59  ;;  %v16255_v21 = vsub.f32 %v16219_v40, %v10821_v59  ;;  %v16256_v6 = vsub.f32 %v16011_v14, %v10821_v59 }
 0x690   : > { %v11015_v0 = vmul.f32 %v10967_v45, %v16253_v39  ;;  %v16257_v39 = vsub.f32 %v16010_v46, %v10821_v59  ;;  %v11155_v37 = vmul.f32 %v10967_v45, %v3293_v31  ;;  %v11172_v31 = vmul.f32 %v10967_v45, %v3296_v10 }
 0x691   : > { %v11021_v23 = vmul.f32 %v10967_v45, %v16254_v41  ;;  %v11027_v63 = vmul.f32 %v10967_v45, %v16255_v21  ;;  %v11033_v57 = vmul.f32 %v10967_v45, %v16256_v6  ;;  %v16258_v41 = vsub.f32 %v16009_v11, %v10821_v59 }
 0x692   : > { %v11039_v48 = vmul.f32 %v10967_v45, %v16257_v39  ;;  %v16259_v21 = vsub.f32 %v16008_v1, %v10821_v59  ;;  %v16260_v6 = vsub.f32 %v16007_v49, %v10821_v59  ;;  %v16261_v39 = vsub.f32 %v16006_v38, %v10821_v59  ;;  %16264 = vst [vmem:[#allocation71_spill] sm:$0xff] %v11155_v37  ;;  %v16274_v37 = vld [vmem:[#allocation31_spill] sm:$0xff] }
 0x693   : > { %v11045_v40 = vmul.f32 %v10967_v45, %v16258_v41  ;;  %v11066_v41 = vmul.f32 %v10967_v45, %v3265_v17  ;;  %v11069_v1 = vmul.f32 %v10967_v45, %v3266_v7  ;;  %v11075_v49 = vmul.f32 %v10967_v45, %v3268_v43  ;;  %16271 = vst [vmem:[#allocation67_spill] sm:$0xff] %v11172_v31 }
 0x694   : > { %v11051_v14 = vmul.f32 %v10967_v45, %v16259_v21  ;;  %v11057_v46 = vmul.f32 %v10967_v45, %v16260_v6  ;;  %v11063_v11 = vmul.f32 %v10967_v45, %v16261_v39  ;;  %v11072_v21 = vmul.f32 %v10967_v45, %v3267_v50 }
 0x695   : > { %v11078_v6 = vmul.f32 %v10967_v45, %v3269_v9  ;;  %v11081_v38 = vmul.f32 %v10967_v45, %v3270_v61  ;;  %v11084_v39 = vmul.f32 %v10967_v45, %v3271_v12  ;;  %v11087_v17 = vmul.f32 %v10967_v45, %v3272_v29 }
 0x696   : > { %v11090_v7 = vmul.f32 %v10967_v45, %v3273_v3  ;;  %v11093_v50 = vmul.f32 %v10967_v45, %v3274_v32  ;;  %v11096_v43 = vmul.f32 %v10967_v45, %v3275_v54  ;;  %v11099_v9 = vmul.f32 %v10967_v45, %v3276_v24 }
 0x697   : > { %v11102_v61 = vmul.f32 %v10967_v45, %v3277_v4  ;;  %v11105_v12 = vmul.f32 %v10967_v45, %v3278_v25  ;;  %v11108_v29 = vmul.f32 %v10967_v45, %v3279_v58  ;;  %v11111_v3 = vmul.f32 %v10967_v45, %v3280_v62 }
 0x698   : > { %v11114_v32 = vmul.f32 %v10967_v45, %v3281_v36  ;;  %v11117_v54 = vmul.f32 %v10967_v45, %v3282_v34  ;;  %v11120_v24 = vmul.f32 %v10967_v45, %v3283_v19  ;;  %v11123_v4 = vmul.f32 %v10967_v45, %v3284_v30  ;;  %v11134_v36 = vld [vmem:[%s15278_s4] ss:$0 sm:$0xff] }
 0x699   : > { %v11126_v25 = vmul.f32 %v10967_v45, %v3285_v42  ;;  %v11129_v58 = vmul.f32 %v10967_v45, %v3286_v5  ;;  %v11137_v62 = vmul.f32 %v10967_v45, %v3287_v13  ;;  %v11140_v34 = vmul.f32 %v10967_v45, %v3288_v52  ;;  %v16266_v52 = vld [vmem:[#allocation60_spill] sm:$0xff] }
 0x69a   : > { %v11143_v19 = vmul.f32 %v10967_v45, %v3289_v2  ;;  %v11146_v30 = vmul.f32 %v10967_v45, %v3290_v53  ;;  %v11149_v42 = vmul.f32 %v10967_v45, %v3291_v16  ;;  %v11152_v5 = vmul.f32 %v10967_v45, %v3292_v44  ;;  %v16267_v2 = vld [vmem:[#allocation42_spill] sm:$0xff]  ;;  %v16268_v53 = vld [vmem:[#allocation49_spill] sm:$0xff] }
 0x69b   : > { %v11158_v13 = vmul.f32 %v10967_v45, %v3294_v56  ;;  %vm3902_vm9 = vcmp.ge.f32.partialorder %v16266_v52, 4.0  ;;  %vm3956_vm10 = vcmp.lt.f32.partialorder %v16266_v52, 20.0  ;;  %vm3903_vm11 = vcmp.ge.f32.partialorder %v16267_v2, 4.0  ;;  %v16269_v16 = vld [vmem:[#allocation54_spill] sm:$0xff]  ;;  %v16357_v52 = vld [vmem:[#allocation44_spill] sm:$0xff] }
 0x69c   : > { %16262 = vst [vmem:[#allocation74_spill] sm:$0xff] %v11149_v42  ;;  %vm3957_vm12 = vcmp.lt.f32.partialorder %v16267_v2, 20.0  ;;  %vm3904_vm13 = vcmp.ge.f32.partialorder %v16268_v53, 4.0  ;;  %vm3958_vm15 = vcmp.lt.f32.partialorder %v16268_v53, 20.0  ;;  %vm3905_vm1 = vcmp.ge.f32.partialorder %v16269_v16, 4.0  ;;  %v16276_v42 = vld [vmem:[#allocation43_spill] sm:$0xff]  ;;  %vm11418_vm14 = vmand %vm3902_vm9, %vm3956_vm10 }
 0x69d   : > { %16263 = vst [vmem:[#allocation73_spill] sm:$0xff] %v11152_v5  ;;  %vm3959_vm2 = vcmp.lt.f32.partialorder %v16269_v16, 20.0  ;;  %v11169_v44 = vmul.f32 %v10967_v45, %v3295_v55  ;;  %v11175_v56 = vmul.f32 %v10967_v45, %v3297_v47  ;;  %v16275_v5 = vld [vmem:[#allocation39_spill] sm:$0xff]  ;;  %v16277_v55 = vld [vmem:[#allocation41_spill] sm:$0xff]  ;;  %v16280_v47 = vsub.f32 %v16004_v27, %v10821_v59  ;;  %vm11427_vm5 = vmand %vm3903_vm11, %vm3957_vm12 }
 0x69e   : > { %16265 = vst [vmem:[#allocation70_spill] sm:$0xff] %v11158_v13  ;;  %v11178_v13 = vmul.f32 %v10967_v45, %v3298_v35  ;;  %v16278_v35 = vsub.f32 %v16005_v20, %v10821_v59  ;;  %v16287_v27 = vld [vmem:[#allocation25_spill] sm:$0xff]  ;;  %vm11436_vm9 = vmand %vm3904_vm13, %vm3958_vm15  ;;  %v11454_v53 = vadd.f32 %v11134_v36, %v11126_v25  ;;  %v11462_v16 = vadd.f32 %v11134_v36, %v11137_v62  ;;  %v16370_v25 = vld [vmem:[#allocation28_spill] sm:$0xff] }
 0x69f   : > { %16270 = vst [vmem:[#allocation69_spill] sm:$0xff] %v11169_v44  ;;  %v16284_v44 = vsub.f32 %v16248_v60, %v10821_v59  ;;  %v16290_v60 = vsub.f32 %v16003_v28, %v10821_v59  ;;  %v16295_v28 = vld [vmem:[#allocation36_spill] sm:$0xff]  ;;  %vm11445_vm11 = vmand %vm3905_vm1, %vm3959_vm2  ;;  %vm16366_vm13 = vcmp.lt.f32.partialorder %v16274_v37, 20.0  ;;  %vm16367_vm15 = vcmp.ge.f32.partialorder %v16274_v37, 4.0  ;;  %v16375_v62 = vld [vmem:[#allocation33_spill] sm:$0xff] }
 0x6a0   : > { %16272 = vst [vmem:[#allocation68_spill] sm:$0xff] %v11175_v56  ;;  %v11192_v10 = vmul.f32 %v10967_v45, %v16278_v35  ;;  %v16282_v56 = vsub.f32 %v16247_v15, %v10821_v59  ;;  %v16286_v35 = vld [vmem:[#allocation64_spill] sm:$0xff]  ;;  %v16289_v15 = vld [vmem:[#allocation37_spill] sm:$0xff]  ;;  %vm11472_vm1 = vmand %vm16367_vm15, %vm16366_vm13  ;;  %vm16371_vm6 = vcmp.lt.f32.partialorder %v16275_v5, 20.0  ;;  %vm16372_vm7 = vcmp.ge.f32.partialorder %v16275_v5, 4.0 }
 0x6a1   : > { %16273 = vst [vmem:[#allocation11_spill] sm:$0xff] %v11178_v13  ;;  %v11198_v13 = vmul.f32 %v10967_v45, %v16280_v47  ;;  %v11210_v20 = vmul.f32 %v10967_v45, %v16284_v44  ;;  %v16288_v47 = vld [vmem:[#allocation29_spill] sm:$0xff]  ;;  %v11224_v44 = vmul.f32 %v10967_v45, %v16290_v60  ;;  %v16296_v60 = vld [vmem:[#allocation22_spill] sm:$0xff]  ;;  %vm11481_vm12 = vmand %vm16372_vm7, %vm16371_vm6  ;;  %vm16376_vm3 = vcmp.lt.f32.partialorder %v16276_v42, 20.0 }
 0x6a2   : > { %16279 = vst [vmem:[#allocation12_spill] sm:$0xff] %v11192_v10  ;;  %v11204_v31 = vmul.f32 %v10967_v45, %v16282_v56  ;;  %v16291_v56 = vsub.f32 %v16002_v22, %v10821_v59  ;;  %v16292_v10 = vsub.f32 %v16001_v26, %v10821_v59  ;;  %v16297_v22 = vld [vmem:[#allocation26_spill] sm:$0xff]  ;;  %v11252_v59 = vadd.f32 %v11134_v36, %v10997_v18 }
 0x6a3   : > { %16281 = vst [vmem:[#allocation13_spill] sm:$0xff] %v11198_v13  ;;  %v16298_v26 = vld [vmem:[#allocation34_spill] sm:$0xff]  ;;  %vm16377_vm4 = vcmp.ge.f32.partialorder %v16276_v42, 4.0  ;;  %v16378_v37 = vmov 0  ;;  %vm16381_vm2 = vcmp.lt.f32.partialorder %v16277_v55, 20.0  ;;  %vm16382_vm8 = vcmp.ge.f32.partialorder %v16277_v55, 4.0 }
 0x6a4   : > { %16283 = vst [vmem:[#allocation14_spill] sm:$0xff] %v11204_v31  ;;  %v11230_v13 = vmul.f32 %v10967_v45, %v16291_v56  ;;  %v11240_v31 = vadd.f32 %v11134_v36, %v10991_v8  ;;  %v11260_v8 = vadd.f32 %v11134_v36, %v11009_v33  ;;  %v16303_v56 = vld [vmem:[#allocation32_spill] sm:$0xff]  ;;  %v16305_v18 = vld [vmem:[#allocation30_spill] sm:$0xff]  ;;  %v11276_v33 = vadd.f32 %v11134_v36, %v11021_v23  ;;  %v16313_v23 = vld [vmem:[#allocation81_spill] sm:$0xff] }
 0x6a5   : > { %16285 = vst [vmem:[#allocation15_spill] sm:$0xff] %v11210_v20  ;;  %v11236_v20 = vmul.f32 %v10967_v45, %v16292_v10  ;;  %v11256_v45 = vadd.f32 %v11134_v36, %v11003_v51  ;;  %v11264_v10 = vadd.f32 %v11134_v36, %v11015_v0  ;;  %v16306_v51 = vld [vmem:[#allocation66_spill] sm:$0xff]  ;;  %v11280_v0 = vadd.f32 %v11134_v36, %v11027_v63  ;;  %v16314_v63 = vld [vmem:[#allocation79_spill] sm:$0xff]  ;;  %vm11490_vm13 = vmand %vm16377_vm4, %vm16376_vm3 }
 0x6a6   : > { %16294 = vst [vmem:[#allocation17_spill] sm:$0xff] %v11240_v31  ;;  %v16379_v37 = vsel %vm11490_vm13, 4294967295, %v16378_v37  ;;  %vm11499_vm6 = vmand %vm16382_vm8, %vm16381_vm2  ;;  %v16383_v5 = vmov 0  ;;  %v11508_v42 = vadd.f32 %v11134_v36, %v11143_v19  ;;  %vm16393_vm3 = vcmp.lt.f32.partialorder %v16286_v35, 20.0  ;;  %v16397_v19 = vld [vmem:[#allocation24_spill] sm:$0xff] }
 0x6a7   : > { %16293 = vst [vmem:[#allocation16_spill] sm:$0xff] %v11236_v20  ;;  %v16304_v20 = vld [vmem:[#allocation23_spill] sm:$0xff]  ;;  %v16384_v5 = vsel %vm11499_vm6, 4294967295, %v16383_v5  ;;  %vm16394_vm4 = vcmp.ge.f32.partialorder %v16286_v35, 4.0  ;;  %vm16398_vm10 = vcmp.lt.f32.partialorder %v16287_v27, 20.0  ;;  %vm16399_vm0 = vcmp.ge.f32.partialorder %v16287_v27, 4.0 }
 0x6a8   : > { %16299 = vst [vmem:[#allocation19_spill] sm:$0xff] %v11252_v59  ;;  %v16312_v59 = vld [vmem:[#allocation7_spill] sm:$0xff]  ;;  %vm11526_vm8 = vmand %vm16394_vm4, %vm16393_vm3  ;;  %vm16403_vm6 = vcmp.lt.f32.partialorder %v16288_v47, 20.0  ;;  %vm16404_vm13 = vcmp.ge.f32.partialorder %v16288_v47, 4.0  ;;  %v16405_v35 = vmov 0  ;;  %vm16409_vm2 = vcmp.lt.f32.partialorder %v16289_v15, 20.0 }
 0x6a9   : > { %16300 = vst [vmem:[#allocation20_spill] sm:$0xff] %v11256_v45  ;;  %v16311_v45 = vld [vmem:[#allocation65_spill] sm:$0xff]  ;;  %vm11535_vm7 = vmand %vm16399_vm0, %vm16398_vm10  ;;  %v16411_v27 = vmov 0  ;;  %v16416_v47 = vld [vmem:[#allocation71_spill] sm:$0xff]  ;;  %vm16429_vm15 = vcmp.lt.f32.partialorder %v16296_v60, 20.0  ;;  %vm16462_vm4 = vcmp.lt.f32.partialorder %v16304_v20, 20.0 }
 0x6aa   : > { %16301 = vst [vmem:[#allocation21_spill] sm:$0xff] %v11260_v8  ;;  %v11288_v8 = vadd.f32 %v11134_v36, %v11039_v48  ;;  %v11304_v48 = vadd.f32 %v11134_v36, %v11051_v14  ;;  %v16322_v14 = vld [vmem:[#allocation75_spill] sm:$0xff]  ;;  %vm11544_vm3 = vmand %vm16404_vm13, %vm16403_vm6  ;;  %vm16424_vm13 = vcmp.lt.f32.partialorder %v16295_v28, 20.0  ;;  %vm16425_vm6 = vcmp.ge.f32.partialorder %v16295_v28, 4.0 }
 0x6ab   : > { %16302 = vst [vmem:[#allocation87_spill] sm:$0xff] %v11264_v10  ;;  %v11284_v10 = vadd.f32 %v11134_v36, %v11033_v57  ;;  %v11300_v57 = vadd.f32 %v11134_v36, %v11045_v40  ;;  %v16321_v40 = vld [vmem:[#allocation76_spill] sm:$0xff]  ;;  %v16406_v35 = vsel %vm11544_vm3, 4294967295, %v16405_v35  ;;  %vm16436_vm3 = vcmp.ge.f32.partialorder %v16297_v22, 4.0 }
 0x6ac   : > { %16307 = vst [vmem:[#allocation86_spill] sm:$0xff] %v11276_v33  ;;  %v16320_v33 = vld [vmem:[#allocation77_spill] sm:$0xff]  ;;  %v16437_v28 = vmov 0 }
 0x6ad   : > { %16308 = vst [vmem:[#allocation85_spill] sm:$0xff] %v11280_v0  ;;  %v16319_v0 = vld [vmem:[#allocation78_spill] sm:$0xff] }
 0x6ae   : > { %16309 = vst [vmem:[#allocation18_spill] sm:$0xff] %v11284_v10  ;;  %v11312_v10 = vadd.f32 %v11134_v36, %v11063_v11  ;;  %v11328_v11 = vadd.f32 %v11134_v36, %v11069_v1  ;;  %v11346_v1 = vadd.f32 %v11134_v36, %v11078_v6  ;;  %v11364_v6 = vadd.f32 %v11134_v36, %v11090_v7 }
 0x6af   : > { %16310 = vst [vmem:[#allocation88_spill] sm:$0xff] %v11288_v8  ;;  %v11308_v8 = vadd.f32 %v11134_v36, %v11057_v46  ;;  %v11324_v46 = vadd.f32 %v11134_v36, %v11066_v41  ;;  %v16329_v41 = vld [vmem:[#allocation94_spill] sm:$0xff]  ;;  %v11382_v7 = vadd.f32 %v11134_v36, %v11102_v61  ;;  %v11400_v61 = vadd.f32 %v11134_v36, %v11114_v32  ;;  %v16351_v32 = vld [vmem:[#allocation47_spill] sm:$0xff] }
 0x6b0   : > { %16315 = vst [vmem:[#allocation57_spill] sm:$0xff] %v11300_v57  ;;  %v16328_v57 = vld [vmem:[#allocation93_spill] sm:$0xff] }
 0x6b1   : > { %16316 = vst [vmem:[#allocation89_spill] sm:$0xff] %v11304_v48  ;;  %v16327_v48 = vld [vmem:[#allocation72_spill] sm:$0xff] }
 0x6b2   : > { %16317 = vst [vmem:[#allocation52_spill] sm:$0xff] %v11308_v8  ;;  %v11336_v8 = vadd.f32 %v11134_v36, %v11075_v49  ;;  %v11354_v49 = vadd.f32 %v11134_v36, %v11084_v39  ;;  %v11372_v39 = vadd.f32 %v11134_v36, %v11096_v43  ;;  %v11390_v43 = vadd.f32 %v11134_v36, %v11108_v29 }
 0x6b3   : > { %16318 = vst [vmem:[#allocation90_spill] sm:$0xff] %v11312_v10  ;;  %v11332_v10 = vadd.f32 %v11134_v36, %v11072_v21  ;;  %v11350_v21 = vadd.f32 %v11134_v36, %v11081_v38  ;;  %v11368_v38 = vadd.f32 %v11134_v36, %v11093_v50  ;;  %v11386_v50 = vadd.f32 %v11134_v36, %v11105_v12 }
 0x6b4   : > { %16323 = vst [vmem:[#allocation45_spill] sm:$0xff] %v11324_v46  ;;  %v11404_v12 = vadd.f32 %v11134_v36, %v11117_v54  ;;  %v11408_v29 = vadd.f32 %v11134_v36, %v11120_v24  ;;  %v16354_v24 = vld [vmem:[#allocation50_spill] sm:$0xff]  ;;  %v16636_v54 = vmov 0 }
 0x6b5   : > { %16324 = vst [vmem:[#allocation91_spill] sm:$0xff] %v11328_v11 }
 0x6b6   : > { %16325 = vst [vmem:[#allocation35_spill] sm:$0xff] %v11332_v10  ;;  %v16334_v10 = vld [vmem:[#allocation95_spill] sm:$0xff] }
 0x6b7   : > { %16326 = vst [vmem:[#allocation92_spill] sm:$0xff] %v11336_v8  ;;  %v11358_v8 = vadd.f32 %v11134_v36, %v11087_v17  ;;  %v11376_v17 = vadd.f32 %v11134_v36, %v11099_v9  ;;  %v11394_v9 = vadd.f32 %v11134_v36, %v11111_v3  ;;  %v11412_v3 = vadd.f32 %v11134_v36, %v11123_v4 }
 0x6b8   : > { %16330 = vst [vmem:[#allocation55_spill] sm:$0xff] %v11346_v1 }
 0x6b9   : > { %16331 = vst [vmem:[#allocation48_spill] sm:$0xff] %v11350_v21 }
 0x6ba   : > { %16332 = vst [vmem:[#allocation38_spill] sm:$0xff] %v11354_v49 }
 0x6bb   : > { %16333 = vst [vmem:[#allocation61_spill] sm:$0xff] %v11358_v8  ;;  %v16339_v8 = vld [vmem:[#allocation96_spill] sm:$0xff] }
 0x6bc   : > { %16335 = vst [vmem:[#allocation58_spill] sm:$0xff] %v11364_v6  ;;  %v16420_v6 = vld [vmem:[#allocation69_spill] sm:$0xff] }
 0x6bd   : > { %16336 = vst [vmem:[#allocation51_spill] sm:$0xff] %v11368_v38 }
 0x6be   : > { %16337 = vst [vmem:[#allocation60_spill] sm:$0xff] %v11372_v39  ;;  %v16395_v39 = vmov 0  ;;  %v16645_v2 = vld [vmem:[#allocation92_spill] sm:$0xff] }
 0x6bf   : > { %16338 = vst [vmem:[#allocation42_spill] sm:$0xff] %v11376_v17  ;;  %v16344_v17 = vld [vmem:[#allocation97_spill] sm:$0xff]  ;;  %v16396_v39 = vsel %vm11526_vm8, 4294967295, %v16395_v39  ;;  %vm16410_vm8 = vcmp.ge.f32.partialorder %v16289_v15, 4.0  ;;  %v11570_v15 = vadd.f32 %v11134_v36, %v16420_v6  ;;  %v16431_v6 = vmov 0 }
 0x6c0   : > { %16340 = vst [vmem:[#allocation49_spill] sm:$0xff] %v11382_v7  ;;  %vm11553_vm0 = vmand %vm16410_vm8, %vm16409_vm2  ;;  %vm16441_vm2 = vcmp.lt.f32.partialorder %v16298_v26, 20.0 }
 0x6c1   : > { %16341 = vst [vmem:[#allocation54_spill] sm:$0xff] %v11386_v50  ;;  %v16391_v50 = vld [vmem:[#allocation73_spill] sm:$0xff]  ;;  %v16412_v27 = vsel %vm11553_vm0, 4294967295, %v16411_v27  ;;  %vm11580_vm8 = vmand %vm16425_vm6, %vm16424_vm13  ;;  %vm16435_vm0 = vcmp.lt.f32.partialorder %v16297_v22, 20.0  ;;  %v16448_v22 = vld [vmem:[#allocation68_spill] sm:$0xff]  ;;  %vm16493_vm6 = vcmp.lt.f32.partialorder %v16312_v59, 20.0 }
 0x6c2   : > { %16342 = vst [vmem:[#allocation31_spill] sm:$0xff] %v11390_v43  ;;  %v11520_v7 = vadd.f32 %v11134_v36, %v16391_v50  ;;  %v16402_v50 = vld [vmem:[#allocation63_spill] sm:$0xff]  ;;  %vm11598_vm13 = vmand %vm16436_vm3, %vm16435_vm0  ;;  %vm16456_vm3 = vcmp.lt.f32.partialorder %v16303_v56, 20.0  ;;  %vm16457_vm0 = vcmp.ge.f32.partialorder %v16303_v56, 4.0  ;;  %v16470_v56 = vmov 0 }
 0x6c3   : > { %16343 = vst [vmem:[#allocation39_spill] sm:$0xff] %v11394_v9  ;;  %v16438_v28 = vsel %vm11598_vm13, 4294967295, %v16437_v28  ;;  %vm16469_vm13 = vcmp.ge.f32.partialorder %v16305_v18, 4.0  ;;  %v16633_v9 = vmov 0  ;;  %v16655_v43 = vmov 0 }
 0x6c4   : > { %16345 = vst [vmem:[#allocation43_spill] sm:$0xff] %v11400_v61  ;;  %v11466_v61 = vadd.f32 %v11134_v36, %v11140_v34  ;;  %v16380_v34 = vld [vmem:[#allocation40_spill] sm:$0xff] }
 0x6c5   : > { %16346 = vst [vmem:[#allocation41_spill] sm:$0xff] %v11404_v12  ;;  %v11458_v12 = vadd.f32 %v11134_v36, %v11129_v58  ;;  %v16659_v58 = vmov 0 }
 0x6c6   : > { %16347 = vst [vmem:[#allocation64_spill] sm:$0xff] %v11408_v29  ;;  %v16361_v29 = vld [vmem:[#allocation98_spill] sm:$0xff] }
 0x6c7   : > { %16348 = vst [vmem:[#allocation25_spill] sm:$0xff] %v11412_v3  ;;  %v16360_v3 = vld [vmem:[#allocation46_spill] sm:$0xff] }
 0x6c8   : > { %16362 = vst [vmem:[#allocation29_spill] sm:$0xff] %v11454_v53  ;;  %v16389_v53 = vld [vmem:[#allocation74_spill] sm:$0xff] }
 0x6c9   : > { %16363 = vst [vmem:[#allocation37_spill] sm:$0xff] %v11458_v12  ;;  %v11512_v12 = vadd.f32 %v11134_v36, %v11146_v30  ;;  %v11516_v55 = vadd.f32 %v11134_v36, %v16389_v53  ;;  %v16400_v30 = vmov 0  ;;  %v16408_v53 = vld [vmem:[#allocation8_spill] sm:$0xff] }
 0x6ca   : > { %16364 = vst [vmem:[#allocation36_spill] sm:$0xff] %v11462_v16  ;;  %v16386_v16 = vld [vmem:[#allocation101_spill] sm:$0xff]  ;;  %v16401_v30 = vsel %vm11535_vm7, 4294967295, %v16400_v30  ;;  %vm16430_vm7 = vcmp.ge.f32.partialorder %v16296_v60, 4.0  ;;  %v16443_v60 = vmov 0 }
 0x6cb   : > { %16365 = vst [vmem:[#allocation22_spill] sm:$0xff] %v11466_v61  ;;  %v16385_v61 = vld [vmem:[#allocation27_spill] sm:$0xff]  ;;  %vm11589_vm10 = vmand %vm16430_vm7, %vm16429_vm15 }
 0x6cc   : > { %16387 = vst [vmem:[#allocation26_spill] sm:$0xff] %v11508_v42  ;;  %v16418_v42 = vld [vmem:[#allocation70_spill] sm:$0xff]  ;;  %v16432_v6 = vsel %vm11589_vm10, 4294967295, %v16431_v6  ;;  %vm16463_vm10 = vcmp.ge.f32.partialorder %v16304_v20, 4.0  ;;  %v16476_v20 = vmov 0 }
 0x6cd   : > { %16388 = vst [vmem:[#allocation34_spill] sm:$0xff] %v11512_v12  ;;  %v11562_v12 = vadd.f32 %v11134_v36, %v16416_v47  ;;  %v11566_v38 = vadd.f32 %v11134_v36, %v16418_v42  ;;  %v16428_v47 = vld [vmem:[#allocation59_spill] sm:$0xff]  ;;  %v16434_v42 = vld [vmem:[#allocation6_spill] sm:$0xff]  ;;  %vm11652_vm7 = vmand %vm16463_vm10, %vm16462_vm4 }
 0x6ce   : > { %16390 = vst [vmem:[#allocation32_spill] sm:$0xff] %v11516_v55  ;;  %v16426_v55 = vmov 0 }
 0x6cf   : > { %16392 = vst [vmem:[#allocation23_spill] sm:$0xff] %v11520_v7  ;;  %v16414_v7 = vld [vmem:[#allocation62_spill] sm:$0xff]  ;;  %v16427_v55 = vsel %vm11580_vm8, 4294967295, %v16426_v55  ;;  %vm16442_vm8 = vcmp.ge.f32.partialorder %v16298_v26, 4.0 }
 0x6d0   : > { %16407 = vst [vmem:[#allocation30_spill] sm:$0xff] %v16406_v35  ;;  %v16422_v35 = vld [vmem:[#allocation67_spill] sm:$0xff]  ;;  %vm11607_vm15 = vmand %vm16442_vm8, %vm16441_vm2  ;;  %vm16474_vm2 = vcmp.lt.f32.partialorder %v16306_v51, 20.0 }
 0x6d1   : > { %16413 = vst [vmem:[#allocation66_spill] sm:$0xff] %v16412_v27  ;;  %v11574_v27 = vadd.f32 %v11134_v36, %v16422_v35  ;;  %v16444_v60 = vsel %vm11607_vm15, 4294967295, %v16443_v60  ;;  %v16452_v35 = vld [vmem:[#allocation14_spill] sm:$0xff]  ;;  %vm11643_vm8 = vmand %vm16457_vm0, %vm16456_vm3  ;;  %vm16468_vm15 = vcmp.lt.f32.partialorder %v16305_v18, 20.0  ;;  %v16481_v18 = vld [vmem:[#allocation12_spill] sm:$0xff]  ;;  %vm16525_vm0 = vcmp.lt.f32.partialorder %v16320_v33, 20.0 }
 0x6d2   : > { %16417 = vst [vmem:[#allocation65_spill] sm:$0xff] %v11562_v12  ;;  %v16450_v12 = vld [vmem:[#allocation11_spill] sm:$0xff]  ;;  %v11624_v26 = vadd.f32 %v11134_v36, %v16452_v35  ;;  %v16458_v35 = vmov 0  ;;  %vm11661_vm3 = vmand %vm16469_vm13, %vm16468_vm15  ;;  %vm16487_vm13 = vcmp.lt.f32.partialorder %v16311_v45, 20.0  ;;  %vm16488_vm15 = vcmp.ge.f32.partialorder %v16311_v45, 4.0 }
 0x6d3   : > { %16419 = vst [vmem:[#allocation7_spill] sm:$0xff] %v11566_v38  ;;  %v11616_v38 = vadd.f32 %v11134_v36, %v16448_v22  ;;  %v8400_v22 = vld [vmem:[%s15279_s5 + $0x18] sm:$0xff]  ;;  %v16459_v35 = vsel %vm11643_vm8, 4294967295, %v16458_v35  ;;  %v16471_v56 = vsel %vm11661_vm3, 4294967295, %v16470_v56  ;;  %vm16475_vm8 = vcmp.ge.f32.partialorder %v16306_v51, 4.0 }
 0x6d4   : > { %16421 = vst [vmem:[#allocation81_spill] sm:$0xff] %v11570_v15  ;;  %v8404_v15 = vld [vmem:[%s15279_s5 + $0x38] sm:$0xff]  ;;  %vm11670_vm4 = vmand %vm16475_vm8, %vm16474_vm2  ;;  %v11687_v51 = vadd.f32 %v11134_v36, %v11224_v44  ;;  %v16495_v44 = vmov 0  ;;  %vm16500_vm3 = vcmp.ge.f32.partialorder %v16313_v23, 4.0  ;;  %v16501_v45 = vmov 0  ;;  %5002 = vmatpush.bf16.msrb.mxu1 %v8400_v22  ;;  %v16921_v4 = vld [vmem:[#allocation34_spill] sm:$0xff] }
 0x6d5   : > { %16423 = vst [vmem:[#allocation79_spill] sm:$0xff] %v11574_v27  ;;  %v16446_v27 = vld [vmem:[#allocation5_spill] sm:$0xff]  ;;  %v16477_v20 = vsel %vm11670_vm4, 4294967295, %v16476_v20  ;;  %vm11696_vm8 = vmand %vm16488_vm15, %vm16487_vm13  ;;  %vm16499_vm4 = vcmp.lt.f32.partialorder %v16313_v23, 20.0  ;;  %vm16505_vm2 = vcmp.lt.f32.partialorder %v16314_v63, 20.0  ;;  %v11732_v23 = vadd.f32 %v11134_v36, %v11230_v13  ;;  %4841 = vmatpush.bf16.msrb.mxu3 %v8404_v15  ;;  %v16548_v13 = vld [vmem:[#allocation86_spill] sm:$0xff] }
 0x6d6   : > { %16433 = vst [vmem:[#allocation78_spill] sm:$0xff] %v16432_v6  ;;  %v16454_v6 = vld [vmem:[#allocation15_spill] sm:$0xff]  ;;  %vm11714_vm13 = vmand %vm16500_vm3, %vm16499_vm4  ;;  %vm16519_vm3 = vcmp.lt.f32.partialorder %v16319_v0, 20.0  ;;  %vm16520_vm4 = vcmp.ge.f32.partialorder %v16319_v0, 4.0  ;;  %v16533_v0 = vmov 0  ;;  %v16554_v15 = vmov 0 }
 0x6d7   : > { %16439 = vst [vmem:[#allocation77_spill] sm:$0xff] %v16438_v28  ;;  %v11620_v28 = vadd.f32 %v11134_v36, %v16450_v12  ;;  %v8408_v12 = vld [vmem:[%s15279_s5 + $0x58] sm:$0xff]  ;;  %v16502_v45 = vsel %vm11714_vm13, 4294967295, %v16501_v45  ;;  %vm16532_vm13 = vcmp.ge.f32.partialorder %v16321_v40, 4.0  ;;  %vm16558_vm15 = vcmp.lt.f32.partialorder %v16328_v57, 20.0 }
 0x6d8   : > { %16445 = vst [vmem:[#allocation76_spill] sm:$0xff] %v16444_v60  ;;  %v11628_v60 = vadd.f32 %v11134_v36, %v16454_v6  ;;  %5301 = vmatpush.bf16.msra.mxu2 %v8408_v12 }
 0x6d9   : > { %16449 = vst [vmem:[#allocation75_spill] sm:$0xff] %v11616_v38 }
 0x6da   : > { %16451 = vst [vmem:[#allocation72_spill] sm:$0xff] %v11620_v28 }
 0x6db   : > { %16453 = vst [vmem:[#allocation93_spill] sm:$0xff] %v11624_v26  ;;  %v11679_v26 = vadd.f32 %v11134_v36, %v16481_v18  ;;  %v16515_v18 = vld [vmem:[#allocation20_spill] sm:$0xff] }
 0x6dc   : > { %16455 = vst [vmem:[#allocation94_spill] sm:$0xff] %v11628_v60  ;;  %v16464_v60 = vmov 0  ;;  %v11738_v38 = vmul.f32 0.2, %v16515_v18  ;;  %v16688_v18 = vld [vmem:[#allocation102_spill] sm:$0xff] }
 0x6dd   : > { %16460 = vst [vmem:[#allocation95_spill] sm:$0xff] %v16459_v35  ;;  %v16465_v60 = vsel %vm11652_vm7, 4294967295, %v16464_v60  ;;  %vm16494_vm7 = vcmp.ge.f32.partialorder %v16312_v59, 4.0  ;;  %v16507_v59 = vmov 0 }
 0x6de   : > { %16466 = vst [vmem:[#allocation96_spill] sm:$0xff] %v16465_v60  ;;  %v16489_v60 = vmov 0  ;;  %vm11705_vm10 = vmand %vm16494_vm7, %vm16493_vm6 }
 0x6df   : > { %16472 = vst [vmem:[#allocation97_spill] sm:$0xff] %v16471_v56  ;;  %v16483_v56 = vld [vmem:[#allocation13_spill] sm:$0xff]  ;;  %v16490_v60 = vsel %vm11696_vm8, 4294967295, %v16489_v60  ;;  %v16496_v44 = vsel %vm11705_vm10, 4294967295, %v16495_v44  ;;  %vm16506_vm8 = vcmp.ge.f32.partialorder %v16314_v63, 4.0  ;;  %vm16526_vm10 = vcmp.ge.f32.partialorder %v16320_v33, 4.0 }
 0x6e0   : > { %16478 = vst [vmem:[#allocation47_spill] sm:$0xff] %v16477_v20  ;;  %v11683_v28 = vadd.f32 %v11134_v36, %v16483_v56  ;;  %v11690_v20 = vmul.f32 0.2, %v11240_v31  ;;  %vm11723_vm6 = vmand %vm16506_vm8, %vm16505_vm2  ;;  %v16517_v63 = vld [vmem:[#allocation21_spill] sm:$0xff]  ;;  %v16521_v56 = vmov 0  ;;  %vm16537_vm2 = vcmp.lt.f32.partialorder %v16322_v14, 20.0 }
 0x6e1   : > { %16482 = vst [vmem:[#allocation50_spill] sm:$0xff] %v11679_v26  ;;  %v16508_v59 = vsel %vm11723_vm6, 4294967295, %v16507_v59  ;;  %v11741_v35 = vmul.f32 0.2, %v16517_v63  ;;  %vm11747_vm8 = vmand %vm16520_vm4, %vm16519_vm3  ;;  %vm16531_vm6 = vcmp.lt.f32.partialorder %v16321_v40, 20.0  ;;  %v16539_v33 = vmov 0 }
 0x6e2   : > { %16484 = vst [vmem:[#allocation44_spill] sm:$0xff] %v11683_v28  ;;  %v16522_v56 = vsel %vm11747_vm8, 4294967295, %v16521_v56  ;;  %vm11756_vm7 = vmand %vm16526_vm10, %vm16525_vm0  ;;  %vm16538_vm8 = vcmp.ge.f32.partialorder %v16322_v14, 4.0  ;;  %v16544_v40 = vld [vmem:[#allocation16_spill] sm:$0xff]  ;;  %v16550_v14 = vld [vmem:[#allocation85_spill] sm:$0xff]  ;;  %vm16638_vm4 = vcmp.lt.f32.partialorder %v16361_v29, 20.0 }
 0x6e3   : > { %16485 = vst [vmem:[#allocation46_spill] sm:$0xff] %v11687_v51  ;;  %vm11765_vm3 = vmand %vm16532_vm13, %vm16531_vm6  ;;  %v11792_v6 = vmul.f32 0.2, %v16550_v14  ;;  %vm16552_vm13 = vcmp.lt.f32.partialorder %v16327_v48, 20.0  ;;  %vm16553_vm6 = vcmp.ge.f32.partialorder %v16327_v48, 4.0  ;;  %v16566_v48 = vmov 0 }
 0x6e4   : > { %16486 = vst [vmem:[#allocation98_spill] sm:$0xff] %v11690_v20  ;;  %v16534_v0 = vsel %vm11765_vm3, 4294967295, %v16533_v0  ;;  %vm11774_vm0 = vmand %vm16538_vm8, %vm16537_vm2  ;;  %vm16565_vm3 = vcmp.ge.f32.partialorder %v16329_v41, 4.0  ;;  %v16576_v14 = vld [vmem:[#allocation18_spill] sm:$0xff]  ;;  %v16643_v20 = vld [vmem:[#allocation35_spill] sm:$0xff] }
 0x6e5   : > { %16491 = vst [vmem:[#allocation28_spill] sm:$0xff] %v16490_v60  ;;  %v16540_v33 = vsel %vm11774_vm0, 4294967295, %v16539_v33  ;;  %vm11798_vm8 = vmand %vm16553_vm6, %vm16552_vm13  ;;  %vm16564_vm0 = vcmp.lt.f32.partialorder %v16329_v41, 20.0  ;;  %v16578_v41 = vld [vmem:[#allocation88_spill] sm:$0xff]  ;;  %vm16635_vm6 = vcmp.ge.f32.partialorder %v16360_v3, 4.0 }
 0x6e6   : > { %16497 = vst [vmem:[#allocation33_spill] sm:$0xff] %v16496_v44  ;;  %v11789_v44 = vmul.f32 0.2, %v16548_v13  ;;  %v16555_v15 = vsel %vm11798_vm8, 4294967295, %v16554_v15  ;;  %vm11816_vm13 = vmand %vm16565_vm3, %vm16564_vm0  ;;  %v11833_v13 = vmul.f32 0.2, %v16578_v41 }
 0x6e7   : > { %16503 = vst [vmem:[#allocation40_spill] sm:$0xff] %v16502_v45  ;;  %v16513_v45 = vld [vmem:[#allocation19_spill] sm:$0xff]  ;;  %v16567_v48 = vsel %vm11816_vm13, 4294967295, %v16566_v48  ;;  %vm16583_vm3 = vcmp.ge.f32.partialorder %v16334_v10, 4.0  ;;  %v16591_v41 = vld [vmem:[#allocation150_spill] sm:$0xff]  ;;  %v16719_v63 = vld [vmem:[#allocation76_spill] sm:$0xff] }
 0x6e8   : > { %16509 = vst [vmem:[#allocation27_spill] sm:$0xff] %v16508_v59  ;;  %v11735_v60 = vmul.f32 0.2, %v16513_v45  ;;  %v16527_v59 = vmov 0  ;;  %v11961_v31 = vmul.f32 0.2, %v16643_v20 }
 0x6e9   : > { %16512 = vst [vmem:[#allocation101_spill] sm:$0xff] %v11732_v23  ;;  %v16528_v59 = vsel %vm11756_vm7, 4294967295, %v16527_v59  ;;  %vm16559_vm7 = vcmp.ge.f32.partialorder %v16328_v57, 4.0  ;;  %v16572_v57 = vld [vmem:[#allocation149_spill] sm:$0xff]  ;;  %v12021_v45 = vmul.f32 0.2, %v11354_v49 }
 0x6ea   : > { %16514 = vst [vmem:[#allocation74_spill] sm:$0xff] %v11735_v60  ;;  %vm11807_vm10 = vmand %vm16559_vm7, %vm16558_vm15  ;;  %vm16582_vm7 = vcmp.lt.f32.partialorder %v16334_v10, 20.0  ;;  %v16597_v10 = vld [vmem:[#allocation52_spill] sm:$0xff]  ;;  %v12018_v60 = vmul.f32 0.2, %v11350_v21  ;;  %v16675_v49 = vmov 0 }
 0x6eb   : > { %16516 = vst [vmem:[#allocation73_spill] sm:$0xff] %v11738_v38  ;;  %vm11842_vm0 = vmand %vm16583_vm3, %vm16582_vm7  ;;  %vm16601_vm7 = vcmp.lt.f32.partialorder %v16339_v8, 20.0  ;;  %vm16602_vm3 = vcmp.ge.f32.partialorder %v16339_v8, 4.0  ;;  %v11885_v8 = vmul.f32 0.2, %v11683_v28  ;;  %v16627_v28 = vmov 0 }
 0x6ec   : > { %16518 = vst [vmem:[#allocation24_spill] sm:$0xff] %v11741_v35  ;;  %vm11868_vm2 = vmand %vm16602_vm3, %vm16601_vm7  ;;  %vm16616_vm7 = vcmp.lt.f32.partialorder %v16344_v17, 20.0  ;;  %vm16617_vm3 = vcmp.ge.f32.partialorder %v16344_v17, 4.0  ;;  %v11909_v17 = vmul.f32 0.2, %v11324_v46  ;;  %v16630_v46 = vmov 0 }
 0x6ed   : > { %16523 = vst [vmem:[#allocation63_spill] sm:$0xff] %v16522_v56  ;;  %v11783_v56 = vadd.f32 %v11134_v36, %v16544_v40  ;;  %v16560_v40 = vmov 0  ;;  %v16584_v36 = vmov 0  ;;  %vm11894_vm8 = vmand %vm16617_vm3, %vm16616_vm7  ;;  %vm16626_vm7 = vcmp.ge.f32.partialorder %v16351_v32, 4.0  ;;  %v16683_v38 = vld [vmem:[#allocation66_spill] sm:$0xff]  ;;  %v16694_v21 = vld [vmem:[#allocation61_spill] sm:$0xff] }
 0x6ee   : > { %16529 = vst [vmem:[#allocation8_spill] sm:$0xff] %v16528_v59  ;;  %v16561_v40 = vsel %vm11807_vm10, 4294967295, %v16560_v40  ;;  %v16585_v36 = vsel %vm11842_vm0, 4294967295, %v16584_v36  ;;  %vm11917_vm3 = vmand %vm11418_vm14, %vm16626_vm7  ;;  %vm16653_vm7 = vcmp.ge.f32.partialorder %v16380_v34, 4.0  ;;  %v16713_v35 = vld [vmem:[#allocation77_spill] sm:$0xff] }
 0x6ef   : > { %16535 = vst [vmem:[#allocation62_spill] sm:$0xff] %v16534_v0  ;;  %v16546_v0 = vld [vmem:[#allocation87_spill] sm:$0xff]  ;;  %v16628_v28 = vsel %vm11917_vm3, 4294967295, %v16627_v28  ;;  %vm16714_vm3 = vnez %v16713_v35  ;;  %v16727_v35 = vmov 0 }
 0x6f0   : > { %16541 = vst [vmem:[#allocation71_spill] sm:$0xff] %v16540_v33  ;;  %v11786_v22 = vmul.f32 0.2, %v16546_v0  ;;  %v16757_v0 = vld [vmem:[#allocation10_spill] sm:$0xff] }
 0x6f1   : > { %16545 = vst [vmem:[#allocation70_spill] sm:$0xff] %v11783_v56 }
 0x6f2   : > { %16547 = vst [vmem:[#allocation69_spill] sm:$0xff] %v11786_v22  ;;  %v16752_v22 = vld [vmem:[#allocation97_spill] sm:$0xff] }
 0x6f3   : > { %16549 = vst [vmem:[#allocation67_spill] sm:$0xff] %v11789_v44 }
 0x6f4   : > { %16551 = vst [vmem:[#allocation68_spill] sm:$0xff] %v11792_v6  ;;  %v11830_v6 = vmul.f32 0.2, %v16576_v14  ;;  %v11859_v14 = vmul.f32 0.2, %v16597_v10  ;;  %v16609_v10 = vld [vmem:[#allocation151_spill] sm:$0xff] }
 0x6f5   : > { %16556 = vst [vmem:[#allocation11_spill] sm:$0xff] %v16555_v15  ;;  %v16595_v15 = vld [vmem:[#allocation89_spill] sm:$0xff] }
 0x6f6   : > { %16562 = vst [vmem:[#allocation14_spill] sm:$0xff] %v16561_v40  ;;  %v16573_v40 = vld [vmem:[#allocation118_spill] sm:$0xff]  ;;  %v11856_v12 = vmul.f32 0.2, %v16595_v15  ;;  %v11882_v15 = vmul.f32 0.2, %v11679_v26 }
 0x6f7   : > { %16568 = vst [vmem:[#allocation15_spill] sm:$0xff] %v16567_v48  ;;  %v16574_v59 = vcvt.s32.f32 %v16573_v40  ;;  %v16580_v48 = vld [vmem:[#allocation57_spill] sm:$0xff]  ;;  %v16587_v40 = vld [vmem:[#allocation111_spill] sm:$0xff] }
 0x6f8   : > { %16577 = vst [vmem:[#allocation13_spill] sm:$0xff] %v11830_v6  ;;  %v11836_v44 = vmul.f32 0.2, %v16580_v48 }
 0x6f9   : > { %v11827_v33 = vsub.f32 %v16574_v59, %v16572_v57  ;;  %16579 = vst [vmem:[#allocation16_spill] sm:$0xff] %v11833_v13  ;;  %v16588_v59 = vld [vmem:[#allocation112_spill] sm:$0xff]  ;;  %v16589_v57 = vld [vmem:[#allocation113_spill] sm:$0xff]  ;;  %v16592_v13 = vld [vmem:[#allocation119_spill] sm:$0xff] }
 0x6fa   : > { %16581 = vst [vmem:[#allocation149_spill] sm:$0xff] %v11836_v44  ;;  %v16593_v48 = vcvt.s32.f32 %v16592_v13  ;;  %v16605_v13 = vld [vmem:[#allocation115_spill] sm:$0xff] }
 0x6fb   : > { %16575 = vst [vmem:[#allocation12_spill] sm:$0xff] %v11827_v33  ;;  %v16603_v33 = vmov 0 }
 0x6fc   : > { %16586 = vst [vmem:[#allocation118_spill] sm:$0xff] %v16585_v36  ;;  %v11853_v44 = vsub.f32 %v16593_v48, %v16591_v41  ;;  %v16599_v36 = vld [vmem:[#allocation90_spill] sm:$0xff]  ;;  %v16604_v33 = vsel %vm11868_vm2, 4294967295, %v16603_v33  ;;  %v16606_v48 = vld [vmem:[#allocation116_spill] sm:$0xff]  ;;  %v16607_v41 = vld [vmem:[#allocation121_spill] sm:$0xff]  ;;  %vm16629_vm2 = vcmp.ge.f32.partialorder %v16354_v24, 4.0 }
 0x6fd   : > { %16596 = vst [vmem:[#allocation150_spill] sm:$0xff] %v11856_v12  ;;  %v11862_v6 = vmul.f32 0.2, %v16599_v36  ;;  %v11888_v12 = vmul.f32 0.2, %v11687_v51  ;;  %vm11926_vm15 = vmand %vm11427_vm5, %vm16629_vm2  ;;  %vm16661_vm2 = vcmp.lt.f32.partialorder %v16386_v16, 20.0 }
 0x6fe   : > { %16594 = vst [vmem:[#allocation111_spill] sm:$0xff] %v11853_v44  ;;  %v16618_v44 = vmov 0  ;;  %v11906_v51 = vmul.f32 0.2, %v11783_v56  ;;  %v16631_v46 = vsel %vm11926_vm15, 4294967295, %v16630_v46  ;;  %vm11944_vm5 = vmand %vm11445_vm11, %vm16635_vm6  ;;  %vm16639_vm15 = vcmp.ge.f32.partialorder %v16361_v29, 4.0 }
 0x6ff   : > { %16598 = vst [vmem:[#allocation119_spill] sm:$0xff] %v11859_v14  ;;  %v16610_v14 = vld [vmem:[#allocation120_spill] sm:$0xff]  ;;  %v16619_v44 = vsel %vm11894_vm8, 4294967295, %v16618_v44  ;;  %vm16632_vm8 = vcmp.ge.f32.partialorder %v16357_v52, 4.0  ;;  %v16637_v54 = vsel %vm11944_vm5, 4294967295, %v16636_v54  ;;  %vm16647_vm11 = vcmp.ge.f32.partialorder %v16370_v25, 4.0 }
 0x700   : > { %16600 = vst [vmem:[#allocation152_spill] sm:$0xff] %v11862_v6  ;;  %v16611_v36 = vcvt.s32.f32 %v16610_v14  ;;  %v16620_v14 = vld [vmem:[#allocation137_spill] sm:$0xff]  ;;  %vm11935_vm14 = vmand %vm11436_vm9, %vm16632_vm8  ;;  %v16648_v29 = vmov 0  ;;  %vm16650_vm6 = vcmp.ge.f32.partialorder %v16375_v62, 4.0  ;;  %vm16654_vm5 = vnez %v16379_v37  ;;  %v16665_v56 = vld [vmem:[#allocation126_spill] sm:$0xff] }
 0x701   : > { %16613 = vst [vmem:[#allocation120_spill] sm:$0xff] %v11882_v15  ;;  %v16634_v9 = vsel %vm11935_vm14, 4294967295, %v16633_v9  ;;  %vm11953_vm9 = vmand %vm16639_vm15, %vm16638_vm4  ;;  %vm16657_vm8 = vcmp.ge.f32.partialorder %v16385_v61, 4.0  ;;  %v16949_v37 = vld [vmem:[#allocation143_spill] sm:$0xff]  ;;  %v17030_v15 = vmov 0 }
 0x702   : > { %v11879_v6 = vsub.f32 %v16611_v36, %v16609_v10  ;;  %16614 = vst [vmem:[#allocation153_spill] sm:$0xff] %v11885_v8  ;;  %v16621_v36 = vld [vmem:[#allocation139_spill] sm:$0xff]  ;;  %v16622_v10 = vld [vmem:[#allocation125_spill] sm:$0xff]  ;;  %vm11972_vm4 = vmand %vm11472_vm1, %vm16647_vm11  ;;  %vm16674_vm11 = vnez %v16401_v30  ;;  %v16685_v30 = vmov 0  ;;  %v17251_v8 = vmov 0 }
 0x703   : > { %16615 = vst [vmem:[#allocation154_spill] sm:$0xff] %v11888_v12  ;;  %v11958_v12 = vmul.f32 0.2, %v11328_v11  ;;  %v16649_v29 = vsel %vm11972_vm4, 4294967295, %v16648_v29  ;;  %vm11981_vm15 = vmand %vm11481_vm12, %vm16650_vm6  ;;  %vm16658_vm4 = vnez %v16384_v5  ;;  %v12015_v5 = vmul.f32 0.2, %v11346_v1 }
 0x704   : > { %16612 = vst [vmem:[#allocation151_spill] sm:$0xff] %v11879_v6  ;;  %v11903_v6 = vmul.f32 0.2, %v11732_v23  ;;  %vm11990_vm1 = vmand %vm16654_vm5, %vm16653_vm7  ;;  %vm16673_vm5 = vcmp.ge.f32.partialorder %v16402_v50, 4.0  ;;  %v16820_v11 = vld [vmem:[#allocation100_spill] sm:$0xff]  ;;  %v17069_v23 = vmov 0 }
 0x705   : > { %16624 = vst [vmem:[#allocation155_spill] sm:$0xff] %v11906_v51  ;;  %v16656_v43 = vsel %vm11990_vm1, 4294967295, %v16655_v43  ;;  %vm11999_vm12 = vmand %vm16658_vm4, %vm16657_vm8  ;;  %vm16670_vm4 = vnez %v16396_v39  ;;  %vm16677_vm1 = vcmp.ge.f32.partialorder %v16408_v53, 4.0  ;;  %v16680_v39 = vmov 0  ;;  %v17144_v51 = vld [vmem:[#allocation82_spill] sm:$0xff] }
 0x706   : > { %16623 = vst [vmem:[#allocation125_spill] sm:$0xff] %v11903_v6  ;;  %v16660_v58 = vsel %vm11999_vm12, 4294967295, %v16659_v58  ;;  %vm12038_vm6 = vmand %vm16674_vm11, %vm16673_vm5  ;;  %vm16689_vm12 = vcmp.lt.f32.partialorder %v16688_v18, 20.0  ;;  %v17257_v6 = vmov 0 }
 0x707   : > { %16625 = vst [vmem:[#allocation156_spill] sm:$0xff] %v11909_v17  ;;  %v11964_v17 = vmul.f32 0.2, %v16645_v2  ;;  %v16651_v2 = vmov 0  ;;  %v16676_v49 = vsel %vm12038_vm6, 4294967295, %v16675_v49  ;;  %vm16690_vm6 = vcmp.ge.f32.partialorder %v16688_v18, 4.0 }
 0x708   : > { %16642 = vst [vmem:[#allocation157_spill] sm:$0xff] %v11958_v12  ;;  %v16652_v2 = vsel %vm11981_vm15, 4294967295, %v16651_v2  ;;  %vm16662_vm15 = vcmp.ge.f32.partialorder %v16386_v16, 4.0  ;;  %v16678_v16 = vld [vmem:[#allocation30_spill] sm:$0xff]  ;;  %v16711_v18 = vld [vmem:[#allocation56_spill] sm:$0xff]  ;;  %v16824_v12 = vmov 0 }
 0x709   : > { %16644 = vst [vmem:[#allocation158_spill] sm:$0xff] %v11961_v31  ;;  %vm12008_vm7 = vmand %vm16662_vm15, %vm16661_vm2  ;;  %vm16669_vm2 = vcmp.ge.f32.partialorder %v16397_v19, 4.0  ;;  %vm16679_vm14 = vnez %v16678_v16  ;;  %vm16682_vm15 = vcmp.ge.f32.partialorder %v16414_v7, 4.0  ;;  %v16702_v31 = vmov 0 }
 0x70a   : > { %16646 = vst [vmem:[#allocation159_spill] sm:$0xff] %v11964_v17  ;;  %vm12029_vm8 = vmand %vm16670_vm4, %vm16669_vm2  ;;  %v16671_v17 = vmov 0  ;;  %v16940_v16 = vmov 0 }
 0x70b   : > { %16666 = vst [vmem:[#allocation126_spill] sm:$0xff] %v12015_v5  ;;  %v16672_v17 = vsel %vm12029_vm8, 4294967295, %v16671_v17  ;;  %vm12047_vm2 = vmand %vm16679_vm14, %vm16677_vm1  ;;  %vm16684_vm8 = vnez %v16683_v38  ;;  %v12072_v38 = vmul.f32 0.2, %v16694_v21  ;;  %v16698_v5 = vld [vmem:[#allocation51_spill] sm:$0xff]  ;;  %vm16705_vm1 = vcmp.ge.f32.partialorder %v16434_v42, 4.0 }
 0x70c   : > { %16667 = vst [vmem:[#allocation160_spill] sm:$0xff] %v12018_v60  ;;  %v16681_v39 = vsel %vm12047_vm2, 4294967295, %v16680_v39  ;;  %vm12056_vm11 = vmand %vm16684_vm8, %vm16682_vm15  ;;  %v16696_v60 = vld [vmem:[#allocation58_spill] sm:$0xff]  ;;  %v12078_v20 = vmul.f32 0.2, %v16698_v5  ;;  %v16708_v5 = vmov 0 }
 0x70d   : > { %16668 = vst [vmem:[#allocation161_spill] sm:$0xff] %v12021_v45  ;;  %v16686_v30 = vsel %vm12056_vm11, 4294967295, %v16685_v30  ;;  %vm12065_vm14 = vmand %vm16690_vm6, %vm16689_vm12  ;;  %v12075_v1 = vmul.f32 0.2, %v16696_v60  ;;  %vm16700_vm12 = vcmp.ge.f32.partialorder %v16428_v47, 4.0  ;;  %vm16701_vm6 = vnez %v16427_v55  ;;  %v16706_v60 = vld [vmem:[#allocation78_spill] sm:$0xff] }
 0x70e   : > { %16687 = vst [vmem:[#allocation30_spill] sm:$0xff] %v16686_v30  ;;  %vm12086_vm8 = vmand %vm16701_vm6, %vm16700_vm12  ;;  %vm16707_vm4 = vnez %v16706_v60  ;;  %vm16712_vm2 = vcmp.ge.f32.partialorder %v16711_v18, 4.0  ;;  %v16715_v55 = vmov 0  ;;  %vm16718_vm15 = vcmp.ge.f32.partialorder %v16446_v27, 4.0  ;;  %v16730_v21 = vld [vmem:[#allocation60_spill] sm:$0xff]  ;;  %v16734_v18 = vld [vmem:[#allocation49_spill] sm:$0xff] }
 0x70f   : > { %16695 = vst [vmem:[#allocation66_spill] sm:$0xff] %v12072_v38  ;;  %v16703_v31 = vsel %vm12086_vm8, 4294967295, %v16702_v31  ;;  %vm12095_vm5 = vmand %vm16707_vm4, %vm16705_vm1  ;;  %vm16720_vm8 = vnez %v16719_v63  ;;  %v16721_v60 = vmov 0  ;;  %v12128_v38 = vmul.f32 0.2, %v16730_v21  ;;  %v16732_v63 = vld [vmem:[#allocation42_spill] sm:$0xff] }
 0x710   : > { %16697 = vst [vmem:[#allocation102_spill] sm:$0xff] %v12075_v1  ;;  %v16709_v5 = vsel %vm12095_vm5, 4294967295, %v16708_v5  ;;  %vm12104_vm12 = vmand %vm16714_vm3, %vm16712_vm2  ;;  %v16729_v1 = vld [vmem:[#allocation140_spill] sm:$0xff]  ;;  %v16740_v42 = vmov 0  ;;  %v16743_v21 = vld [vmem:[#allocation83_spill] sm:$0xff]  ;;  %v16782_v47 = vmov 0 }
 0x711   : > { %16699 = vst [vmem:[#allocation162_spill] sm:$0xff] %v12078_v20  ;;  %v16716_v55 = vsel %vm12104_vm12, 4294967295, %v16715_v55  ;;  %vm12113_vm4 = vmand %vm16720_vm8, %vm16718_vm15  ;;  %v16724_v20 = vld [vmem:[#allocation106_spill] sm:$0xff]  ;;  %vm16744_vm2 = vcmp.ge.f32.partialorder %v16743_v21, 4.0  ;;  %v16750_v27 = vld [vmem:[#allocation84_spill] sm:$0xff]  ;;  %vm16758_vm15 = vcmp.ge.f32.partialorder %v16757_v0, 4.0 }
 0x712   : > { %16704 = vst [vmem:[#allocation163_spill] sm:$0xff] %v16703_v31  ;;  %v16722_v60 = vsel %vm12113_vm4, 4294967295, %v16721_v60  ;;  %vm16725_vm11 = vcmp.lt.f32.partialorder %v16724_v20, 20.0  ;;  %vm16726_vm5 = vcmp.ge.f32.partialorder %v16724_v20, 4.0  ;;  %v16738_v20 = vld [vmem:[#allocation95_spill] sm:$0xff]  ;;  %vm16751_vm12 = vcmp.ge.f32.partialorder %v16750_v27, 4.0 }
 0x713   : > { %16710 = vst [vmem:[#allocation78_spill] sm:$0xff] %v16709_v5  ;;  %vm12122_vm3 = vmand %vm16726_vm5, %vm16725_vm11  ;;  %v16736_v5 = vld [vmem:[#allocation53_spill] sm:$0xff]  ;;  %vm16739_vm11 = vnez %v16738_v20  ;;  %v16754_v20 = vmov 0  ;;  %v16774_v21 = vld [vmem:[#allocation39_spill] sm:$0xff]  ;;  %v16866_v30 = vmov 0 }
 0x714   : > { %16717 = vst [vmem:[#allocation77_spill] sm:$0xff] %v16716_v55  ;;  %v16728_v35 = vsel %vm12122_vm3, 4294967295, %v16727_v35  ;;  %v12131_v55 = vmul.f32 0.2, %v16732_v63  ;;  %vm16737_vm8 = vcmp.ge.f32.partialorder %v16736_v5, 4.0  ;;  %v16745_v63 = vld [vmem:[#allocation96_spill] sm:$0xff]  ;;  %vm16753_vm3 = vnez %v16752_v22 }
 0x715   : > { %16723 = vst [vmem:[#allocation76_spill] sm:$0xff] %v16722_v60  ;;  %v12134_v60 = vmul.f32 0.2, %v16734_v18  ;;  %vm12142_vm5 = vmand %vm16739_vm11, %vm16737_vm8  ;;  %vm16746_vm1 = vnez %v16745_v63  ;;  %v16747_v18 = vmov 0  ;;  %v16761_v63 = vmov 0  ;;  %v16778_v31 = vld [vmem:[#allocation9_spill] sm:$0xff] }
 0x716   : > { %16731 = vst [vmem:[#allocation106_spill] sm:$0xff] %v12128_v38  ;;  %v16741_v42 = vsel %vm12142_vm5, 4294967295, %v16740_v42  ;;  %vm12151_vm6 = vmand %vm16746_vm1, %vm16744_vm2  ;;  %v16767_v22 = vmov 0  ;;  %v16769_v38 = vld [vmem:[#allocation141_spill] sm:$0xff]  ;;  %v16792_v5 = vld [vmem:[#allocation80_spill] sm:$0xff] }
 0x717   : > { %16733 = vst [vmem:[#allocation140_spill] sm:$0xff] %v12131_v55  ;;  %v16748_v18 = vsel %vm12151_vm6, 4294967295, %v16747_v18  ;;  %vm12160_vm8 = vmand %vm16753_vm3, %vm16751_vm12  ;;  %v16764_v55 = vld [vmem:[#allocation117_spill] sm:$0xff]  ;;  %v16794_v0 = vld [vmem:[#allocation40_spill] sm:$0xff] }
 0x718   : > { %16735 = vst [vmem:[#allocation164_spill] sm:$0xff] %v12134_v60  ;;  %v16755_v20 = vsel %vm12160_vm8, 4294967295, %v16754_v20  ;;  %v16759_v60 = vld [vmem:[#allocation47_spill] sm:$0xff]  ;;  %vm16765_vm4 = vcmp.lt.f32.partialorder %v16764_v55, 20.0  ;;  %vm16766_vm6 = vcmp.ge.f32.partialorder %v16764_v55, 4.0  ;;  %v16780_v55 = vld [vmem:[#allocation28_spill] sm:$0xff] }
 0x719   : > { %16742 = vst [vmem:[#allocation95_spill] sm:$0xff] %v16741_v42  ;;  %vm16760_vm5 = vnez %v16759_v60  ;;  %vm12178_vm12 = vmand %vm16766_vm6, %vm16765_vm4  ;;  %v16772_v60 = vld [vmem:[#allocation31_spill] sm:$0xff]  ;;  %vm16781_vm6 = vnez %v16780_v55  ;;  %vm16793_vm8 = vcmp.ge.f32.partialorder %v16792_v5, 4.0  ;;  %v16796_v55 = vmov 0 }
 0x71a   : > { %16749 = vst [vmem:[#allocation96_spill] sm:$0xff] %v16748_v18  ;;  %vm12169_vm1 = vmand %vm16760_vm5, %vm16758_vm15  ;;  %v16768_v22 = vsel %vm12178_vm12, 4294967295, %v16767_v22  ;;  %v12187_v18 = vmul.f32 0.2, %v16772_v60  ;;  %vm16779_vm5 = vcmp.ge.f32.partialorder %v16778_v31, 4.0  ;;  %v16787_v60 = vld [vmem:[#allocation33_spill] sm:$0xff]  ;;  %vm16795_vm12 = vnez %v16794_v0 }
 0x71b   : > { %16756 = vst [vmem:[#allocation97_spill] sm:$0xff] %v16755_v20  ;;  %v16762_v63 = vsel %vm12169_vm1, 4294967295, %v16761_v63  ;;  %v16770_v20 = vld [vmem:[#allocation54_spill] sm:$0xff]  ;;  %vm12198_vm4 = vmand %vm16781_vm6, %vm16779_vm5  ;;  %vm16788_vm2 = vnez %v16787_v60  ;;  %v16799_v42 = vld [vmem:[#allocation99_spill] sm:$0xff]  ;;  %v16803_v60 = vmov 0  ;;  %v16809_v0 = vmov 0 }
 0x71c   : > { %16763 = vst [vmem:[#allocation47_spill] sm:$0xff] %v16762_v63  ;;  %v12184_v27 = vmul.f32 0.2, %v16770_v20  ;;  %v12190_v63 = vmul.f32 0.2, %v16774_v21  ;;  %v16783_v47 = vsel %vm12198_vm4, 4294967295, %v16782_v47  ;;  %vm12216_vm5 = vmand %vm16795_vm12, %vm16793_vm8 }
 0x71d   : > { %16773 = vst [vmem:[#allocation141_spill] sm:$0xff] %v12187_v18  ;;  %v16785_v20 = vld [vmem:[#allocation82_spill] sm:$0xff]  ;;  %v16789_v21 = vmov 0  ;;  %v16797_v55 = vsel %vm12216_vm5, 4294967295, %v16796_v55  ;;  %vm16800_vm15 = vcmp.ge.f32.partialorder %v16799_v42, 4.0  ;;  %v16834_v31 = vld [vmem:[#allocation104_spill] sm:$0xff] }
 0x71e   : > { %16771 = vst [vmem:[#allocation117_spill] sm:$0xff] %v12184_v27  ;;  %vm16786_vm3 = vcmp.ge.f32.partialorder %v16785_v20, 4.0  ;;  %v16806_v18 = vld [vmem:[#allocation122_spill] sm:$0xff]  ;;  %v16816_v20 = vld [vmem:[#allocation64_spill] sm:$0xff]  ;;  %vm16835_vm5 = vcmp.ge.f32.partialorder %v16834_v31, 4.0  ;;  %v16856_v31 = vld [vmem:[#allocation29_spill] sm:$0xff] }
 0x71f   : > { %16775 = vst [vmem:[#allocation165_spill] sm:$0xff] %v12190_v63  ;;  %vm12207_vm11 = vmand %vm16788_vm2, %vm16786_vm3  ;;  %v16801_v63 = vld [vmem:[#allocation27_spill] sm:$0xff]  ;;  %vm16807_vm1 = vcmp.lt.f32.partialorder %v16806_v18, 20.0  ;;  %v16811_v27 = vld [vmem:[#allocation142_spill] sm:$0xff] }
 0x720   : > { %16784 = vst [vmem:[#allocation28_spill] sm:$0xff] %v16783_v47  ;;  %v16790_v21 = vsel %vm12207_vm11, 4294967295, %v16789_v21  ;;  %vm16802_vm4 = vnez %v16801_v63  ;;  %vm16808_vm11 = vcmp.ge.f32.partialorder %v16806_v18, 4.0  ;;  %v16814_v63 = vld [vmem:[#allocation41_spill] sm:$0xff]  ;;  %v16822_v18 = vld [vmem:[#allocation63_spill] sm:$0xff]  ;;  %v16836_v42 = vld [vmem:[#allocation62_spill] sm:$0xff] }
 0x721   : > { %16791 = vst [vmem:[#allocation33_spill] sm:$0xff] %v16790_v21  ;;  %vm12225_vm2 = vmand %vm16802_vm4, %vm16800_vm15  ;;  %v12243_v21 = vmul.f32 0.2, %v16814_v63  ;;  %vm16821_vm4 = vcmp.ge.f32.partialorder %v16820_v11, 4.0  ;;  %v16829_v63 = vld [vmem:[#allocation8_spill] sm:$0xff]  ;;  %v16841_v47 = vld [vmem:[#allocation105_spill] sm:$0xff] }
 0x722   : > { %16798 = vst [vmem:[#allocation40_spill] sm:$0xff] %v16797_v55  ;;  %v16804_v60 = vsel %vm12225_vm2, 4294967295, %v16803_v60  ;;  %vm12234_vm8 = vmand %vm16808_vm11, %vm16807_vm1  ;;  %v16812_v55 = vld [vmem:[#allocation43_spill] sm:$0xff]  ;;  %vm16823_vm11 = vnez %v16822_v18  ;;  %vm16830_vm3 = vnez %v16829_v63  ;;  %v16838_v18 = vmov 0  ;;  %v17074_v26 = vld [vmem:[#allocation77_spill] sm:$0xff] }
 0x723   : > { %16805 = vst [vmem:[#allocation27_spill] sm:$0xff] %v16804_v60  ;;  %v16810_v0 = vsel %vm12234_vm8, 4294967295, %v16809_v0  ;;  %v12240_v5 = vmul.f32 0.2, %v16812_v55  ;;  %v12246_v60 = vmul.f32 0.2, %v16816_v20  ;;  %vm12254_vm1 = vmand %vm16823_vm11, %vm16821_vm4  ;;  %vm16837_vm8 = vnez %v16836_v42 }
 0x724   : > { %16815 = vst [vmem:[#allocation142_spill] sm:$0xff] %v12243_v21  ;;  %v16825_v12 = vsel %vm12254_vm1, 4294967295, %v16824_v12  ;;  %v16827_v55 = vld [vmem:[#allocation103_spill] sm:$0xff]  ;;  %v16831_v20 = vmov 0  ;;  %vm12272_vm4 = vmand %vm16837_vm8, %vm16835_vm5  ;;  %vm16842_vm15 = vcmp.ge.f32.partialorder %v16841_v47, 4.0  ;;  %v16845_v63 = vmov 0 }
 0x725   : > { %16813 = vst [vmem:[#allocation122_spill] sm:$0xff] %v12240_v5  ;;  %vm16828_vm12 = vcmp.ge.f32.partialorder %v16827_v55, 4.0  ;;  %v16839_v18 = vsel %vm12272_vm4, 4294967295, %v16838_v18  ;;  %v16848_v21 = vld [vmem:[#allocation123_spill] sm:$0xff]  ;;  %v16853_v5 = vld [vmem:[#allocation128_spill] sm:$0xff]  ;;  %v8402_v42 = vld [vmem:[%s15279_s5 + $0x28] sm:$0xff] }
 0x726   : > { %16817 = vst [vmem:[#allocation166_spill] sm:$0xff] %v12246_v60  ;;  %vm12263_vm6 = vmand %vm16830_vm3, %vm16828_vm12  ;;  %v16843_v60 = vld [vmem:[#allocation71_spill] sm:$0xff]  ;;  %vm16849_vm2 = vcmp.lt.f32.partialorder %v16848_v21, 20.0 }
 0x727   : > { %16826 = vst [vmem:[#allocation63_spill] sm:$0xff] %v16825_v12  ;;  %v16832_v20 = vsel %vm12263_vm6, 4294967295, %v16831_v20  ;;  %vm16844_vm1 = vnez %v16843_v60  ;;  %vm16850_vm6 = vcmp.ge.f32.partialorder %v16848_v21, 4.0  ;;  %v16862_v11 = vld [vmem:[#allocation107_spill] sm:$0xff]  ;;  %v16875_v21 = vld [vmem:[#allocation109_spill] sm:$0xff]  ;;  %v16881_v12 = vld [vmem:[#allocation110_spill] sm:$0xff] }
 0x728   : > { %16833 = vst [vmem:[#allocation8_spill] sm:$0xff] %v16832_v20  ;;  %vm12281_vm3 = vmand %vm16844_vm1, %vm16842_vm15  ;;  %v12300_v20 = vmul.f32 0.2, %v16856_v31  ;;  %v16864_v45 = vld [vmem:[#allocation11_spill] sm:$0xff]  ;;  %vm16882_vm15 = vcmp.ge.f32.partialorder %v16881_v12, 4.0  ;;  %v16884_v31 = vmov 0 }
 0x729   : > { %16840 = vst [vmem:[#allocation62_spill] sm:$0xff] %v16839_v18  ;;  %v16846_v63 = vsel %vm12281_vm3, 4294967295, %v16845_v63  ;;  %vm12290_vm5 = vmand %vm16850_vm6, %vm16849_vm2  ;;  %v16854_v18 = vld [vmem:[#allocation25_spill] sm:$0xff]  ;;  %vm16863_vm6 = vcmp.ge.f32.partialorder %v16862_v11, 4.0  ;;  %vm16865_vm2 = vnez %v16864_v45  ;;  %vm16876_vm3 = vcmp.ge.f32.partialorder %v16875_v21, 4.0  ;;  %v16893_v21 = vld [vmem:[#allocation36_spill] sm:$0xff] }
 0x72a   : > { %16847 = vst [vmem:[#allocation71_spill] sm:$0xff] %v16846_v63  ;;  %v12297_v60 = vmul.f32 0.2, %v16854_v18  ;;  %v16858_v63 = vld [vmem:[#allocation37_spill] sm:$0xff]  ;;  %vm12311_vm1 = vmand %vm16865_vm2, %vm16863_vm6  ;;  %v16869_v18 = vld [vmem:[#allocation108_spill] sm:$0xff]  ;;  %v16878_v45 = vmov 0  ;;  %vm16907_vm2 = vnez %v16619_v44 }
 0x72b   : > { %16857 = vst [vmem:[#allocation128_spill] sm:$0xff] %v12300_v20  ;;  %v12303_v47 = vmul.f32 0.2, %v16858_v63  ;;  %v16867_v30 = vsel %vm12311_vm1, 4294967295, %v16866_v30  ;;  %vm16870_vm8 = vcmp.ge.f32.partialorder %v16869_v18, 4.0  ;;  %v16872_v63 = vmov 0  ;;  %vm12329_vm6 = vmand %vm11816_vm13, %vm16876_vm3 }
 0x72c   : > { %16855 = vst [vmem:[#allocation123_spill] sm:$0xff] %v12297_v60  ;;  %vm12320_vm11 = vmand %vm11807_vm10, %vm16870_vm8  ;;  %v16879_v45 = vsel %vm12329_vm6, 4294967295, %v16878_v45  ;;  %v16887_v20 = vld [vmem:[#allocation124_spill] sm:$0xff]  ;;  %v16903_v60 = vmov 0  ;;  %vm16906_vm3 = vcmp.ge.f32.partialorder %v16588_v59, 4.0  ;;  %vm16911_vm6 = vcmp.ge.f32.partialorder %v16589_v57, 4.0 }
 0x72d   : > { %16859 = vst [vmem:[#allocation167_spill] sm:$0xff] %v12303_v47  ;;  %v16873_v63 = vsel %vm12320_vm11, 4294967295, %v16872_v63  ;;  %vm12338_vm10 = vmand %vm11842_vm0, %vm16882_vm15  ;;  %vm16888_vm12 = vcmp.lt.f32.partialorder %v16887_v20, 20.0  ;;  %vm16889_vm11 = vcmp.ge.f32.partialorder %v16887_v20, 4.0  ;;  %v12354_v47 = vmul.f32 0.2, %v16893_v21 }
 0x72e   : > { %16868 = vst [vmem:[#allocation11_spill] sm:$0xff] %v16867_v30  ;;  %v16885_v31 = vsel %vm12338_vm10, 4294967295, %v16884_v31  ;;  %vm12347_vm13 = vmand %vm16889_vm11, %vm16888_vm12  ;;  %vm16901_vm0 = vcmp.ge.f32.partialorder %v16587_v40, 4.0  ;;  %vm16902_vm11 = vnez %v16604_v33  ;;  %v16912_v33 = vmov 0  ;;  %v16915_v20 = vld [vmem:[#allocation114_spill] sm:$0xff]  ;;  %v16925_v57 = vld [vmem:[#allocation23_spill] sm:$0xff] }
 0x72f   : > { %16874 = vst [vmem:[#allocation14_spill] sm:$0xff] %v16873_v63  ;;  %v16895_v63 = vld [vmem:[#allocation22_spill] sm:$0xff]  ;;  %vm12368_vm12 = vmand %vm16902_vm11, %vm16901_vm0  ;;  %vm16916_vm15 = vcmp.ge.f32.partialorder %v16915_v20, 4.0  ;;  %v16917_v44 = vmov 0  ;;  %v12403_v11 = vmul.f32 0.2, %v16921_v4  ;;  %vm16934_vm10 = vnez %v16728_v35 }
 0x730   : > { %16880 = vst [vmem:[#allocation15_spill] sm:$0xff] %v16879_v45  ;;  %v16892_v45 = vld [vmem:[#allocation129_spill] sm:$0xff]  ;;  %v12357_v18 = vmul.f32 0.2, %v16895_v63  ;;  %v16904_v60 = vsel %vm12368_vm12, 4294967295, %v16903_v60  ;;  %vm12377_vm8 = vmand %vm16907_vm2, %vm16906_vm3  ;;  %v16920_v30 = vld [vmem:[#allocation130_spill] sm:$0xff] }
 0x731   : > { %16886 = vst [vmem:[#allocation118_spill] sm:$0xff] %v16885_v31  ;;  %v16897_v31 = vld [vmem:[#allocation26_spill] sm:$0xff]  ;;  %vm12386_vm0 = vmand %vm11953_vm9, %vm16911_vm6  ;;  %vm16929_vm9 = vcmp.ge.f32.partialorder %v16605_v13, 4.0  ;;  %vm16938_vm11 = vcmp.ge.f32.partialorder %v16607_v41, 4.0  ;;  %v16946_v35 = vmov 0  ;;  %v16950_v59 = vld [vmem:[#allocation65_spill] sm:$0xff] }
 0x732   : > { %16894 = vst [vmem:[#allocation124_spill] sm:$0xff] %v12354_v47  ;;  %v12360_v12 = vmul.f32 0.2, %v16897_v31  ;;  %v16908_v31 = vmov 0  ;;  %v16913_v33 = vsel %vm12386_vm0, 4294967295, %v16912_v33  ;;  %vm12395_vm2 = vmand %vm12008_vm7, %vm16916_vm15  ;;  %vm16933_vm15 = vcmp.ge.f32.partialorder %v16606_v48, 4.0 }
 0x733   : > { %16896 = vst [vmem:[#allocation129_spill] sm:$0xff] %v12357_v18  ;;  %v16909_v31 = vsel %vm12377_vm8, 4294967295, %v16908_v31  ;;  %v16918_v44 = vsel %vm12395_vm2, 4294967295, %v16917_v44  ;;  %vm12417_vm7 = vmand %vm12065_vm14, %vm16929_vm9  ;;  %vm16939_vm2 = vnez %v16768_v22  ;;  %v12451_v22 = vmul.f32 0.2, %v16950_v59  ;;  %v16970_v55 = vld [vmem:[#allocation79_spill] sm:$0xff] }
 0x734   : > { %16898 = vst [vmem:[#allocation168_spill] sm:$0xff] %v12360_v12  ;;  %v16923_v12 = vld [vmem:[#allocation32_spill] sm:$0xff]  ;;  %vm12426_vm8 = vmand %vm16934_vm10, %vm16933_vm15  ;;  %vm16965_vm9 = vcmp.lt.f32.partialorder %v16622_v10, 20.0  ;;  %v16972_v13 = vld [vmem:[#allocation75_spill] sm:$0xff]  ;;  %vm16988_vm15 = vnez %v16634_v9  ;;  %v17281_v63 = vmov 0 }
 0x735   : > { %16905 = vst [vmem:[#allocation169_spill] sm:$0xff] %v16904_v60  ;;  %vm12435_vm14 = vmand %vm16939_vm2, %vm16938_vm11  ;;  %v16943_v60 = vld [vmem:[#allocation136_spill] sm:$0xff]  ;;  %vm16957_vm11 = vcmp.ge.f32.partialorder %v16620_v14, 4.0  ;;  %v17005_v14 = vmov 0  ;;  %v17058_v9 = vld [vmem:[#allocation59_spill] sm:$0xff] }
 0x736   : > { %16910 = vst [vmem:[#allocation170_spill] sm:$0xff] %v16909_v31  ;;  %v12409_v31 = vmul.f32 0.2, %v16925_v57  ;;  %v16935_v57 = vmov 0  ;;  %v16941_v16 = vsel %vm12435_vm14, 4294967295, %v16940_v16  ;;  %vm16944_vm6 = vcmp.ge.f32.partialorder %v16943_v60, 4.0  ;;  %vm12465_vm2 = vmand %vm12290_vm5, %vm16957_vm11 }
 0x737   : > { %16914 = vst [vmem:[#allocation171_spill] sm:$0xff] %v16913_v33  ;;  %v12406_v33 = vmul.f32 0.2, %v16923_v12  ;;  %v16936_v57 = vsel %vm12426_vm8, 4294967295, %v16935_v57  ;;  %vm16987_vm11 = vcmp.lt.f32.partialorder %v16357_v52, 20.0  ;;  %v17275_v18 = vld [vmem:[#allocation26_spill] sm:$0xff] }
 0x738   : > { %16919 = vst [vmem:[#allocation114_spill] sm:$0xff] %v16918_v44  ;;  %v16930_v44 = vmov 0  ;;  %v17306_v47 = vld [vmem:[#allocation81_spill] sm:$0xff] }
 0x739   : > { %16922 = vst [vmem:[#allocation130_spill] sm:$0xff] %v12403_v11  ;;  %v16931_v44 = vsel %vm12417_vm7, 4294967295, %v16930_v44  ;;  %vm16945_vm7 = vnez %v16810_v0  ;;  %v16969_v0 = vld [vmem:[#allocation144_spill] sm:$0xff]  ;;  %v17307_v4 = vld [vmem:[#allocation137_spill] sm:$0xff] }
 0x73a   : > { %16924 = vst [vmem:[#allocation172_spill] sm:$0xff] %v12406_v33  ;;  %vm12444_vm10 = vmand %vm16945_vm7, %vm16944_vm6  ;;  %vm16961_vm6 = vcmp.ge.f32.partialorder %v16621_v36, 4.0  ;;  %v16974_v36 = vld [vmem:[#allocation72_spill] sm:$0xff] }
 0x73b   : > { %16926 = vst [vmem:[#allocation173_spill] sm:$0xff] %v12409_v31  ;;  %v16947_v35 = vsel %vm12444_vm10, 4294967295, %v16946_v35  ;;  %vm12474_vm3 = vmand %vm12347_vm13, %vm16961_vm6  ;;  %vm16966_vm10 = vcmp.ge.f32.partialorder %v16622_v10, 4.0  ;;  %vm16978_vm13 = vcmp.lt.f32.partialorder %v16351_v32, 20.0  ;;  %vm16982_vm6 = vcmp.lt.f32.partialorder %v16354_v24, 20.0 }
 0x73c   : > { %16932 = vst [vmem:[#allocation174_spill] sm:$0xff] %v16931_v44  ;;  %vm12483_vm5 = vmand %vm16966_vm10, %vm16965_vm9  ;;  %v12491_v44 = vmul.f32 0.2, %v16970_v55  ;;  %vm16979_vm9 = vnez %v16628_v28  ;;  %v16989_v32 = vmov 0  ;;  %v16994_v24 = vmov 0  ;;  %v16998_v28 = vld [vmem:[#allocation93_spill] sm:$0xff] }
 0x73d   : > { %16937 = vst [vmem:[#allocation175_spill] sm:$0xff] %v16936_v57  ;;  %v16951_v57 = vld [vmem:[#allocation7_spill] sm:$0xff]  ;;  %vm12505_vm10 = vmand %vm16979_vm9, %vm16978_vm13  ;;  %vm16992_vm13 = vcmp.lt.f32.partialorder %v16360_v3, 20.0  ;;  %vm16993_vm9 = vnez %v16637_v54  ;;  %v12536_v52 = vmul.f32 0.2, %v16998_v28  ;;  %v17009_v54 = vmov 0 }
 0x73e   : > { %16942 = vst [vmem:[#allocation176_spill] sm:$0xff] %v16941_v16  ;;  %v12454_v48 = vmul.f32 0.2, %v16951_v57  ;;  %v16953_v16 = vld [vmem:[#allocation81_spill] sm:$0xff]  ;;  %v16980_v57 = vmov 0  ;;  %v17034_v10 = vmov 0 }
 0x73f   : > { %16948 = vst [vmem:[#allocation136_spill] sm:$0xff] %v16947_v35  ;;  %v12457_v41 = vmul.f32 0.2, %v16953_v16  ;;  %v16958_v35 = vmov 0  ;;  %v16962_v16 = vmov 0  ;;  %v16981_v57 = vsel %vm12505_vm10, 4294967295, %v16980_v57  ;;  %vm12529_vm10 = vmand %vm16993_vm9, %vm16992_vm13 }
 0x740   : > { %16952 = vst [vmem:[#allocation143_spill] sm:$0xff] %v12454_v48  ;;  %v16959_v35 = vsel %vm12465_vm2, 4294967295, %v16958_v35  ;;  %v16963_v16 = vsel %vm12474_vm3, 4294967295, %v16962_v16  ;;  %vm16983_vm2 = vnez %v16631_v46  ;;  %vm12521_vm3 = vmand %vm16988_vm15, %vm16987_vm11  ;;  %v16995_v24 = vsel %vm12529_vm10, 4294967295, %v16994_v24  ;;  %v16997_v46 = vld [vmem:[#allocation145_spill] sm:$0xff]  ;;  %v17120_v3 = vld [vmem:[#allocation47_spill] sm:$0xff] }
 0x741   : > { %16954 = vst [vmem:[#allocation65_spill] sm:$0xff] %v12457_v41  ;;  %vm12513_vm7 = vmand %vm16983_vm2, %vm16982_vm6  ;;  %v16990_v32 = vsel %vm12521_vm3, 4294967295, %v16989_v32  ;;  %vm17003_vm15 = vcmp.lt.f32.partialorder %v16370_v25, 20.0  ;;  %vm17004_vm11 = vnez %v16649_v29  ;;  %vm17007_vm9 = vcmp.lt.f32.partialorder %v16375_v62, 20.0  ;;  %v17060_v41 = vld [vmem:[#allocation163_spill] sm:$0xff] }
 0x742   : > { %16960 = vst [vmem:[#allocation177_spill] sm:$0xff] %v16959_v35  ;;  %v12497_v35 = vmul.f32 0.2, %v16974_v36  ;;  %vm12557_vm13 = vmand %vm17004_vm11, %vm17003_vm15  ;;  %vm17008_vm6 = vnez %v16652_v2  ;;  %vm17011_vm10 = vcmp.lt.f32.partialorder %v16380_v34, 20.0  ;;  %vm17012_vm3 = vnez %v16656_v43  ;;  %v17023_v2 = vld [vmem:[#allocation94_spill] sm:$0xff]  ;;  %v17153_v34 = vld [vmem:[#allocation40_spill] sm:$0xff] }
 0x743   : > { %16964 = vst [vmem:[#allocation178_spill] sm:$0xff] %v16963_v16  ;;  %v12494_v16 = vmul.f32 0.2, %v16972_v13  ;;  %v16984_v13 = vmov 0  ;;  %v17006_v14 = vsel %vm12557_vm13, 4294967295, %v17005_v14  ;;  %vm12565_vm2 = vmand %vm17008_vm6, %vm17007_vm9  ;;  %v17013_v25 = vmov 0 }
 0x744   : > { %16971 = vst [vmem:[#allocation144_spill] sm:$0xff] %v12491_v44  ;;  %v16985_v13 = vsel %vm12513_vm7, 4294967295, %v16984_v13  ;;  %v17010_v54 = vsel %vm12565_vm2, 4294967295, %v17009_v54  ;;  %vm12573_vm7 = vmand %vm17012_vm3, %vm17011_vm10  ;;  %vm17015_vm15 = vcmp.lt.f32.partialorder %v16385_v61, 20.0  ;;  %vm17016_vm11 = vnez %v16660_v58  ;;  %v17081_v61 = vld [vmem:[#allocation76_spill] sm:$0xff]  ;;  %v17285_v11 = vld [vmem:[#allocation175_spill] sm:$0xff] }
 0x745   : > { %16973 = vst [vmem:[#allocation179_spill] sm:$0xff] %v12494_v16  ;;  %v17014_v25 = vsel %vm12573_vm7, 4294967295, %v17013_v25  ;;  %vm12581_vm13 = vmand %vm17016_vm11, %vm17015_vm15  ;;  %v17017_v62 = vmov 0  ;;  %vm17019_vm6 = vcmp.lt.f32.partialorder %v16665_v56, 20.0  ;;  %vm17020_vm9 = vcmp.ge.f32.partialorder %v16665_v56, 4.0  ;;  %v8407_v56 = vld [vmem:[%s15279_s5 + $0x50] sm:$0xff] }
 0x746   : > { %16975 = vst [vmem:[#allocation180_spill] sm:$0xff] %v12497_v35  ;;  %v17018_v62 = vsel %vm12581_vm13, 4294967295, %v17017_v62  ;;  %vm12589_vm2 = vmand %vm17020_vm9, %vm17019_vm6  ;;  %v12595_v29 = vmul.f32 0.2, %v17023_v2  ;;  %vm17028_vm10 = vcmp.lt.f32.partialorder %v16397_v19, 20.0  ;;  %vm17029_vm15 = vnez %v16672_v17  ;;  %v17041_v17 = vld [vmem:[#allocation30_spill] sm:$0xff]  ;;  %5302 = vmatpush.bf16.msra.mxu2 %v8407_v56 }
 0x747   : > { %16986 = vst [vmem:[#allocation181_spill] sm:$0xff] %v16985_v13  ;;  %v8399_v13 = vld [vmem:[%s15279_s5 + $0x10] sm:$0xff]  ;;  %vm12610_vm11 = vmand %vm17029_vm15, %vm17028_vm10  ;;  %vm17032_vm6 = vcmp.lt.f32.partialorder %v16402_v50, 20.0  ;;  %vm17033_vm9 = vnez %v16676_v49  ;;  %vm17036_vm13 = vcmp.lt.f32.partialorder %v16408_v53, 20.0  ;;  %vm17037_vm7 = vnez %v16681_v39  ;;  %v17191_v56 = vld [vmem:[#allocation104_spill] sm:$0xff] }
 0x748   : > { %16991 = vst [vmem:[#allocation182_spill] sm:$0xff] %v16990_v32  ;;  %v8403_v32 = vld [vmem:[%s15279_s5 + $0x30] sm:$0xff]  ;;  %v17031_v15 = vsel %vm12610_vm11, 4294967295, %v17030_v15  ;;  %vm12618_vm3 = vmand %vm17033_vm9, %vm17032_vm6  ;;  %v17038_v19 = vmov 0  ;;  %vm17040_vm10 = vcmp.lt.f32.partialorder %v16414_v7, 20.0  ;;  %vm17042_vm15 = vnez %v17041_v17  ;;  %v17065_v17 = vld [vmem:[#allocation6_spill] sm:$0xff]  ;;  %5003 = vmatpush.bf16.msrb.mxu1 %v8399_v13 }
 0x749   : > { %16996 = vst [vmem:[#allocation183_spill] sm:$0xff] %v16995_v24  ;;  %v8424_v24 = vld [vmem:[%s15279_s5 + $0xd8] sm:$0xff]  ;;  %v17035_v10 = vsel %vm12618_vm3, 4294967295, %v17034_v10  ;;  %vm12626_vm14 = vmand %vm17037_vm7, %vm17036_vm13  ;;  %v17043_v50 = vmov 0  ;;  %v17045_v49 = vld [vmem:[#allocation127_spill] sm:$0xff]  ;;  %vm17059_vm13 = vcmp.lt.f32.partialorder %v17058_v9, 20.0  ;;  %4842 = vmatpush.bf16.msrb.mxu3 %v8403_v32 }
 0x74a   : > { %16999 = vst [vmem:[#allocation145_spill] sm:$0xff] %v12536_v52  ;;  %v17039_v19 = vsel %vm12626_vm14, 4294967295, %v17038_v19  ;;  %vm12634_vm11 = vmand %vm17042_vm15, %vm17040_vm10  ;;  %vm17046_vm6 = vcmp.lt.f32.partialorder %v17045_v49, 20.0  ;;  %vm17047_vm9 = vcmp.ge.f32.partialorder %v17045_v49, 4.0  ;;  %5967 = vmatpush.bf16.msra.mxu0 %v8424_v24  ;;  %v8423_v49 = vld [vmem:[%s15279_s5 + $0xd0] sm:$0xff]  ;;  %vm17061_vm10 = vnez %v17060_v41  ;;  %v17067_v7 = vld [vmem:[#allocation78_spill] sm:$0xff] }
 0x74b   : > { %17024 = vst [vmem:[#allocation184_spill] sm:$0xff] %v12595_v29  ;;  %v17044_v50 = vsel %vm12634_vm11, 4294967295, %v17043_v50  ;;  %vm12642_vm3 = vmand %vm17047_vm9, %vm17046_vm6  ;;  %v17062_v58 = vmov 0  ;;  %vm17066_vm6 = vcmp.lt.f32.partialorder %v17065_v17, 20.0  ;;  %vm17068_vm9 = vnez %v17067_v7  ;;  %v17072_v24 = vld [vmem:[#allocation56_spill] sm:$0xff]  ;;  %v17079_v41 = vld [vmem:[#allocation5_spill] sm:$0xff] }
 0x74c   : > { %vm12662_vm15 = vmand %vm17061_vm10, %vm17059_vm13  ;;  %vm17073_vm11 = vcmp.lt.f32.partialorder %v17072_v24, 20.0  ;;  %vm17075_vm14 = vnez %v17074_v26  ;;  %v17076_v9 = vmov 0  ;;  %vm17080_vm13 = vcmp.lt.f32.partialorder %v17079_v41, 20.0  ;;  %v17106_v41 = vld [vmem:[#allocation96_spill] sm:$0xff]  ;;  %v17184_v26 = vld [vmem:[#allocation103_spill] sm:$0xff] }
 0x74d   : > { %v17063_v58 = vsel %vm12662_vm15, 4294967295, %v17062_v58  ;;  %vm12670_vm7 = vmand %vm17068_vm9, %vm17066_vm6  ;;  %vm17082_vm10 = vnez %v17081_v61  ;;  %v17083_v17 = vmov 0  ;;  %vm17086_vm6 = vcmp.ge.f32.partialorder %v16729_v1, 4.0  ;;  %v17104_v61 = vld [vmem:[#allocation83_spill] sm:$0xff]  ;;  %v17111_v32 = vld [vmem:[#allocation84_spill] sm:$0xff]  ;;  %4843 = vmatpush.bf16.msrb.mxu3 %v8402_v42 }
 0x74e   : > { %17064 = vst [vmem:[#allocation30_spill] sm:$0xff] %v17063_v58  ;;  %v17070_v23 = vsel %vm12670_vm7, 4294967295, %v17069_v23  ;;  %vm12678_vm8 = vmand %vm17075_vm14, %vm17073_vm11  ;;  %v17099_v58 = vld [vmem:[#allocation95_spill] sm:$0xff]  ;;  %v17101_v43 = vmov 0  ;;  %v17108_v39 = vmov 0  ;;  %v17148_v24 = vmov 0  ;;  %5968 = vmatpush.bf16.msra.mxu0 %v8423_v49 }
 0x74f   : > { %17071 = vst [vmem:[#allocation127_spill] sm:$0xff] %v17070_v23  ;;  %v17077_v9 = vsel %vm12678_vm8, 4294967295, %v17076_v9  ;;  %vm12686_vm15 = vmand %vm17082_vm10, %vm17080_vm13  ;;  %v17097_v23 = vld [vmem:[#allocation53_spill] sm:$0xff]  ;;  %vm17100_vm11 = vnez %v17099_v58  ;;  %vm17105_vm10 = vcmp.lt.f32.partialorder %v17104_v61, 20.0  ;;  %v17118_v58 = vld [vmem:[#allocation10_spill] sm:$0xff]  ;;  %v17122_v61 = vmov 0 }
 0x750   : > { %17078 = vst [vmem:[#allocation59_spill] sm:$0xff] %v17077_v9  ;;  %v17084_v17 = vsel %vm12686_vm15, 4294967295, %v17083_v17  ;;  %vm12694_vm9 = vmand %vm12483_vm5, %vm17086_vm6  ;;  %vm17098_vm5 = vcmp.lt.f32.partialorder %v17097_v23, 20.0  ;;  %vm17107_vm6 = vnez %v17106_v41  ;;  %vm17112_vm15 = vcmp.lt.f32.partialorder %v17111_v32, 20.0  ;;  %v17113_v9 = vld [vmem:[#allocation97_spill] sm:$0xff]  ;;  %v17151_v13 = vld [vmem:[#allocation80_spill] sm:$0xff] }
 0x751   : > { %17085 = vst [vmem:[#allocation163_spill] sm:$0xff] %v17084_v17  ;;  %vm12714_vm13 = vmand %vm17100_vm11, %vm17098_vm5  ;;  %vm17114_vm8 = vnez %v17113_v9  ;;  %v17115_v23 = vmov 0  ;;  %vm17119_vm5 = vcmp.lt.f32.partialorder %v17118_v58, 20.0  ;;  %vm17121_vm11 = vnez %v17120_v3  ;;  %v17139_v9 = vld [vmem:[#allocation28_spill] sm:$0xff]  ;;  %v17146_v3 = vld [vmem:[#allocation33_spill] sm:$0xff] }
 0x752   : > { %v17102_v43 = vsel %vm12714_vm13, 4294967295, %v17101_v43  ;;  %vm12722_vm14 = vmand %vm17107_vm6, %vm17105_vm10  ;;  %vm17125_vm10 = vcmp.ge.f32.partialorder %v16769_v38, 4.0  ;;  %v17141_v17 = vmov 0  ;;  %v17188_v58 = vmov 0  ;;  %v17222_v32 = vld [vmem:[#allocation108_spill] sm:$0xff]  ;;  %v17228_v49 = vld [vmem:[#allocation109_spill] sm:$0xff] }
 0x753   : > { %17103 = vst [vmem:[#allocation6_spill] sm:$0xff] %v17102_v43  ;;  %v17109_v39 = vsel %vm12722_vm14, 4294967295, %v17108_v39  ;;  %vm12730_vm7 = vmand %vm17114_vm8, %vm17112_vm15  ;;  %v17137_v43 = vld [vmem:[#allocation9_spill] sm:$0xff]  ;;  %vm17147_vm8 = vnez %v17146_v3  ;;  %v17234_v53 = vld [vmem:[#allocation110_spill] sm:$0xff] }
 0x754   : > { %17110 = vst [vmem:[#allocation78_spill] sm:$0xff] %v17109_v39  ;;  %v17116_v23 = vsel %vm12730_vm7, 4294967295, %v17115_v23  ;;  %vm12738_vm13 = vmand %vm17121_vm11, %vm17119_vm5  ;;  %v8398_v39 = vld [vmem:[%s15279_s5 + $0x8] sm:$0xff]  ;;  %vm17140_vm5 = vnez %v17139_v9  ;;  %vm17154_vm7 = vnez %v17153_v34  ;;  %v17158_v9 = vld [vmem:[#allocation99_spill] sm:$0xff] }
 0x755   : > { %17117 = vst [vmem:[#allocation56_spill] sm:$0xff] %v17116_v23  ;;  %v17123_v61 = vsel %vm12738_vm13, 4294967295, %v17122_v61  ;;  %vm12746_vm6 = vmand %vm12589_vm2, %vm17125_vm10  ;;  %vm17138_vm2 = vcmp.lt.f32.partialorder %v17137_v43, 20.0  ;;  %vm17145_vm10 = vcmp.lt.f32.partialorder %v17144_v51, 20.0  ;;  %vm17152_vm13 = vcmp.lt.f32.partialorder %v17151_v13, 20.0  ;;  %v17179_v34 = vld [vmem:[#allocation63_spill] sm:$0xff]  ;;  %5004 = vmatpush.bf16.msrb.mxu1 %v8398_v39 }
 0x756   : > { %17124 = vst [vmem:[#allocation77_spill] sm:$0xff] %v17123_v61  ;;  %vm12767_vm11 = vmand %vm17140_vm5, %vm17138_vm2  ;;  %v17155_v43 = vmov 0  ;;  %vm17159_vm2 = vcmp.lt.f32.partialorder %v17158_v9, 20.0  ;;  %v17160_v61 = vld [vmem:[#allocation27_spill] sm:$0xff]  ;;  %v17162_v51 = vmov 0  ;;  %v17181_v23 = vmov 0 }
 0x757   : > { %v17142_v17 = vsel %vm12767_vm11, 4294967295, %v17141_v17  ;;  %vm12775_vm15 = vmand %vm17147_vm8, %vm17145_vm10  ;;  %vm17161_vm5 = vnez %v17160_v61  ;;  %vm17165_vm8 = vcmp.ge.f32.partialorder %v16811_v27, 4.0  ;;  %v17186_v61 = vld [vmem:[#allocation8_spill] sm:$0xff]  ;;  %v17226_v9 = vmov 0  ;;  %v17259_v42 = vld [vmem:[#allocation113_spill] sm:$0xff] }
 0x758   : > { %17143 = vst [vmem:[#allocation5_spill] sm:$0xff] %v17142_v17  ;;  %v17149_v24 = vsel %vm12775_vm15, 4294967295, %v17148_v24  ;;  %vm12783_vm14 = vmand %vm17154_vm7, %vm17152_vm13  ;;  %v17177_v17 = vld [vmem:[#allocation100_spill] sm:$0xff]  ;;  %vm17187_vm7 = vnez %v17186_v61  ;;  %v17277_v13 = vld [vmem:[#allocation115_spill] sm:$0xff] }
 0x759   : > { %17150 = vst [vmem:[#allocation76_spill] sm:$0xff] %v17149_v24  ;;  %v17156_v43 = vsel %vm12783_vm14, 4294967295, %v17155_v43  ;;  %vm12791_vm11 = vmand %vm17161_vm5, %vm17159_vm2  ;;  %v8406_v24 = vld [vmem:[%s15279_s5 + $0x48] sm:$0xff]  ;;  %vm17180_vm2 = vnez %v17179_v34  ;;  %v17197_v34 = vld [vmem:[#allocation105_spill] sm:$0xff] }
 0x75a   : > { %17157 = vst [vmem:[#allocation53_spill] sm:$0xff] %v17156_v43  ;;  %v17163_v51 = vsel %vm12791_vm11, 4294967295, %v17162_v51  ;;  %vm12799_vm10 = vmand %vm12642_vm3, %vm17165_vm8  ;;  %vm17178_vm3 = vcmp.lt.f32.partialorder %v17177_v17, 20.0  ;;  %vm17185_vm8 = vcmp.lt.f32.partialorder %v17184_v26, 20.0  ;;  %vm17192_vm11 = vcmp.lt.f32.partialorder %v17191_v56, 20.0  ;;  %v17273_v56 = vld [vmem:[#allocation147_spill] sm:$0xff]  ;;  %5303 = vmatpush.bf16.msra.mxu2 %v8406_v24 }
 0x75b   : > { %17164 = vst [vmem:[#allocation95_spill] sm:$0xff] %v17163_v51  ;;  %vm12820_vm5 = vmand %vm17180_vm2, %vm17178_vm3  ;;  %v17194_v17 = vmov 0  ;;  %vm17198_vm3 = vcmp.lt.f32.partialorder %v17197_v34, 20.0  ;;  %v17199_v51 = vld [vmem:[#allocation71_spill] sm:$0xff]  ;;  %v17201_v26 = vmov 0  ;;  %v17220_v43 = vmov 0 }
 0x75c   : > { %v17182_v23 = vsel %vm12820_vm5, 4294967295, %v17181_v23  ;;  %vm12828_vm13 = vmand %vm17187_vm7, %vm17185_vm8  ;;  %vm17200_vm2 = vnez %v17199_v51  ;;  %vm17204_vm7 = vcmp.lt.f32.partialorder %v16853_v5, 20.0  ;;  %vm17205_vm8 = vcmp.ge.f32.partialorder %v16853_v5, 4.0  ;;  %v17224_v51 = vld [vmem:[#allocation14_spill] sm:$0xff]  ;;  %v17230_v5 = vld [vmem:[#allocation15_spill] sm:$0xff] }
 0x75d   : > { %17183 = vst [vmem:[#allocation83_spill] sm:$0xff] %v17182_v23  ;;  %v17189_v58 = vsel %vm12828_vm13, 4294967295, %v17188_v58  ;;  %vm12836_vm14 = vmand %vm12272_vm4, %vm17192_vm11  ;;  %v17217_v23 = vld [vmem:[#allocation107_spill] sm:$0xff]  ;;  %vm17229_vm11 = vcmp.lt.f32.partialorder %v17228_v49, 20.0  ;;  %v17265_v34 = vld [vmem:[#allocation114_spill] sm:$0xff] }
 0x75e   : > { %17190 = vst [vmem:[#allocation96_spill] sm:$0xff] %v17189_v58  ;;  %v17195_v17 = vsel %vm12836_vm14, 4294967295, %v17194_v17  ;;  %vm12844_vm5 = vmand %vm17200_vm2, %vm17198_vm3  ;;  %v8422_v58 = vld [vmem:[%s15279_s5 + $0xc8] sm:$0xff]  ;;  %vm17218_vm3 = vcmp.lt.f32.partialorder %v17217_v23, 20.0  ;;  %v17232_v23 = vmov 0  ;;  %v17289_v39 = vld [vmem:[#allocation121_spill] sm:$0xff] }
 0x75f   : > { %17196 = vst [vmem:[#allocation84_spill] sm:$0xff] %v17195_v17  ;;  %v17202_v26 = vsel %vm12844_vm5, 4294967295, %v17201_v26  ;;  %vm12852_vm13 = vmand %vm17205_vm8, %vm17204_vm7  ;;  %vm17223_vm7 = vcmp.lt.f32.partialorder %v17222_v32, 20.0  ;;  %vm17225_vm8 = vnez %v17224_v51  ;;  %vm17231_vm5 = vnez %v17230_v5  ;;  %v17244_v5 = vld [vmem:[#allocation146_spill] sm:$0xff]  ;;  %v17246_v17 = vld [vmem:[#allocation29_spill] sm:$0xff]  ;;  %5969 = vmatpush.bf16.msra.mxu0 %v8422_v58 }
 0x760   : > { %17203 = vst [vmem:[#allocation97_spill] sm:$0xff] %v17202_v26  ;;  %vm12873_vm2 = vmand %vm12311_vm1, %vm17218_vm3  ;;  %vm17235_vm1 = vcmp.lt.f32.partialorder %v17234_v53, 20.0  ;;  %v17236_v26 = vld [vmem:[#allocation118_spill] sm:$0xff]  ;;  %v17238_v32 = vmov 0  ;;  %v17291_v21 = vld [vmem:[#allocation176_spill] sm:$0xff] }
 0x761   : > { %v17221_v43 = vsel %vm12873_vm2, 4294967295, %v17220_v43  ;;  %vm12881_vm4 = vmand %vm17225_vm8, %vm17223_vm7  ;;  %vm17237_vm3 = vnez %v17236_v26  ;;  %vm17240_vm7 = vcmp.lt.f32.partialorder %v16892_v45, 20.0  ;;  %vm17241_vm8 = vcmp.ge.f32.partialorder %v16892_v45, 4.0  ;;  %v8401_v45 = vld [vmem:[%s15279_s5 + $0x20] sm:$0xff]  ;;  %v17253_v26 = vld [vmem:[#allocation112_spill] sm:$0xff] }
 0x762   : > { %v17227_v9 = vsel %vm12881_vm4, 4294967295, %v17226_v9  ;;  %vm12889_vm14 = vmand %vm17231_vm5, %vm17229_vm11  ;;  %vm17249_vm11 = vcmp.lt.f32.partialorder %v16587_v40, 20.0  ;;  %v17255_v53 = vld [vmem:[#allocation170_spill] sm:$0xff]  ;;  %vm17260_vm5 = vcmp.lt.f32.partialorder %v17259_v42, 20.0  ;;  %v17262_v40 = vmov 0  ;;  %v17305_v31 = vld [vmem:[#allocation65_spill] sm:$0xff]  ;;  %4844 = vmatpush.bf16.msrb.mxu3 %v8401_v45 }
 0x763   : > { %v17233_v23 = vsel %vm12889_vm14, 4294967295, %v17232_v23  ;;  %vm12897_vm2 = vmand %vm17237_vm3, %vm17235_vm1  ;;  %vm17254_vm3 = vcmp.lt.f32.partialorder %v17253_v26, 20.0  ;;  %v17267_v26 = vmov 0  ;;  %v17279_v49 = vld [vmem:[#allocation174_spill] sm:$0xff]  ;;  %v8405_v61 = vld [vmem:[%s15279_s5 + $0x40] sm:$0xff] }
 0x764   : > { %v17239_v32 = vsel %vm12897_vm2, 4294967295, %v17238_v32  ;;  %vm12905_vm4 = vmand %vm17241_vm8, %vm17240_vm7  ;;  %vm17256_vm7 = vnez %v17255_v53  ;;  %v17309_v42 = vld [vmem:[#allocation177_spill] sm:$0xff]  ;;  %v17315_v48 = vld [vmem:[#allocation178_spill] sm:$0xff]  ;;  %5304 = vmatpush.bf16.msra.mxu2 %v8405_v61 }
 0x765   : > { %vm12925_vm1 = vmand %vm12368_vm12, %vm17249_vm11  ;;  %vm17264_vm12 = vcmp.lt.f32.partialorder %v16915_v20, 20.0  ;;  %vm17266_vm11 = vnez %v17265_v34  ;;  %v17283_v20 = vld [vmem:[#allocation116_spill] sm:$0xff]  ;;  %v8421_v51 = vld [vmem:[%s15279_s5 + $0xc0] sm:$0xff] }
 0x766   : > { %v17252_v8 = vsel %vm12925_vm1, 4294967295, %v17251_v8  ;;  %vm12933_vm8 = vmand %vm17256_vm7, %vm17254_vm3  ;;  %vm17269_vm3 = vcmp.lt.f32.partialorder %v16920_v30, 20.0  ;;  %vm17270_vm7 = vcmp.ge.f32.partialorder %v16920_v30, 4.0  ;;  %v8397_v30 = vld [vmem:[%s15279_s5] sm:$0xff]  ;;  %v17339_v3 = vld [vmem:[#allocation19_spill] sm:$0xff]  ;;  %5970 = vmatpush.bf16.msra.mxu0 %v8421_v51 }
 0x767   : > { %v17258_v6 = vsel %vm12933_vm8, 4294967295, %v17257_v6  ;;  %vm12941_vm2 = vmand %vm12386_vm0, %vm17260_vm5  ;;  %vm17278_vm5 = vcmp.lt.f32.partialorder %v17277_v13, 20.0  ;;  %v17293_v13 = vmov 0  ;;  %v17335_v58 = vld [vmem:[#allocation17_spill] sm:$0xff]  ;;  %v17340_v7 = vld [vmem:[#allocation74_spill] sm:$0xff]  ;;  %5005 = vmatpush.bf16.msrb.mxu1 %v8397_v30 }
 0x768   : > { %v17263_v40 = vsel %vm12941_vm2, 4294967295, %v17262_v40  ;;  %vm12949_vm1 = vmand %vm17266_vm11, %vm17264_vm12  ;;  %vm17280_vm12 = vnez %v17279_v49  ;;  %vm17292_vm2 = vnez %v17291_v21  ;;  %v17296_v49 = vld [vmem:[#allocation136_spill] sm:$0xff]  ;;  %v17341_v12 = vmax.f32 %v17339_v3, %v17340_v7  ;;  %v17342_v29 = vld [vmem:[#allocation181_spill] sm:$0xff] }
 0x769   : > { %v17268_v26 = vsel %vm12949_vm1, 4294967295, %v17267_v26  ;;  %vm12957_vm8 = vmand %vm17270_vm7, %vm17269_vm3  ;;  %vm17284_vm3 = vcmp.lt.f32.partialorder %v17283_v20, 20.0  ;;  %vm17286_vm7 = vnez %v17285_v11  ;;  %vm17290_vm1 = vcmp.lt.f32.partialorder %v17289_v39, 20.0  ;;  %v17303_v21 = vld [vmem:[#allocation148_spill] sm:$0xff]  ;;  %v17345_v52 = vld [vmem:[#allocation73_spill] sm:$0xff] }
 0x76a   : > { %vm12977_vm11 = vmand %vm17280_vm12, %vm17278_vm5  ;;  %vm17295_vm5 = vcmp.lt.f32.partialorder %v16943_v60, 20.0  ;;  %vm17297_vm12 = vnez %v17296_v49  ;;  %v17298_v20 = vmov 0  ;;  %v17304_v60 = vld [vmem:[#allocation7_spill] sm:$0xff]  ;;  %v17344_v53 = vld [vmem:[#allocation20_spill] sm:$0xff] }
 0x76b   : > { %v17282_v63 = vsel %vm12977_vm11, 4294967295, %v17281_v63  ;;  %vm12985_vm0 = vmand %vm17286_vm7, %vm17284_vm3  ;;  %vm17300_vm3 = vcmp.ge.f32.partialorder %v16949_v37, 4.0  ;;  %v17313_v49 = vld [vmem:[#allocation139_spill] sm:$0xff]  ;;  %v17346_v28 = vmax.f32 %v17344_v53, %v17345_v52  ;;  %v17347_v35 = vld [vmem:[#allocation182_spill] sm:$0xff] }
 0x76c   : > { %vm12993_vm14 = vmand %vm17292_vm2, %vm17290_vm1  ;;  %vm17310_vm1 = vnez %v17309_v42  ;;  %v17336_v42 = vld [vmem:[#allocation98_spill] sm:$0xff]  ;;  %v17349_v16 = vld [vmem:[#allocation21_spill] sm:$0xff] }
 0x76d   : > { %v17294_v13 = vsel %vm12993_vm14, 4294967295, %v17293_v13  ;;  %vm13001_vm11 = vmand %vm17297_vm12, %vm17295_vm5  ;;  %vm17314_vm12 = vcmp.lt.f32.partialorder %v17313_v49, 20.0  ;;  %v17362_v7 = vld [vmem:[#allocation67_spill] sm:$0xff]  ;;  %v17365_v11 = vld [vmem:[#allocation85_spill] sm:$0xff] }
 0x76e   : > { %v17299_v20 = vsel %vm13001_vm11, 4294967295, %v17298_v20  ;;  %vm13009_vm7 = vmand %vm12852_vm13, %vm17300_vm3  ;;  %vm17308_vm13 = vcmp.lt.f32.partialorder %v17307_v4, 20.0  ;;  %vm17316_vm3 = vnez %v17315_v48  ;;  %vm17319_vm11 = vcmp.lt.f32.partialorder %v16729_v1, 20.0  ;;  %v17366_v3 = vld [vmem:[#allocation68_spill] sm:$0xff]  ;;  %v17381_v30 = vld [vmem:[#allocation57_spill] sm:$0xff] }
 0x76f   : > { %vm13029_vm5 = vmand %vm17310_vm1, %vm17308_vm13  ;;  %vm17322_vm13 = vcmp.lt.f32.partialorder %v16769_v38, 20.0  ;;  %v17337_v38 = vmax.f32 %v17335_v58, %v17336_v42  ;;  %v17350_v42 = vld [vmem:[#allocation24_spill] sm:$0xff]  ;;  %v17367_v53 = vmax.f32 %v17365_v11, %v17366_v3  ;;  %v17386_v11 = vld [vmem:[#allocation150_spill] sm:$0xff] }
 0x770   : > { %vm13037_vm2 = vmand %vm17316_vm3, %vm17314_vm12  ;;  %vm17325_vm12 = vcmp.ge.f32.partialorder %v16969_v0, 4.0  ;;  %v17351_v58 = vmax.f32 %v17349_v16, %v17350_v42  ;;  %v17405_v61 = vld [vmem:[#allocation50_spill] sm:$0xff]  ;;  %v17476_v48 = vld [vmem:[#allocation48_spill] sm:$0xff] }
 0x771   : > { %vm13045_vm14 = vmand %vm12694_vm9, %vm17319_vm11  ;;  %vm17332_vm11 = vcmp.ge.f32.partialorder %v16997_v46, 4.0  ;;  %vm17338_vm9 = vnez %v16981_v57  ;;  %v17352_v57 = vld [vmem:[#allocation183_spill] sm:$0xff]  ;;  %v17435_v51 = vld [vmem:[#allocation70_spill] sm:$0xff] }
 0x772   : > { %vm13053_vm1 = vmand %vm12746_vm6, %vm17322_vm13  ;;  %vm17329_vm6 = vcmp.lt.f32.partialorder %v16811_v27, 20.0  ;;  %v13099_v27 = vsel %vm17338_vm9, %v17337_v38, 0.0  ;;  %vm17353_vm9 = vnez %v17352_v57  ;;  %v17370_v57 = vld [vmem:[#allocation13_spill] sm:$0xff]  ;;  %v17504_v55 = vld [vmem:[#allocation51_spill] sm:$0xff] }
 0x773   : > { %vm13061_vm3 = vmand %vm12905_vm4, %vm17325_vm12  ;;  %v13120_v38 = vsel %vm17353_vm9, %v17351_v58, 0.0  ;;  %vm17364_vm9 = vnez %v17010_v54  ;;  %v17369_v58 = vld [vmem:[#allocation18_spill] sm:$0xff]  ;;  %vm17380_vm12 = vnez %v17031_v15  ;;  %v17638_v33 = vld [vmem:[#allocation145_spill] sm:$0xff] }
 0x774   : > { %vm13081_vm4 = vmand %vm12799_vm10, %vm17329_vm6  ;;  %vm17343_vm10 = vnez %v17342_v29  ;;  %vm17354_vm6 = vcmp.lt.f32.partialorder %v16949_v37, 20.0  ;;  %v17361_v29 = vld [vmem:[#allocation86_spill] sm:$0xff] }
 0x775   : > { %vm13089_vm13 = vmand %vm12957_vm8, %vm17332_vm11  ;;  %v13106_v2 = vsel %vm17343_vm10, %v17341_v12, 0.0  ;;  %vm17348_vm8 = vnez %v17347_v35  ;;  %v17357_v35 = vld [vmem:[#allocation87_spill] sm:$0xff]  ;;  %v17363_v45 = vmax.f32 %v17361_v29, %v17362_v7  ;;  %v17382_v7 = vld [vmem:[#allocation149_spill] sm:$0xff] }
 0x776   : > { %v13113_v36 = vsel %vm17348_vm8, %v17346_v28, 0.0  ;;  %vm13126_vm11 = vmand %vm13009_vm7, %vm17354_vm6  ;;  %v17358_v28 = vld [vmem:[#allocation69_spill] sm:$0xff]  ;;  %vm17360_vm8 = vnez %v17006_v14  ;;  %vm17368_vm7 = vnez %v17014_v25  ;;  %vm17372_vm6 = vnez %v17018_v62  ;;  %v17377_v25 = vld [vmem:[#allocation88_spill] sm:$0xff] }
 0x777   : > { %v17359_v52 = vmax.f32 %v17357_v35, %v17358_v28  ;;  %v13143_v37 = vsel %vm17364_vm9, %v17363_v45, 0.0  ;;  %v13150_v42 = vsel %vm17368_vm7, %v17367_v53, 0.0  ;;  %v17371_v35 = vmax.f32 %v17369_v58, %v17370_v57  ;;  %v17376_v28 = vld [vmem:[#allocation134_spill] sm:$0xff]  ;;  %v17385_v45 = vld [vmem:[#allocation89_spill] sm:$0xff]  ;;  %v17390_v58 = vld [vmem:[#allocation52_spill] sm:$0xff] }
 0x778   : > { %v17387_v3 = vmax.f32 %v17385_v45, %v17386_v11  ;;  %v17391_v57 = vld [vmem:[#allocation119_spill] sm:$0xff]  ;;  %v17411_v45 = vld [vmem:[#allocation44_spill] sm:$0xff]  ;;  %v17412_v11 = vld [vmem:[#allocation153_spill] sm:$0xff]  ;;  %v4494_v54 = vrot.slane %v13113_v36, 3  ;;  %v5096_v34 = vrot.slane %v13143_v37, 5 }
 0x779   : > { %v13136_v16 = vsel %vm17360_vm8, %v17359_v52, 0.0  ;;  %v13157_v14 = vsel %vm17372_vm6, %v17371_v35, 0.0  ;;  %vm17373_vm8 = vcmp.lt.f32.partialorder %v16969_v0, 20.0  ;;  %v17378_v52 = vld [vmem:[#allocation16_spill] sm:$0xff]  ;;  %v17383_v0 = vmax.f32 %v17381_v30, %v17382_v7  ;;  %v17402_v30 = vld [vmem:[#allocation30_spill] sm:$0xff] }
 0x77a   : > { %vm13163_vm9 = vmand %vm13061_vm3, %vm17373_vm8  ;;  %v17379_v29 = vmax.f32 %v17377_v25, %v17378_v52  ;;  %vm17384_vm6 = vnez %v17035_v10  ;;  %vm17388_vm3 = vnez %v17039_v19  ;;  %v17392_v35 = vmax.f32 %v17390_v58, %v17391_v57  ;;  %v17398_v25 = vld [vmem:[#allocation135_spill] sm:$0xff]  ;;  %v17399_v19 = vld [vmem:[#allocation90_spill] sm:$0xff] }
 0x77b   : > { %v13181_v1 = vsel %vm17384_vm6, %v17383_v0, 0.0  ;;  %v13188_v53 = vsel %vm17388_vm3, %v17387_v3, 0.0  ;;  %vm17395_vm8 = vcmp.lt.f32.partialorder %v16997_v46, 20.0  ;;  %v17396_v10 = vmov 0  ;;  %v17400_v52 = vld [vmem:[#allocation152_spill] sm:$0xff]  ;;  %v17408_v0 = vld [vmem:[#allocation127_spill] sm:$0xff] }
 0x77c   : > { %v13174_v62 = vsel %vm17380_vm12, %v17379_v29, 0.0  ;;  %17389 = vst [vmem:[#allocation10_spill] sm:$0xff] %v13188_v53  ;;  %vm17393_vm12 = vnez %v17044_v50  ;;  %vm13201_vm6 = vmand %vm13089_vm13, %vm17395_vm8  ;;  %v17401_v29 = vmax.f32 %v17399_v19, %v17400_v52  ;;  %vm17403_vm7 = vnez %v17402_v30  ;;  %v17406_v7 = vld [vmem:[#allocation120_spill] sm:$0xff]  ;;  %v17414_v58 = vld [vmem:[#allocation59_spill] sm:$0xff] }
 0x77d   : > { %v13195_v15 = vsel %vm17393_vm12, %v17392_v35, 0.0  ;;  %v17397_v10 = vsel %vm13201_vm6, 4294967295, %v17396_v10  ;;  %v17407_v46 = vmax.f32 %v17405_v61, %v17406_v7  ;;  %vm17409_vm12 = vnez %v17408_v0  ;;  %v17417_v35 = vld [vmem:[#allocation46_spill] sm:$0xff]  ;;  %v17420_v30 = vld [vmem:[#allocation163_spill] sm:$0xff]  ;;  %v17429_v0 = vld [vmem:[#allocation101_spill] sm:$0xff] }
 0x77e   : > { %17394 = vst [vmem:[#allocation47_spill] sm:$0xff] %v13195_v15  ;;  %v13212_v50 = vsel %vm17403_vm7, %v17401_v29, 0.0  ;;  %v17413_v3 = vmax.f32 %v17411_v45, %v17412_v11  ;;  %vm17415_vm13 = vnez %v17414_v58  ;;  %v17418_v19 = vld [vmem:[#allocation154_spill] sm:$0xff]  ;;  %vm17421_vm7 = vnez %v17420_v30  ;;  %v17423_v61 = vld [vmem:[#allocation131_spill] sm:$0xff]  ;;  %v17430_v45 = vld [vmem:[#allocation125_spill] sm:$0xff] }
 0x77f   : > { %17404 = vst [vmem:[#allocation9_spill] sm:$0xff] %v13212_v50  ;;  %v13219_v41 = vsel %vm17409_vm12, %v17407_v46, 0.0  ;;  %v17419_v52 = vmax.f32 %v17417_v35, %v17418_v19  ;;  %vm17424_vm8 = vcmp.lt.f32.partialorder %v17423_v61, 20.0  ;;  %vm17425_vm12 = vcmp.ge.f32.partialorder %v17423_v61, 4.0  ;;  %v17428_v46 = vld [vmem:[#allocation138_spill] sm:$0xff]  ;;  %v17436_v35 = vld [vmem:[#allocation155_spill] sm:$0xff] }
 0x780   : > { %17410 = vst [vmem:[#allocation28_spill] sm:$0xff] %v13219_v41  ;;  %v13226_v57 = vsel %vm17415_vm13, %v17413_v3, 0.0  ;;  %vm13239_vm10 = vmand %vm17425_vm12, %vm17424_vm8  ;;  %v17431_v11 = vmax.f32 %v17429_v0, %v17430_v45  ;;  %v17432_v3 = vld [vmem:[#allocation6_spill] sm:$0xff]  ;;  %v17437_v19 = vmax.f32 %v17435_v51, %v17436_v35  ;;  %v17441_v61 = vld [vmem:[#allocation45_spill] sm:$0xff] }
 0x781   : > { %17416 = vst [vmem:[#allocation82_spill] sm:$0xff] %v13226_v57  ;;  %v13233_v29 = vsel %vm17421_vm7, %v17419_v52, 0.0  ;;  %vm17433_vm6 = vnez %v17432_v3  ;;  %v17438_v52 = vld [vmem:[#allocation78_spill] sm:$0xff]  ;;  %v17444_v41 = vld [vmem:[#allocation56_spill] sm:$0xff]  ;;  %v17447_v15 = vld [vmem:[#allocation91_spill] sm:$0xff] }
 0x782   : > { %17422 = vst [vmem:[#allocation33_spill] sm:$0xff] %v13233_v29  ;;  %v13250_v58 = vsel %vm17433_vm6, %v17431_v11, 0.0  ;;  %vm17439_vm7 = vnez %v17438_v52  ;;  %v17442_v29 = vld [vmem:[#allocation156_spill] sm:$0xff]  ;;  %vm17445_vm8 = vnez %v17444_v41  ;;  %v17448_v0 = vld [vmem:[#allocation157_spill] sm:$0xff]  ;;  %v17459_v41 = vld [vmem:[#allocation35_spill] sm:$0xff] }
 0x783   : > { %17434 = vst [vmem:[#allocation80_spill] sm:$0xff] %v13250_v58  ;;  %v13257_v30 = vsel %vm17439_vm7, %v17437_v19, 0.0  ;;  %v17443_v57 = vmax.f32 %v17441_v61, %v17442_v29  ;;  %v17449_v45 = vmax.f32 %v17447_v15, %v17448_v0  ;;  %v17450_v3 = vld [vmem:[#allocation77_spill] sm:$0xff]  ;;  %v17453_v58 = vld [vmem:[#allocation132_spill] sm:$0xff]  ;;  %v17466_v61 = vld [vmem:[#allocation159_spill] sm:$0xff] }
 0x784   : > { %17440 = vst [vmem:[#allocation40_spill] sm:$0xff] %v13257_v30  ;;  %vm17451_vm6 = vnez %v17450_v3  ;;  %vm17454_vm12 = vcmp.lt.f32.partialorder %v17453_v58, 20.0  ;;  %vm17455_vm3 = vcmp.ge.f32.partialorder %v17453_v58, 4.0  ;;  %v17458_v29 = vld [vmem:[#allocation12_spill] sm:$0xff]  ;;  %v17462_v19 = vld [vmem:[#allocation5_spill] sm:$0xff]  ;;  %v17470_v58 = vld [vmem:[#allocation55_spill] sm:$0xff] }
 0x785   : > { %v13264_v50 = vsel %vm17445_vm8, %v17443_v57, 0.0  ;;  %v13271_v11 = vsel %vm17451_vm6, %v17449_v45, 0.0  ;;  %vm13277_vm7 = vmand %vm17455_vm3, %vm17454_vm12  ;;  %v17460_v57 = vld [vmem:[#allocation158_spill] sm:$0xff]  ;;  %vm17463_vm8 = vnez %v17462_v19  ;;  %v17465_v52 = vld [vmem:[#allocation92_spill] sm:$0xff] }
 0x786   : > { %17446 = vst [vmem:[#allocation99_spill] sm:$0xff] %v13264_v50  ;;  %v17461_v35 = vmax.f32 %v17459_v41, %v17460_v57  ;;  %v17467_v0 = vmax.f32 %v17465_v52, %v17466_v61  ;;  %v17473_v30 = vld [vmem:[#allocation53_spill] sm:$0xff]  ;;  %v17477_v41 = vld [vmem:[#allocation160_spill] sm:$0xff]  ;;  %v17479_v19 = vld [vmem:[#allocation95_spill] sm:$0xff] }
 0x787   : > { %17452 = vst [vmem:[#allocation27_spill] sm:$0xff] %v13271_v11  ;;  %v17471_v11 = vld [vmem:[#allocation126_spill] sm:$0xff]  ;;  %vm17474_vm3 = vnez %v17473_v30  ;;  %v17478_v57 = vmax.f32 %v17476_v48, %v17477_v41  ;;  %vm17480_vm6 = vnez %v17479_v19  ;;  %v17493_v45 = vld [vmem:[#allocation61_spill] sm:$0xff]  ;;  %v17541_v51 = vld [vmem:[#allocation43_spill] sm:$0xff] }
 0x788   : > { %v13287_v15 = vsel %vm17463_vm8, %v17461_v35, 0.0  ;;  %v13294_v3 = vsel %vm12775_vm15, %v17467_v0, 0.0  ;;  %v17472_v50 = vmax.f32 %v17470_v58, %v17471_v11  ;;  %v17487_v11 = vld [vmem:[#allocation111_spill] sm:$0xff]  ;;  %v17488_v30 = vld [vmem:[#allocation38_spill] sm:$0xff]  ;;  %v17522_v7 = vld [vmem:[#allocation49_spill] sm:$0xff] }
 0x789   : > { %17464 = vst [vmem:[#allocation100_spill] sm:$0xff] %v13287_v15  ;;  %v13308_v35 = vsel %vm17480_vm6, %v17478_v57, 0.0  ;;  %v17482_v15 = vld [vmem:[#allocation133_spill] sm:$0xff]  ;;  %v17491_v0 = vld [vmem:[#allocation83_spill] sm:$0xff]  ;;  %v17494_v58 = vld [vmem:[#allocation66_spill] sm:$0xff]  ;;  %vm4224_vm13 = vcmp.lt.f32.partialorder %v17487_v11, 20.0 }
 0x78a   : > { %17469 = vst [vmem:[#allocation63_spill] sm:$0xff] %v13294_v3  ;;  %v13301_v53 = vsel %vm17474_vm3, %v17472_v50, 0.0  ;;  %vm17483_vm12 = vcmp.lt.f32.partialorder %v17482_v15, 20.0  ;;  %vm17484_vm8 = vcmp.ge.f32.partialorder %v17482_v15, 4.0  ;;  %v17489_v50 = vld [vmem:[#allocation161_spill] sm:$0xff]  ;;  %vm17492_vm3 = vnez %v17491_v0  ;;  %v17496_v57 = vld [vmem:[#allocation96_spill] sm:$0xff] }
 0x78b   : > { %17475 = vst [vmem:[#allocation103_spill] sm:$0xff] %v13301_v53  ;;  %vm13314_vm15 = vmand %vm17484_vm8, %vm17483_vm12  ;;  %v17490_v61 = vmax.f32 %v17488_v30, %v17489_v50  ;;  %v17495_v41 = vmax.f32 %v17493_v45, %v17494_v58  ;;  %vm17497_vm6 = vnez %v17496_v57  ;;  %v17498_v15 = vld [vmem:[#allocation58_spill] sm:$0xff]  ;;  %v17501_v3 = vld [vmem:[#allocation84_spill] sm:$0xff] }
 0x78c   : > { %17481 = vst [vmem:[#allocation8_spill] sm:$0xff] %v13308_v35  ;;  %v17499_v35 = vld [vmem:[#allocation102_spill] sm:$0xff]  ;;  %vm17502_vm12 = vnez %v17501_v3  ;;  %v17507_v0 = vld [vmem:[#allocation97_spill] sm:$0xff]  ;;  %v17514_v3 = vld [vmem:[#allocation60_spill] sm:$0xff] }
 0x78d   : > { %v13324_v48 = vsel %vm17492_vm3, %v17490_v61, 0.0  ;;  %v13331_v19 = vsel %vm17497_vm6, %v17495_v41, 0.0  ;;  %v17500_v53 = vmax.f32 %v17498_v15, %v17499_v35  ;;  %v17505_v30 = vld [vmem:[#allocation162_spill] sm:$0xff]  ;;  %vm17508_vm8 = vnez %v17507_v0  ;;  %v17513_v35 = vld [vmem:[#allocation151_spill] sm:$0xff]  ;;  %v17519_v57 = vld [vmem:[#allocation140_spill] sm:$0xff] }
 0x78e   : > { %v17506_v50 = vmax.f32 %v17504_v55, %v17505_v30  ;;  %vm17510_vm3 = vcmp.ge.f32.partialorder %v17244_v5, 4.0  ;;  %v17518_v41 = vld [vmem:[#allocation42_spill] sm:$0xff]  ;;  %v17559_v52 = vld [vmem:[#allocation128_spill] sm:$0xff] }
 0x78f   : > { %v13338_v44 = vsel %vm17502_vm12, %v17500_v53, 0.0  ;;  %vm13351_vm6 = vmand %vm13239_vm10, %vm17510_vm3  ;;  %v17515_v53 = vld [vmem:[#allocation106_spill] sm:$0xff]  ;;  %vm17517_vm12 = vnez %v17221_v43  ;;  %v17520_v15 = vmax.f32 %v17518_v41, %v17519_v57  ;;  %vm17525_vm10 = vnez %v17233_v23  ;;  %v17533_v23 = vld [vmem:[#allocation31_spill] sm:$0xff] }
 0x790   : > { %17503 = vst [vmem:[#allocation104_spill] sm:$0xff] %v13338_v44  ;;  %v13345_v61 = vsel %vm17508_vm8, %v17506_v50, 0.0  ;;  %v17516_v58 = vmax.f32 %v17514_v3, %v17515_v53  ;;  %vm17521_vm8 = vnez %v17227_v9  ;;  %v17523_v50 = vld [vmem:[#allocation164_spill] sm:$0xff]  ;;  %v17526_v44 = vld [vmem:[#allocation54_spill] sm:$0xff]  ;;  %v17527_v3 = vld [vmem:[#allocation117_spill] sm:$0xff]  ;;  %vm17529_vm3 = vnez %v17239_v32 }
 0x791   : > { %17509 = vst [vmem:[#allocation62_spill] sm:$0xff] %v13345_v61  ;;  %v13368_v30 = vsel %vm17521_vm8, %v17520_v15, 0.0  ;;  %v17524_v0 = vmax.f32 %v17522_v7, %v17523_v50  ;;  %v17528_v53 = vmax.f32 %v17526_v44, %v17527_v3  ;;  %v17537_v32 = vld [vmem:[#allocation39_spill] sm:$0xff]  ;;  %v17538_v57 = vld [vmem:[#allocation165_spill] sm:$0xff]  ;;  %v17542_v50 = vld [vmem:[#allocation122_spill] sm:$0xff] }
 0x792   : > { %v13361_v55 = vsel %vm17517_vm12, %v17516_v58, 0.0  ;;  %vm17530_vm12 = vcmp.ge.f32.partialorder %v17273_v56, 4.0  ;;  %v17534_v58 = vld [vmem:[#allocation141_spill] sm:$0xff]  ;;  %v17539_v15 = vmax.f32 %v17537_v32, %v17538_v57  ;;  %v17575_v45 = vld [vmem:[#allocation168_spill] sm:$0xff] }
 0x793   : > { %v13375_v61 = vsel %vm17525_vm10, %v17524_v0, 0.0  ;;  %v13382_v43 = vsel %vm17529_vm3, %v17528_v53, 0.0  ;;  %vm13388_vm8 = vmand %vm13277_vm7, %vm17530_vm12  ;;  %v17535_v41 = vmax.f32 %v17533_v23, %v17534_v58  ;;  %vm17536_vm10 = vnez %v17252_v8  ;;  %v17545_v53 = vld [vmem:[#allocation41_spill] sm:$0xff]  ;;  %v17546_v23 = vld [vmem:[#allocation142_spill] sm:$0xff] }
 0x794   : > { %vm17540_vm3 = vnez %v17258_v6  ;;  %v17543_v0 = vmax.f32 %v17541_v51, %v17542_v50  ;;  %vm17544_vm7 = vnez %v17263_v40  ;;  %v17547_v58 = vmax.f32 %v17545_v53, %v17546_v23  ;;  %v17552_v40 = vld [vmem:[#allocation64_spill] sm:$0xff]  ;;  %v17562_v23 = vld [vmem:[#allocation37_spill] sm:$0xff] }
 0x795   : > { %v13398_v44 = vsel %vm17536_vm10, %v17535_v41, 0.0  ;;  %v13405_v7 = vsel %vm17540_vm3, %v17539_v15, 0.0  ;;  %vm17548_vm12 = vnez %v17268_v26  ;;  %vm17549_vm10 = vcmp.ge.f32.partialorder %v17303_v21, 4.0  ;;  %v17553_v41 = vld [vmem:[#allocation166_spill] sm:$0xff]  ;;  %v17556_v26 = vld [vmem:[#allocation25_spill] sm:$0xff]  ;;  %v17557_v15 = vld [vmem:[#allocation123_spill] sm:$0xff] }
 0x796   : > { %v13412_v3 = vsel %vm17544_vm7, %v17543_v0, 0.0  ;;  %v13419_v8 = vsel %vm17548_vm12, %v17547_v58, 0.0  ;;  %vm13425_vm3 = vmand %vm13314_vm15, %vm17549_vm10  ;;  %v17554_v32 = vmax.f32 %v17552_v40, %v17553_v41  ;;  %vm17555_vm7 = vnez %v17282_v63  ;;  %v17563_v58 = vld [vmem:[#allocation167_spill] sm:$0xff] }
 0x797   : > { %v17558_v51 = vmax.f32 %v17556_v26, %v17557_v15  ;;  %v17560_v0 = vmax.f32 %v17246_v17, %v17559_v52  ;;  %vm17561_vm15 = vnez %v17294_v13  ;;  %v17564_v40 = vmax.f32 %v17562_v23, %v17563_v58  ;;  %v17569_v17 = vld [vmem:[#allocation36_spill] sm:$0xff]  ;;  %v17573_v26 = vld [vmem:[#allocation129_spill] sm:$0xff]  ;;  %v17578_v23 = vld [vmem:[#allocation130_spill] sm:$0xff] }
 0x798   : > { %v13435_v57 = vsel %vm17555_vm7, %v17554_v32, 0.0  ;;  %vm17565_vm12 = vnez %v17299_v20  ;;  %vm17566_vm10 = vcmp.lt.f32.partialorder %v17244_v5, 20.0  ;;  %vm4225_vm7 = vcmp.lt.f32.partialorder %v17513_v35, 20.0  ;;  %v17570_v13 = vld [vmem:[#allocation124_spill] sm:$0xff]  ;;  %v17572_v20 = vld [vmem:[#allocation22_spill] sm:$0xff] }
 0x799   : > { %v13442_v50 = vsel %vm12985_vm0, %v17558_v51, 0.0  ;;  %v13449_v53 = vsel %vm17561_vm15, %v17560_v0, 0.0  ;;  %v13456_v63 = vsel %vm17565_vm12, %v17564_v40, 0.0  ;;  %vm13462_vm0 = vmand %vm13351_vm6, %vm17566_vm10  ;;  %v17571_v41 = vmax.f32 %v17569_v17, %v17570_v13  ;;  %v17577_v0 = vld [vmem:[#allocation34_spill] sm:$0xff]  ;;  %v17584_v40 = vld [vmem:[#allocation172_spill] sm:$0xff] }
 0x79a   : > { %v17574_v15 = vmax.f32 %v17572_v20, %v17573_v26  ;;  %v17576_v51 = vmax.f32 %v17275_v18, %v17575_v45  ;;  %v17579_v58 = vmax.f32 %v17577_v0, %v17578_v23  ;;  %v17583_v18 = vld [vmem:[#allocation32_spill] sm:$0xff]  ;;  %v17586_v13 = vld [vmem:[#allocation23_spill] sm:$0xff]  ;;  %v4504_v6 = vrot.slane %v13174_v62, 3 }
 0x79b   : > { %v13472_v32 = vsel %vm13029_vm5, %v17571_v41, 0.0  ;;  %vm17580_vm5 = vcmp.lt.f32.partialorder %v17273_v56, 20.0  ;;  %v17585_v4 = vmax.f32 %v17583_v18, %v17584_v40  ;;  %v17587_v41 = vld [vmem:[#allocation173_spill] sm:$0xff]  ;;  %v17589_v56 = vmax.f32 %v16950_v59, %v12451_v22  ;;  %v17590_v26 = vld [vmem:[#allocation143_spill] sm:$0xff] }
 0x79c   : > { %v13479_v5 = vsel %vm13037_vm2, %v17574_v15, 0.0  ;;  %v13486_v52 = vsel %vm13045_vm14, %v17576_v51, 0.0  ;;  %v13493_v39 = vsel %vm13053_vm1, %v17579_v58, 0.0  ;;  %vm13499_vm2 = vmand %vm13388_vm8, %vm17580_vm5  ;;  %v17588_v24 = vmax.f32 %v17586_v13, %v17587_v41  ;;  %v17627_v40 = vld [vmem:[#allocation79_spill] sm:$0xff] }
 0x79d   : > { %v13508_v17 = vsel %vm13081_vm4, %v17585_v4, 0.0  ;;  %v13522_v9 = vsel %vm13163_vm9, %v17589_v56, 0.0  ;;  %v17591_v15 = vmax.f32 %v17304_v60, %v17590_v26  ;;  %vm17592_vm14 = vnez %v17397_v10 }
 0x79e   : > { %v13515_v20 = vsel %vm13126_vm11, %v17588_v24, 0.0  ;;  %vm17593_vm1 = vcmp.lt.f32.partialorder %v17303_v21, 20.0  ;;  %v4491_v59 = vrot.slane %v13099_v27, 3  ;;  %v4492_v22 = vrot.slane %v13106_v2, 3 }
 0x79f   : > { %v13529_v49 = vsel %vm17592_vm14, %v17591_v15, 0.0  ;;  %vm13535_vm4 = vmand %vm13425_vm3, %vm17593_vm1  ;;  %v4501_v60 = vrot.slane %v13150_v42, 3  ;;  %vm17596_vm11 = vcmp.lt.f32.partialorder %v17376_v28, 20.0  ;;  %vm17597_vm9 = vcmp.ge.f32.partialorder %v17376_v28, 4.0 }
 0x7a0   : > { %vm13547_vm6 = vmand %vm17597_vm9, %vm17596_vm11  ;;  %v4502_v10 = vrot.slane %v13157_v14, 3  ;;  %v4628_v45 = vrot.slane %v13099_v27, 4  ;;  %v4629_v51 = vrot.slane %v13106_v2, 4  ;;  %vm17600_vm8 = vcmp.lt.f32.partialorder %v17398_v25, 20.0 }
 0x7a1   : > { %vm17601_vm3 = vcmp.ge.f32.partialorder %v17398_v25, 4.0  ;;  %v4631_v28 = vrot.slane %v13113_v36, 4  ;;  %v5088_v23 = vrot.slane %v13099_v27, 5  ;;  %v5089_v58 = vrot.slane %v13106_v2, 5 }
 0x7a2   : > { %vm13559_vm15 = vmand %vm17601_vm3, %vm17600_vm8  ;;  %v5091_v18 = vrot.slane %v13113_v36, 5  ;;  %vm17604_vm12 = vcmp.lt.f32.partialorder %v17428_v46, 20.0  ;;  %vm17605_vm10 = vcmp.ge.f32.partialorder %v17428_v46, 4.0  ;;  %vm4627_vm14 = vcmask 1043456  }
 0x7a3   : > { %vm13571_vm5 = vmand %vm17605_vm10, %vm17604_vm12  ;;  %vm4490_vm1 = vcmask 1044480   ;;  %vm5087_vm11 = vcmask 1042432   ;;  %v4633_v25 = vrot.slane %v13120_v38, 4  ;;  %vm17608_vm9 = vcmp.ge.f32.partialorder %v17458_v29, 4.0 }
 0x7a4   : > { %vm13580_vm8 = vmand %vm13547_vm6, %vm17608_vm9  ;;  %v4630_v36 = vsel %vm4627_vm14, %v4628_v45, %v4629_v51  ;;  %v4632_v27 = vsel %vm4627_vm14, %v4629_v51, %v4631_v28  ;;  %v4493_v46 = vsel %vm4490_vm1, %v4491_v59, %v4492_v22  ;;  %v4495_v4 = vsel %vm4490_vm1, %v4492_v22, %v4494_v54 }
 0x7a5   : > { %vm17611_vm3 = vcmp.ge.f32.partialorder %v17487_v11, 4.0  ;;  %v4740_v41 = vpack.c.bf16 %v4632_v27, %v4630_v36  ;;  %v4603_v24 = vpack.c.bf16 %v4495_v4, %v4493_v46  ;;  %v5090_v56 = vsel %vm5087_vm11, %v5088_v23, %v5089_v58  ;;  %v17631_v36 = vld [vmem:[#allocation179_spill] sm:$0xff]  ;;  %v17634_v4 = vld [vmem:[#allocation180_spill] sm:$0xff] }
 0x7a6   : > { %vm13592_vm12 = vmand %vm13559_vm15, %vm17611_vm3  ;;  %v5092_v26 = vsel %vm5087_vm11, %v5089_v58, %v5091_v18  ;;  %vm17614_vm6 = vcmp.ge.f32.partialorder %v17513_v35, 4.0  ;;  %v4503_v22 = vsel %vm4490_vm1, %v4501_v60, %v4502_v10  ;;  %v4505_v54 = vsel %vm4490_vm1, %v4502_v10, %v4504_v6  ;;  %v17630_v35 = vld [vmem:[#allocation75_spill] sm:$0xff] }
 0x7a7   : > { %vm13602_vm10 = vmand %vm13571_vm5, %vm17614_vm6  ;;  %v5200_v59 = vpack.c.bf16 %v5092_v26, %v5090_v56  ;;  %v4634_v21 = vrot.slane %v13136_v16, 4  ;;  %vm17617_vm15 = vcmp.lt.f32.partialorder %v17458_v29, 20.0  ;;  %vm17620_vm3 = vcmask 523264   ;;  %v17637_v56 = vld [vmem:[#allocation93_spill] sm:$0xff] }
 0x7a8   : > { %vm13613_vm9 = vmand %vm13580_vm8, %vm17617_vm15  ;;  %7846 = vmatmul.msk.bf16.vlgmr.msrb.gmra.mxu3 %vm17620_vm3, %v4740_v41  ;;  %v13619_v51 = vpack.c.bf16 %v4505_v54, %v4503_v22  ;;  %v4636_v60 = vrot.slane %v13143_v37, 4  ;;  %v4496_v10 = vrot.slane %v13120_v38, 3  ;;  %v4497_v6 = vrot.slane %v13136_v16, 3  ;;  %v17636_v41 = vld [vmem:[#allocation10_spill] sm:$0xff]  ;;  %v17640_v22 = vld [vmem:[#allocation47_spill] sm:$0xff] }
 0x7a9   : > { %vm17621_vm5 = vmmov %vm17620_vm3  ;;  %v17624_v0 = vmax.f32 %v17306_v47, %v17305_v31  ;;  %v4499_v23 = vrot.slane %v13143_v37, 3  ;;  %v5093_v58 = vrot.slane %v13120_v38, 5  ;;  %v5094_v11 = vrot.slane %v13136_v16, 5  ;;  %v17628_v38 = vld [vmem:[#allocation144_spill] sm:$0xff] }
 0x7aa   : > { %7878 = vmatmul.msk.bf16.vlgmr.msrb.gmra.mxu1 %vm17621_vm5, %v4603_v24  ;;  %vm13628_vm8 = vmand %vm13592_vm12, %vm4224_vm13  ;;  %v4635_v31 = vsel %vm4627_vm14, %v4633_v25, %v4634_v21  ;;  %v4637_v47 = vsel %vm4627_vm14, %v4634_v21, %v4636_v60  ;;  %v4506_v18 = vrot.slane %v13181_v1, 3  ;;  %v17629_v2 = vmax.f32 %v17627_v40, %v17628_v38  ;;  %v17633_v25 = vld [vmem:[#allocation72_spill] sm:$0xff]  ;;  %v17641_v21 = vld [vmem:[#allocation94_spill] sm:$0xff] }
 0x7ab   : > { %v13637_v28 = vsel %vm13462_vm0, %v17624_v0, 0.0  ;;  %vm17625_vm6 = vmmov %vm17620_vm3  ;;  %v17632_v27 = vmax.f32 %v17630_v35, %v17631_v36  ;;  %v17635_v13 = vmax.f32 %v17633_v25, %v17634_v4  ;;  %v4507_v24 = vrot.slane %v17636_v41, 3  ;;  %v17642_v60 = vld [vmem:[#allocation184_spill] sm:$0xff] }
 0x7ac   : > { %7918 = vmatmul.msk.bf16.vlgmr.msra.gmra.mxu2 %vm17625_vm6, %v5200_v59  ;;  %vm4279_vm13 = vmand %vm13602_vm10, %vm4225_vm7  ;;  %v13658_v16 = vsel %vm13499_vm2, %v17629_v2, 0.0  ;;  %v17639_v26 = vmax.f32 %v17637_v56, %v17638_v33  ;;  %v4498_v12 = vsel %vm4490_vm1, %v4496_v10, %v4497_v6  ;;  %v4500_v59 = vsel %vm4490_vm1, %v4497_v6, %v4499_v23 }
 0x7ad   : > { %vm17626_vm12 = vmmov %vm17620_vm3  ;;  %v13665_v46 = vsel %vm13535_vm4, %v17632_v27, 0.0  ;;  %v13672_v37 = vsel %vm13613_vm9, %v17635_v13, 0.0  ;;  %v4509_v54 = vrot.slane %v17640_v22, 3  ;;  %v17643_v45 = vmax.f32 %v17641_v21, %v17642_v60  ;;  %v17649_v13 = vld [vmem:[#allocation82_spill] sm:$0xff]  ;;  %v17650_v21 = vld [vmem:[#allocation33_spill] sm:$0xff] }
 0x7ae   : > { %8078 = vmatmul.msk.bf16.vlgmr.msra.gmra.mxu0 %vm17626_vm12, %v13619_v51  ;;  %v13680_v15 = vsel %vm13628_vm8, %v17639_v26, 0.0  ;;  %v13690_v40 = vpack.c.bf16 %v4637_v47, %v4635_v31  ;;  %v5095_v38 = vsel %vm5087_vm11, %v5093_v58, %v5094_v11  ;;  %v5097_v2 = vsel %vm5087_vm11, %v5094_v11, %v5096_v34  ;;  %v17647_v11 = vld [vmem:[#allocation9_spill] sm:$0xff]  ;;  %vm17653_vm0 = vmmov %vm17620_vm3 }
 0x7af   : > { %v13688_v0 = vsel %vm4279_vm13, %v17643_v45, 0.0  ;;  %v4508_v29 = vsel %vm4490_vm1, %v4506_v18, %v4507_v24  ;;  %v4510_v35 = vsel %vm4490_vm1, %v4507_v24, %v4509_v54  ;;  %v4638_v10 = vrot.slane %v13150_v42, 4  ;;  %v17648_v18 = vld [vmem:[#allocation28_spill] sm:$0xff]  ;;  %vm17654_vm7 = vmmov %vm17653_vm0 }
 0x7b0   : > { %17644 = vst [vmem:[#allocation105_spill] sm:$0xff] %v13690_v40  ;;  %v4639_v6 = vrot.slane %v13157_v14, 4  ;;  %v13698_v23 = vpack.c.bf16 %v4500_v59, %v4498_v12  ;;  %v4641_v36 = vrot.slane %v13174_v62, 4  ;;  %v5098_v27 = vrot.slane %v13150_v42, 5  ;;  %vm17656_vm2 = vmmov %vm17653_vm0 }
 0x7b1   : > { %v5099_v31 = vrot.slane %v13157_v14, 5  ;;  %v13703_v47 = vpack.c.bf16 %v5097_v2, %v5095_v38  ;;  %v5101_v58 = vrot.slane %v13174_v62, 5  ;;  %v4511_v34 = vrot.slane %v17647_v11, 3  ;;  %vm17658_vm4 = vmmov %vm17653_vm0 }
 0x7b2   : > { %17645 = vst [vmem:[#allocation71_spill] sm:$0xff] %v13698_v23  ;;  %v4512_v25 = vrot.slane %v17648_v18, 3  ;;  %v13708_v4 = vpack.c.bf16 %v4510_v35, %v4508_v29  ;;  %v4514_v24 = vrot.slane %v17649_v13, 3  ;;  %v4643_v56 = vrot.slane %v13181_v1, 4  ;;  %v17651_v29 = vld [vmem:[#allocation80_spill] sm:$0xff]  ;;  %vm17668_vm10 = vmmov %vm17653_vm0 }
 0x7b3   : > { %17646 = vst [vmem:[#allocation107_spill] sm:$0xff] %v13703_v47  ;;  %v4644_v33 = vrot.slane %v17636_v41, 4  ;;  %v4640_v42 = vsel %vm4627_vm14, %v4638_v10, %v4639_v6  ;;  %v4646_v14 = vrot.slane %v17640_v22, 4  ;;  %v5103_v26 = vrot.slane %v13181_v1, 5  ;;  %v17652_v10 = vld [vmem:[#allocation40_spill] sm:$0xff]  ;;  %vm17669_vm15 = vmmov %vm17653_vm0 }
 0x7b4   : > { %v5104_v62 = vrot.slane %v17636_v41, 5  ;;  %v4642_v12 = vsel %vm4627_vm14, %v4639_v6, %v4641_v36  ;;  %v5100_v59 = vsel %vm5087_vm11, %v5098_v27, %v5099_v31  ;;  %v5106_v54 = vrot.slane %v17640_v22, 5  ;;  %vm17670_vm9 = vmmov %vm17653_vm0 }
 0x7b5   : > { %v4516_v60 = vrot.slane %v17650_v21, 3  ;;  %v5102_v45 = vsel %vm5087_vm11, %v5099_v31, %v5101_v58  ;;  %v4513_v38 = vsel %vm4490_vm1, %v4511_v34, %v4512_v25  ;;  %v4515_v2 = vsel %vm4490_vm1, %v4512_v25, %v4514_v24  ;;  %vm17671_vm3 = vmmov %vm17653_vm0 }
 0x7b6   : > { %v4517_v35 = vrot.slane %v17651_v29, 3  ;;  %v4645_v1 = vsel %vm4627_vm14, %v4643_v56, %v4644_v33  ;;  %v4647_v41 = vsel %vm4627_vm14, %v4644_v33, %v4646_v14  ;;  %v4519_v6 = vrot.slane %v17652_v10, 3  ;;  %vm17672_vm5 = vmmov %vm17653_vm0 }
 0x7b7   : > { %v4648_v36 = vrot.slane %v17647_v11, 4  ;;  %v5105_v22 = vsel %vm5087_vm11, %v5103_v26, %v5104_v62  ;;  %v5107_v27 = vsel %vm5087_vm11, %v5104_v62, %v5106_v54  ;;  %v4649_v31 = vrot.slane %v17648_v18, 4  ;;  %v17655_v62 = vld [vmem:[#allocation99_spill] sm:$0xff]  ;;  %vm17673_vm8 = vmmov %vm17653_vm0 }
 0x7b8   : > { %v4651_v58 = vrot.slane %v17649_v13, 4  ;;  %v4518_v34 = vsel %vm4490_vm1, %v4516_v60, %v4517_v35  ;;  %v5108_v25 = vrot.slane %v17647_v11, 5  ;;  %v5109_v24 = vrot.slane %v17648_v18, 5  ;;  %7847 = vmatmul.msk.bf16.gmra.mxu3 %vm17653_vm0, %v13690_v40  ;;  %v17657_v60 = vld [vmem:[#allocation27_spill] sm:$0xff]  ;;  %vm17674_vm6 = vmmov %vm17653_vm0 }
 0x7b9   : > { %v5111_v56 = vrot.slane %v17649_v13, 5  ;;  %v4520_v33 = vsel %vm4490_vm1, %v4517_v35, %v4519_v6  ;;  %v4650_v14 = vsel %vm4627_vm14, %v4648_v36, %v4649_v31  ;;  %v4521_v54 = vrot.slane %v17655_v62, 3  ;;  %vm17675_vm13 = vmmov %vm17653_vm0 }
 0x7ba   : > { %7879 = vmatmul.msk.bf16.gmra.mxu1 %vm17654_vm7, %v13698_v23  ;;  %v4652_v26 = vsel %vm4627_vm14, %v4649_v31, %v4651_v58  ;;  %v13747_v11 = vpack.c.bf16 %v4642_v12, %v4640_v42  ;;  %v5110_v18 = vsel %vm5087_vm11, %v5108_v25, %v5109_v24  ;;  %v4522_v40 = vrot.slane %v17657_v60, 3  ;;  %v17659_v31 = vld [vmem:[#allocation100_spill] sm:$0xff]  ;;  %vm17680_vm12 = vmmov %vm17653_vm0 }
 0x7bb   : > { %v5112_v13 = vsel %vm5087_vm11, %v5109_v24, %v5111_v56  ;;  %v13754_v35 = vpack.c.bf16 %v5102_v45, %v5100_v59  ;;  %v13756_v6 = vpack.c.bf16 %v4515_v2, %v4513_v38  ;;  %v13758_v36 = vpack.c.bf16 %v4647_v41, %v4645_v1  ;;  %v17660_v45 = vld [vmem:[#allocation63_spill] sm:$0xff]  ;;  %vm17681_vm7 = vmmov %vm17653_vm0 }
 0x7bc   : > { %7919 = vmatmul.msk.bf16.gmra.mxu2 %vm17656_vm2, %v13703_v47  ;;  %v4524_v58 = vrot.slane %v17659_v31, 3  ;;  %v13761_v47 = vpack.c.bf16 %v5107_v27, %v5105_v22  ;;  %v13763_v42 = vpack.c.bf16 %v4520_v33, %v4518_v34  ;;  %v13765_v12 = vpack.c.bf16 %v4652_v26, %v4650_v14  ;;  %v17661_v22 = vld [vmem:[#allocation103_spill] sm:$0xff]  ;;  %v17662_v14 = vld [vmem:[#allocation8_spill] sm:$0xff]  ;;  %vm17682_vm2 = vmmov %vm17653_vm0 }
 0x7bd   : > { %v4523_v25 = vsel %vm4490_vm1, %v4521_v54, %v4522_v40  ;;  %v13768_v24 = vpack.c.bf16 %v5112_v13, %v5110_v18  ;;  %v4526_v38 = vrot.slane %v17660_v45, 3  ;;  %v4527_v27 = vrot.slane %v17661_v22, 3 }
 0x7be   : > { %8079 = vmatmul.msk.bf16.gmra.mxu0 %vm17658_vm4, %v13708_v4  ;;  %v4525_v56 = vsel %vm4490_vm1, %v4522_v40, %v4524_v58  ;;  %v4529_v26 = vrot.slane %v17662_v14, 3  ;;  %v4658_v40 = vrot.slane %v17655_v62, 4  ;;  %v4659_v13 = vrot.slane %v17657_v60, 4  ;;  %vm17701_vm4 = vmmov %vm17653_vm0 }
 0x7bf   : > { %v13773_v2 = vpack.c.bf16 %v4525_v56, %v4523_v25  ;;  %v4528_v18 = vsel %vm4490_vm1, %v4526_v38, %v4527_v27  ;;  %v4661_v58 = vrot.slane %v17659_v31, 4  ;;  %v5118_v56 = vrot.slane %v17655_v62, 5 }
 0x7c0   : > { %v4530_v25 = vsel %vm4490_vm1, %v4527_v27, %v4529_v26  ;;  %v5119_v34 = vrot.slane %v17657_v60, 5  ;;  %v5121_v33 = vrot.slane %v17659_v31, 5  ;;  %v4660_v59 = vsel %vm4627_vm14, %v4658_v40, %v4659_v13  ;;  %v17666_v60 = vld [vmem:[#allocation104_spill] sm:$0xff] }
 0x7c1   : > { %v13790_v41 = vpack.c.bf16 %v4530_v25, %v4528_v18  ;;  %v4662_v54 = vsel %vm4627_vm14, %v4659_v13, %v4661_v58  ;;  %v4531_v38 = vrot.slane %v13324_v48, 3  ;;  %v4532_v62 = vrot.slane %v13331_v19, 3  ;;  %v17667_v25 = vld [vmem:[#allocation62_spill] sm:$0xff] }
 0x7c2   : > { %v13795_v1 = vpack.c.bf16 %v4662_v54, %v4660_v59  ;;  %v5120_v23 = vsel %vm5087_vm11, %v5118_v56, %v5119_v34  ;;  %v5122_v27 = vsel %vm5087_vm11, %v5119_v34, %v5121_v33  ;;  %v4534_v31 = vrot.slane %v17666_v60, 3 }
 0x7c3   : > { %17663 = vst [vmem:[#allocation11_spill] sm:$0xff] %v13790_v41  ;;  %v13800_v26 = vpack.c.bf16 %v5122_v27, %v5120_v23  ;;  %v4663_v18 = vrot.slane %v17660_v45, 4  ;;  %v4664_v40 = vrot.slane %v17661_v22, 4  ;;  %v4533_v13 = vsel %vm4490_vm1, %v4531_v38, %v4532_v62 }
 0x7c4   : > { %17664 = vst [vmem:[#allocation108_spill] sm:$0xff] %v13795_v1  ;;  %v4666_v58 = vrot.slane %v17662_v14, 4  ;;  %v5123_v59 = vrot.slane %v17660_v45, 5  ;;  %v5124_v54 = vrot.slane %v17661_v22, 5  ;;  %v4535_v34 = vsel %vm4490_vm1, %v4532_v62, %v4534_v31 }
 0x7c5   : > { %17665 = vst [vmem:[#allocation14_spill] sm:$0xff] %v13800_v26  ;;  %v4665_v33 = vsel %vm4627_vm14, %v4663_v18, %v4664_v40  ;;  %v5126_v23 = vrot.slane %v17662_v14, 5  ;;  %v4536_v56 = vrot.slane %v17667_v25, 3  ;;  %v13813_v27 = vpack.c.bf16 %v4535_v34, %v4533_v13 }
 0x7c6   : > { %v4667_v26 = vsel %vm4627_vm14, %v4664_v40, %v4666_v58  ;;  %v5125_v38 = vsel %vm5087_vm11, %v5123_v59, %v5124_v54  ;;  %v4537_v1 = vrot.slane %v13361_v55, 3  ;;  %v4539_v22 = vrot.slane %v13368_v30, 3 }
 0x7c7   : > { %v13818_v41 = vpack.c.bf16 %v4667_v26, %v4665_v33  ;;  %v5127_v45 = vsel %vm5087_vm11, %v5124_v54, %v5126_v23  ;;  %v4668_v62 = vrot.slane %v13324_v48, 4  ;;  %v4669_v18 = vrot.slane %v13331_v19, 4 }
 0x7c8   : > { %7848 = vmatmul.msk.bf16.gmra.mxu3 %vm17668_vm10, %v13747_v11  ;;  %v13827_v14 = vpack.c.bf16 %v5127_v45, %v5125_v38  ;;  %v4538_v31 = vsel %vm4490_vm1, %v4536_v56, %v4537_v1  ;;  %v4671_v26 = vrot.slane %v17666_v60, 4  ;;  %v4540_v40 = vsel %vm4490_vm1, %v4537_v1, %v4539_v22  ;;  %vm17703_vm10 = vmmov %vm17653_vm0 }
 0x7c9   : > { %v5128_v13 = vrot.slane %v13324_v48, 5  ;;  %v5129_v58 = vrot.slane %v13331_v19, 5  ;;  %v5131_v59 = vrot.slane %v17666_v60, 5  ;;  %v13840_v54 = vpack.c.bf16 %v4540_v40, %v4538_v31 }
 0x7ca   : > { %7880 = vmatmul.msk.bf16.gmra.mxu1 %vm17669_vm15, %v13619_v51  ;;  %v4670_v34 = vsel %vm4627_vm14, %v4668_v62, %v4669_v18  ;;  %v4672_v33 = vsel %vm4627_vm14, %v4669_v18, %v4671_v26  ;;  %v4541_v23 = vrot.slane %v13375_v61, 3  ;;  %v4542_v19 = vrot.slane %v13382_v43, 3  ;;  %vm17706_vm15 = vmmov %vm17653_vm0 }
 0x7cb   : > { %v13845_v56 = vpack.c.bf16 %v4672_v33, %v4670_v34  ;;  %v5130_v1 = vsel %vm5087_vm11, %v5128_v13, %v5129_v58  ;;  %v5132_v48 = vsel %vm5087_vm11, %v5129_v58, %v5131_v59  ;;  %v4544_v38 = vrot.slane %v13398_v44, 3 }
 0x7cc   : > { %7920 = vmatmul.msk.bf16.gmra.mxu2 %vm17670_vm9, %v13754_v35  ;;  %v13850_v60 = vpack.c.bf16 %v5132_v48, %v5130_v1  ;;  %v4673_v45 = vrot.slane %v17667_v25, 4  ;;  %v4674_v22 = vrot.slane %v13361_v55, 4  ;;  %v4543_v62 = vsel %vm4490_vm1, %v4541_v23, %v4542_v19  ;;  %vm17708_vm9 = vmmov %vm17653_vm0 }
 0x7cd   : > { %v4676_v31 = vrot.slane %v13368_v30, 4  ;;  %v5133_v18 = vrot.slane %v17667_v25, 5  ;;  %v5134_v26 = vrot.slane %v13361_v55, 5  ;;  %v4545_v40 = vsel %vm4490_vm1, %v4542_v19, %v4544_v38 }
 0x7ce   : > { %8080 = vmatmul.msk.bf16.gmra.mxu0 %vm17671_vm3, %v13756_v6  ;;  %v4675_v13 = vsel %vm4627_vm14, %v4673_v45, %v4674_v22  ;;  %v5136_v58 = vrot.slane %v13368_v30, 5  ;;  %v4546_v59 = vrot.slane %v13405_v7, 3  ;;  %v13863_v34 = vpack.c.bf16 %v4545_v40, %v4543_v62  ;;  %vm17709_vm3 = vmmov %vm17653_vm0 }
 0x7cf   : > { %v4677_v33 = vsel %vm4627_vm14, %v4674_v22, %v4676_v31  ;;  %v5135_v23 = vsel %vm5087_vm11, %v5133_v18, %v5134_v26  ;;  %v4547_v1 = vrot.slane %v13412_v3, 3  ;;  %v4549_v25 = vrot.slane %v13419_v8, 3 }
 0x7d0   : > { %v13868_v48 = vpack.c.bf16 %v4677_v33, %v4675_v13  ;;  %v5137_v55 = vsel %vm5087_vm11, %v5134_v26, %v5136_v58  ;;  %v4678_v19 = vrot.slane %v13375_v61, 4  ;;  %v4679_v45 = vrot.slane %v13382_v43, 4 }
 0x7d1   : > { %v13873_v38 = vpack.c.bf16 %v5137_v55, %v5135_v23  ;;  %v4548_v30 = vsel %vm4490_vm1, %v4546_v59, %v4547_v1  ;;  %v4681_v22 = vrot.slane %v13398_v44, 4  ;;  %v4550_v62 = vsel %vm4490_vm1, %v4547_v1, %v4549_v25 }
 0x7d2   : > { %v5138_v31 = vrot.slane %v13375_v61, 5  ;;  %v5139_v18 = vrot.slane %v13382_v43, 5  ;;  %v5141_v26 = vrot.slane %v13398_v44, 5  ;;  %v13882_v40 = vpack.c.bf16 %v4550_v62, %v4548_v30 }
 0x7d3   : > { %v4680_v13 = vsel %vm4627_vm14, %v4678_v19, %v4679_v45  ;;  %v4682_v58 = vsel %vm4627_vm14, %v4679_v45, %v4681_v22  ;;  %v4551_v59 = vrot.slane %v13435_v57, 3  ;;  %v4552_v61 = vrot.slane %v13442_v50, 3 }
 0x7d4   : > { %v13887_v33 = vpack.c.bf16 %v4682_v58, %v4680_v13  ;;  %v5140_v23 = vsel %vm5087_vm11, %v5138_v31, %v5139_v18  ;;  %v5142_v1 = vsel %vm5087_vm11, %v5139_v18, %v5141_v26  ;;  %v4554_v43 = vrot.slane %v13449_v53, 3 }
 0x7d5   : > { %v13892_v55 = vpack.c.bf16 %v5142_v1, %v5140_v23  ;;  %v4683_v44 = vrot.slane %v13405_v7, 4  ;;  %v4684_v25 = vrot.slane %v13412_v3, 4  ;;  %v4553_v19 = vsel %vm4490_vm1, %v4551_v59, %v4552_v61 }
 0x7d6   : > { %v4686_v30 = vrot.slane %v13419_v8, 4  ;;  %v5143_v45 = vrot.slane %v13405_v7, 5  ;;  %v5144_v22 = vrot.slane %v13412_v3, 5  ;;  %v4555_v62 = vsel %vm4490_vm1, %v4552_v61, %v4554_v43 }
 0x7d7   : > { %v4685_v31 = vsel %vm4627_vm14, %v4683_v44, %v4684_v25  ;;  %v5146_v18 = vrot.slane %v13419_v8, 5  ;;  %v4556_v26 = vrot.slane %v13456_v63, 3  ;;  %v13909_v13 = vpack.c.bf16 %v4555_v62, %v4553_v19 }
 0x7d8   : > { %7849 = vmatmul.msk.bf16.gmra.mxu3 %vm17672_vm5, %v13758_v36  ;;  %v4687_v7 = vsel %vm4627_vm14, %v4684_v25, %v4686_v30  ;;  %v5145_v3 = vsel %vm5087_vm11, %v5143_v45, %v5144_v22  ;;  %v4557_v58 = vrot.slane %v13472_v32, 3  ;;  %v4559_v23 = vrot.slane %v13479_v5, 3  ;;  %vm17710_vm5 = vmmov %vm17653_vm0 }
 0x7d9   : > { %v13916_v8 = vpack.c.bf16 %v4687_v7, %v4685_v31  ;;  %v5147_v59 = vsel %vm5087_vm11, %v5144_v22, %v5146_v18  ;;  %v4688_v1 = vrot.slane %v13435_v57, 4  ;;  %v4689_v44 = vrot.slane %v13442_v50, 4 }
 0x7da   : > { %7881 = vmatmul.msk.bf16.gmra.mxu1 %vm17673_vm8, %v13708_v4  ;;  %v13923_v61 = vpack.c.bf16 %v5147_v59, %v5145_v3  ;;  %v4558_v43 = vsel %vm4490_vm1, %v4556_v26, %v4557_v58  ;;  %v4691_v25 = vrot.slane %v13449_v53, 4  ;;  %v4560_v19 = vsel %vm4490_vm1, %v4557_v58, %v4559_v23  ;;  %vm17711_vm8 = vmmov %vm17653_vm0 }
 0x7db   : > { %v5148_v30 = vrot.slane %v13435_v57, 5  ;;  %v5149_v45 = vrot.slane %v13442_v50, 5  ;;  %v5151_v22 = vrot.slane %v13449_v53, 5  ;;  %v13932_v62 = vpack.c.bf16 %v4560_v19, %v4558_v43 }
 0x7dc   : > { %7921 = vmatmul.msk.bf16.gmra.mxu2 %vm17674_vm6, %v13761_v47  ;;  %v4690_v31 = vsel %vm4627_vm14, %v4688_v1, %v4689_v44  ;;  %v4692_v18 = vsel %vm4627_vm14, %v4689_v44, %v4691_v25  ;;  %v4561_v26 = vrot.slane %v13486_v52, 3  ;;  %v4562_v57 = vrot.slane %v13493_v39, 3  ;;  %vm17712_vm6 = vmmov %vm17653_vm0 }
 0x7dd   : > { %v13937_v7 = vpack.c.bf16 %v4692_v18, %v4690_v31  ;;  %v5150_v3 = vsel %vm5087_vm11, %v5148_v30, %v5149_v45  ;;  %v5152_v58 = vsel %vm5087_vm11, %v5149_v45, %v5151_v22  ;;  %v4564_v50 = vrot.slane %v13508_v17, 3 }
 0x7de   : > { %8081 = vmatmul.msk.bf16.gmra.mxu0 %vm17675_vm13, %v13763_v42  ;;  %v13942_v59 = vpack.c.bf16 %v5152_v58, %v5150_v3  ;;  %v4693_v53 = vrot.slane %v13456_v63, 4  ;;  %v4694_v23 = vrot.slane %v13472_v32, 4  ;;  %v4563_v1 = vsel %vm4490_vm1, %v4561_v26, %v4562_v57  ;;  %vm17713_vm13 = vmmov %vm17653_vm0 }
 0x7df   : > { %v4696_v43 = vrot.slane %v13479_v5, 4  ;;  %v5153_v44 = vrot.slane %v13456_v63, 5  ;;  %v5154_v25 = vrot.slane %v13472_v32, 5  ;;  %v4565_v19 = vsel %vm4490_vm1, %v4562_v57, %v4564_v50 }
 0x7e0   : > { %v4695_v30 = vsel %vm4627_vm14, %v4693_v53, %v4694_v23  ;;  %v5156_v45 = vrot.slane %v13479_v5, 5  ;;  %v4566_v22 = vrot.slane %v13515_v20, 3  ;;  %v13955_v31 = vpack.c.bf16 %v4565_v19, %v4563_v1 }
 0x7e1   : > { %v4697_v18 = vsel %vm4627_vm14, %v4694_v23, %v4696_v43  ;;  %v5155_v26 = vsel %vm5087_vm11, %v5153_v44, %v5154_v25  ;;  %v4567_v3 = vrot.slane %v13522_v9, 3  ;;  %v4569_v32 = vrot.slane %v13529_v49, 3 }
 0x7e2   : > { %17676 = vst [vmem:[#allocation109_spill] sm:$0xff] %v13955_v31  ;;  %v13960_v58 = vpack.c.bf16 %v4697_v18, %v4695_v30  ;;  %v5157_v63 = vsel %vm5087_vm11, %v5154_v25, %v5156_v45  ;;  %v4698_v57 = vrot.slane %v13486_v52, 4  ;;  %v4699_v53 = vrot.slane %v13493_v39, 4 }
 0x7e3   : > { %v13965_v50 = vpack.c.bf16 %v5157_v63, %v5155_v26  ;;  %v4568_v5 = vsel %vm4490_vm1, %v4566_v22, %v4567_v3  ;;  %v4701_v23 = vrot.slane %v13508_v17, 4  ;;  %v4570_v1 = vsel %vm4490_vm1, %v4567_v3, %v4569_v32 }
 0x7e4   : > { %v5158_v43 = vrot.slane %v13486_v52, 5  ;;  %v5159_v44 = vrot.slane %v13493_v39, 5  ;;  %v5161_v25 = vrot.slane %v13508_v17, 5  ;;  %v13974_v19 = vpack.c.bf16 %v4570_v1, %v4568_v5 }
 0x7e5   : > { %17677 = vst [vmem:[#allocation15_spill] sm:$0xff] %v13965_v50  ;;  %v4700_v30 = vsel %vm4627_vm14, %v4698_v57, %v4699_v53  ;;  %v4702_v45 = vsel %vm4627_vm14, %v4699_v53, %v4701_v23  ;;  %v5421_v22 = vrot.slane %v13637_v28, 3  ;;  %v5422_v52 = vrot.slane %v13658_v16, 3 }
 0x7e6   : > { %v13979_v18 = vpack.c.bf16 %v4702_v45, %v4700_v30  ;;  %v5160_v26 = vsel %vm5087_vm11, %v5158_v43, %v5159_v44  ;;  %v5162_v3 = vsel %vm5087_vm11, %v5159_v44, %v5161_v25  ;;  %v5424_v39 = vrot.slane %v13665_v46, 3 }
 0x7e7   : > { %v13984_v63 = vpack.c.bf16 %v5162_v3, %v5160_v26  ;;  %v4703_v17 = vrot.slane %v13515_v20, 4  ;;  %v4704_v32 = vrot.slane %v13522_v9, 4  ;;  %v5423_v57 = vsel %vm4490_vm1, %v5421_v22, %v5422_v52 }
 0x7e8   : > { %17678 = vst [vmem:[#allocation110_spill] sm:$0xff] %v13979_v18  ;;  %7850 = vmatmul.msk.bf16.gmra.mxu3 %vm17680_vm12, %v13765_v12  ;;  %v4706_v5 = vrot.slane %v13529_v49, 4  ;;  %v5163_v53 = vrot.slane %v13515_v20, 5  ;;  %v5164_v23 = vrot.slane %v13522_v9, 5  ;;  %v5425_v1 = vsel %vm4490_vm1, %v5422_v52, %v5424_v39  ;;  %vm17714_vm12 = vmmov %vm17653_vm0 }
 0x7e9   : > { %17679 = vst [vmem:[#allocation118_spill] sm:$0xff] %v13984_v63  ;;  %v4705_v43 = vsel %vm4627_vm14, %v4703_v17, %v4704_v32  ;;  %v5166_v44 = vrot.slane %v13529_v49, 5  ;;  %v5919_v25 = vrot.slane %v13672_v37, 3  ;;  %v14005_v30 = vpack.c.bf16 %v5425_v1, %v5423_v57 }
 0x7ea   : > { %7882 = vmatmul.msk.bf16.gmra.mxu1 %vm17653_vm0, %v13756_v6  ;;  %v4707_v20 = vsel %vm4627_vm14, %v4704_v32, %v4706_v5  ;;  %v5165_v9 = vsel %vm5087_vm11, %v5163_v53, %v5164_v23  ;;  %v5920_v45 = vrot.slane %v13680_v15, 3  ;;  %v5922_v3 = vrot.slane %v13688_v0, 3 }
 0x7eb   : > { %17683 = vst [vmem:[#allocation146_spill] sm:$0xff] %v14005_v30  ;;  %v14010_v22 = vpack.c.bf16 %v4707_v20, %v4705_v43  ;;  %v5167_v26 = vsel %vm5087_vm11, %v5164_v23, %v5166_v44  ;;  %v5586_v49 = vrot.slane %v13637_v28, 4  ;;  %v5587_v17 = vrot.slane %v13658_v16, 4 }
 0x7ec   : > { %7922 = vmatmul.msk.bf16.gmra.mxu2 %vm17681_vm7, %v13768_v24  ;;  %v14015_v52 = vpack.c.bf16 %v5167_v26, %v5165_v9  ;;  %v14018_v39 = vsel %vm4490_vm1, %v5919_v25, %v5920_v45  ;;  %v5589_v32 = vrot.slane %v13665_v46, 4  ;;  %v14023_v57 = vsel %vm4490_vm1, %v5920_v45, %v5922_v3  ;;  %vm17700_vm1 = vmmov %vm17653_vm0 }
 0x7ed   : > { %17684 = vst [vmem:[#allocation29_spill] sm:$0xff] %v14010_v22  ;;  %v5751_v5 = vrot.slane %v13637_v28, 5  ;;  %v5752_v53 = vrot.slane %v13658_v16, 5  ;;  %v5754_v23 = vrot.slane %v13665_v46, 5  ;;  %v5588_v43 = vsel %vm4627_vm14, %v5586_v49, %v5587_v17  ;;  %vm17715_vm7 = vmmov %vm17653_vm0 }
 0x7ee   : > { %8082 = vmatmul.msk.bf16.gmra.mxu0 %vm17682_vm2, %v13773_v2  ;;  %v5590_v44 = vsel %vm4627_vm14, %v5587_v17, %v5589_v32  ;;  %v6084_v25 = vrot.slane %v13672_v37, 4  ;;  %v6085_v28 = vrot.slane %v13680_v15, 4  ;;  %v6087_v46 = vrot.slane %v13688_v0, 4  ;;  %vm17716_vm2 = vmmov %vm17653_vm0 }
 0x7ef   : > { %v14033_v20 = vpack.c.bf16 %v5590_v44, %v5588_v43  ;;  %v5753_v9 = vsel %vm5087_vm11, %v5751_v5, %v5752_v53  ;;  %v5755_v45 = vsel %vm5087_vm11, %v5752_v53, %v5754_v23  ;;  %v6249_v26 = vrot.slane %v13672_v37, 5 }
 0x7f0   : > { %v14038_v16 = vpack.c.bf16 %v5755_v45, %v5753_v9  ;;  %v6250_v3 = vrot.slane %v13680_v15, 5  ;;  %v14044_v49 = vsel %vm4627_vm14, %v6084_v25, %v6085_v28  ;;  %v6252_v17 = vrot.slane %v13688_v0, 5 }
 0x7f1   : > { %17685 = vst [vmem:[#allocation169_spill] sm:$0xff] %v14033_v20  ;;  %v14048_v32 = vsel %vm4627_vm14, %v6085_v28, %v6087_v46  ;;  %v17690_v53 = vrot.slane %v17651_v29, 4  ;;  %v17691_v23 = vrot.slane %v17650_v21, 4  ;;  %v17692_v37 = vrot.slane %v17652_v10, 4 }
 0x7f2   : > { %17686 = vst [vmem:[#allocation112_spill] sm:$0xff] %v14038_v16  ;;  %v14051_v5 = vsel %vm5087_vm11, %v6249_v26, %v6250_v3  ;;  %v14066_v25 = vsel %vm5087_vm11, %v6250_v3, %v6252_v17  ;;  %v17695_v9 = vrot.slane %v17651_v29, 5  ;;  %v17696_v45 = vrot.slane %v17650_v21, 5  ;;  %v17702_v21 = vld [vmem:[#allocation11_spill] sm:$0xff]  ;;  %v17704_v29 = vld [vmem:[#allocation108_spill] sm:$0xff] }
 0x7f3   : > { %17687 = vst [vmem:[#allocation170_spill] sm:$0xff] %v14044_v49  ;;  %v4655_v43 = vsel %vm4627_vm14, %v17691_v23, %v17690_v53  ;;  %v17693_v15 = vmov %v17690_v53  ;;  %v17697_v46 = vrot.slane %v17652_v10, 5  ;;  %v17707_v10 = vld [vmem:[#allocation14_spill] sm:$0xff] }
 0x7f4   : > { %17688 = vst [vmem:[#allocation113_spill] sm:$0xff] %v14048_v32  ;;  %v4657_v44 = vsel %vm4627_vm14, %v17693_v15, %v17692_v37  ;;  %v5115_v28 = vsel %vm5087_vm11, %v17696_v45, %v17695_v9  ;;  %v17698_v26 = vmov %v17695_v9  ;;  %vm17699_vm14 = vmmov %vm17653_vm0 }
 0x7f5   : > { %17689 = vst [vmem:[#allocation171_spill] sm:$0xff] %v14051_v5  ;;  %v5117_v53 = vsel %vm5087_vm11, %v17698_v26, %v17697_v46  ;;  %v14080_v37 = vpack.c.bf16 %v4657_v44, %v4655_v43  ;;  %vm17705_vm11 = vmmov %vm17653_vm0 }
 0x7f6   : > { %17694 = vst [vmem:[#allocation114_spill] sm:$0xff] %v14066_v25  ;;  %v14082_v15 = vpack.c.bf16 %v5117_v53, %v5115_v28 }
 0x7f8   : > { %7851 = vmatmul.msk.bf16.gmra.mxu3 %vm17699_vm14, %v14080_v37  ;;  %vm17717_vm14 = vmmov %vm17653_vm0 }
 0x7fa   : > { %7883 = vmatmul.msk.bf16.gmra.mxu1 %vm17700_vm1, %v13763_v42  ;;  %vm17718_vm1 = vmmov %vm17653_vm0 }
 0x7fc   : > { %7923 = vmatmul.msk.bf16.gmra.mxu2 %vm17701_vm4, %v14082_v15  ;;  %vm17719_vm4 = vmmov %vm17653_vm0 }
 0x7fe   : > { %8083 = vmatmul.msk.bf16.gmra.mxu0 %vm17703_vm10, %v17702_v21  ;;  %vm17720_vm10 = vmmov %vm17653_vm0 }
 0x808   : > { %7852 = vmatmul.msk.bf16.gmra.mxu3 %vm17705_vm11, %v17704_v29  ;;  %vm17721_vm11 = vmmov %vm17653_vm0 }
 0x80a   : > { %7884 = vmatmul.msk.bf16.gmra.mxu1 %vm17706_vm15, %v13773_v2  ;;  %vm17722_vm15 = vmmov %vm17653_vm0 }
 0x80c   : > { %7924 = vmatmul.msk.bf16.gmra.mxu2 %vm17708_vm9, %v17707_v10  ;;  %vm17723_vm9 = vmmov %vm17653_vm0 }
 0x80e   : > { %8084 = vmatmul.msk.bf16.gmra.mxu0 %vm17709_vm3, %v13813_v27  ;;  %vm17724_vm3 = vmmov %vm17653_vm0 }
 0x818   : > { %7853 = vmatmul.msk.bf16.gmra.mxu3 %vm17710_vm5, %v13818_v41  ;;  %vm17726_vm5 = vmmov %vm17653_vm0 }
 0x81a   : > { %7885 = vmatmul.msk.bf16.gmra.mxu1 %vm17711_vm8, %v17702_v21  ;;  %vm17727_vm8 = vmmov %vm17653_vm0 }
 0x81c   : > { %7925 = vmatmul.msk.bf16.gmra.mxu2 %vm17712_vm6, %v13827_v14  ;;  %vm17728_vm6 = vmmov %vm17653_vm0 }
 0x81e   : > { %8085 = vmatmul.msk.bf16.gmra.mxu0 %vm17713_vm13, %v13840_v54  ;;  %vm17729_vm13 = vmmov %vm17653_vm0 }
 0x827   : > { %v5007_v3 = vpop.f32.mrf.mxu1 }
 0x828   : > { %7854 = vmatmul.msk.bf16.gmra.mxu3 %vm17714_vm12, %v13845_v56  ;;  %vm17733_vm12 = vmmov %vm17653_vm0 }
 0x82a   : > { %7886 = vmatmul.msk.bf16.gmra.mxu1 %vm17653_vm0, %v13813_v27 }
 0x82b   : > { %v4846_v17 = vpop.f32.mrf.mxu3 }
 0x82c   : > { %7926 = vmatmul.msk.bf16.gmra.mxu2 %vm17715_vm7, %v13850_v60  ;;  %v5008_v43 = vadd.f32 %v5007_v3, %v4846_v17  ;;  %vm17734_vm7 = vmmov %vm17653_vm0 }
 0x82e   : > { %8086 = vmatmul.msk.bf16.gmra.mxu0 %vm17716_vm2, %v13863_v34  ;;  %vm17735_vm2 = vmmov %vm17653_vm0 }
 0x82f   : > { %v5306_v44 = vpop.f32.mrf.mxu2  ;;  %v5009_v9 = vpop.f32.mrf.mxu1 }
 0x830   : > { %v14116_v45 = vadd.f32 %v5306_v44, %v5008_v43 }
 0x833   : > { %v4848_v28 = vpop.f32.mrf.mxu3 }
 0x834   : > { %v5010_v46 = vadd.f32 %v5009_v9, %v4848_v28 }
 0x837   : > { %v5308_v26 = vpop.f32.mrf.mxu2  ;;  %v5012_v53 = vpop.f32.mrf.mxu1 }
 0x838   : > { %v14118_v23 = vadd.f32 %v5308_v26, %v5010_v46  ;;  %7855 = vmatmul.msk.bf16.gmra.mxu3 %vm17717_vm14, %v13868_v48  ;;  %vm17739_vm14 = vmmov %vm17653_vm0 }
 0x83a   : > { %7887 = vmatmul.msk.bf16.gmra.mxu1 %vm17718_vm1, %v13840_v54  ;;  %vm17740_vm1 = vmmov %vm17653_vm0 }
 0x83b   : > { %v4851_v3 = vpop.f32.mrf.mxu3 }
 0x83c   : > { %7927 = vmatmul.msk.bf16.gmra.mxu2 %vm17719_vm4, %v13873_v38  ;;  %v5013_v17 = vadd.f32 %v5012_v53, %v4851_v3  ;;  %vm17741_vm4 = vmmov %vm17653_vm0 }
 0x83e   : > { %8087 = vmatmul.msk.bf16.gmra.mxu0 %vm17720_vm10, %v13882_v40  ;;  %vm17742_vm10 = vmmov %vm17653_vm0 }
 0x83f   : > { %v5311_v43 = vpop.f32.mrf.mxu2  ;;  %v5014_v44 = vpop.f32.mrf.mxu1 }
 0x840   : > { %v14128_v9 = vadd.f32 %v5311_v43, %v5013_v17 }
 0x843   : > { %v4853_v28 = vpop.f32.mrf.mxu3 }
 0x844   : > { %v5015_v46 = vadd.f32 %v5014_v44, %v4853_v28 }
 0x847   : > { %v5313_v26 = vpop.f32.mrf.mxu2  ;;  %v5017_v0 = vpop.f32.mrf.mxu1 }
 0x848   : > { %v14130_v1 = vadd.f32 %v5313_v26, %v5015_v46  ;;  %7856 = vmatmul.msk.bf16.gmra.mxu3 %vm17721_vm11, %v13887_v33  ;;  %v14142_v46 = vpop.f32.mrf.mxu0  ;;  %vm17747_vm11 = vmmov %vm17653_vm0 }
 0x849   : > { %17725 = vst [vmem:[#allocation147_spill] sm:$0xff] %v14142_v46 }
 0x84a   : > { %7888 = vmatmul.msk.bf16.gmra.mxu1 %vm17722_vm15, %v13863_v34  ;;  %vm17748_vm15 = vmmov %vm17653_vm0 }
 0x84b   : > { %v4856_v53 = vpop.f32.mrf.mxu3 }
 0x84c   : > { %7928 = vmatmul.msk.bf16.gmra.mxu2 %vm17723_vm9, %v13892_v55  ;;  %v5018_v3 = vadd.f32 %v5017_v0, %v4856_v53  ;;  %vm17749_vm9 = vmmov %vm17653_vm0 }
 0x84e   : > { %8088 = vmatmul.msk.bf16.gmra.mxu0 %vm17724_vm3, %v13909_v13  ;;  %vm17750_vm3 = vmmov %vm17653_vm0 }
 0x84f   : > { %v5316_v17 = vpop.f32.mrf.mxu2  ;;  %v5019_v43 = vpop.f32.mrf.mxu1 }
 0x850   : > { %v14140_v44 = vadd.f32 %v5316_v17, %v5018_v3 }
 0x853   : > { %v4858_v28 = vpop.f32.mrf.mxu3 }
 0x854   : > { %v5020_v26 = vadd.f32 %v5019_v43, %v4858_v28  ;;  %v14154_v43 = vpop.f32.mrf.mxu0 }
 0x855   : > { %17730 = vst [vmem:[#allocation26_spill] sm:$0xff] %v14154_v43 }
 0x857   : > { %v5318_v5 = vpop.f32.mrf.mxu2  ;;  %v5022_v25 = vpop.f32.mrf.mxu1 }
 0x858   : > { %v14144_v49 = vadd.f32 %v5318_v5, %v5020_v26  ;;  %7857 = vmatmul.msk.bf16.gmra.mxu3 %vm17726_vm5, %v13916_v8  ;;  %vm17752_vm5 = vmmov %vm17653_vm0 }
 0x85a   : > { %7889 = vmatmul.msk.bf16.gmra.mxu1 %vm17727_vm8, %v13882_v40  ;;  %vm17753_vm8 = vmmov %vm17653_vm0 }
 0x85b   : > { %v4861_v0 = vpop.f32.mrf.mxu3 }
 0x85c   : > { %7929 = vmatmul.msk.bf16.gmra.mxu2 %vm17728_vm6, %v13923_v61  ;;  %v5023_v53 = vadd.f32 %v5022_v25, %v4861_v0  ;;  %v14160_v20 = vpop.f32.mrf.mxu0  ;;  %vm17754_vm6 = vmmov %vm17653_vm0 }
 0x85d   : > { %17732 = vst [vmem:[#allocation174_spill] sm:$0xff] %v14160_v20 }
 0x85e   : > { %8089 = vmatmul.msk.bf16.gmra.mxu0 %vm17729_vm13, %v13932_v62  ;;  %vm17757_vm13 = vmmov %vm17653_vm0 }
 0x85f   : > { %v5321_v3 = vpop.f32.mrf.mxu2  ;;  %v5024_v17 = vpop.f32.mrf.mxu1 }
 0x860   : > { %v14156_v5 = vadd.f32 %v5321_v3, %v5023_v53 }
 0x863   : > { %v4863_v28 = vpop.f32.mrf.mxu3 }
 0x864   : > { %v5025_v26 = vadd.f32 %v5024_v17, %v4863_v28  ;;  %v14172_v17 = vpop.f32.mrf.mxu0 }
 0x865   : > { %17737 = vst [vmem:[#allocation175_spill] sm:$0xff] %v14172_v17 }
 0x867   : > { %v5323_v32 = vpop.f32.mrf.mxu2  ;;  %v5027_v46 = vpop.f32.mrf.mxu1 }
 0x868   : > { %v14158_v16 = vadd.f32 %v5323_v32, %v5025_v26  ;;  %7858 = vmatmul.msk.bf16.gmra.mxu3 %vm17733_vm12, %v13937_v7  ;;  %vm17759_vm12 = vmmov %vm17653_vm0 }
 0x86a   : > { %17731 = vst [vmem:[#allocation115_spill] sm:$0xff] %v14158_v16  ;;  %7890 = vmatmul.msk.bf16.gmra.mxu1 %vm17653_vm0, %v13909_v13 }
 0x86b   : > { %v4866_v25 = vpop.f32.mrf.mxu3 }
 0x86c   : > { %7930 = vmatmul.msk.bf16.gmra.mxu2 %vm17734_vm7, %v13942_v59  ;;  %v5028_v0 = vadd.f32 %v5027_v46, %v4866_v25  ;;  %v8412_v46 = vld [vmem:[%s15279_s5 + $0x78] sm:$0xff]  ;;  %vm17762_vm7 = vmmov %vm17653_vm0 }
 0x86d   : > { %v8420_v25 = vld [vmem:[%s15279_s5 + $0xb8] sm:$0xff]  ;;  %5469 = vmatpush.bf16.msra.mxu3 %v8412_v46  ;;  %v8414_v46 = vld [vmem:[%s15279_s5 + $0x88] sm:$0xff] }
 0x86e   : > { %8090 = vmatmul.msk.bf16.gmra.mxu0 %vm17735_vm2, %v13955_v31  ;;  %5799 = vmatpush.bf16.msrb.mxu2 %v8420_v25  ;;  %vm17763_vm2 = vmmov %vm17653_vm0 }
 0x86f   : > { %v5326_v53 = vpop.f32.mrf.mxu2  ;;  %v5029_v3 = vpop.f32.mrf.mxu1 }
 0x870   : > { %v14170_v32 = vadd.f32 %v5326_v53, %v5028_v0  ;;  %v14193_v53 = vpop.f32.mrf.mxu0 }
 0x871   : > { %17743 = vst [vmem:[#allocation176_spill] sm:$0xff] %v14193_v53  ;;  %v8419_v53 = vld [vmem:[%s15279_s5 + $0xb0] sm:$0xff] }
 0x872   : > { %17736 = vst [vmem:[#allocation116_spill] sm:$0xff] %v14170_v32  ;;  %v8415_v32 = vld [vmem:[%s15279_s5 + $0x90] sm:$0xff]  ;;  %5800 = vmatpush.bf16.msrb.mxu2 %v8419_v53  ;;  %v8413_v53 = vld [vmem:[%s15279_s5 + $0x80] sm:$0xff] }
 0x873   : > { %v4868_v28 = vpop.f32.mrf.mxu3 }
 0x874   : > { %v5030_v26 = vadd.f32 %v5029_v3, %v4868_v28 }
 0x877   : > { %v5328_v20 = vpop.f32.mrf.mxu2  ;;  %v5032_v43 = vpop.f32.mrf.mxu1 }
 0x878   : > { %v14174_v16 = vadd.f32 %v5328_v20, %v5030_v26  ;;  %7859 = vmatmul.msk.bf16.gmra.mxu3 %vm17739_vm14, %v13960_v58  ;;  %v8416_v20 = vld [vmem:[%s15279_s5 + $0x98] sm:$0xff]  ;;  %vm17764_vm14 = vmmov %vm17653_vm0 }
 0x879   : > { %5634 = vmatpush.bf16.msra.mxu1 %v8416_v20  ;;  %v8418_v20 = vld [vmem:[%s15279_s5 + $0xa8] sm:$0xff] }
 0x87a   : > { %17738 = vst [vmem:[#allocation121_spill] sm:$0xff] %v14174_v16  ;;  %7891 = vmatmul.msk.bf16.gmra.mxu1 %vm17740_vm1, %v13932_v62  ;;  %v8411_v16 = vld [vmem:[%s15279_s5 + $0x70] sm:$0xff]  ;;  %5801 = vmatpush.bf16.msrb.mxu2 %v8418_v20  ;;  %vm17765_vm1 = vmmov %vm17653_vm0 }
 0x87b   : > { %v4871_v0 = vpop.f32.mrf.mxu3  ;;  %5470 = vmatpush.bf16.msra.mxu3 %v8411_v16 }
 0x87c   : > { %7931 = vmatmul.msk.bf16.gmra.mxu2 %vm17741_vm4, %v13965_v50  ;;  %v5033_v3 = vadd.f32 %v5032_v43, %v4871_v0  ;;  %v8410_v43 = vld [vmem:[%s15279_s5 + $0x68] sm:$0xff]  ;;  %vm17766_vm4 = vmmov %vm17653_vm0 }
 0x87d   : > { %5635 = vmatpush.bf16.msra.mxu1 %v8415_v32  ;;  %v14215_v32 = vpop.f32.mrf.mxu0 }
 0x87e   : > { %8091 = vmatmul.msk.bf16.gmra.mxu0 %vm17742_vm10, %v13974_v19  ;;  %17745 = vst [vmem:[#allocation148_spill] sm:$0xff] %v14215_v32  ;;  %vm17767_vm10 = vmmov %vm17653_vm0 }
 0x87f   : > { %v5331_v28 = vpop.f32.mrf.mxu2  ;;  %v5034_v26 = vpop.f32.mrf.mxu1  ;;  %5471 = vmatpush.bf16.msra.mxu3 %v8410_v43 }
 0x880   : > { %v14195_v17 = vadd.f32 %v5331_v28, %v5033_v3 }
 0x881   : > { %5636 = vmatpush.bf16.msra.mxu1 %v8414_v46 }
 0x882   : > { %17744 = vst [vmem:[#allocation136_spill] sm:$0xff] %v14195_v17  ;;  %v8409_v17 = vld [vmem:[%s15279_s5 + $0x60] sm:$0xff] }
 0x883   : > { %v4873_v25 = vpop.f32.mrf.mxu3  ;;  %5472 = vmatpush.bf16.msra.mxu3 %v8409_v17 }
 0x884   : > { %v5035_v0 = vadd.f32 %v5034_v26, %v4873_v25  ;;  %v8417_v26 = vld [vmem:[%s15279_s5 + $0xa0] sm:$0xff] }
 0x885   : > { %5637 = vmatpush.bf16.msra.mxu1 %v8413_v53  ;;  %5802 = vmatpush.bf16.msrb.mxu2 %v8417_v26 }
 0x887   : > { %v5333_v3 = vpop.f32.mrf.mxu2  ;;  %v5037_v16 = vpop.f32.mrf.mxu1 }
 0x888   : > { %v14217_v28 = vadd.f32 %v5333_v3, %v5035_v0  ;;  %7860 = vmatmul.msk.bf16.gmra.mxu3 %vm17747_vm11, %v13979_v18  ;;  %v14238_v3 = vpop.f32.mrf.mxu0  ;;  %vm17768_vm11 = vmmov %vm17653_vm0 }
 0x889   : > { %17751 = vst [vmem:[#allocation65_spill] sm:$0xff] %v14238_v3 }
 0x88a   : > { %17746 = vst [vmem:[#allocation7_spill] sm:$0xff] %v14217_v28  ;;  %7892 = vmatmul.msk.bf16.gmra.mxu1 %vm17748_vm15, %v13955_v31  ;;  %vm17770_vm15 = vmmov %vm17653_vm0 }
 0x88b   : > { %v4876_v43 = vpop.f32.mrf.mxu3 }
 0x88c   : > { %7932 = vmatmul.msk.bf16.gmra.mxu2 %vm17749_vm9, %v13984_v63  ;;  %v5038_v46 = vadd.f32 %v5037_v16, %v4876_v43  ;;  %v17756_v16 = vpack.c.bf16 %v14023_v57, %v14018_v39  ;;  %v17761_v39 = vld [vmem:[#allocation107_spill] sm:$0xff]  ;;  %vm17771_vm9 = vmmov %vm17653_vm0 }
 0x88e   : > { %8092 = vmatmul.msk.bf16.gmra.mxu0 %vm17750_vm3, %v14005_v30  ;;  %v17758_v30 = vld [vmem:[#allocation71_spill] sm:$0xff]  ;;  %vm17772_vm3 = vmmov %vm17653_vm0 }
 0x88f   : > { %v5336_v20 = vpop.f32.mrf.mxu2  ;;  %v5039_v25 = vpop.f32.mrf.mxu1 }
 0x890   : > { %v14236_v0 = vadd.f32 %v5336_v20, %v5038_v46  ;;  %v14248_v17 = vpop.f32.mrf.mxu0 }
 0x891   : > { %17755 = vst [vmem:[#allocation81_spill] sm:$0xff] %v14248_v17  ;;  %v17760_v17 = vld [vmem:[#allocation105_spill] sm:$0xff] }
 0x893   : > { %v4878_v32 = vpop.f32.mrf.mxu3 }
 0x894   : > { %v5040_v28 = vadd.f32 %v5039_v25, %v4878_v32 }
 0x897   : > { %v5338_v18 = vpop.f32.mrf.mxu2  ;;  %v5042_v31 = vpop.f32.mrf.mxu1 }
 0x898   : > { %v14240_v50 = vadd.f32 %v5338_v18, %v5040_v28  ;;  %7861 = vmatmul.msk.bf16.gmra.mxu3 %vm17752_vm5, %v14010_v22  ;;  %vm17774_vm5 = vmmov %vm17653_vm0 }
 0x89a   : > { %7893 = vmatmul.msk.bf16.gmra.mxu1 %vm17753_vm8, %v13974_v19  ;;  %vm17775_vm8 = vmmov %vm17653_vm0 }
 0x89b   : > { %v4881_v32 = vpop.f32.mrf.mxu3 }
 0x89c   : > { %7933 = vmatmul.msk.bf16.gmra.mxu2 %vm17754_vm6, %v14015_v52  ;;  %v5043_v53 = vadd.f32 %v5042_v31, %v4881_v32  ;;  %vm17776_vm6 = vmmov %vm17653_vm0 }
 0x89e   : > { %8093 = vmatmul.msk.bf16.gmra.mxu0 %vm17757_vm13, %v17756_v16  ;;  %vm17778_vm13 = vmmov %vm17653_vm0 }
 0x89f   : > { %v5341_v18 = vpop.f32.mrf.mxu2  ;;  %v5044_v28 = vpop.f32.mrf.mxu1 }
 0x8a0   : > { %v14254_v26 = vadd.f32 %v5341_v18, %v5043_v53 }
 0x8a3   : > { %v4883_v43 = vpop.f32.mrf.mxu3 }
 0x8a4   : > { %v5045_v46 = vadd.f32 %v5044_v28, %v4883_v43 }
 0x8a7   : > { %v5343_v20 = vpop.f32.mrf.mxu2  ;;  %v5047_v25 = vpop.f32.mrf.mxu1 }
 0x8a8   : > { %v14256_v3 = vadd.f32 %v5343_v20, %v5045_v46  ;;  %7958 = vmatmul.msk.bf16.vlgmr.msra.gmra.mxu3 %vm17759_vm12, %v17758_v30  ;;  %vm17779_vm12 = vmmov %vm17653_vm0 }
 0x8aa   : > { %7998 = vmatmul.msk.bf16.vlgmr.msra.gmra.mxu1 %vm17653_vm0, %v17760_v17 }
 0x8ab   : > { %v4886_v31 = vpop.f32.mrf.mxu3 }
 0x8ac   : > { %8038 = vmatmul.msk.bf16.vlgmr.msrb.gmra.mxu2 %vm17762_vm7, %v17761_v39  ;;  %v5048_v57 = vadd.f32 %v5047_v25, %v4886_v31  ;;  %vm17781_vm7 = vmmov %vm17653_vm0 }
 0x8af   : > { %v5346_v16 = vpop.f32.mrf.mxu2  ;;  %v5049_v32 = vpop.f32.mrf.mxu1 }
 0x8b0   : > { %v14264_v53 = vadd.f32 %v5346_v16, %v5048_v57 }
 0x8b3   : > { %v4888_v18 = vpop.f32.mrf.mxu3 }
 0x8b4   : > { %v5050_v28 = vadd.f32 %v5049_v32, %v4888_v18 }
 0x8b7   : > { %v5348_v43 = vpop.f32.mrf.mxu2  ;;  %v5052_v46 = vpop.f32.mrf.mxu1 }
 0x8b8   : > { %v14266_v20 = vadd.f32 %v5348_v43, %v5050_v28  ;;  %7959 = vmatmul.msk.bf16.gmra.mxu3 %vm17763_vm2, %v13619_v51  ;;  %vm17782_vm2 = vmmov %vm17653_vm0 }
 0x8ba   : > { %7999 = vmatmul.msk.bf16.gmra.mxu1 %vm17764_vm14, %v13747_v11  ;;  %vm17783_vm14 = vmmov %vm17653_vm0 }
 0x8bb   : > { %v4891_v30 = vpop.f32.mrf.mxu3 }
 0x8bc   : > { %8039 = vmatmul.msk.bf16.gmra.mxu2 %vm17765_vm1, %v13754_v35  ;;  %v5053_v17 = vadd.f32 %v5052_v46, %v4891_v30  ;;  %vm17785_vm1 = vmmov %vm17653_vm0 }
 0x8bf   : > { %v5351_v25 = vpop.f32.mrf.mxu2  ;;  %v5054_v39 = vpop.f32.mrf.mxu1 }
 0x8c0   : > { %v14274_v31 = vadd.f32 %v5351_v25, %v5053_v17 }
 0x8c3   : > { %v4893_v57 = vpop.f32.mrf.mxu3 }
 0x8c4   : > { %v5055_v16 = vadd.f32 %v5054_v39, %v4893_v57 }
 0x8c7   : > { %v5353_v32 = vpop.f32.mrf.mxu2  ;;  %v5057_v18 = vpop.f32.mrf.mxu1 }
 0x8c8   : > { %v14276_v28 = vadd.f32 %v5353_v32, %v5055_v16  ;;  %7960 = vmatmul.msk.bf16.gmra.mxu3 %vm17766_vm4, %v13708_v4  ;;  %vm17786_vm4 = vmmov %vm17653_vm0 }
 0x8ca   : > { %8000 = vmatmul.msk.bf16.gmra.mxu1 %vm17767_vm10, %v13758_v36  ;;  %vm17787_vm10 = vmmov %vm17653_vm0 }
 0x8cb   : > { %v4896_v51 = vpop.f32.mrf.mxu3 }
 0x8cc   : > { %8040 = vmatmul.msk.bf16.gmra.mxu2 %vm17768_vm11, %v13761_v47  ;;  %v5058_v43 = vadd.f32 %v5057_v18, %v4896_v51  ;;  %vm17790_vm11 = vmmov %vm17653_vm0 }
 0x8cf   : > { %v5356_v46 = vpop.f32.mrf.mxu2  ;;  %v5059_v30 = vpop.f32.mrf.mxu1 }
 0x8d0   : > { %v14284_v17 = vadd.f32 %v5356_v46, %v5058_v43 }
 0x8d2   : > { %17769 = vst [vmem:[#allocation137_spill] sm:$0xff] %v14284_v17 }
 0x8d3   : > { %v4898_v25 = vpop.f32.mrf.mxu3 }
 0x8d4   : > { %v5060_v39 = vadd.f32 %v5059_v30, %v4898_v25 }
 0x8d7   : > { %v5358_v57 = vpop.f32.mrf.mxu2  ;;  %v5062_v16 = vpop.f32.mrf.mxu1 }
 0x8d8   : > { %v14286_v32 = vadd.f32 %v5358_v57, %v5060_v39  ;;  %7961 = vmatmul.msk.bf16.gmra.mxu3 %vm17770_vm15, %v13756_v6  ;;  %vm17791_vm15 = vmmov %vm17653_vm0 }
 0x8da   : > { %8001 = vmatmul.msk.bf16.gmra.mxu1 %vm17771_vm9, %v13765_v12  ;;  %vm17792_vm9 = vmmov %vm17653_vm0 }
 0x8db   : > { %v4901_v4 = vpop.f32.mrf.mxu3 }
 0x8dc   : > { %8041 = vmatmul.msk.bf16.gmra.mxu2 %vm17772_vm3, %v13768_v24  ;;  %v5063_v18 = vadd.f32 %v5062_v16, %v4901_v4  ;;  %vm17793_vm3 = vmmov %vm17653_vm0 }
 0x8df   : > { %v5361_v51 = vpop.f32.mrf.mxu2  ;;  %v5064_v43 = vpop.f32.mrf.mxu1 }
 0x8e0   : > { %v14294_v46 = vadd.f32 %v5361_v51, %v5063_v18 }
 0x8e2   : > { %17773 = vst [vmem:[#allocation177_spill] sm:$0xff] %v14294_v46 }
 0x8e3   : > { %v4903_v30 = vpop.f32.mrf.mxu3 }
 0x8e4   : > { %v5065_v25 = vadd.f32 %v5064_v43, %v4903_v30 }
 0x8e7   : > { %v5363_v17 = vpop.f32.mrf.mxu2  ;;  %v5067_v39 = vpop.f32.mrf.mxu1 }
 0x8e8   : > { %v14296_v57 = vadd.f32 %v5363_v17, %v5065_v25  ;;  %7962 = vmatmul.msk.bf16.gmra.mxu3 %vm17774_vm5, %v13763_v42  ;;  %vm17794_vm5 = vmmov %vm17653_vm0 }
 0x8ea   : > { %8002 = vmatmul.msk.bf16.gmra.mxu1 %vm17775_vm8, %v14080_v37  ;;  %vm17795_vm8 = vmmov %vm17653_vm0 }
 0x8eb   : > { %v4906_v6 = vpop.f32.mrf.mxu3 }
 0x8ec   : > { %8042 = vmatmul.msk.bf16.gmra.mxu2 %vm17776_vm6, %v14082_v15  ;;  %v5068_v16 = vadd.f32 %v5067_v39, %v4906_v6  ;;  %vm17796_vm6 = vmmov %vm17653_vm0 }
 0x8ef   : > { %v5366_v4 = vpop.f32.mrf.mxu2  ;;  %v5069_v18 = vpop.f32.mrf.mxu1 }
 0x8f0   : > { %v14304_v51 = vadd.f32 %v5366_v4, %v5068_v16 }
 0x8f2   : > { %17777 = vst [vmem:[#allocation139_spill] sm:$0xff] %v14304_v51 }
 0x8f3   : > { %v4908_v43 = vpop.f32.mrf.mxu3 }
 0x8f4   : > { %v5070_v30 = vadd.f32 %v5069_v18, %v4908_v43 }
 0x8f7   : > { %v5368_v46 = vpop.f32.mrf.mxu2  ;;  %v5072_v17 = vpop.f32.mrf.mxu1 }
 0x8f8   : > { %v14306_v25 = vadd.f32 %v5368_v46, %v5070_v30  ;;  %7963 = vmatmul.msk.bf16.gmra.mxu3 %vm17778_vm13, %v13773_v2  ;;  %vm17797_vm13 = vmmov %vm17653_vm0 }
 0x8fa   : > { %8003 = vmatmul.msk.bf16.gmra.mxu1 %vm17779_vm12, %v17704_v29  ;;  %vm17798_vm12 = vmmov %vm17653_vm0 }
 0x8fb   : > { %v4911_v42 = vpop.f32.mrf.mxu3 }
 0x8fc   : > { %8043 = vmatmul.msk.bf16.gmra.mxu2 %vm17653_vm0, %v17707_v10  ;;  %v5073_v39 = vadd.f32 %v5072_v17, %v4911_v42 }
 0x8ff   : > { %v5371_v6 = vpop.f32.mrf.mxu2  ;;  %v5074_v16 = vpop.f32.mrf.mxu1 }
 0x900   : > { %v14314_v4 = vadd.f32 %v5371_v6, %v5073_v39 }
 0x902   : > { %17780 = vst [vmem:[#allocation178_spill] sm:$0xff] %v14314_v4 }
 0x903   : > { %v4913_v18 = vpop.f32.mrf.mxu3 }
 0x904   : > { %v5075_v43 = vadd.f32 %v5074_v16, %v4913_v18 }
 0x907   : > { %v5373_v51 = vpop.f32.mrf.mxu2  ;;  %v5077_v46 = vpop.f32.mrf.mxu1 }
 0x908   : > { %v14316_v30 = vadd.f32 %v5373_v51, %v5075_v43  ;;  %7964 = vmatmul.msk.bf16.gmra.mxu3 %vm17781_vm7, %v17702_v21  ;;  %vm17799_vm7 = vmmov %vm17653_vm0 }
 0x90a   : > { %8004 = vmatmul.msk.bf16.gmra.mxu1 %vm17782_vm2, %v13818_v41  ;;  %vm17800_vm2 = vmmov %vm17653_vm0 }
 0x90b   : > { %v4916_v2 = vpop.f32.mrf.mxu3 }
 0x90c   : > { %8044 = vmatmul.msk.bf16.gmra.mxu2 %vm17783_vm14, %v13827_v14  ;;  %v5078_v17 = vadd.f32 %v5077_v46, %v4916_v2  ;;  %vm17802_vm14 = vmmov %vm17653_vm0 }
 0x90f   : > { %v5376_v42 = vpop.f32.mrf.mxu2  ;;  %v5079_v39 = vpop.f32.mrf.mxu1 }
 0x910   : > { %v14324_v6 = vadd.f32 %v5376_v42, %v5078_v17 }
 0x912   : > { %17784 = vst [vmem:[#allocation17_spill] sm:$0xff] %v14324_v6 }
 0x913   : > { %v4918_v16 = vpop.f32.mrf.mxu3 }
 0x914   : > { %v5080_v18 = vadd.f32 %v5079_v39, %v4918_v16 }
 0x917   : > { %v5378_v4 = vpop.f32.mrf.mxu2  ;;  %v5082_v51 = vpop.f32.mrf.mxu1 }
 0x918   : > { %v14326_v43 = vadd.f32 %v5378_v4, %v5080_v18  ;;  %7965 = vmatmul.msk.bf16.gmra.mxu3 %vm17785_vm1, %v13813_v27  ;;  %vm17803_vm1 = vmmov %vm17653_vm0 }
 0x91a   : > { %8005 = vmatmul.msk.bf16.gmra.mxu1 %vm17786_vm4, %v13845_v56  ;;  %vm17805_vm4 = vmmov %vm17653_vm0 }
 0x91b   : > { %v4921_v21 = vpop.f32.mrf.mxu3 }
 0x91c   : > { %8045 = vmatmul.msk.bf16.gmra.mxu2 %vm17787_vm10, %v13850_v60  ;;  %v5083_v46 = vadd.f32 %v5082_v51, %v4921_v21  ;;  %vm17811_vm10 = vmmov %vm17653_vm0 }
 0x91f   : > { %v5381_v2 = vpop.f32.mrf.mxu2  ;;  %v5084_v17 = vpop.f32.mrf.mxu1 }
 0x920   : > { %v14334_v42 = vadd.f32 %v5381_v2, %v5083_v46 }
 0x922   : > { %17788 = vst [vmem:[#allocation98_spill] sm:$0xff] %v14334_v42 }
 0x923   : > { %v4923_v39 = vpop.f32.mrf.mxu3 }
 0x924   : > { %v5085_v16 = vadd.f32 %v5084_v17, %v4923_v39 }
 0x927   : > { %v5383_v6 = vpop.f32.mrf.mxu2  ;;  %v5639_v4 = vpop.f32.mrf.mxu1 }
 0x928   : > { %v14336_v18 = vadd.f32 %v5383_v6, %v5085_v16  ;;  %7966 = vmatmul.msk.bf16.gmra.mxu3 %vm17790_vm11, %v13840_v54  ;;  %vm17813_vm11 = vmmov %vm17653_vm0 }
 0x92a   : > { %17789 = vst [vmem:[#allocation19_spill] sm:$0xff] %v14336_v18  ;;  %8006 = vmatmul.msk.bf16.gmra.mxu1 %vm17791_vm15, %v13868_v48  ;;  %vm17814_vm15 = vmmov %vm17653_vm0 }
 0x92b   : > { %v5474_v27 = vpop.f32.mrf.mxu3 }
 0x92c   : > { %8046 = vmatmul.msk.bf16.gmra.mxu2 %vm17792_vm9, %v13873_v38  ;;  %v5554_v51 = vadd.f32 %v5474_v27, %v14116_v45  ;;  %vm17821_vm9 = vmmov %vm17653_vm0 }
 0x92e   : > { %v5719_v2 = vadd.f32 %v5639_v4, %v5554_v51 }
 0x92f   : > { %v5804_v21 = vpop.f32.mrf.mxu2  ;;  %v5641_v46 = vpop.f32.mrf.mxu1 }
 0x930   : > { %v14345_v17 = vadd.f32 %v5804_v21, %v5719_v2 }
 0x933   : > { %v5476_v39 = vpop.f32.mrf.mxu3 }
 0x934   : > { %v5555_v6 = vadd.f32 %v5476_v39, %v14118_v23 }
 0x936   : > { %v5720_v54 = vadd.f32 %v5641_v46, %v5555_v6 }
 0x937   : > { %v5806_v16 = vpop.f32.mrf.mxu2  ;;  %v5644_v18 = vpop.f32.mrf.mxu1 }
 0x938   : > { %v14348_v42 = vadd.f32 %v5806_v16, %v5720_v54  ;;  %7967 = vmatmul.msk.bf16.gmra.mxu3 %vm17793_vm3, %v13863_v34  ;;  %vm17822_vm3 = vmmov %vm17653_vm0 }
 0x93a   : > { %8007 = vmatmul.msk.bf16.gmra.mxu1 %vm17794_vm5, %v13887_v33  ;;  %vm17824_vm5 = vmmov %vm17653_vm0 }
 0x93b   : > { %v5479_v45 = vpop.f32.mrf.mxu3 }
 0x93c   : > { %8047 = vmatmul.msk.bf16.gmra.mxu2 %vm17795_vm8, %v13892_v55  ;;  %v5556_v4 = vadd.f32 %v5479_v45, %v14128_v9  ;;  %vm17830_vm8 = vmmov %vm17653_vm0 }
 0x93e   : > { %v5721_v23 = vadd.f32 %v5644_v18, %v5556_v4 }
 0x93f   : > { %v5809_v27 = vpop.f32.mrf.mxu2  ;;  %v5646_v51 = vpop.f32.mrf.mxu1 }
 0x940   : > { %v14357_v21 = vadd.f32 %v5809_v27, %v5721_v23 }
 0x943   : > { %v5481_v46 = vpop.f32.mrf.mxu3 }
 0x944   : > { %v5557_v2 = vadd.f32 %v5481_v46, %v14130_v1 }
 0x946   : > { %v5722_v34 = vadd.f32 %v5646_v51, %v5557_v2 }
 0x947   : > { %v5811_v39 = vpop.f32.mrf.mxu2  ;;  %v5649_v6 = vpop.f32.mrf.mxu1 }
 0x948   : > { %v14360_v16 = vadd.f32 %v5811_v39, %v5722_v34  ;;  %7968 = vmatmul.msk.bf16.gmra.mxu3 %vm17796_vm6, %v13882_v40  ;;  %vm17832_vm6 = vmmov %vm17653_vm0 }
 0x94a   : > { %8008 = vmatmul.msk.bf16.gmra.mxu1 %vm17797_vm13, %v13916_v8  ;;  %vm17834_vm13 = vmmov %vm17653_vm0 }
 0x94b   : > { %v5484_v9 = vpop.f32.mrf.mxu3 }
 0x94c   : > { %8048 = vmatmul.msk.bf16.gmra.mxu2 %vm17798_vm12, %v13923_v61  ;;  %v5558_v18 = vadd.f32 %v5484_v9, %v14140_v44  ;;  %vm17837_vm12 = vmmov %vm17653_vm0 }
 0x94e   : > { %v5723_v1 = vadd.f32 %v5649_v6, %v5558_v18 }
 0x94f   : > { %v5814_v54 = vpop.f32.mrf.mxu2  ;;  %v5651_v45 = vpop.f32.mrf.mxu1 }
 0x950   : > { %v14369_v4 = vadd.f32 %v5814_v54, %v5723_v1  ;;  %v17801_v54 = vld [vmem:[#allocation115_spill] sm:$0xff] }
 0x953   : > { %v5486_v27 = vpop.f32.mrf.mxu3 }
 0x954   : > { %v5559_v51 = vadd.f32 %v5486_v27, %v14144_v49 }
 0x956   : > { %v5724_v40 = vadd.f32 %v5651_v45, %v5559_v51 }
 0x957   : > { %v5816_v23 = vpop.f32.mrf.mxu2  ;;  %v5654_v46 = vpop.f32.mrf.mxu1 }
 0x958   : > { %v14372_v2 = vadd.f32 %v5816_v23, %v5724_v40  ;;  %7969 = vmatmul.msk.bf16.gmra.mxu3 %vm17653_vm0, %v13909_v13 }
 0x95a   : > { %8009 = vmatmul.msk.bf16.gmra.mxu1 %vm17799_vm7, %v13937_v7  ;;  %vm17838_vm7 = vmmov %vm17653_vm0 }
 0x95b   : > { %v5489_v44 = vpop.f32.mrf.mxu3 }
 0x95c   : > { %8049 = vmatmul.msk.bf16.gmra.mxu2 %vm17800_vm2, %v13942_v59  ;;  %v5560_v39 = vadd.f32 %v5489_v44, %v14156_v5  ;;  %v17804_v5 = vld [vmem:[#allocation15_spill] sm:$0xff]  ;;  %vm17839_vm2 = vmmov %vm17653_vm0 }
 0x95e   : > { %v5725_v49 = vadd.f32 %v5654_v46, %v5560_v39  ;;  %v17806_v46 = vld [vmem:[#allocation116_spill] sm:$0xff] }
 0x95f   : > { %v5819_v6 = vpop.f32.mrf.mxu2  ;;  %v5656_v34 = vpop.f32.mrf.mxu1 }
 0x960   : > { %v14381_v9 = vadd.f32 %v5819_v6, %v5725_v49 }
 0x963   : > { %v5491_v18 = vpop.f32.mrf.mxu3 }
 0x964   : > { %v5561_v45 = vadd.f32 %v5491_v18, %v17801_v54  ;;  %v17807_v18 = vld [vmem:[#allocation121_spill] sm:$0xff] }
 0x966   : > { %v5726_v13 = vadd.f32 %v5656_v34, %v5561_v45 }
 0x967   : > { %v5821_v1 = vpop.f32.mrf.mxu2  ;;  %v5659_v27 = vpop.f32.mrf.mxu1 }
 0x968   : > { %v14384_v51 = vadd.f32 %v5821_v1, %v5726_v13  ;;  %7970 = vmatmul.msk.bf16.gmra.mxu3 %vm17802_vm14, %v13932_v62  ;;  %v17810_v62 = vld [vmem:[#allocation109_spill] sm:$0xff]  ;;  %v17812_v13 = vld [vmem:[#allocation110_spill] sm:$0xff]  ;;  %vm17840_vm14 = vmmov %vm17653_vm0 }
 0x96a   : > { %8010 = vmatmul.msk.bf16.gmra.mxu1 %vm17803_vm1, %v13960_v58  ;;  %vm17841_vm1 = vmmov %vm17653_vm0 }
 0x96b   : > { %v5494_v23 = vpop.f32.mrf.mxu3 }
 0x96c   : > { %8050 = vmatmul.msk.bf16.gmra.mxu2 %vm17805_vm4, %v17804_v5  ;;  %v5562_v40 = vadd.f32 %v5494_v23, %v17806_v46  ;;  %v8432_v23 = vld [vmem:[%s15279_s5 + $0x118] sm:$0xff]  ;;  %vm17844_vm4 = vmmov %vm17653_vm0 }
 0x96d   : > { %6297 = vmatpush.bf16.msrb.mxu1 %v8432_v23 }
 0x96e   : > { %v5727_v6 = vadd.f32 %v5659_v27, %v5562_v40  ;;  %v8428_v27 = vld [vmem:[%s15279_s5 + $0xf8] sm:$0xff] }
 0x96f   : > { %v5824_v44 = vpop.f32.mrf.mxu2  ;;  %v5661_v39 = vpop.f32.mrf.mxu1  ;;  %6132 = vmatpush.bf16.msrb.mxu3 %v8428_v27  ;;  %v17815_v40 = vld [vmem:[#allocation136_spill] sm:$0xff]  ;;  %v8426_v27 = vld [vmem:[%s15279_s5 + $0xe8] sm:$0xff] }
 0x973   : > { %v5496_v49 = vpop.f32.mrf.mxu3 }
 0x974   : > { %v5563_v34 = vadd.f32 %v5496_v49, %v17807_v18 }
 0x976   : > { %v14396_v1 = vadd.f32 %v5661_v39, %v5563_v34 }
 0x977   : > { %v14394_v54 = vpop.f32.mrf.mxu2  ;;  %v5664_v45 = vpop.f32.mrf.mxu1 }
 0x978   : > { %17808 = vst [vmem:[#allocation74_spill] sm:$0xff] %v14394_v54  ;;  %7971 = vmatmul.msk.bf16.gmra.mxu3 %vm17811_vm10, %v17810_v62  ;;  %v5992_v62 = vpop.f32.mrf.mxu0  ;;  %v8427_v54 = vld [vmem:[%s15279_s5 + $0xf0] sm:$0xff]  ;;  %vm17845_vm10 = vmmov %vm17653_vm0 }
 0x979   : > { %17809 = vst [vmem:[#allocation181_spill] sm:$0xff] %v14396_v1  ;;  %v8431_v1 = vld [vmem:[%s15279_s5 + $0x110] sm:$0xff]  ;;  %6133 = vmatpush.bf16.msrb.mxu3 %v8427_v54  ;;  %v8425_v54 = vld [vmem:[%s15279_s5 + $0xe0] sm:$0xff] }
 0x97a   : > { %8011 = vmatmul.msk.bf16.gmra.mxu1 %vm17813_vm11, %v17812_v13  ;;  %vm17847_vm11 = vmmov %vm17653_vm0 }
 0x97b   : > { %v5499_v46 = vpop.f32.mrf.mxu3  ;;  %6298 = vmatpush.bf16.msrb.mxu1 %v8431_v1  ;;  %v8429_v1 = vld [vmem:[%s15279_s5 + $0x100] sm:$0xff] }
 0x97c   : > { %8051 = vmatmul.msk.bf16.gmra.mxu2 %vm17814_vm15, %v13984_v63  ;;  %v5564_v39 = vadd.f32 %v5499_v46, %v17815_v40  ;;  %v17818_v46 = vld [vmem:[#allocation7_spill] sm:$0xff]  ;;  %vm17848_vm15 = vmmov %vm17653_vm0 }
 0x97d   : > { %6134 = vmatpush.bf16.msrb.mxu3 %v8426_v27 }
 0x97e   : > { %v14413_v34 = vadd.f32 %v5664_v45, %v5564_v39  ;;  %v8430_v45 = vld [vmem:[%s15279_s5 + $0x108] sm:$0xff] }
 0x97f   : > { %v14411_v49 = vpop.f32.mrf.mxu2  ;;  %v5666_v18 = vpop.f32.mrf.mxu1  ;;  %6299 = vmatpush.bf16.msrb.mxu1 %v8430_v45 }
 0x980   : > { %17816 = vst [vmem:[#allocation20_spill] sm:$0xff] %v14411_v49 }
 0x981   : > { %17817 = vst [vmem:[#allocation73_spill] sm:$0xff] %v14413_v34  ;;  %6135 = vmatpush.bf16.msrb.mxu3 %v8425_v54  ;;  %v5892_v54 = vadd.f32 %v5824_v44, %v5727_v6 }
 0x983   : > { %v5501_v23 = vpop.f32.mrf.mxu3  ;;  %6300 = vmatpush.bf16.msrb.mxu1 %v8429_v1  ;;  %v17829_v1 = vld [vmem:[#allocation146_spill] sm:$0xff] }
 0x984   : > { %v5565_v40 = vadd.f32 %v5501_v23, %v17818_v46  ;;  %v14442_v23 = vpop.f32.mrf.mxu0 }
 0x985   : > { %17823 = vst [vmem:[#allocation24_spill] sm:$0xff] %v14442_v23 }
 0x986   : > { %v14430_v34 = vadd.f32 %v5666_v18, %v5565_v40 }
 0x987   : > { %v14428_v39 = vpop.f32.mrf.mxu2  ;;  %v5669_v49 = vpop.f32.mrf.mxu1 }
 0x988   : > { %17819 = vst [vmem:[#allocation182_spill] sm:$0xff] %v14428_v39  ;;  %7972 = vmatmul.msk.bf16.gmra.mxu3 %vm17821_vm9, %v13974_v19  ;;  %vm17851_vm9 = vmmov %vm17653_vm0 }
 0x989   : > { %17820 = vst [vmem:[#allocation21_spill] sm:$0xff] %v14430_v34 }
 0x98a   : > { %8012 = vmatmul.msk.bf16.gmra.mxu1 %vm17822_vm3, %v14010_v22  ;;  %vm17852_vm3 = vmmov %vm17653_vm0 }
 0x98b   : > { %v5504_v18 = vpop.f32.mrf.mxu3 }
 0x98c   : > { %8052 = vmatmul.msk.bf16.gmra.mxu2 %vm17824_vm5, %v14015_v52  ;;  %v5566_v19 = vadd.f32 %v5504_v18, %v14236_v0  ;;  %v14451_v40 = vpop.f32.mrf.mxu0  ;;  %v17831_v0 = vld [vmem:[#allocation169_spill] sm:$0xff]  ;;  %v17833_v18 = vld [vmem:[#allocation112_spill] sm:$0xff]  ;;  %vm17856_vm5 = vmmov %vm17653_vm0 }
 0x98d   : > { %17827 = vst [vmem:[#allocation69_spill] sm:$0xff] %v14451_v40 }
 0x98e   : > { %v14449_v46 = vadd.f32 %v5669_v49, %v5566_v19 }
 0x98f   : > { %v14447_v27 = vpop.f32.mrf.mxu2  ;;  %v5671_v45 = vpop.f32.mrf.mxu1 }
 0x990   : > { %17825 = vst [vmem:[#allocation183_spill] sm:$0xff] %v14447_v27 }
 0x991   : > { %17826 = vst [vmem:[#allocation87_spill] sm:$0xff] %v14449_v46 }
 0x993   : > { %v5506_v39 = vpop.f32.mrf.mxu3 }
 0x994   : > { %v5567_v34 = vadd.f32 %v5506_v39, %v14240_v50  ;;  %v14467_v50 = vadd.f32 %v5992_v62, %v5892_v54  ;;  %v14469_v39 = vpop.f32.mrf.mxu0 }
 0x995   : > { %17835 = vst [vmem:[#allocation67_spill] sm:$0xff] %v14469_v39 }
 0x996   : > { %v14456_v63 = vadd.f32 %v5671_v45, %v5567_v34 }
 0x997   : > { %v14454_v22 = vpop.f32.mrf.mxu2  ;;  %v5674_v23 = vpop.f32.mrf.mxu1 }
 0x998   : > { %17828 = vst [vmem:[#allocation86_spill] sm:$0xff] %v14454_v22  ;;  %7973 = vmatmul.msk.bf16.gmra.mxu3 %vm17830_vm8, %v17829_v1  ;;  %vm17857_vm8 = vmmov %vm17653_vm0 }
 0x99a   : > { %8013 = vmatmul.msk.bf16.gmra.mxu1 %vm17832_vm6, %v17831_v0  ;;  %vm17861_vm6 = vmmov %vm17653_vm0 }
 0x99b   : > { %v5509_v49 = vpop.f32.mrf.mxu3 }
 0x99c   : > { %8053 = vmatmul.msk.bf16.gmra.mxu2 %vm17834_vm13, %v17833_v18  ;;  %v5568_v19 = vadd.f32 %v5509_v49, %v14254_v26  ;;  %v14478_v22 = vpop.f32.mrf.mxu0  ;;  %vm17862_vm13 = vmmov %vm17653_vm0 }
 0x99d   : > { %17836 = vst [vmem:[#allocation85_spill] sm:$0xff] %v14478_v22 }
 0x99e   : > { %v14471_v44 = vadd.f32 %v5674_v23, %v5568_v19 }
 0x99f   : > { %v14465_v40 = vpop.f32.mrf.mxu2  ;;  %v5676_v34 = vpop.f32.mrf.mxu1 }
 0x9a3   : > { %v5511_v6 = vpop.f32.mrf.mxu3 }
 0x9a4   : > { %v5569_v45 = vadd.f32 %v5511_v6, %v14256_v3  ;;  %v14487_v19 = vpop.f32.mrf.mxu0 }
 0x9a6   : > { %v14476_v46 = vadd.f32 %v5676_v34, %v5569_v45 }
 0x9a7   : > { %v14474_v1 = vpop.f32.mrf.mxu2  ;;  %v5679_v27 = vpop.f32.mrf.mxu1 }
 0x9a8   : > { %8118 = vmatmul.msk.bf16.vlgmr.msrb.gmra.mxu3 %vm17837_vm12, %v13747_v11  ;;  %vm17867_vm12 = vmmov %vm17653_vm0 }
 0x9aa   : > { %8158 = vmatmul.msk.bf16.vlgmr.msrb.gmra.mxu1 %vm17653_vm0, %v13754_v35 }
 0x9ab   : > { %v5514_v26 = vpop.f32.mrf.mxu3 }
 0x9ac   : > { %v5570_v62 = vadd.f32 %v5514_v26, %v14264_v53  ;;  %v14496_v35 = vpop.f32.mrf.mxu0 }
 0x9ae   : > { %v5735_v49 = vadd.f32 %v5679_v27, %v5570_v62 }
 0x9af   : > { %v5844_v23 = vpop.f32.mrf.mxu2  ;;  %v5681_v54 = vpop.f32.mrf.mxu1 }
 0x9b0   : > { %v14485_v3 = vadd.f32 %v5844_v23, %v5735_v49 }
 0x9b3   : > { %v5516_v34 = vpop.f32.mrf.mxu3 }
 0x9b4   : > { %v5571_v6 = vadd.f32 %v5516_v34, %v14266_v20  ;;  %v14502_v34 = vpop.f32.mrf.mxu0 }
 0x9b6   : > { %v5736_v22 = vadd.f32 %v5681_v54, %v5571_v6 }
 0x9b7   : > { %v5846_v45 = vpop.f32.mrf.mxu2  ;;  %v5684_v39 = vpop.f32.mrf.mxu1 }
 0x9b8   : > { %v14490_v11 = vadd.f32 %v5846_v45, %v5736_v22  ;;  %8119 = vmatmul.msk.bf16.gmra.mxu3 %vm17838_vm7, %v13758_v36  ;;  %vm17870_vm7 = vmmov %vm17653_vm0 }
 0x9ba   : > { %8159 = vmatmul.msk.bf16.gmra.mxu1 %vm17839_vm2, %v13761_v47  ;;  %vm17871_vm2 = vmmov %vm17653_vm0 }
 0x9bb   : > { %v5519_v53 = vpop.f32.mrf.mxu3 }
 0x9bc   : > { %v5572_v27 = vadd.f32 %v5519_v53, %v14274_v31  ;;  %v17842_v31 = vld [vmem:[#allocation137_spill] sm:$0xff] }
 0x9be   : > { %v5737_v23 = vadd.f32 %v5684_v39, %v5572_v27 }
 0x9bf   : > { %v5849_v26 = vpop.f32.mrf.mxu2  ;;  %v5686_v62 = vpop.f32.mrf.mxu1 }
 0x9c0   : > { %v14499_v20 = vadd.f32 %v5849_v26, %v5737_v23 }
 0x9c3   : > { %v5521_v49 = vpop.f32.mrf.mxu3 }
 0x9c4   : > { %v5573_v22 = vadd.f32 %v5521_v49, %v14276_v28  ;;  %v14511_v28 = vpop.f32.mrf.mxu0 }
 0x9c6   : > { %v5738_v6 = vadd.f32 %v5686_v62, %v5573_v22 }
 0x9c7   : > { %v5851_v54 = vpop.f32.mrf.mxu2  ;;  %v5689_v36 = vpop.f32.mrf.mxu1 }
 0x9c8   : > { %v14504_v45 = vadd.f32 %v5851_v54, %v5738_v6  ;;  %8120 = vmatmul.msk.bf16.gmra.mxu3 %vm17840_vm14, %v13765_v12  ;;  %vm17874_vm14 = vmmov %vm17653_vm0 }
 0x9ca   : > { %8160 = vmatmul.msk.bf16.gmra.mxu1 %vm17841_vm1, %v13768_v24  ;;  %vm17875_vm1 = vmmov %vm17653_vm0 }
 0x9cb   : > { %v5524_v47 = vpop.f32.mrf.mxu3 }
 0x9cc   : > { %v5574_v39 = vadd.f32 %v5524_v47, %v17842_v31  ;;  %v14522_v24 = vpop.f32.mrf.mxu0  ;;  %v17846_v47 = vld [vmem:[#allocation177_spill] sm:$0xff] }
 0x9ce   : > { %v5739_v26 = vadd.f32 %v5689_v36, %v5574_v39 }
 0x9cf   : > { %v5854_v53 = vpop.f32.mrf.mxu2  ;;  %v5691_v27 = vpop.f32.mrf.mxu1 }
 0x9d0   : > { %v14513_v23 = vadd.f32 %v5854_v53, %v5739_v26 }
 0x9d3   : > { %v5526_v49 = vpop.f32.mrf.mxu3 }
 0x9d4   : > { %v5575_v62 = vadd.f32 %v5526_v49, %v14286_v32  ;;  %v14527_v49 = vpop.f32.mrf.mxu0 }
 0x9d6   : > { %v5740_v6 = vadd.f32 %v5691_v27, %v5575_v62 }
 0x9d7   : > { %v5856_v22 = vpop.f32.mrf.mxu2  ;;  %v5694_v54 = vpop.f32.mrf.mxu1 }
 0x9d8   : > { %v14516_v12 = vadd.f32 %v5856_v22, %v5740_v6  ;;  %8121 = vmatmul.msk.bf16.gmra.mxu3 %vm17844_vm4, %v14080_v37  ;;  %vm17878_vm4 = vmmov %vm17653_vm0 }
 0x9da   : > { %17843 = vst [vmem:[#allocation68_spill] sm:$0xff] %v14516_v12  ;;  %8161 = vmatmul.msk.bf16.gmra.mxu1 %vm17845_vm10, %v14082_v15  ;;  %vm17879_vm10 = vmmov %vm17653_vm0 }
 0x9db   : > { %v5529_v36 = vpop.f32.mrf.mxu3 }
 0x9dc   : > { %v5576_v31 = vadd.f32 %v5529_v36, %v17846_v47  ;;  %v14537_v47 = vpop.f32.mrf.mxu0 }
 0x9de   : > { %v5741_v26 = vadd.f32 %v5694_v54, %v5576_v31  ;;  %v17849_v54 = vld [vmem:[#allocation139_spill] sm:$0xff] }
 0x9df   : > { %v5859_v39 = vpop.f32.mrf.mxu2  ;;  %v5696_v53 = vpop.f32.mrf.mxu1 }
 0x9e0   : > { %v14525_v32 = vadd.f32 %v5859_v39, %v5741_v26 }
 0x9e3   : > { %v5531_v27 = vpop.f32.mrf.mxu3 }
 0x9e4   : > { %v5577_v62 = vadd.f32 %v5531_v27, %v14296_v57 }
 0x9e6   : > { %v5742_v6 = vadd.f32 %v5696_v53, %v5577_v62 }
 0x9e7   : > { %v5861_v22 = vpop.f32.mrf.mxu2  ;;  %v5699_v37 = vpop.f32.mrf.mxu1 }
 0x9e8   : > { %v14530_v12 = vadd.f32 %v5861_v22, %v5742_v6  ;;  %8122 = vmatmul.msk.bf16.gmra.mxu3 %vm17847_vm11, %v17704_v29  ;;  %v14542_v6 = vpop.f32.mrf.mxu0  ;;  %vm17882_vm11 = vmmov %vm17653_vm0 }
 0x9ea   : > { %8162 = vmatmul.msk.bf16.gmra.mxu1 %vm17848_vm15, %v17707_v10  ;;  %v17853_v10 = vld [vmem:[#allocation178_spill] sm:$0xff]  ;;  %vm17884_vm15 = vmmov %vm17653_vm0 }
 0x9eb   : > { %v5534_v15 = vpop.f32.mrf.mxu3 }
 0x9ec   : > { %v5578_v36 = vadd.f32 %v5534_v15, %v17849_v54 }
 0x9ee   : > { %v5743_v39 = vadd.f32 %v5699_v37, %v5578_v36 }
 0x9ef   : > { %v5701_v31 = vpop.f32.mrf.mxu1  ;;  %v5864_v26 = vpop.f32.mrf.mxu2 }
 0x9f0   : > { %v5908_v57 = vadd.f32 %v5864_v26, %v5743_v39  ;;  %v14551_v36 = vpop.f32.mrf.mxu0 }
 0x9f3   : > { %v5536_v27 = vpop.f32.mrf.mxu3 }
 0x9f4   : > { %v5579_v53 = vadd.f32 %v5536_v27, %v14306_v25  ;;  %v17858_v27 = vld [vmem:[#allocation17_spill] sm:$0xff] }
 0x9f6   : > { %v14540_v22 = vadd.f32 %v5701_v31, %v5579_v53 }
 0x9f7   : > { %v5704_v62 = vpop.f32.mrf.mxu1 }
 0x9f8   : > { %17850 = vst [vmem:[#allocation18_spill] sm:$0xff] %v14540_v22  ;;  %8123 = vmatmul.msk.bf16.gmra.mxu3 %vm17851_vm9, %v13818_v41  ;;  %v14560_v41 = vpop.f32.mrf.mxu0  ;;  %vm17886_vm9 = vmmov %vm17653_vm0 }
 0x9fa   : > { %8163 = vmatmul.msk.bf16.gmra.mxu1 %vm17852_vm3, %v13827_v14  ;;  %vm17887_vm3 = vmmov %vm17653_vm0 }
 0x9fb   : > { %v5539_v29 = vpop.f32.mrf.mxu3 }
 0x9fc   : > { %v5580_v15 = vadd.f32 %v5539_v29, %v17853_v10 }
 0x9fe   : > { %v14549_v54 = vadd.f32 %v5704_v62, %v5580_v15 }
 0x9ff   : > { %v5706_v37 = vpop.f32.mrf.mxu1 }
 0xa00   : > { %17854 = vst [vmem:[#allocation13_spill] sm:$0xff] %v14549_v54  ;;  %v14566_v15 = vpop.f32.mrf.mxu0 }
 0xa03   : > { %v5541_v25 = vpop.f32.mrf.mxu3 }
 0xa04   : > { %v5581_v31 = vadd.f32 %v5541_v25, %v14316_v30 }
 0xa06   : > { %v14554_v26 = vadd.f32 %v5706_v37, %v5581_v31 }
 0xa07   : > { %v5709_v39 = vpop.f32.mrf.mxu1 }
 0xa08   : > { %17855 = vst [vmem:[#allocation134_spill] sm:$0xff] %v14554_v26  ;;  %8124 = vmatmul.msk.bf16.gmra.mxu3 %vm17856_vm5, %v13845_v56  ;;  %vm17888_vm5 = vmmov %vm17653_vm0  ;;  %v17903_v26 = vld [vmem:[#allocation73_spill] sm:$0xff] }
 0xa0a   : > { %8164 = vmatmul.msk.bf16.gmra.mxu1 %vm17857_vm8, %v13850_v60  ;;  %v17863_v60 = vld [vmem:[#allocation98_spill] sm:$0xff]  ;;  %vm17889_vm8 = vmmov %vm17653_vm0 }
 0xa0b   : > { %v5544_v14 = vpop.f32.mrf.mxu3 }
 0xa0c   : > { %v5582_v53 = vadd.f32 %v5544_v14, %v17858_v27  ;;  %v6032_v27 = vpop.f32.mrf.mxu0 }
 0xa0e   : > { %v14563_v29 = vadd.f32 %v5709_v39, %v5582_v53  ;;  %v14577_v53 = vadd.f32 %v6032_v27, %v5908_v57 }
 0xa0f   : > { %v5711_v62 = vpop.f32.mrf.mxu1 }
 0xa10   : > { %17859 = vst [vmem:[#allocation88_spill] sm:$0xff] %v14563_v29  ;;  %v17904_v29 = vld [vmem:[#allocation20_spill] sm:$0xff] }
 0xa13   : > { %v5546_v10 = vpop.f32.mrf.mxu3 }
 0xa14   : > { %v5583_v30 = vadd.f32 %v5546_v10, %v14326_v43  ;;  %v17865_v10 = vld [vmem:[#allocation19_spill] sm:$0xff] }
 0xa16   : > { %v14568_v25 = vadd.f32 %v5711_v62, %v5583_v30 }
 0xa17   : > { %v5714_v37 = vpop.f32.mrf.mxu1 }
 0xa18   : > { %17860 = vst [vmem:[#allocation16_spill] sm:$0xff] %v14568_v25  ;;  %8125 = vmatmul.msk.bf16.gmra.mxu3 %vm17861_vm6, %v13868_v48  ;;  %v17868_v48 = vld [vmem:[#allocation147_spill] sm:$0xff]  ;;  %vm17893_vm6 = vmmov %vm17653_vm0  ;;  %v17906_v25 = vld [vmem:[#allocation181_spill] sm:$0xff] }
 0xa1a   : > { %8165 = vmatmul.msk.bf16.gmra.mxu1 %vm17862_vm13, %v13873_v38  ;;  %v6052_v38 = vadd.f32 %v17868_v48, %v14345_v17  ;;  %vm17897_vm13 = vmmov %vm17653_vm0 }
 0xa1b   : > { %v5549_v56 = vpop.f32.mrf.mxu3 }
 0xa1c   : > { %v5584_v31 = vadd.f32 %v5549_v56, %v17863_v60 }
 0xa1e   : > { %v14575_v39 = vadd.f32 %v5714_v37, %v5584_v31  ;;  %v17869_v31 = vld [vmem:[#allocation26_spill] sm:$0xff] }
 0xa1f   : > { %v5716_v14 = vpop.f32.mrf.mxu1  ;;  %v6053_v27 = vadd.f32 %v17869_v31, %v14348_v42  ;;  %v17873_v42 = vld [vmem:[#allocation175_spill] sm:$0xff] }
 0xa20   : > { %17864 = vst [vmem:[#allocation57_spill] sm:$0xff] %v14575_v39 }
 0xa23   : > { %v5551_v43 = vpop.f32.mrf.mxu3 }
 0xa24   : > { %v5585_v22 = vadd.f32 %v5551_v43, %v17865_v10 }
 0xa26   : > { %v14580_v30 = vadd.f32 %v5716_v14, %v5585_v22 }
 0xa27   : > { %v6302_v62 = vpop.f32.mrf.mxu1 }
 0xa28   : > { %17866 = vst [vmem:[#allocation149_spill] sm:$0xff] %v14580_v30  ;;  %8126 = vmatmul.msk.bf16.gmra.mxu3 %vm17867_vm12, %v13887_v33  ;;  %v17872_v33 = vld [vmem:[#allocation174_spill] sm:$0xff]  ;;  %vm17938_vm12 = vmmov %vm17653_vm0 }
 0xa2a   : > { %8166 = vmatmul.msk.bf16.gmra.mxu1 %vm17653_vm0, %v13892_v55  ;;  %v6054_v55 = vadd.f32 %v17872_v33, %v14357_v21 }
 0xa2b   : > { %v6137_v37 = vpop.f32.mrf.mxu3 }
 0xa2c   : > { %v6217_v56 = vadd.f32 %v6137_v37, %v6052_v38  ;;  %v6055_v37 = vadd.f32 %v17873_v42, %v14360_v16  ;;  %v17877_v16 = vld [vmem:[#allocation148_spill] sm:$0xff] }
 0xa2d   : > { %v6057_v33 = vadd.f32 %v17877_v16, %v14372_v2  ;;  %v17881_v2 = vld [vmem:[#allocation81_spill] sm:$0xff] }
 0xa2e   : > { %v14588_v57 = vadd.f32 %v6302_v62, %v6217_v56 }
 0xa2f   : > { %v6304_v60 = vpop.f32.mrf.mxu1 }
 0xa33   : > { %v6139_v43 = vpop.f32.mrf.mxu3 }
 0xa34   : > { %v6218_v22 = vadd.f32 %v6139_v43, %v6053_v27 }
 0xa36   : > { %v14592_v10 = vadd.f32 %v6304_v60, %v6218_v22 }
 0xa37   : > { %v6307_v14 = vpop.f32.mrf.mxu1 }
 0xa38   : > { %8127 = vmatmul.msk.bf16.gmra.mxu3 %vm17870_vm7, %v13916_v8  ;;  %v17876_v8 = vld [vmem:[#allocation176_spill] sm:$0xff] }
 0xa3a   : > { %8167 = vmatmul.msk.bf16.gmra.mxu1 %vm17871_vm2, %v13923_v61  ;;  %v6056_v61 = vadd.f32 %v17876_v8, %v14369_v4 }
 0xa3b   : > { %v6142_v17 = vpop.f32.mrf.mxu3 }
 0xa3c   : > { %v6219_v62 = vadd.f32 %v6142_v17, %v6054_v55 }
 0xa3e   : > { %v14600_v38 = vadd.f32 %v6307_v14, %v6219_v62 }
 0xa3f   : > { %v6309_v48 = vpop.f32.mrf.mxu1 }
 0xa43   : > { %v6144_v56 = vpop.f32.mrf.mxu3 }
 0xa44   : > { %v6220_v60 = vadd.f32 %v6144_v56, %v6055_v37 }
 0xa46   : > { %v14604_v27 = vadd.f32 %v6309_v48, %v6220_v60  ;;  %v6059_v60 = vadd.f32 %v17881_v2, %v14384_v51  ;;  %v17885_v51 = vld [vmem:[#allocation29_spill] sm:$0xff] }
 0xa47   : > { %v6312_v31 = vpop.f32.mrf.mxu1 }
 0xa48   : > { %8128 = vmatmul.msk.bf16.gmra.mxu3 %vm17874_vm14, %v13937_v7  ;;  %v17880_v7 = vld [vmem:[#allocation65_spill] sm:$0xff] }
 0xa4a   : > { %8168 = vmatmul.msk.bf16.gmra.mxu1 %vm17875_vm1, %v13942_v59  ;;  %v6058_v59 = vadd.f32 %v17880_v7, %v14381_v9  ;;  %vm17939_vm1 = vmmov %vm17653_vm0 }
 0xa4b   : > { %v6147_v21 = vpop.f32.mrf.mxu3 }
 0xa4c   : > { %v6221_v43 = vadd.f32 %v6147_v21, %v6056_v61 }
 0xa4e   : > { %v14612_v14 = vadd.f32 %v6312_v31, %v6221_v43 }
 0xa4f   : > { %v6314_v22 = vpop.f32.mrf.mxu1 }
 0xa53   : > { %v6149_v55 = vpop.f32.mrf.mxu3 }
 0xa54   : > { %v6222_v17 = vadd.f32 %v6149_v55, %v6057_v33 }
 0xa56   : > { %v14616_v48 = vadd.f32 %v6314_v22, %v6222_v17 }
 0xa57   : > { %v6317_v62 = vpop.f32.mrf.mxu1 }
 0xa58   : > { %8129 = vmatmul.msk.bf16.gmra.mxu3 %vm17878_vm4, %v13960_v58  ;;  %v17883_v58 = vld [vmem:[#allocation118_spill] sm:$0xff]  ;;  %vm17940_vm4 = vmmov %vm17653_vm0 }
 0xa5a   : > { %8169 = vmatmul.msk.bf16.gmra.mxu1 %vm17879_vm10, %v17804_v5  ;;  %vm17941_vm10 = vmmov %vm17653_vm0 }
 0xa5b   : > { %v6152_v4 = vpop.f32.mrf.mxu3 }
 0xa5c   : > { %v6223_v42 = vadd.f32 %v6152_v4, %v6058_v59 }
 0xa5e   : > { %v14624_v56 = vadd.f32 %v6317_v62, %v6223_v42  ;;  %v17890_v42 = vld [vmem:[#allocation113_spill] sm:$0xff] }
 0xa5f   : > { %v6319_v37 = vpop.f32.mrf.mxu1 }
 0xa63   : > { %v6154_v31 = vpop.f32.mrf.mxu3 }
 0xa64   : > { %v6224_v8 = vadd.f32 %v6154_v31, %v6059_v60  ;;  %v17895_v60 = vld [vmem:[#allocation171_spill] sm:$0xff] }
 0xa66   : > { %v14628_v21 = vadd.f32 %v6319_v37, %v6224_v8  ;;  %v17891_v37 = vld [vmem:[#allocation170_spill] sm:$0xff] }
 0xa67   : > { %v6322_v61 = vpop.f32.mrf.mxu1  ;;  %v17892_v2 = vpack.c.bf16 %v17890_v42, %v17891_v37 }
 0xa68   : > { %8130 = vmatmul.msk.bf16.gmra.mxu3 %vm17882_vm11, %v17812_v13  ;;  %vm17942_vm11 = vmmov %vm17653_vm0 }
 0xa6a   : > { %8170 = vmatmul.msk.bf16.gmra.mxu1 %vm17884_vm15, %v17883_v58  ;;  %vm17943_vm15 = vmmov %vm17653_vm0 }
 0xa6b   : > { %v6157_v9 = vpop.f32.mrf.mxu3 }
 0xa6c   : > { %v6225_v5 = vadd.f32 %v6157_v9, %v14467_v50  ;;  %v5899_v9 = vadd.f32 %v14474_v1, %v14476_v46 }
 0xa6e   : > { %v14635_v22 = vadd.f32 %v6322_v61, %v6225_v5  ;;  %v17899_v5 = vld [vmem:[#allocation87_spill] sm:$0xff] }
 0xa6f   : > { %v6324_v43 = vpop.f32.mrf.mxu1 }
 0xa73   : > { %v6159_v16 = vpop.f32.mrf.mxu3 }
 0xa77   : > { %v6327_v33 = vpop.f32.mrf.mxu1 }
 0xa78   : > { %8131 = vmatmul.msk.bf16.gmra.mxu3 %vm17886_vm9, %v17885_v51  ;;  %v17900_v51 = vld [vmem:[#allocation183_spill] sm:$0xff]  ;;  %vm17944_vm9 = vmmov %vm17653_vm0 }
 0xa79   : > { %v5896_v42 = vadd.f32 %v17900_v51, %v17899_v5  ;;  %v17907_v5 = vld [vmem:[#allocation74_spill] sm:$0xff] }
 0xa7a   : > { %8171 = vmatmul.msk.bf16.gmra.mxu1 %vm17887_vm3, %v14015_v52  ;;  %v17894_v52 = vld [vmem:[#allocation114_spill] sm:$0xff]  ;;  %v5893_v51 = vadd.f32 %v17907_v5, %v17906_v25  ;;  %vm17945_vm3 = vmmov %vm17653_vm0 }
 0xa7b   : > { %v6162_v55 = vpop.f32.mrf.mxu3  ;;  %v17896_v31 = vpack.c.bf16 %v17894_v52, %v17895_v60  ;;  %v17902_v52 = vld [vmem:[#allocation182_spill] sm:$0xff] }
 0xa7f   : > { %v6329_v17 = vpop.f32.mrf.mxu1 }
 0xa83   : > { %v6164_v13 = vpop.f32.mrf.mxu3 }
 0xa87   : > { %v6332_v62 = vpop.f32.mrf.mxu1 }
 0xa88   : > { %8132 = vmatmul.msk.bf16.gmra.mxu3 %vm17888_vm5, %v17831_v0  ;;  %v5898_v0 = vadd.f32 %v14465_v40, %v14471_v44  ;;  %v6067_v40 = vadd.f32 %v14502_v34, %v5899_v9  ;;  %v14675_v34 = vld [vmem:[%s15280_s6] ss:$0 sm:$0xff]  ;;  %v17910_v9 = vld [vmem:[#allocation24_spill] sm:$0xff]  ;;  %vm17946_vm5 = vmmov %vm17653_vm0 }
 0xa89   : > { %v6061_v25 = vadd.f32 %v17910_v9, %v5893_v51 }
 0xa8a   : > { %8172 = vmatmul.msk.bf16.gmra.mxu1 %vm17889_vm8, %v17833_v18  ;;  %v17898_v18 = vld [vmem:[#allocation86_spill] sm:$0xff]  ;;  %v6066_v37 = vadd.f32 %v14496_v35, %v5898_v0  ;;  %v17908_v0 = vld [vmem:[#allocation67_spill] sm:$0xff]  ;;  %vm17947_vm8 = vmmov %vm17653_vm0 }
 0xa8b   : > { %v6167_v50 = vpop.f32.mrf.mxu3  ;;  %v5897_v58 = vadd.f32 %v17898_v18, %v14456_v63  ;;  %v5894_v63 = vadd.f32 %v17904_v29, %v17903_v26  ;;  %v17905_v18 = vld [vmem:[#allocation85_spill] sm:$0xff] }
 0xa8c   : > { %v6064_v30 = vadd.f32 %v17905_v18, %v5896_v42  ;;  %v14729_v18 = vadd.f32 %v14675_v34, %v14624_v56  ;;  %v14753_v56 = vadd.f32 %v14675_v34, %v14600_v38  ;;  %v6072_v38 = vadd.f32 %v14542_v6, %v14513_v23  ;;  %v5866_v6 = vpop.f32.mrf.mxu2 }
 0xa8e   : > { %17913 = vst [vmem:[#allocation52_spill] sm:$0xff] %v14729_v18 }
 0xa8f   : > { %v6334_v7 = vpop.f32.mrf.mxu1  ;;  %17917 = vst [vmem:[#allocation152_spill] sm:$0xff] %v14753_v56 }
 0xa93   : > { %v6169_v59 = vpop.f32.mrf.mxu3 }
 0xa97   : > { %v6337_v4 = vpop.f32.mrf.mxu1 }
 0xa98   : > { %8133 = vmatmul.msk.bf16.gmra.mxu3 %vm17893_vm6, %v17892_v2  ;;  %v17901_v2 = vld [vmem:[#allocation21_spill] sm:$0xff]  ;;  %vm17948_vm6 = vmmov %vm17653_vm0 }
 0xa99   : > { %v5895_v60 = vadd.f32 %v17902_v52, %v17901_v2  ;;  %v6229_v2 = vadd.f32 %v6167_v50, %v6064_v30 }
 0xa9a   : > { %8173 = vmatmul.msk.bf16.gmra.mxu1 %vm17897_vm13, %v17896_v31  ;;  %v6065_v31 = vadd.f32 %v14487_v19, %v5897_v58  ;;  %vm17949_vm13 = vmmov %vm17653_vm0 }
 0xa9b   : > { %v6172_v8 = vpop.f32.mrf.mxu3  ;;  %v6063_v39 = vadd.f32 %v17908_v0, %v5895_v60 }
 0xa9c   : > { %v6231_v54 = vadd.f32 %v6172_v8, %v6066_v37  ;;  %v6230_v46 = vadd.f32 %v6169_v59, %v6065_v31  ;;  %v17909_v8 = vld [vmem:[#allocation69_spill] sm:$0xff]  ;;  %v6394_v37 = vadd.f32 %v6332_v62, %v6229_v2 }
 0xa9d   : > { %v6062_v26 = vadd.f32 %v17909_v8, %v5894_v63  ;;  %v6228_v29 = vadd.f32 %v6164_v13, %v6063_v39  ;;  %v14717_v63 = vadd.f32 %v14675_v34, %v14635_v22  ;;  %v14734_v22 = vadd.f32 %v14675_v34, %v14616_v48  ;;  %v17921_v8 = vld [vmem:[#allocation68_spill] sm:$0xff] }
 0xa9e   : > { %v6396_v52 = vadd.f32 %v6337_v4, %v6231_v54  ;;  %v6395_v58 = vadd.f32 %v6334_v7, %v6230_v46  ;;  %v6068_v54 = vadd.f32 %v14511_v28, %v14485_v3  ;;  %v6226_v4 = vadd.f32 %v6159_v16, %v6061_v25 }
 0xa9f   : > { %v6339_v61 = vpop.f32.mrf.mxu1  ;;  %v6227_v42 = vadd.f32 %v6162_v55, %v6062_v26  ;;  %v14696_v3 = vadd.f32 %v14675_v34, %v6394_v37  ;;  %17911 = vst [vmem:[#allocation89_spill] sm:$0xff] %v14717_v63  ;;  %v6071_v48 = vadd.f32 %v14537_v47, %v14504_v45  ;;  %v14765_v45 = vadd.f32 %v14675_v34, %v14588_v57 }
 0xaa0   : > { %v14686_v30 = vadd.f32 %v14675_v34, %v6396_v52  ;;  %v14690_v13 = vadd.f32 %v14675_v34, %v6395_v58  ;;  %v6391_v28 = vadd.f32 %v6324_v43, %v6226_v4  ;;  %17914 = vst [vmem:[#allocation119_spill] sm:$0xff] %v14734_v22  ;;  %v17920_v47 = vmov 1.0  }
 0xaa1   : > { %v6392_v55 = vadd.f32 %v6327_v33, %v6227_v42  ;;  %17919 = vst [vmem:[#allocation50_spill] sm:$0xff] %v14765_v45  ;;  %v6073_v26 = vadd.f32 %v14551_v36, %v17921_v8  ;;  %v6074_v25 = vadd.f32 %v14560_v41, %v14525_v32  ;;  %v6034_v36 = vpop.f32.mrf.mxu0 }
 0xaa3   : > { %v6174_v44 = vpop.f32.mrf.mxu3  ;;  %v14706_v33 = vadd.f32 %v14675_v34, %v6392_v55  ;;  %v5869_v55 = vpop.f32.mrf.mxu2 }
 0xaa4   : > { %v6232_v1 = vadd.f32 %v6174_v44, %v6067_v40  ;;  %v14710_v40 = vadd.f32 %v14675_v34, %v6391_v28 }
 0xaa6   : > { %v6397_v19 = vadd.f32 %v6339_v61, %v6232_v1  ;;  %v6393_v61 = vadd.f32 %v6329_v17, %v6228_v29  ;;  %v6069_v17 = vadd.f32 %v14522_v24, %v14490_v11  ;;  %v14722_v11 = vadd.f32 %v14675_v34, %v14628_v21 }
 0xaa7   : > { %v6342_v35 = vpop.f32.mrf.mxu1  ;;  %v6070_v24 = vadd.f32 %v14527_v49, %v14499_v20  ;;  %v14741_v20 = vadd.f32 %v14675_v34, %v14612_v14  ;;  %v14746_v49 = vadd.f32 %v14675_v34, %v14604_v27  ;;  %v14758_v14 = vadd.f32 %v14675_v34, %v14592_v10 }
 0xaa8   : > { %v14679_v59 = vadd.f32 %v14675_v34, %v6397_v19  ;;  %v14700_v16 = vadd.f32 %v14675_v34, %v6393_v61  ;;  %17912 = vst [vmem:[#allocation150_spill] sm:$0xff] %v14722_v11 }
 0xaa9   : > { %17915 = vst [vmem:[#allocation135_spill] sm:$0xff] %v14741_v20 }
 0xaaa   : > { %6452 = vmatpush.msra.mxu2 %v14679_v59  ;;  %17916 = vst [vmem:[#allocation90_spill] sm:$0xff] %v14746_v49 }
 0xaab   : > { %v6177_v50 = vpop.f32.mrf.mxu3  ;;  %17918 = vst [vmem:[#allocation30_spill] sm:$0xff] %v14758_v14 }
 0xaac   : > { %v6233_v39 = vadd.f32 %v6177_v50, %v6068_v54  ;;  %6453 = vmatpush.msra.mxu2 %v14686_v30  ;;  %v6075_v50 = vadd.f32 %v14566_v15, %v14530_v12 }
 0xaae   : > { %v14692_v62 = vadd.f32 %v6342_v35, %v6233_v39  ;;  %6454 = vmatpush.msra.mxu2 %v14690_v13 }
 0xaaf   : > { %v6344_v7 = vpop.f32.mrf.mxu1 }
 0xab0   : > { %6455 = vmatpush.msra.mxu2 %v14696_v3 }
 0xab2   : > { %6456 = vmatpush.msra.mxu2 %v14700_v16 }
 0xab3   : > { %v6179_v60 = vpop.f32.mrf.mxu3 }
 0xab4   : > { %v6234_v31 = vadd.f32 %v6179_v60, %v6069_v17  ;;  %6457 = vmatpush.msra.mxu2 %v14706_v33  ;;  %v6037_v60 = vpop.f32.mrf.mxu0 }
 0xab6   : > { %v14712_v44 = vadd.f32 %v6344_v7, %v6234_v31  ;;  %6458 = vmatpush.msra.mxu2 %v14710_v40 }
 0xab7   : > { %v6347_v43 = vpop.f32.mrf.mxu1 }
 0xab8   : > { %6459 = vmatpush.msra.mxu2 %v14717_v63 }
 0xaba   : > { %6460 = vmatpush.msra.mxu2 %v14722_v11 }
 0xabb   : > { %v6182_v46 = vpop.f32.mrf.mxu3 }
 0xabc   : > { %v6235_v1 = vadd.f32 %v6182_v46, %v6070_v24  ;;  %6461 = vmatpush.msra.mxu2 %v14729_v18  ;;  %v6039_v46 = vpop.f32.mrf.mxu0 }
 0xabe   : > { %v14736_v21 = vadd.f32 %v6347_v43, %v6235_v1  ;;  %6462 = vmatpush.msra.mxu2 %v14734_v22  ;;  %v5871_v43 = vpop.f32.mrf.mxu2 }
 0xabf   : > { %v6349_v5 = vpop.f32.mrf.mxu1 }
 0xac0   : > { %6463 = vmatpush.msra.mxu2 %v14741_v20  ;;  %v17927_v20 = vld [vmem:[#allocation13_spill] sm:$0xff] }
 0xac1   : > { %v5910_v22 = vadd.f32 %v5869_v55, %v17927_v20 }
 0xac2   : > { %6464 = vmatpush.msra.mxu2 %v14746_v49 }
 0xac3   : > { %v6184_v51 = vpop.f32.mrf.mxu3 }
 0xac4   : > { %v6236_v35 = vadd.f32 %v6184_v51, %v6071_v48  ;;  %6465 = vmatpush.msra.mxu2 %v14753_v56 }
 0xac6   : > { %v14760_v27 = vadd.f32 %v6349_v5, %v6236_v35  ;;  %6466 = vmatpush.msra.mxu2 %v14758_v14  ;;  %v5874_v15 = vpop.f32.mrf.mxu2  ;;  %v6042_v5 = vpop.f32.mrf.mxu0 }
 0xac7   : > { %v6352_v0 = vpop.f32.mrf.mxu1 }
 0xac8   : > { %6467 = vmatpush.msra.mxu2 %v14765_v45 }
 0xac9   : > { %6468 = vmatmul.f32.vlgmr.msra.gmra.mxu2 %v17920_v47 }
 0xacb   : > { %v6187_v2 = vpop.f32.mrf.mxu3 }
 0xacc   : > { %v6237_v52 = vadd.f32 %v6187_v2, %v6072_v38 }
 0xace   : > { %v14771_v19 = vadd.f32 %v6352_v0, %v6237_v52  ;;  %v5876_v35 = vpop.f32.mrf.mxu2  ;;  %v6044_v38 = vpop.f32.mrf.mxu0 }
 0xacf   : > { %v6354_v10 = vpop.f32.mrf.mxu1 }
 0xad3   : > { %v6189_v29 = vpop.f32.mrf.mxu3 }
 0xad4   : > { %v6238_v58 = vadd.f32 %v6189_v29, %v6073_v26  ;;  %v17922_v29 = vld [vmem:[#allocation57_spill] sm:$0xff] }
 0xad6   : > { %v14775_v57 = vadd.f32 %v6354_v10, %v6238_v58  ;;  %v5879_v52 = vpop.f32.mrf.mxu2  ;;  %v6047_v10 = vpop.f32.mrf.mxu0 }
 0xad7   : > { %v6357_v9 = vpop.f32.mrf.mxu1  ;;  %v5914_v58 = vadd.f32 %v5879_v52, %v17922_v29  ;;  %v17928_v29 = vld [vmem:[#allocation18_spill] sm:$0xff] }
 0xad8   : > { %v5909_v63 = vadd.f32 %v5866_v6, %v17928_v29 }
 0xadb   : > { %v6192_v42 = vpop.f32.mrf.mxu3 }
 0xadc   : > { %v6239_v37 = vadd.f32 %v6192_v42, %v6074_v25  ;;  %v17923_v25 = vld [vmem:[#allocation16_spill] sm:$0xff] }
 0xadd   : > { %v5913_v42 = vadd.f32 %v5876_v35, %v17923_v25 }
 0xade   : > { %v14779_v23 = vadd.f32 %v6357_v9, %v6239_v37  ;;  %v5881_v9 = vpop.f32.mrf.mxu2  ;;  %v17924_v37 = vld [vmem:[#allocation149_spill] sm:$0xff] }
 0xadf   : > { %v6359_v54 = vpop.f32.mrf.mxu1  ;;  %v6081_v45 = vadd.f32 %v6044_v38, %v5913_v42  ;;  %v6077_v38 = vadd.f32 %v6034_v36, %v5909_v63 }
 0xae3   : > { %v6194_v4 = vpop.f32.mrf.mxu3 }
 0xae4   : > { %v6240_v61 = vadd.f32 %v6194_v4, %v6075_v50  ;;  %v17925_v50 = vld [vmem:[#allocation88_spill] sm:$0xff] }
 0xae5   : > { %v5912_v4 = vadd.f32 %v5874_v15, %v17925_v50 }
 0xae6   : > { %v14783_v7 = vadd.f32 %v6359_v54, %v6240_v61  ;;  %v5915_v54 = vadd.f32 %v5881_v9, %v17924_v37  ;;  %v6082_v61 = vadd.f32 %v6047_v10, %v5914_v58  ;;  %v6078_v10 = vadd.f32 %v6037_v60, %v5910_v22 }
 0xae7   : > { %v6362_v39 = vpop.f32.mrf.mxu1  ;;  %v6080_v18 = vadd.f32 %v6042_v5, %v5912_v4  ;;  %v14840_v60 = vadd.f32 %v14675_v34, %v14775_v57  ;;  %v14860_v57 = vadd.f32 %v14675_v34, %v14712_v44  ;;  %v6505_v44 = vmul.f32 %v14690_v13, %v14690_v13 }
 0xae8   : > { %v14830_v55 = vadd.f32 %v14675_v34, %v14783_v7  ;;  %v14850_v7 = vadd.f32 %v14675_v34, %v14760_v27  ;;  %v6507_v27 = vmul.f32 %v14679_v59, %v14679_v59 }
 0xaeb   : > { %v6197_v28 = vpop.f32.mrf.mxu3 }
 0xaec   : > { %v6241_v17 = vadd.f32 %v6197_v28, %v14577_v53  ;;  %v17926_v28 = vld [vmem:[#allocation134_spill] sm:$0xff] }
 0xaee   : > { %v14786_v41 = vadd.f32 %v6362_v39, %v6241_v17  ;;  %v6049_v39 = vpop.f32.mrf.mxu0  ;;  %v5911_v17 = vadd.f32 %v5871_v43, %v17926_v28  ;;  %v17936_v28 = vld [vmem:[#allocation30_spill] sm:$0xff] }
 0xaef   : > { %v6364_v32 = vpop.f32.mrf.mxu1  ;;  %v6083_v56 = vadd.f32 %v6049_v39, %v5915_v54  ;;  %v17934_v54 = vld [vmem:[#allocation90_spill] sm:$0xff] }
 0xaf0   : > { %v6079_v25 = vadd.f32 %v6039_v46, %v5911_v17  ;;  %v14825_v36 = vadd.f32 %v14675_v34, %v14786_v41  ;;  %v14845_v41 = vadd.f32 %v14675_v34, %v14771_v19  ;;  %v14865_v19 = vadd.f32 %v14675_v34, %v14692_v62  ;;  %v17929_v46 = vld [vmem:[#allocation89_spill] sm:$0xff] }
 0xaf1   : > { %v6503_v62 = vmul.f32 %v14700_v16, %v14700_v16  ;;  %v6495_v4 = vmul.f32 %v17934_v54, %v17934_v54  ;;  %v6493_v17 = vmul.f32 %v17936_v28, %v17936_v28 }
 0xaf3   : > { %v6199_v31 = vpop.f32.mrf.mxu3 }
 0xaf7   : > { %v6367_v24 = vpop.f32.mrf.mxu1 }
 0xafb   : > { %v6202_v1 = vpop.f32.mrf.mxu3 }
 0xaff   : > { %v6369_v12 = vpop.f32.mrf.mxu1 }
 0xb03   : > { %v6204_v48 = vpop.f32.mrf.mxu3 }
 0xb04   : > { %v6244_v58 = vadd.f32 %v6204_v48, %v6079_v25  ;;  %v17931_v48 = vld [vmem:[#allocation52_spill] sm:$0xff] }
 0xb07   : > { %v6372_v51 = vpop.f32.mrf.mxu1 }
 0xb0b   : > { %v6207_v0 = vpop.f32.mrf.mxu3 }
 0xb0c   : > { %v6245_v9 = vadd.f32 %v6207_v0, %v6080_v18  ;;  %v17932_v0 = vld [vmem:[#allocation119_spill] sm:$0xff] }
 0xb0e   : > { %v6410_v42 = vadd.f32 %v6372_v51, %v6245_v9  ;;  %v6498_v51 = vmul.f32 %v17931_v48, %v17931_v48 }
 0xb0f   : > { %v6374_v2 = vpop.f32.mrf.mxu1 }
 0xb13   : > { %v6209_v53 = vpop.f32.mrf.mxu3 }
 0xb14   : > { %v6246_v11 = vadd.f32 %v6209_v53, %v6081_v45  ;;  %v17933_v53 = vld [vmem:[#allocation135_spill] sm:$0xff] }
 0xb16   : > { %v6411_v50 = vadd.f32 %v6374_v2, %v6246_v11  ;;  %v14808_v11 = vadd.f32 %v14675_v34, %v6410_v42  ;;  %v6497_v2 = vmul.f32 %v17932_v0, %v17932_v0  ;;  %v6513_v42 = vmul.f32 %v14840_v60, %v14840_v60 }
 0xb17   : > { %v6377_v8 = vpop.f32.mrf.mxu1 }
 0xb18   : > { %v14804_v18 = vadd.f32 %v14675_v34, %v6411_v50  ;;  %v6516_v50 = vmul.f32 %v14825_v36, %v14825_v36 }
 0xb1a   : > { %v6521_v9 = vmul.f32 %v14804_v18, %v14804_v18 }
 0xb1b   : > { %v6212_v26 = vpop.f32.mrf.mxu3 }
 0xb1c   : > { %v6247_v14 = vadd.f32 %v6212_v26, %v6082_v61  ;;  %v6243_v26 = vadd.f32 %v6202_v1, %v6078_v10  ;;  %v6500_v1 = vmul.f32 %v17929_v46, %v17929_v46  ;;  %v17935_v61 = vld [vmem:[#allocation152_spill] sm:$0xff] }
 0xb1d   : > { %v6494_v39 = vmul.f32 %v17935_v61, %v17935_v61 }
 0xb1e   : > { %v6412_v37 = vadd.f32 %v6377_v8, %v6247_v14  ;;  %v6408_v22 = vadd.f32 %v6367_v24, %v6243_v26  ;;  %v6501_v24 = vmul.f32 %v14710_v40, %v14710_v40  ;;  %v6496_v8 = vmul.f32 %v17933_v53, %v17933_v53 }
 0xb1f   : > { %v6379_v35 = vpop.f32.mrf.mxu1 }
 0xb20   : > { %v14800_v20 = vadd.f32 %v14675_v34, %v6412_v37  ;;  %v14816_v45 = vadd.f32 %v14675_v34, %v6408_v22  ;;  %v6520_v37 = vmul.f32 %v14808_v11, %v14808_v11 }
 0xb22   : > { %v6522_v25 = vmul.f32 %v14800_v20, %v14800_v20  ;;  %v6518_v10 = vmul.f32 %v14816_v45, %v14816_v45 }
 0xb23   : > { %v6214_v49 = vpop.f32.mrf.mxu3 }
 0xb24   : > { %v6248_v52 = vadd.f32 %v6214_v49, %v6083_v56  ;;  %v6242_v49 = vadd.f32 %v6199_v31, %v6077_v38  ;;  %v6409_v56 = vadd.f32 %v6369_v12, %v6244_v58  ;;  %v6502_v31 = vmul.f32 %v14706_v33, %v14706_v33  ;;  %v17930_v12 = vld [vmem:[#allocation150_spill] sm:$0xff] }
 0xb25   : > { %v6499_v5 = vmul.f32 %v17930_v12, %v17930_v12  ;;  %v6515_v38 = vmul.f32 %v14830_v55, %v14830_v55 }
 0xb26   : > { %v6413_v15 = vadd.f32 %v6379_v35, %v6248_v52  ;;  %v6407_v63 = vadd.f32 %v6364_v32, %v6242_v49  ;;  %v14812_v14 = vadd.f32 %v14675_v34, %v6409_v56  ;;  %v14835_v32 = vadd.f32 %v14675_v34, %v14779_v23  ;;  %v17937_v52 = vld [vmem:[#allocation50_spill] sm:$0xff] }
 0xb27   : > { %v14855_v23 = vadd.f32 %v14675_v34, %v14736_v21  ;;  %v6506_v21 = vmul.f32 %v14686_v30, %v14686_v30  ;;  %v6492_v29 = vmul.f32 %v17937_v52, %v17937_v52  ;;  %v6512_v49 = vmul.f32 %v14845_v41, %v14845_v41 }
 0xb28   : > { %v14796_v43 = vadd.f32 %v14675_v34, %v6413_v15  ;;  %v14820_v6 = vadd.f32 %v14675_v34, %v6407_v63  ;;  %v6504_v34 = vmul.f32 %v14696_v3, %v14696_v3  ;;  %v6519_v15 = vmul.f32 %v14812_v14, %v14812_v14 }
 0xb29   : > { %v6514_v26 = vmul.f32 %v14835_v32, %v14835_v32  ;;  %v6511_v56 = vmul.f32 %v14850_v7, %v14850_v7  ;;  %v6510_v22 = vmul.f32 %v14855_v23, %v14855_v23  ;;  %v6509_v63 = vmul.f32 %v14860_v57, %v14860_v57 }
 0xb2a   : > { %6472 = vmatpush.msrb.mxu2 %v14796_v43  ;;  %v6523_v35 = vmul.f32 %v14796_v43, %v14796_v43  ;;  %v6517_v58 = vmul.f32 %v14820_v6, %v14820_v6 }
 0xb2c   : > { %6473 = vmatpush.msrb.mxu2 %v14800_v20 }
 0xb2e   : > { %6474 = vmatpush.msrb.mxu2 %v14804_v18 }
 0xb30   : > { %6475 = vmatpush.msrb.mxu2 %v14808_v11 }
 0xb32   : > { %6476 = vmatpush.msrb.mxu2 %v14812_v14 }
 0xb34   : > { %6477 = vmatpush.msrb.mxu2 %v14816_v45 }
 0xb36   : > { %6478 = vmatpush.msrb.mxu2 %v14820_v6 }
 0xb38   : > { %6479 = vmatpush.msrb.mxu2 %v14825_v36 }
 0xb3a   : > { %6480 = vmatpush.msrb.mxu2 %v14830_v55 }
 0xb3c   : > { %6481 = vmatpush.msrb.mxu2 %v14835_v32 }
 0xb3e   : > { %6482 = vmatpush.msrb.mxu2 %v14840_v60 }
 0xb40   : > { %6483 = vmatpush.msrb.mxu2 %v14845_v41 }
 0xb42   : > { %6484 = vmatpush.msrb.mxu2 %v14850_v7 }
 0xb44   : > { %6485 = vmatpush.msrb.mxu2 %v14855_v23 }
 0xb46   : > { %6486 = vmatpush.msrb.mxu2 %v14860_v57 }
 0xb48   : > { %6487 = vmatpush.msrb.mxu2 %v14865_v19 }
 0xb49   : > { %6488 = vmatmul.f32.vlgmr.msrb.gmra.mxu2 %v17920_v47 }
 0xb4a   : > { %6524 = vmatpush.msra.mxu2 %v6507_v27  ;;  %v6508_v27 = vmul.f32 %v14865_v19, %v14865_v19 }
 0xb4c   : > { %6525 = vmatpush.msra.mxu2 %v6506_v21  ;;  %v8496_v21 = vld [vmem:[%s15283_s9 + $0x38] sm:$0xff] }
 0xb4e   : > { %6526 = vmatpush.msra.mxu2 %v6505_v44  ;;  %v8497_v44 = vld [vmem:[%s15283_s9 + $0x30] sm:$0xff] }
 0xb50   : > { %6527 = vmatpush.msra.mxu2 %v6504_v34  ;;  %v8498_v34 = vld [vmem:[%s15283_s9 + $0x28] sm:$0xff] }
 0xb52   : > { %6528 = vmatpush.msra.mxu2 %v6503_v62  ;;  %v8499_v62 = vld [vmem:[%s15283_s9 + $0x20] sm:$0xff] }
 0xb54   : > { %6529 = vmatpush.msra.mxu2 %v6502_v31  ;;  %v8501_v31 = vld [vmem:[%s15283_s9 + $0x10] sm:$0xff] }
 0xb56   : > { %6530 = vmatpush.msra.mxu2 %v6501_v24  ;;  %v8502_v24 = vld [vmem:[%s15283_s9 + $0x8] sm:$0xff] }
 0xb58   : > { %6531 = vmatpush.msra.mxu2 %v6500_v1  ;;  %v8503_v1 = vld [vmem:[%s15283_s9] sm:$0xff] }
 0xb5a   : > { %6532 = vmatpush.msra.mxu2 %v6499_v5  ;;  %v6469_v5 = vpop.f32.mrf.mxu2 }
 0xb5c   : > { %6533 = vmatpush.msra.mxu2 %v6498_v51 }
 0xb5e   : > { %6534 = vmatpush.msra.mxu2 %v6497_v2 }
 0xb60   : > { %6535 = vmatpush.msra.mxu2 %v6496_v8 }
 0xb62   : > { %6536 = vmatpush.msra.mxu2 %v6495_v4 }
 0xb64   : > { %6537 = vmatpush.msra.mxu2 %v6494_v39 }
 0xb66   : > { %6538 = vmatpush.msra.mxu2 %v6493_v17 }
 0xb68   : > { %6539 = vmatpush.msra.mxu2 %v6492_v29 }
 0xb69   : > { %6540 = vmatmul.f32.vlgmr.msra.gmra.mxu2 %v17920_v47 }
 0xb6a   : > { %6544 = vmatpush.msrb.mxu2 %v6523_v35 }
 0xb6c   : > { %6545 = vmatpush.msrb.mxu2 %v6522_v25 }
 0xb6e   : > { %6546 = vmatpush.msrb.mxu2 %v6521_v9 }
 0xb70   : > { %6547 = vmatpush.msrb.mxu2 %v6520_v37 }
 0xb72   : > { %6548 = vmatpush.msrb.mxu2 %v6519_v15 }
 0xb74   : > { %6549 = vmatpush.msrb.mxu2 %v6518_v10 }
 0xb76   : > { %6550 = vmatpush.msrb.mxu2 %v6517_v58 }
 0xb78   : > { %6551 = vmatpush.msrb.mxu2 %v6516_v50 }
 0xb7a   : > { %6552 = vmatpush.msrb.mxu2 %v6515_v38 }
 0xb7c   : > { %6553 = vmatpush.msrb.mxu2 %v6514_v26  ;;  %v6450_v26 = vld [vmem:[%s15281_s7] sm:$0x1] }
 0xb7e   : > { %6554 = vmatpush.msrb.mxu2 %v6513_v42 }
 0xb80   : > { %6555 = vmatpush.msrb.mxu2 %v6512_v49 }
 0xb82   : > { %6556 = vmatpush.msrb.mxu2 %v6511_v56 }
 0xb84   : > { %6557 = vmatpush.msrb.mxu2 %v6510_v22 }
 0xb86   : > { %6558 = vmatpush.msrb.mxu2 %v6509_v63 }
 0xb88   : > { %6559 = vmatpush.msrb.mxu2 %v6508_v27 }
 0xb89   : > { %6560 = vmatmul.f32.vlgmr.msrb.gmra.mxu2 %v17920_v47  ;;  %v8500_v47 = vld [vmem:[%s15283_s9 + $0x18] sm:$0xff] }
 0xb8a   : > { %6575 = vmatpush.msra.mxu2 %v8496_v21 }
 0xb8c   : > { %6576 = vmatpush.msra.mxu2 %v8497_v44 }
 0xb8e   : > { %6577 = vmatpush.msra.mxu2 %v8498_v34 }
 0xb90   : > { %6578 = vmatpush.msra.mxu2 %v8499_v62 }
 0xb92   : > { %6579 = vmatpush.msra.mxu2 %v8500_v47 }
 0xb94   : > { %6580 = vmatpush.msra.mxu2 %v8501_v31 }
 0xb96   : > { %6581 = vmatpush.msra.mxu2 %v8502_v24 }
 0xb98   : > { %6582 = vmatpush.msra.mxu2 %v8503_v1 }
 0xb9a   : > { %6598 = vmatpush.msrb.mxu2 %v8496_v21 }
 0xb9c   : > { %6599 = vmatpush.msrb.mxu2 %v8497_v44 }
 0xb9e   : > { %6600 = vmatpush.msrb.mxu2 %v8498_v34 }
 0xba0   : > { %6601 = vmatpush.msrb.mxu2 %v8499_v62 }
 0xba2   : > { %6602 = vmatpush.msrb.mxu2 %v8500_v47 }
 0xba4   : > { %6603 = vmatpush.msrb.mxu2 %v8501_v31 }
 0xba6   : > { %6604 = vmatpush.msrb.mxu2 %v8502_v24 }
 0xba8   : > { %6605 = vmatpush.msrb.mxu2 %v8503_v1 }
 0xbcc   : > { %v6489_v51 = vpop.f32.mrf.mxu2 }
 0xbcd   : > { %v6490_v2 = vadd.f32 %v6489_v51, %v6469_v5 }
 0xbcf   : > { %8174 = vmatmul.msk.f32.vlgmr.msra.gmra.mxu2 %vm17938_vm12, %v6490_v2  ;;  %vm17950_vm12 = vmmov %vm17653_vm0 }
 0xbec   : > { %v6541_v8 = vpop.f32.mrf.mxu2 }
 0xc0c   : > { %v6561_v4 = vpop.f32.mrf.mxu2 }
 0xc0d   : > { %v6562_v39 = vadd.f32 %v6561_v4, %v6541_v8 }
 0xc0f   : > { %8175 = vmatmul.msk.f32.vlgmr.msrb.gmra.mxu2 %vm17653_vm0, %v6562_v39 }
 0xc52   : > { %v6584_v17 = vpop.f32.mrf.mxu2 }
 0xc53   : > { %v6610_v29 = vmul.f32 %v6584_v17, %v6584_v17  ;;  %v14964_v56 = vperm.slane %v6584_v17, 0 }
 0xc55   : > { %v6624_v63 = vsub.f32 %v17937_v52, %v14964_v56  ;;  %v6625_v27 = vsub.f32 %v17936_v28, %v14964_v56  ;;  %v6626_v21 = vsub.f32 %v17935_v61, %v14964_v56  ;;  %v6627_v44 = vsub.f32 %v17934_v54, %v14964_v56  ;;  %v14987_v28 = vld [vmem:[%s15282_s8] ss:$0 sm:$0xff] }
 0xc56   : > { %v6628_v34 = vsub.f32 %v17933_v53, %v14964_v56  ;;  %v6629_v62 = vsub.f32 %v17932_v0, %v14964_v56  ;;  %v6630_v47 = vsub.f32 %v17931_v48, %v14964_v56  ;;  %v6631_v52 = vsub.f32 %v17930_v12, %v14964_v56 }
 0xc57   : > { %v6632_v54 = vsub.f32 %v17929_v46, %v14964_v56  ;;  %v6633_v53 = vsub.f32 %v14710_v40, %v14964_v56  ;;  %v6634_v0 = vsub.f32 %v14706_v33, %v14964_v56  ;;  %v6635_v48 = vsub.f32 %v14700_v16, %v14964_v56 }
 0xc58   : > { %v6636_v12 = vsub.f32 %v14696_v3, %v14964_v56  ;;  %v6637_v31 = vsub.f32 %v14690_v13, %v14964_v56  ;;  %v6638_v46 = vsub.f32 %v14686_v30, %v14964_v56  ;;  %v6639_v40 = vsub.f32 %v14679_v59, %v14964_v56 }
 0xc59   : > { %v6640_v33 = vsub.f32 %v14865_v19, %v14964_v56  ;;  %v6641_v16 = vsub.f32 %v14860_v57, %v14964_v56  ;;  %v6642_v13 = vsub.f32 %v14855_v23, %v14964_v56  ;;  %v6643_v3 = vsub.f32 %v14850_v7, %v14964_v56 }
 0xc5a   : > { %v6644_v59 = vsub.f32 %v14845_v41, %v14964_v56  ;;  %v6645_v19 = vsub.f32 %v14840_v60, %v14964_v56  ;;  %v6646_v57 = vsub.f32 %v14835_v32, %v14964_v56  ;;  %v6647_v2 = vsub.f32 %v14830_v55, %v14964_v56 }
 0xc5b   : > { %v6648_v39 = vsub.f32 %v14825_v36, %v14964_v56  ;;  %v6649_v17 = vsub.f32 %v14820_v6, %v14964_v56 }
 0xc92   : > { %v6607_v35 = vpop.f32.mrf.mxu2 }
 0xc93   : > { %v6611_v25 = vsub.f32 %v6607_v35, %v6610_v29 }
 0xc95   : > { %v6612_v9 = vadd.f32 1e-05, %v6611_v25  ;;  %v6650_v25 = vsub.f32 %v14816_v45, %v14964_v56 }
 0xc97   : > { %8492 = vrsqrt.f32 %v6612_v9  ;;  %vm6619_vm2 = vweird.f32 %v6612_v9 }
 0xc9d   : > { %v8493_v37 = vpop.eup %8492 }
 0xc9e   : > { %v6614_v15 = vmul.f32 %v8493_v37, %v6612_v9  ;;  %vm6620_vm7 = vweird.f32 %v8493_v37  ;;  %v6651_v9 = vsub.f32 %v14812_v14, %v14964_v56 }
 0xc9f   : > { %vm6621_vm14 = vmor %vm6619_vm2, %vm6620_vm7 }
 0xca0   : > { %v6615_v10 = vmul.f32 %v8493_v37, %v6614_v15  ;;  %vm17951_vm7 = vmmov %vm17653_vm0 }
 0xca1   : > { %vm17953_vm2 = vmmov %vm17653_vm0 }
 0xca2   : > { %v6616_v58 = vmul.f32 0.5, %v6615_v10  ;;  %v6652_v10 = vsub.f32 %v14808_v11, %v14964_v56 }
 0xca4   : > { %v6617_v50 = vsub.f32 1.5, %v6616_v58 }
 0xca6   : > { %v6618_v38 = vmul.f32 %v8493_v37, %v6617_v50 }
 0xca8   : > { %v6622_v42 = vsel %vm6621_vm14, %v8493_v37, %v6618_v38  ;;  %vm17955_vm14 = vmmov %vm17653_vm0 }
 0xca9   : > { %v6656_v49 = vmul.f32 %v6622_v42, %v6450_v26  ;;  %v6653_v26 = vsub.f32 %v14804_v18, %v14964_v56  ;;  %v17954_v18 = vsub.f32 %v14796_v43, %v14964_v56 }
 0xcab   : > { %v14966_v22 = vperm.slane %v6656_v49, 0 }
 0xcad   : > { %v6658_v61 = vmul.f32 %v14966_v22, %v6624_v63  ;;  %v6659_v24 = vmul.f32 %v14966_v22, %v6625_v27  ;;  %v6660_v1 = vmul.f32 %v14966_v22, %v6626_v21  ;;  %v6661_v30 = vmul.f32 %v14966_v22, %v6627_v44 }
 0xcae   : > { %v6662_v5 = vmul.f32 %v14966_v22, %v6628_v34  ;;  %v6663_v8 = vmul.f32 %v14966_v22, %v6629_v62  ;;  %v6664_v29 = vmul.f32 %v14966_v22, %v6630_v47  ;;  %v6665_v37 = vmul.f32 %v14966_v22, %v6631_v52 }
 0xcaf   : > { %v6693_v51 = vadd.f32 %v14987_v28, %v6658_v61  ;;  %v6694_v4 = vadd.f32 %v14987_v28, %v6659_v24  ;;  %v6695_v35 = vadd.f32 %v14987_v28, %v6660_v1  ;;  %v6696_v15 = vadd.f32 %v14987_v28, %v6661_v30 }
 0xcb0   : > { %v6666_v58 = vmul.f32 %v14966_v22, %v6632_v54  ;;  %v6697_v50 = vadd.f32 %v14987_v28, %v6662_v5  ;;  %v6667_v42 = vmul.f32 %v14966_v22, %v6633_v53  ;;  %v6698_v49 = vadd.f32 %v14987_v28, %v6663_v8 }
 0xcb1   : > { %v6725_v38 = vmul.f32 0.2, %v6693_v51  ;;  %v6726_v63 = vmul.f32 0.2, %v6694_v4  ;;  %v6668_v21 = vmul.f32 %v14966_v22, %v6634_v0  ;;  %v6699_v44 = vadd.f32 %v14987_v28, %v6664_v29 }
 0xcb2   : > { %v6727_v34 = vmul.f32 0.2, %v6695_v35  ;;  %v6669_v47 = vmul.f32 %v14966_v22, %v6635_v48  ;;  %v6700_v52 = vadd.f32 %v14987_v28, %v6665_v37  ;;  %v6728_v54 = vmul.f32 0.2, %v6696_v15 }
 0xcb3   : > { %v6670_v53 = vmul.f32 %v14966_v22, %v6636_v12  ;;  %v6701_v61 = vadd.f32 %v14987_v28, %v6666_v58  ;;  %v6729_v24 = vmul.f32 0.2, %v6697_v50  ;;  %v6757_v1 = vmax.f32 %v6693_v51, %v6725_v38 }
 0xcb4   : > { %v6671_v30 = vmul.f32 %v14966_v22, %v6637_v31  ;;  %v6702_v0 = vadd.f32 %v14987_v28, %v6667_v42  ;;  %v6730_v5 = vmul.f32 0.2, %v6698_v49  ;;  %v6758_v8 = vmax.f32 %v6694_v4, %v6726_v63 }
 0xcb5   : > { %v6672_v29 = vmul.f32 %v14966_v22, %v6638_v46  ;;  %v15066_v62 = vadd.f32 %v14987_v28, %v6668_v21  ;;  %v6731_v48 = vmul.f32 0.2, %v6699_v44  ;;  %v6759_v37 = vmax.f32 %v6695_v35, %v6727_v34  ;;  %6789 = vst.msk [vmem:[%s15076_s11] sm:$0xff] %vm17939_vm1, %v6757_v1  ;;  %vm17956_vm1 = vmmov %vm17653_vm0 }
 0xcb6   : > { %v6673_v27 = vmul.f32 %v14966_v22, %v6639_v40  ;;  %v15070_v12 = vadd.f32 %v14987_v28, %v6669_v47  ;;  %v6732_v58 = vmul.f32 0.2, %v6700_v52  ;;  %v6760_v51 = vmax.f32 %v6696_v15, %v6728_v54  ;;  %6790 = vst.msk [vmem:[%s15076_s11 + $0x8] sm:$0xff] %vm17940_vm4, %v6758_v8  ;;  %vm17957_vm4 = vmmov %vm17653_vm0 }
 0xcb7   : > { %v6674_v31 = vmul.f32 %v14966_v22, %v6640_v33  ;;  %v15074_v38 = vadd.f32 %v14987_v28, %v6670_v53  ;;  %v6733_v4 = vmul.f32 0.2, %v6701_v61  ;;  %v6761_v42 = vmax.f32 %v6697_v50, %v6729_v24  ;;  %6791 = vst.msk [vmem:[%s15076_s11 + $0x10] sm:$0xff] %vm17941_vm10, %v6759_v37  ;;  %vm17958_vm10 = vmmov %vm17653_vm0 }
 0xcb8   : > { %v6675_v46 = vmul.f32 %v14966_v22, %v6641_v16  ;;  %v15082_v40 = vadd.f32 %v14987_v28, %v6671_v30  ;;  %v6734_v35 = vmul.f32 0.2, %v6702_v0  ;;  %v6762_v33 = vmax.f32 %v6698_v49, %v6730_v5  ;;  %6792 = vst.msk [vmem:[%s15076_s11 + $0x18] sm:$0xff] %vm17942_vm11, %v6760_v51  ;;  %vm17959_vm11 = vmmov %vm17653_vm0 }
 0xcb9   : > { %v6676_v15 = vmul.f32 %v14966_v22, %v6642_v13  ;;  %v15091_v50 = vadd.f32 %v14987_v28, %v6672_v29  ;;  %v6735_v63 = vmul.f32 0.2, %v15066_v62  ;;  %v6763_v21 = vmax.f32 %v6699_v44, %v6731_v48  ;;  %6793 = vst.msk [vmem:[%s15076_s11 + $0x20] sm:$0xff] %vm17943_vm15, %v6761_v42  ;;  %vm17960_vm15 = vmmov %vm17653_vm0 }
 0xcba   : > { %v6677_v16 = vmul.f32 %v14966_v22, %v6643_v3  ;;  %v15101_v49 = vadd.f32 %v14987_v28, %v6673_v27  ;;  %v6736_v23 = vmul.f32 0.2, %v15070_v12  ;;  %v6764_v13 = vmax.f32 %v6700_v52, %v6732_v58  ;;  %6794 = vst.msk [vmem:[%s15076_s11 + $0x28] sm:$0xff] %vm17944_vm9, %v6762_v33  ;;  %vm17961_vm9 = vmmov %vm17653_vm0 }
 0xcbb   : > { %v6678_v44 = vmul.f32 %v14966_v22, %v6644_v59  ;;  %v15111_v34 = vadd.f32 %v14987_v28, %v6674_v31  ;;  %v6737_v7 = vmul.f32 0.2, %v15074_v38  ;;  %v6765_v3 = vmax.f32 %v6701_v61, %v6733_v4  ;;  %6795 = vst.msk [vmem:[%s15076_s11 + $0x30] sm:$0xff] %vm17945_vm3, %v6763_v21  ;;  %vm17962_vm3 = vmmov %vm17653_vm0 }
 0xcbc   : > { %v6679_v27 = vmul.f32 %v14966_v22, %v6645_v19  ;;  %v6710_v47 = vadd.f32 %v14987_v28, %v6675_v46  ;;  %v6738_v41 = vmul.f32 0.2, %v15082_v40  ;;  %v6766_v52 = vmax.f32 %v6702_v0, %v6734_v35  ;;  %6796 = vst.msk [vmem:[%s15076_s11 + $0x38] sm:$0xff] %vm17946_vm5, %v6764_v13  ;;  %vm17963_vm5 = vmmov %vm17653_vm0 }
 0xcbd   : > { %v6680_v59 = vmul.f32 %v14966_v22, %v6646_v57  ;;  %v6711_v54 = vadd.f32 %v14987_v28, %v6676_v15  ;;  %v6739_v53 = vmul.f32 0.2, %v15091_v50  ;;  %v6767_v60 = vmax.f32 %v15066_v62, %v6735_v63  ;;  %6797 = vst.msk [vmem:[%s15076_s11 + $0x40] sm:$0xff] %vm17947_vm8, %v6765_v3  ;;  %vm17964_vm8 = vmmov %vm17653_vm0 }
 0xcbe   : > { %v6681_v19 = vmul.f32 %v14966_v22, %v6647_v2  ;;  %v6712_v61 = vadd.f32 %v14987_v28, %v6677_v16  ;;  %v6740_v32 = vmul.f32 0.2, %v15101_v49  ;;  %v6768_v57 = vmax.f32 %v15070_v12, %v6736_v23  ;;  %6798 = vst.msk [vmem:[%s15076_s11 + $0x48] sm:$0xff] %vm17948_vm6, %v6766_v52  ;;  %vm17965_vm6 = vmmov %vm17653_vm0 }
 0xcbf   : > { %v6682_v62 = vmul.f32 %v14966_v22, %v6648_v39  ;;  %v6713_v24 = vadd.f32 %v14987_v28, %v6678_v44  ;;  %v6741_v55 = vmul.f32 0.2, %v15111_v34  ;;  %v6769_v2 = vmax.f32 %v15074_v38, %v6737_v7  ;;  %6799 = vst.msk [vmem:[%s15076_s11 + $0x50] sm:$0xff] %vm17949_vm13, %v6767_v60  ;;  %vm17966_vm13 = vmmov %vm17653_vm0 }
 0xcc0   : > { %v6683_v1 = vmul.f32 %v14966_v22, %v6649_v17  ;;  %v6714_v30 = vadd.f32 %v14987_v28, %v6679_v27  ;;  %v6742_v0 = vmul.f32 0.2, %v6710_v47  ;;  %v6770_v36 = vmax.f32 %v15082_v40, %v6738_v41  ;;  %6800 = vst.msk [vmem:[%s15076_s11 + $0x58] sm:$0xff] %vm17950_vm12, %v6768_v57  ;;  %vm17967_vm12 = vmmov %vm17653_vm0 }
 0xcc1   : > { %v6684_v39 = vmul.f32 %v14966_v22, %v6650_v25  ;;  %v6715_v5 = vadd.f32 %v14987_v28, %v6680_v59  ;;  %v6743_v8 = vmul.f32 0.2, %v6711_v54  ;;  %v6771_v6 = vmax.f32 %v15091_v50, %v6739_v53  ;;  %6801 = vst.msk [vmem:[%s15076_s11 + $0x60] sm:$0xff] %vm17653_vm0, %v6769_v2 }
 0xcc2   : > { %v6685_v17 = vmul.f32 %v14966_v22, %v6651_v9  ;;  %v6716_v29 = vadd.f32 %v14987_v28, %v6681_v19  ;;  %v6744_v48 = vmul.f32 0.2, %v6712_v61  ;;  %v6772_v45 = vmax.f32 %v15101_v49, %v6740_v32  ;;  %6802 = vst.msk [vmem:[%s15076_s11 + $0x68] sm:$0xff] %vm17951_vm7, %v6770_v36  ;;  %vm17968_vm7 = vmmov %vm17653_vm0 }
 0xcc3   : > { %v6686_v25 = vmul.f32 %v14966_v22, %v6652_v10  ;;  %v6717_v37 = vadd.f32 %v14987_v28, %v6682_v62  ;;  %v6745_v12 = vmul.f32 0.2, %v6713_v24  ;;  %v6773_v14 = vmax.f32 %v15111_v34, %v6741_v55  ;;  %6803 = vst.msk [vmem:[%s15076_s11 + $0x70] sm:$0xff] %vm17953_vm2, %v6771_v6  ;;  %vm17969_vm2 = vmmov %vm17653_vm0 }
 0xcc4   : > { %v6687_v9 = vmul.f32 %v14966_v22, %v6653_v26  ;;  %v6718_v58 = vadd.f32 %v14987_v28, %v6683_v1  ;;  %v6746_v51 = vmul.f32 0.2, %v6714_v30  ;;  %v6774_v11 = vmax.f32 %v6710_v47, %v6742_v0  ;;  %6804 = vst.msk [vmem:[%s15076_s11 + $0x78] sm:$0xff] %vm17955_vm14, %v6772_v45  ;;  %vm17970_vm14 = vmmov %vm17653_vm0 }
 0xcc5   : > { %v17952_v10 = vsub.f32 %v14800_v20, %v14964_v56  ;;  %v6719_v38 = vadd.f32 %v14987_v28, %v6684_v39  ;;  %v6747_v4 = vmul.f32 0.2, %v6715_v5  ;;  %v6775_v42 = vmax.f32 %v6711_v54, %v6743_v8  ;;  %6805 = vst.msk [vmem:[%s15076_s11 + $0x80] sm:$0xff] %vm17956_vm1, %v6773_v14 }
 0xcc6   : > { %v6689_v26 = vmul.f32 %v14966_v22, %v17954_v18  ;;  %v6720_v46 = vadd.f32 %v14987_v28, %v6685_v17  ;;  %v6748_v40 = vmul.f32 0.2, %v6716_v29  ;;  %v6776_v35 = vmax.f32 %v6712_v61, %v6744_v48  ;;  %6806 = vst.msk [vmem:[%s15076_s11 + $0x88] sm:$0xff] %vm17957_vm4, %v6774_v11 }
 0xcc7   : > { %v6688_v31 = vmul.f32 %v14966_v22, %v17952_v10  ;;  %v6721_v20 = vadd.f32 %v14987_v28, %v6686_v25  ;;  %v6749_v33 = vmul.f32 0.2, %v6717_v37  ;;  %v6777_v15 = vmax.f32 %v6713_v24, %v6745_v12  ;;  %6807 = vst.msk [vmem:[%s15076_s11 + $0x90] sm:$0xff] %vm17958_vm10, %v6775_v42 }
 0xcc8   : > { %v6722_v43 = vadd.f32 %v14987_v28, %v6687_v9  ;;  %v6750_v56 = vmul.f32 0.2, %v6718_v58  ;;  %v6778_v22 = vmax.f32 %v6714_v30, %v6746_v51  ;;  %v6751_v63 = vmul.f32 0.2, %v6719_v38  ;;  %6808 = vst.msk [vmem:[%s15076_s11 + $0x98] sm:$0xff] %vm17959_vm11, %v6776_v35 }
 0xcc9   : > { %v6723_v50 = vadd.f32 %v14987_v28, %v6688_v31  ;;  %v6779_v21 = vmax.f32 %v6715_v5, %v6747_v4  ;;  %v6724_v16 = vadd.f32 %v14987_v28, %v6689_v26  ;;  %v6752_v49 = vmul.f32 0.2, %v6720_v46  ;;  %6809 = vst.msk [vmem:[%s15076_s11 + $0xa0] sm:$0xff] %vm17960_vm15, %v6777_v15 }
 0xcca   : > { %v6780_v23 = vmax.f32 %v6716_v29, %v6748_v40  ;;  %v6753_v13 = vmul.f32 0.2, %v6721_v20  ;;  %v6781_v44 = vmax.f32 %v6717_v37, %v6749_v33  ;;  %v6754_v34 = vmul.f32 0.2, %v6722_v43  ;;  %6810 = vst.msk [vmem:[%s15076_s11 + $0xa8] sm:$0xff] %vm17961_vm9, %v6778_v22 }
 0xccb   : > { %v6782_v7 = vmax.f32 %v6718_v58, %v6750_v56  ;;  %v6755_v3 = vmul.f32 0.2, %v6723_v50  ;;  %v6783_v28 = vmax.f32 %v6719_v38, %v6751_v63  ;;  %6811 = vst.msk [vmem:[%s15076_s11 + $0xb0] sm:$0xff] %vm17962_vm3, %v6779_v21  ;;  %v6756_v27 = vmul.f32 0.2, %v6724_v16 }
 0xccc   : > { %v6784_v47 = vmax.f32 %v6720_v46, %v6752_v49  ;;  %6812 = vst.msk [vmem:[%s15076_s11 + $0xb8] sm:$0xff] %vm17963_vm5, %v6780_v23  ;;  %v6785_v41 = vmax.f32 %v6721_v20, %v6753_v13  ;;  %v6786_v52 = vmax.f32 %v6722_v43, %v6754_v34 }
 0xccd   : > { %6813 = vst.msk [vmem:[%s15076_s11 + $0xc0] sm:$0xff] %vm17964_vm8, %v6781_v44  ;;  %v6787_v59 = vmax.f32 %v6723_v50, %v6755_v3  ;;  %v6788_v54 = vmax.f32 %v6724_v16, %v6756_v27 }
 0xcce   : > { %6814 = vst.msk [vmem:[%s15076_s11 + $0xc8] sm:$0xff] %vm17965_vm6, %v6782_v7 }
 0xccf   : > { %6815 = vst.msk [vmem:[%s15076_s11 + $0xd0] sm:$0xff] %vm17966_vm13, %v6783_v28 }
 0xcd0   : > { %6816 = vst.msk [vmem:[%s15076_s11 + $0xd8] sm:$0xff] %vm17967_vm12, %v6784_v47 }
 0xcd1   : > { %6817 = vst.msk [vmem:[%s15076_s11 + $0xe0] sm:$0xff] %vm17653_vm0, %v6785_v41 }
 0xcd2   : > { %6818 = vst.msk [vmem:[%s15076_s11 + $0xe8] sm:$0xff] %vm17968_vm7, %v6786_v52 }
 0xcd3   : > { %6819 = vst.msk [vmem:[%s15076_s11 + $0xf0] sm:$0xff] %vm17969_vm2, %v6787_v59 }
 0xcd4   : > { %6820 = vst.msk [vmem:[%s15076_s11 + $0xf8] sm:$0xff] %vm17970_vm14, %v6788_v54 }
 0xcd5   : > { %8531 = shalt.err (!%p8528_p3)
}
 0xcd6   : > { %s8570_s28 = smov 128   ;;  %s8571_s11 = smov 8  }
 0xcd7   : > { %8443 = dma.vmem_to_hbm [thread:$0]  (%p8665_p5), %s6835_s18, 4096, %s6837_s20, %s6822_s21, %s8570_s28, %s8570_s28, %s8571_s11  }
 0xcd8 PF: > { %p8449_p4 = scmp.ge.s32.totalorder %s8566_s16, 2  ;;  %s6851_s30 = sand.u32 1, %s8554_s13  }
 0xcd9   : > { %s6852_s25 = scalar_lea.sflag [#allocation3], %s6851_s30 }
 0xcda   : > { %p8446_p7 = pnand %p8449_p4, %p8669_p6 }
 0xcdc   : > { %p8447_p8 = pneg %p8446_p7 }
 0xcde   : > { %8549 = dma.done.wait (%p8447_p8), %s6852_s25, 4096  }
 0xcdf   : > { %8551 = vsyncadd (%p8447_p8), %s6852_s25, 4294963200  ;;  %p20_p9 = scmp.ge.s32.totalorder %s8652_s19, 4   ;;  %s17971_s13 = smov %s8558_s14 }
 0xce0   : > { %s17972_s14 = smov %s8562_s15  ;;  %s17973_s15 = smov %s8663_s22 }
 0xce1   : > { %s17974_s16 = smov %s8652_s19  ;;  %22 = sbr.rel (!%p20_p9) target bundleno = 3 (0x3), region = 103 }
 0xce6   :  { %6858 = vsyncpa [#allocation3], 1 }
 0xce7   :  { %6860 = vsyncpa [#allocation3 + $0x1], 1 }

</bundles_post_ra>
